<compile_context>
chip_gen: v5e
topology: v5e:2x2
jax: 0.10.0
libtpu: 0.0.40
codegen_flags: <defaults>
</compile_context>

<pallas_src>
import math
import functools

import jax
import jax.numpy as jnp
from jax import lax
from jax.experimental import pallas as pl
from jax.experimental.pallas import tpu as pltpu


# ---------------------------------------------------------------------------
# Hardware-aware knobs
# ---------------------------------------------------------------------------
@functools.lru_cache(maxsize=None)
def _vmem_limit_bytes():
    """Generation-aware VMEM budget: physical VMEM minus headroom for Mosaic scratch."""
    cap = 64 * 1024 * 1024                       # conservative default (v7x physical size)
    try:
        cap = int(pltpu.get_tpu_info().vmem_capacity_bytes)
    except Exception:
        pass
    # v5e/v6e (128 MiB) -> 112 MiB; v7x (64 MiB) -> 48 MiB.
    return int(min(max(cap - 16 * 1024 * 1024, 32 * 1024 * 1024), 112 * 1024 * 1024))


@functools.lru_cache(maxsize=None)
def _single_buffer_mode():
    """Return pl.Buffered(1) if this Pallas accepts it for top-level pallas_call operands.

    Used to avoid double-buffering operands whose BlockSpec window never changes
    (constant index_map) — pure VMEM savings. Probed once with a tiny kernel so an
    unsupported lowering gracefully falls back to the default double-buffered spec.
    """
    try:
        mode = pl.Buffered(1)

        def _probe(x_ref, o_ref):
            o_ref[...] = x_ref[...] + 1.0

        out = pl.pallas_call(
            _probe,
            out_shape=jax.ShapeDtypeStruct((16, 128), jnp.float32),
            grid=(2,),
            in_specs=[pl.BlockSpec((8, 128), lambda i: (0, 0), pipeline_mode=mode)],
            out_specs=pl.BlockSpec((8, 128), lambda i: (i, 0)),
        )(jnp.zeros((8, 128), jnp.float32))
        jax.block_until_ready(out)
        return mode
    except Exception:
        return None


def _spec(block_shape, index_map, mode=None):
    if mode is not None:
        return pl.BlockSpec(block_shape, index_map, pipeline_mode=mode)
    return pl.BlockSpec(block_shape, index_map)


# ---------------------------------------------------------------------------
# Host-side, once-per-weight-load / once-per-seq-len preparation
# ---------------------------------------------------------------------------
def _rotary_raw(seq_len, head_dim, base=10000.0):
    # Mirrors Rotary.forward's cache exactly: bf16 cos/sin of outer(t, inv_freq).
    inv_freq = 1.0 / (base ** (jnp.arange(0, head_dim, 2, dtype=jnp.float32) / head_dim))
    t = jnp.arange(seq_len, dtype=jnp.float32)
    freqs = jnp.outer(t, inv_freq)                                   # (T, D//2)
    return jnp.cos(freqs).astype(jnp.bfloat16), jnp.sin(freqs).astype(jnp.bfloat16)


@functools.lru_cache(maxsize=16)
def _rotary_tables(seq_len, head_dim):
    """Lane-dense tables: cos_full=[cos|cos], sin_full=[sin|-sin] so that
    RoPE(x) = x*cos_full + roll(x, D/2)*sin_full."""
    cos, sin = _rotary_raw(seq_len, head_dim)
    return (jnp.concatenate([cos, cos], axis=-1),
            jnp.concatenate([sin, -sin], axis=-1))


def make_attention_weights(wq, wk, wv, wp):
    """One-time weight prep (hoisted out of the forward): fused bf16 QKV weight with
    [Q_allheads | K_allheads | V_allheads] column order, and transposed bf16 c_proj."""
    wqkv = jnp.concatenate([wq.T, wk.T, wv.T], axis=1).astype(jnp.bfloat16)   # (C, 3C)
    wp_t = wp.T.astype(jnp.bfloat16)                                          # (C, C)
    return wqkv, wp_t


# ---------------------------------------------------------------------------
# Stage 1: fused QKV projection + QK RMSNorm + RoPE (+ attention scale on q)
# ---------------------------------------------------------------------------
def _qkv_rope_kernel(x_ref, wqkv_ref, cos_ref, sin_ref, q_ref, k_ref, v_ref,
                     *, n_heads, head_dim, eps, scale):
    # x arrives as f32 and is cast per tile in-kernel (no wrapper-level bf16 round trip).
    x = x_ref[...].astype(jnp.bfloat16)                         # (Tb, C)
    w = wqkv_ref[...]                                           # (C, 3C) [Q_all|K_all|V_all]
    qkv = jnp.dot(x, w, preferred_element_type=jnp.float32)     # (Tb, 3C) f32 (bf16 MXU)

    cos = cos_ref[...].astype(jnp.float32)                      # (Tb, D) = [cos |  cos]
    sin = sin_ref[...].astype(jnp.float32)                      # (Tb, D) = [sin | -sin]

    d = head_dim
    c = n_heads * d
    # NOTE: with head_dim a multiple of 128 every slice below is lane-aligned (no relayout).
    for h in range(n_heads):                                    # static unroll, small H
        qh = qkv[:, h * d:(h + 1) * d]
        kh = qkv[:, c + h * d:c + (h + 1) * d]
        vh = qkv[:, 2 * c + h * d:2 * c + (h + 1) * d]

        # RMSNorm over head_dim in f32 (F.rms_norm default eps = finfo(f32).eps).
        qh = qh * lax.rsqrt(jnp.mean(qh * qh, axis=-1, keepdims=True) + eps)
        kh = kh * lax.rsqrt(jnp.mean(kh * kh, axis=-1, keepdims=True) + eps)

        # Lane-dense RoPE:  y = x * [cos|cos] + roll(x, D/2) * [sin|-sin]
        qh = qh * cos + pltpu.roll(qh, d // 2, axis=1) * sin
        kh = kh * cos + pltpu.roll(kh, d // 2, axis=1) * sin

        q_ref[h] = (qh * scale).astype(q_ref.dtype)             # fold 1/sqrt(D) into q once
        k_ref[h] = kh.astype(k_ref.dtype)
        v_ref[h] = vh.astype(v_ref.dtype)


# ---------------------------------------------------------------------------
# Stage 2: flash attention (online softmax, causal block skipping,
#          masked/unmasked loop split, (B, T, H, D) output layout)
# ---------------------------------------------------------------------------
def _flash_attn_kernel(q_ref, k_ref, v_ref, y_ref, *, block_q, block_kv, head_dim):
    qi = pl.program_id(2)
    q = q_ref[...]                                              # (Tq, D) bf16, pre-scaled

    q_start = qi * block_q
    n_full = q_start // block_kv                                # fully-unmasked KV blocks
    n_kv = (q_start + block_q + block_kv - 1) // block_kv       # total attended KV blocks

    # Loop-invariant row indices, hoisted out of the KV loop.
    rows = q_start + lax.broadcasted_iota(jnp.int32, (block_q, block_kv), 0)

    m0 = jnp.full((block_q, 1), -jnp.inf, jnp.float32)
    l0 = jnp.zeros((block_q, 1), jnp.float32)
    a0 = jnp.zeros((block_q, head_dim), jnp.float32)

    def step(j, carry, masked):
        m, l, acc = carry
        start = pl.multiple_of(j * block_kv, block_kv)
        k = k_ref[pl.ds(start, block_kv), :]                    # (Tkv, D) bf16
        v = v_ref[pl.ds(start, block_kv), :]                    # (Tkv, D) bf16

        # q @ k^T without materializing a transpose.
        s = lax.dot_general(q, k, (((1,), (1,)), ((), ())),
                            preferred_element_type=jnp.float32)  # (Tq, Tkv) f32
        if masked:                                               # only the diagonal blocks
            cols = start + lax.broadcasted_iota(jnp.int32, (block_q, block_kv), 1)
            s = jnp.where(cols <= rows, s, -1e30)                # finite mask (NaN-safe)

        m_new = jnp.maximum(m, s.max(axis=-1, keepdims=True))
        alpha = jnp.exp(m - m_new)
        p = jnp.exp(s - m_new)
        l_new = l * alpha + p.sum(axis=-1, keepdims=True)
        acc_new = acc * alpha + jnp.dot(p.astype(v.dtype), v,
                                        preferred_element_type=jnp.float32)
        return m_new, l_new, acc_new

    carry = lax.fori_loop(0, n_full, lambda j, c: step(j, c, masked=False), (m0, l0, a0))
    m, l, acc = lax.fori_loop(n_full, n_kv, lambda j, c: step(j, c, masked=True), carry)
    y_ref[...] = (acc * pl.reciprocal(l, approx=True)).astype(y_ref.dtype)


# ---------------------------------------------------------------------------
# Stage 3: output projection on a contiguous (block_t, C) slab
# ---------------------------------------------------------------------------
def _out_proj_kernel(y_ref, wp_ref, o_ref):
    out = jnp.dot(y_ref[...], wp_ref[...], preferred_element_type=jnp.float32)
    o_ref[...] = out.astype(o_ref.dtype)


# ---------------------------------------------------------------------------
# Forward wrapper
# ---------------------------------------------------------------------------
def causal_self_attention(x, weights, n_heads, *, block_t=256, block_q=128, block_kv=256):
    """x: (B, T, C) f32; weights = make_attention_weights(wq, wk, wv, wp)."""
    wqkv, wp_t = weights
    B, T, C = x.shape
    assert C % n_heads == 0
    D = C // n_heads
    assert wqkv.shape == (C, 3 * C) and wp_t.shape == (C, C)
    scale = 1.0 / math.sqrt(D)
    eps = float(jnp.finfo(jnp.float32).eps)

    block_t = min(block_t, T)
    block_q = min(block_q, T)
    block_kv = min(block_kv, T)
    assert T % block_t == 0 and T % block_q == 0 and T % block_kv == 0

    cos_full, sin_full = _rotary_tables(T, D)                    # cached per (T, D)
    vmem_limit = _vmem_limit_bytes()
    sb = _single_buffer_mode()                                   # None if unsupported
    # Single-buffer the T-resident K/V only when double-buffering them would be expensive.
    kv_bytes_db = 8 * T * D                                      # K+V, double-buffered, bf16
    kv_mode = sb if (sb is not None and kv_bytes_db > (8 << 20)) else None

    # ---- stage 1: fused QKV + RMSNorm + RoPE -------------------------------
    qkv_kernel = functools.partial(_qkv_rope_kernel, n_heads=n_heads,
                                   head_dim=D, eps=eps, scale=scale)

    def _qkv_out_spec():
        return pl.BlockSpec((None, n_heads, block_t, D), lambda b, t: (b, 0, t, 0))

    q, k, v = pl.pallas_call(
        qkv_kernel,
        out_shape=(jax.ShapeDtypeStruct((B, n_heads, T, D), jnp.bfloat16),
                   jax.ShapeDtypeStruct((B, n_heads, T, D), jnp.bfloat16),
                   jax.ShapeDtypeStruct((B, n_heads, T, D), jnp.bfloat16)),
        grid_spec=pltpu.PrefetchScalarGridSpec(
            num_scalar_prefetch=0,
            grid=(B, T // block_t),
            in_specs=[
                pl.BlockSpec((None, block_t, C), lambda b, t: (b, t, 0)),    # x (f32)
                _spec((C, 3 * C), lambda b, t: (0, 0), sb),                  # Wqkv (constant)
                pl.BlockSpec((block_t, D), lambda b, t: (t, 0)),             # cos [c|c]
                pl.BlockSpec((block_t, D), lambda b, t: (t, 0)),             # sin [s|-s]
            ],
            out_specs=(_qkv_out_spec(), _qkv_out_spec(), _qkv_out_spec())),
        compiler_params=pltpu.CompilerParams(
            dimension_semantics=("parallel", "parallel"),
            vmem_limit_bytes=vmem_limit),
    )(x, wqkv, cos_full, sin_full)

    # ---- stage 2: flash attention, output in (B, T, H, D) ------------------
    attn_kernel = functools.partial(_flash_attn_kernel, block_q=block_q,
                                    block_kv=block_kv, head_dim=D)
    y = pl.pallas_call(
        attn_kernel,
        out_shape=jax.ShapeDtypeStruct((B, T, n_heads, D), jnp.bfloat16),
        grid_spec=pltpu.PrefetchScalarGridSpec(
            num_scalar_prefetch=0,
            grid=(B, n_heads, T // block_q),
            in_specs=[
                pl.BlockSpec((None, None, block_q, D), lambda b, h, i: (b, h, i, 0)),  # q
                _spec((None, None, T, D), lambda b, h, i: (b, h, 0, 0), kv_mode),      # K
                _spec((None, None, T, D), lambda b, h, i: (b, h, 0, 0), kv_mode),      # V
            ],
            out_specs=pl.BlockSpec((None, block_q, None, D),
                                   lambda b, h, i: (b, i, h, 0))),
        compiler_params=pltpu.CompilerParams(
            dimension_semantics=("parallel", "parallel", "parallel"),
            vmem_limit_bytes=vmem_limit),
    )(q, k, v)

    # ---- stage 3: output projection (contiguous (block_t, C) input) --------
    y2 = y.reshape(B, T, C)          # free trailing-dims collapse; heads already adjacent
    out = pl.pallas_call(
        _out_proj_kernel,
        out_shape=jax.ShapeDtypeStruct((B, T, C), x.dtype),
        grid_spec=pltpu.PrefetchScalarGridSpec(
            num_scalar_prefetch=0,
            grid=(B, T // block_t),
            in_specs=[
                pl.BlockSpec((None, block_t, C), lambda b, t: (b, t, 0)),    # y slab
                _spec((C, C), lambda b, t: (0, 0), sb),                      # Wproj (constant)
            ],
            out_specs=pl.BlockSpec((None, block_t, C), lambda b, t: (b, t, 0))),
        compiler_params=pltpu.CompilerParams(
            dimension_semantics=("parallel", "parallel"),
            vmem_limit_bytes=vmem_limit),
    )(y2, wp_t)

    return out


# ---------------------------------------------------------------------------
# Pure-JAX reference (mirror of the PyTorch forward) for numerical checking.
# bf16_matmuls=True rounds matmul operands to bf16 (kernel precision policy).
# ---------------------------------------------------------------------------
def reference(x, wq, wk, wv, wp, n_heads, *, bf16_matmuls=False):
    B, T, C = x.shape
    D = C // n_heads
    eps = jnp.finfo(jnp.float32).eps
    rnd = ((lambda a: a.astype(jnp.bfloat16).astype(jnp.float32))
           if bf16_matmuls else (lambda a: a))
    hp = jax.lax.Precision.HIGHEST

    cos, sin = _rotary_raw(T, D)
    c = cos.astype(jnp.float32)[None, :, None, :]
    s = sin.astype(jnp.float32)[None, :, None, :]

    xq = jnp.matmul(rnd(x), rnd(wq.T), precision=hp).reshape(B, T, n_heads, D)
    xk = jnp.matmul(rnd(x), rnd(wk.T), precision=hp).reshape(B, T, n_heads, D)
    xv = jnp.matmul(rnd(x), rnd(wv.T), precision=hp).reshape(B, T, n_heads, D)

    rms = lambda t: t * jax.lax.rsqrt(jnp.mean(t * t, -1, keepdims=True) + eps)

    def rope(t):
        t1, t2 = t[..., :D // 2], t[..., D // 2:]
        return jnp.concatenate([t1 * c + t2 * s, -t1 * s + t2 * c], axis=-1)

    q = rnd(rope(rms(xq)) * (1.0 / math.sqrt(D)))      # scale folded into q (as kernel)
    k = rnd(rope(rms(xk)))
    v = rnd(xv)

    scores = jnp.einsum('bthd,bshd->bhts', q, k, precision=hp)
    mask = jnp.tril(jnp.ones((T, T), bool))
    scores = jnp.where(mask[None, None], scores, -jnp.inf)
    p = rnd(jax.nn.softmax(scores, axis=-1))
    y = rnd(jnp.einsum('bhts,bshd->bthd', p, v, precision=hp).reshape(B, T, C))
    return jnp.matmul(y, rnd(wp.T), precision=hp)


if __name__ == "__main__":
    B, T, n_heads, D = 2, 128, 4, 128        # C = 512; lane-aligned head_dim
    C = n_heads * D

    key = jax.random.PRNGKey(0)
    kx, kq, kk, kv, kp = jax.random.split(key, 5)

    x = jax.random.normal(kx, (B, T, C), dtype=jnp.float32)

    # nn.Linear default init: U(-1/sqrt(in_features), 1/sqrt(in_features)).
    bound = 1.0 / math.sqrt(C)
    wq = jax.random.uniform(kq, (C, C), jnp.float32, -bound, bound)
    wk = jax.random.uniform(kk, (C, C), jnp.float32, -bound, bound)
    wv = jax.random.uniform(kv, (C, C), jnp.float32, -bound, bound)
    wp = jnp.zeros((C, C), jnp.float32)      # c_proj.weight.data.zero_() (faithful init)

    weights = make_attention_weights(wq, wk, wv, wp)      # one-time weight prep
    out = jax.block_until_ready(causal_self_attention(x, weights, n_heads))
    assert out.shape == (B, T, C) and out.dtype == jnp.float32

    # Numerical check with a non-zero projection (zero init would be vacuous).
    wp_check = jax.random.uniform(kp, (C, C), jnp.float32, -bound, bound)
    weights_check = make_attention_weights(wq, wk, wv, wp_check)
    got = jax.block_until_ready(causal_self_attention(x, weights_check, n_heads))
    want_matched = reference(x, wq, wk, wv, wp_check, n_heads, bf16_matmuls=True)
    want_precise = reference(x, wq, wk, wv, wp_check, n_heads, bf16_matmuls=False)
    err_m = float(jnp.max(jnp.abs(got - want_matched)))
    err_p = float(jnp.max(jnp.abs(got - want_precise)))
    # Structural check (same precision policy) — tight.
    assert jnp.allclose(got, want_matched, rtol=2e-2, atol=1e-2), (err_m, err_p)
    # Fidelity to the f32 PyTorch module — loose (bf16 MXU operands by design).
    assert jnp.allclose(got, want_precise, rtol=1e-1, atol=5e-2), (err_m, err_p)

    print("KERNEL_OK")
</pallas_src>

<mosaic_0001>
module attributes {stable_mosaic.version = 11 : i64} {
  func.func @_probe(%arg0: i32, %arg1: memref<8x128xf32, #tpu.memory_space<vmem>>, %arg2: memref<8x128xf32, #tpu.memory_space<vmem>>) attributes {dimension_semantics = [#tpu.dimension_semantics<arbitrary>], iteration_bounds = array<i64: 2>, scalar_prefetch = 0 : i64, scratch_operands = 0 : i64, tpu.core_type = #tpu.core_type<tc>, window_params = [{pipeline_mode = #tpu.pipeline_mode<synchronous>, transform_indices = @transform_0, window_bounds = array<i64: 8, 128>}, {transform_indices = @transform_1, window_bounds = array<i64: 8, 128>}]} {
    %c0 = arith.constant 0 : index
    %c0_0 = arith.constant 0 : index
    %0 = vector.load %arg1[%c0, %c0_0] : memref<8x128xf32, #tpu.memory_space<vmem>>, vector<8x128xf32>
    %cst = arith.constant 1.000000e+00 : f32
    %1 = vector.broadcast %cst : f32 to vector<8x128xf32>
    %2 = arith.addf %0, %1 : vector<8x128xf32>
    %c0_1 = arith.constant 0 : index
    %c0_2 = arith.constant 0 : index
    %3 = vector.load %arg2[%c0_1, %c0_2] : memref<8x128xf32, #tpu.memory_space<vmem>>, vector<8x128xf32>
    tpu.vector_store %arg2[%c0_1, %c0_2], %2 {strides = array<i32>} : memref<8x128xf32, #tpu.memory_space<vmem>>, vector<8x128xf32>,
    return
  }
  func.func @transform_0(%arg0: i32) -> (i32, i32) {
    %c0_i32 = arith.constant 0 : i32
    %c0_i32_0 = arith.constant 0 : i32
    %c0_i32_1 = arith.constant 0 : i32
    return %c0_i32, %c0_i32_0 : i32, i32
  }
  func.func @transform_1(%arg0: i32) -> (i32, i32) {
    %c0_i32 = arith.constant 0 : i32
    %c0_i32_0 = arith.constant 0 : i32
    return %arg0, %c0_i32 : i32, i32
  }
}

module attributes {stable_mosaic.version = 11 : i64} {
  func.func @_qkv_rope_kernel(%arg0: i32, %arg1: i32, %arg2: memref<1x128x512xf32, #tpu.memory_space<vmem>>, %arg3: memref<512x1536xbf16, #tpu.memory_space<vmem>>, %arg4: memref<128x128xbf16, #tpu.memory_space<vmem>>, %arg5: memref<128x128xbf16, #tpu.memory_space<vmem>>, %arg6: memref<1x4x128x128xbf16, #tpu.memory_space<vmem>>, %arg7: memref<1x4x128x128xbf16, #tpu.memory_space<vmem>>, %arg8: memref<1x4x128x128xbf16, #tpu.memory_space<vmem>>) attributes {dimension_semantics = [#tpu.dimension_semantics<parallel>, #tpu.dimension_semantics<parallel>], iteration_bounds = array<i64: 2, 1>, scalar_prefetch = 0 : i64, scratch_operands = 0 : i64, tpu.core_type = #tpu.core_type<tc>, window_params = [{transform_indices = @transform_0, window_bounds = array<i64: 1, 128, 512>}, {pipeline_mode = #tpu.pipeline_mode<synchronous>, transform_indices = @transform_1, window_bounds = array<i64: 512, 1536>}, {transform_indices = @transform_2, window_bounds = array<i64: 128, 128>}, {transform_indices = @transform_3, window_bounds = array<i64: 128, 128>}, {transform_indices = @transform_4, window_bounds = array<i64: 1, 4, 128, 128>}, {transform_indices = @transform_5, window_bounds = array<i64: 1, 4, 128, 128>}, {transform_indices = @transform_6, window_bounds = array<i64: 1, 4, 128, 128>}]} {
    %c0 = arith.constant 0 : index
    %c0_0 = arith.constant 0 : index
    %c0_1 = arith.constant 0 : index
    %0 = vector.load %arg2[%c0, %c0_0, %c0_1] : memref<1x128x512xf32, #tpu.memory_space<vmem>>, vector<1x128x512xf32>
    %1 = vector.shape_cast %0 : vector<1x128x512xf32> to vector<128x512xf32>
    %2 = arith.truncf %1 : vector<128x512xf32> to vector<128x512xbf16>
    %c0_2 = arith.constant 0 : index
    %c0_3 = arith.constant 0 : index
    %3 = vector.load %arg3[%c0_2, %c0_3] : memref<512x1536xbf16, #tpu.memory_space<vmem>>, vector<512x1536xbf16>
    %cst = arith.constant dense<0.000000e+00> : vector<128x1536xf32>
    %4 = tpu.matmul %2, %3, %cst {dimension_numbers = #tpu.dot_dimension_numbers<[1], [0], [0], [1], [0, 0, 1, 1], [], []>} : vector<128x512xbf16>, vector<512x1536xbf16>, vector<128x1536xf32> -> vector<128x1536xf32>
    %c0_4 = arith.constant 0 : index
    %c0_5 = arith.constant 0 : index
    %5 = vector.load %arg4[%c0_4, %c0_5] : memref<128x128xbf16, #tpu.memory_space<vmem>>, vector<128x128xbf16>
    %6 = arith.extf %5 : vector<128x128xbf16> to vector<128x128xf32>
    %c0_6 = arith.constant 0 : index
    %c0_7 = arith.constant 0 : index
    %7 = vector.load %arg5[%c0_6, %c0_7] : memref<128x128xbf16, #tpu.memory_space<vmem>>, vector<128x128xbf16>
    %8 = arith.extf %7 : vector<128x128xbf16> to vector<128x128xf32>
    %9 = vector.extract_strided_slice %4 {offsets = [0, 0], sizes = [128, 128], strides = [1, 1]} : vector<128x1536xf32> to vector<128x128xf32>
    %10 = vector.extract_strided_slice %4 {offsets = [0, 512], sizes = [128, 128], strides = [1, 1]} : vector<128x1536xf32> to vector<128x128xf32>
    %11 = vector.extract_strided_slice %4 {offsets = [0, 1024], sizes = [128, 128], strides = [1, 1]} : vector<128x1536xf32> to vector<128x128xf32>
    %12 = arith.mulf %9, %9 : vector<128x128xf32>
    %cst_8 = arith.constant dense<0.000000e+00> : vector<128xf32>
    %13 = vector.multi_reduction <add>, %12, %cst_8 [1] : vector<128x128xf32> to vector<128xf32>
    %14 = vector.shape_cast %13 : vector<128xf32> to vector<128x1xf32>
    %cst_9 = arith.constant 1.280000e+02 : f32
    %15 = vector.broadcast %cst_9 : f32 to vector<128x1xf32>
    %16 = arith.divf %14, %15 : vector<128x1xf32>
    %cst_10 = arith.constant 1.1920929E-7 : f32
    %17 = vector.broadcast %cst_10 : f32 to vector<128x1xf32>
    %18 = arith.addf %16, %17 : vector<128x1xf32>
    %19 = math.rsqrt %18 : vector<128x1xf32>
    %20 = vector.broadcast %19 : vector<128x1xf32> to vector<128x128xf32>
    %21 = arith.mulf %9, %20 : vector<128x128xf32>
    %22 = arith.mulf %10, %10 : vector<128x128xf32>
    %cst_11 = arith.constant dense<0.000000e+00> : vector<128xf32>
    %23 = vector.multi_reduction <add>, %22, %cst_11 [1] : vector<128x128xf32> to vector<128xf32>
    %24 = vector.shape_cast %23 : vector<128xf32> to vector<128x1xf32>
    %cst_12 = arith.constant 1.280000e+02 : f32
    %25 = vector.broadcast %cst_12 : f32 to vector<128x1xf32>
    %26 = arith.divf %24, %25 : vector<128x1xf32>
    %cst_13 = arith.constant 1.1920929E-7 : f32
    %27 = vector.broadcast %cst_13 : f32 to vector<128x1xf32>
    %28 = arith.addf %26, %27 : vector<128x1xf32>
    %29 = math.rsqrt %28 : vector<128x1xf32>
    %30 = vector.broadcast %29 : vector<128x1xf32> to vector<128x128xf32>
    %31 = arith.mulf %10, %30 : vector<128x128xf32>
    %32 = arith.mulf %21, %6 : vector<128x128xf32>
    %c64_i32 = arith.constant 64 : i32
    %33 = tpu.dynamic_rotate %21 by %c64_i32 dim 1 : vector<128x128xf32>, i32 -> vector<128x128xf32>
    %34 = arith.mulf %33, %8 : vector<128x128xf32>
    %35 = arith.addf %32, %34 : vector<128x128xf32>
    %36 = arith.mulf %31, %6 : vector<128x128xf32>
    %c64_i32_14 = arith.constant 64 : i32
    %37 = tpu.dynamic_rotate %31 by %c64_i32_14 dim 1 : vector<128x128xf32>, i32 -> vector<128x128xf32>
    %38 = arith.mulf %37, %8 : vector<128x128xf32>
    %39 = arith.addf %36, %38 : vector<128x128xf32>
    %cst_15 = arith.constant 0.0883883461 : f32
    %40 = vector.broadcast %cst_15 : f32 to vector<128x128xf32>
    %41 = arith.mulf %35, %40 : vector<128x128xf32>
    %42 = arith.truncf %41 : vector<128x128xf32> to vector<128x128xbf16>
    %c0_16 = arith.constant 0 : index
    %c0_17 = arith.constant 0 : index
    %c0_18 = arith.constant 0 : index
    %c0_19 = arith.constant 0 : index
    %43 = vector.load %arg6[%c0_16, %c0_17, %c0_18, %c0_19] : memref<1x4x128x128xbf16, #tpu.memory_space<vmem>>, vector<1x1x128x128xbf16>
    %44 = vector.shape_cast %43 : vector<1x1x128x128xbf16> to vector<128x128xbf16>
    %45 = vector.shape_cast %42 : vector<128x128xbf16> to vector<1x1x128x128xbf16>
    tpu.vector_store %arg6[%c0_16, %c0_17, %c0_18, %c0_19], %45 {strides = array<i32>} : memref<1x4x128x128xbf16, #tpu.memory_space<vmem>>, vector<1x1x128x128xbf16>,
    %46 = arith.truncf %39 : vector<128x128xf32> to vector<128x128xbf16>
    %c0_20 = arith.constant 0 : index
    %c0_21 = arith.constant 0 : index
    %c0_22 = arith.constant 0 : index
    %c0_23 = arith.constant 0 : index
    %47 = vector.load %arg7[%c0_20, %c0_21, %c0_22, %c0_23] : memref<1x4x128x128xbf16, #tpu.memory_space<vmem>>, vector<1x1x128x128xbf16>
    %48 = vector.shape_cast %47 : vector<1x1x128x128xbf16> to vector<128x128xbf16>
    %49 = vector.shape_cast %46 : vector<128x128xbf16> to vector<1x1x128x128xbf16>
    tpu.vector_store %arg7[%c0_20, %c0_21, %c0_22, %c0_23], %49 {strides = array<i32>} : memref<1x4x128x128xbf16, #tpu.memory_space<vmem>>, vector<1x1x128x128xbf16>,
    %50 = arith.truncf %11 : vector<128x128xf32> to vector<128x128xbf16>
    %c0_24 = arith.constant 0 : index
    %c0_25 = arith.constant 0 : index
    %c0_26 = arith.constant 0 : index
    %c0_27 = arith.constant 0 : index
    %51 = vector.load %arg8[%c0_24, %c0_25, %c0_26, %c0_27] : memref<1x4x128x128xbf16, #tpu.memory_space<vmem>>, vector<1x1x128x128xbf16>
    %52 = vector.shape_cast %51 : vector<1x1x128x128xbf16> to vector<128x128xbf16>
    %53 = vector.shape_cast %50 : vector<128x128xbf16> to vector<1x1x128x128xbf16>
    tpu.vector_store %arg8[%c0_24, %c0_25, %c0_26, %c0_27], %53 {strides = array<i32>} : memref<1x4x128x128xbf16, #tpu.memory_space<vmem>>, vector<1x1x128x128xbf16>,
    %54 = vector.extract_strided_slice %4 {offsets = [0, 128], sizes = [128, 128], strides = [1, 1]} : vector<128x1536xf32> to vector<128x128xf32>
    %55 = vector.extract_strided_slice %4 {offsets = [0, 640], sizes = [128, 128], strides = [1, 1]} : vector<128x1536xf32> to vector<128x128xf32>
    %56 = vector.extract_strided_slice %4 {offsets = [0, 1152], sizes = [128, 128], strides = [1, 1]} : vector<128x1536xf32> to vector<128x128xf32>
    %57 = arith.mulf %54, %54 : vector<128x128xf32>
    %cst_28 = arith.constant dense<0.000000e+00> : vector<128xf32>
    %58 = vector.multi_reduction <add>, %57, %cst_28 [1] : vector<128x128xf32> to vector<128xf32>
    %59 = vector.shape_cast %58 : vector<128xf32> to vector<128x1xf32>
    %cst_29 = arith.constant 1.280000e+02 : f32
    %60 = vector.broadcast %cst_29 : f32 to vector<128x1xf32>
    %61 = arith.divf %59, %60 : vector<128x1xf32>
    %cst_30 = arith.constant 1.1920929E-7 : f32
    %62 = vector.broadcast %cst_30 : f32 to vector<128x1xf32>
    %63 = arith.addf %61, %62 : vector<128x1xf32>
    %64 = math.rsqrt %63 : vector<128x1xf32>
    %65 = vector.broadcast %64 : vector<128x1xf32> to vector<128x128xf32>
    %66 = arith.mulf %54, %65 : vector<128x128xf32>
    %67 = arith.mulf %55, %55 : vector<128x128xf32>
    %cst_31 = arith.constant dense<0.000000e+00> : vector<128xf32>
    %68 = vector.multi_reduction <add>, %67, %cst_31 [1] : vector<128x128xf32> to vector<128xf32>
    %69 = vector.shape_cast %68 : vector<128xf32> to vector<128x1xf32>
    %cst_32 = arith.constant 1.280000e+02 : f32
    %70 = vector.broadcast %cst_32 : f32 to vector<128x1xf32>
    %71 = arith.divf %69, %70 : vector<128x1xf32>
    %cst_33 = arith.constant 1.1920929E-7 : f32
    %72 = vector.broadcast %cst_33 : f32 to vector<128x1xf32>
    %73 = arith.addf %71, %72 : vector<128x1xf32>
    %74 = math.rsqrt %73 : vector<128x1xf32>
    %75 = vector.broadcast %74 : vector<128x1xf32> to vector<128x128xf32>
    %76 = arith.mulf %55, %75 : vector<128x128xf32>
    %77 = arith.mulf %66, %6 : vector<128x128xf32>
    %c64_i32_34 = arith.constant 64 : i32
    %78 = tpu.dynamic_rotate %66 by %c64_i32_34 dim 1 : vector<128x128xf32>, i32 -> vector<128x128xf32>
    %79 = arith.mulf %78, %8 : vector<128x128xf32>
    %80 = arith.addf %77, %79 : vector<128x128xf32>
    %81 = arith.mulf %76, %6 : vector<128x128xf32>
    %c64_i32_35 = arith.constant 64 : i32
    %82 = tpu.dynamic_rotate %76 by %c64_i32_35 dim 1 : vector<128x128xf32>, i32 -> vector<128x128xf32>
    %83 = arith.mulf %82, %8 : vector<128x128xf32>
    %84 = arith.addf %81, %83 : vector<128x128xf32>
    %cst_36 = arith.constant 0.0883883461 : f32
    %85 = vector.broadcast %cst_36 : f32 to vector<128x128xf32>
    %86 = arith.mulf %80, %85 : vector<128x128xf32>
    %87 = arith.truncf %86 : vector<128x128xf32> to vector<128x128xbf16>
    %c0_37 = arith.constant 0 : index
    %c1 = arith.constant 1 : index
    %c0_38 = arith.constant 0 : index
    %c0_39 = arith.constant 0 : index
    %88 = vector.load %arg6[%c0_37, %c1, %c0_38, %c0_39] : memref<1x4x128x128xbf16, #tpu.memory_space<vmem>>, vector<1x1x128x128xbf16>
    %89 = vector.shape_cast %88 : vector<1x1x128x128xbf16> to vector<128x128xbf16>
    %90 = vector.shape_cast %87 : vector<128x128xbf16> to vector<1x1x128x128xbf16>
    tpu.vector_store %arg6[%c0_37, %c1, %c0_38, %c0_39], %90 {strides = array<i32>} : memref<1x4x128x128xbf16, #tpu.memory_space<vmem>>, vector<1x1x128x128xbf16>,
    %91 = arith.truncf %84 : vector<128x128xf32> to vector<128x128xbf16>
    %c0_40 = arith.constant 0 : index
    %c1_41 = arith.constant 1 : index
    %c0_42 = arith.constant 0 : index
    %c0_43 = arith.constant 0 : index
    %92 = vector.load %arg7[%c0_40, %c1_41, %c0_42, %c0_43] : memref<1x4x128x128xbf16, #tpu.memory_space<vmem>>, vector<1x1x128x128xbf16>
    %93 = vector.shape_cast %92 : vector<1x1x128x128xbf16> to vector<128x128xbf16>
    %94 = vector.shape_cast %91 : vector<128x128xbf16> to vector<1x1x128x128xbf16>
    tpu.vector_store %arg7[%c0_40, %c1_41, %c0_42, %c0_43], %94 {strides = array<i32>} : memref<1x4x128x128xbf16, #tpu.memory_space<vmem>>, vector<1x1x128x128xbf16>,
    %95 = arith.truncf %56 : vector<128x128xf32> to vector<128x128xbf16>
    %c0_44 = arith.constant 0 : index
    %c1_45 = arith.constant 1 : index
    %c0_46 = arith.constant 0 : index
    %c0_47 = arith.constant 0 : index
    %96 = vector.load %arg8[%c0_44, %c1_45, %c0_46, %c0_47] : memref<1x4x128x128xbf16, #tpu.memory_space<vmem>>, vector<1x1x128x128xbf16>
    %97 = vector.shape_cast %96 : vector<1x1x128x128xbf16> to vector<128x128xbf16>
    %98 = vector.shape_cast %95 : vector<128x128xbf16> to vector<1x1x128x128xbf16>
    tpu.vector_store %arg8[%c0_44, %c1_45, %c0_46, %c0_47], %98 {strides = array<i32>} : memref<1x4x128x128xbf16, #tpu.memory_space<vmem>>, vector<1x1x128x128xbf16>,
    %99 = vector.extract_strided_slice %4 {offsets = [0, 256], sizes = [128, 128], strides = [1, 1]} : vector<128x1536xf32> to vector<128x128xf32>
    %100 = vector.extract_strided_slice %4 {offsets = [0, 768], sizes = [128, 128], strides = [1, 1]} : vector<128x1536xf32> to vector<128x128xf32>
    %101 = vector.extract_strided_slice %4 {offsets = [0, 1280], sizes = [128, 128], strides = [1, 1]} : vector<128x1536xf32> to vector<128x128xf32>
    %102 = arith.mulf %99, %99 : vector<128x128xf32>
    %cst_48 = arith.constant dense<0.000000e+00> : vector<128xf32>
    %103 = vector.multi_reduction <add>, %102, %cst_48 [1] : vector<128x128xf32> to vector<128xf32>
    %104 = vector.shape_cast %103 : vector<128xf32> to vector<128x1xf32>
    %cst_49 = arith.constant 1.280000e+02 : f32
    %105 = vector.broadcast %cst_49 : f32 to vector<128x1xf32>
    %106 = arith.divf %104, %105 : vector<128x1xf32>
    %cst_50 = arith.constant 1.1920929E-7 : f32
    %107 = vector.broadcast %cst_50 : f32 to vector<128x1xf32>
    %108 = arith.addf %106, %107 : vector<128x1xf32>
    %109 = math.rsqrt %108 : vector<128x1xf32>
    %110 = vector.broadcast %109 : vector<128x1xf32> to vector<128x128xf32>
    %111 = arith.mulf %99, %110 : vector<128x128xf32>
    %112 = arith.mulf %100, %100 : vector<128x128xf32>
    %cst_51 = arith.constant dense<0.000000e+00> : vector<128xf32>
    %113 = vector.multi_reduction <add>, %112, %cst_51 [1] : vector<128x128xf32> to vector<128xf32>
    %114 = vector.shape_cast %113 : vector<128xf32> to vector<128x1xf32>
    %cst_52 = arith.constant 1.280000e+02 : f32
    %115 = vector.broadcast %cst_52 : f32 to vector<128x1xf32>
    %116 = arith.divf %114, %115 : vector<128x1xf32>
    %cst_53 = arith.constant 1.1920929E-7 : f32
    %117 = vector.broadcast %cst_53 : f32 to vector<128x1xf32>
    %118 = arith.addf %116, %117 : vector<128x1xf32>
    %119 = math.rsqrt %118 : vector<128x1xf32>
    %120 = vector.broadcast %119 : vector<128x1xf32> to vector<128x128xf32>
    %121 = arith.mulf %100, %120 : vector<128x128xf32>
    %122 = arith.mulf %111, %6 : vector<128x128xf32>
    %c64_i32_54 = arith.constant 64 : i32
    %123 = tpu.dynamic_rotate %111 by %c64_i32_54 dim 1 : vector<128x128xf32>, i32 -> vector<128x128xf32>
    %124 = arith.mulf %123, %8 : vector<128x128xf32>
    %125 = arith.addf %122, %124 : vector<128x128xf32>
    %126 = arith.mulf %121, %6 : vector<128x128xf32>
    %c64_i32_55 = arith.constant 64 : i32
    %127 = tpu.dynamic_rotate %121 by %c64_i32_55 dim 1 : vector<128x128xf32>, i32 -> vector<128x128xf32>
    %128 = arith.mulf %127, %8 : vector<128x128xf32>
    %129 = arith.addf %126, %128 : vector<128x128xf32>
    %cst_56 = arith.constant 0.0883883461 : f32
    %130 = vector.broadcast %cst_56 : f32 to vector<128x128xf32>
    %131 = arith.mulf %125, %130 : vector<128x128xf32>
    %132 = arith.truncf %131 : vector<128x128xf32> to vector<128x128xbf16>
    %c0_57 = arith.constant 0 : index
    %c2 = arith.constant 2 : index
    %c0_58 = arith.constant 0 : index
    %c0_59 = arith.constant 0 : index
    %133 = vector.load %arg6[%c0_57, %c2, %c0_58, %c0_59] : memref<1x4x128x128xbf16, #tpu.memory_space<vmem>>, vector<1x1x128x128xbf16>
    %134 = vector.shape_cast %133 : vector<1x1x128x128xbf16> to vector<128x128xbf16>
    %135 = vector.shape_cast %132 : vector<128x128xbf16> to vector<1x1x128x128xbf16>
    tpu.vector_store %arg6[%c0_57, %c2, %c0_58, %c0_59], %135 {strides = array<i32>} : memref<1x4x128x128xbf16, #tpu.memory_space<vmem>>, vector<1x1x128x128xbf16>,
    %136 = arith.truncf %129 : vector<128x128xf32> to vector<128x128xbf16>
    %c0_60 = arith.constant 0 : index
    %c2_61 = arith.constant 2 : index
    %c0_62 = arith.constant 0 : index
    %c0_63 = arith.constant 0 : index
    %137 = vector.load %arg7[%c0_60, %c2_61, %c0_62, %c0_63] : memref<1x4x128x128xbf16, #tpu.memory_space<vmem>>, vector<1x1x128x128xbf16>
    %138 = vector.shape_cast %137 : vector<1x1x128x128xbf16> to vector<128x128xbf16>
    %139 = vector.shape_cast %136 : vector<128x128xbf16> to vector<1x1x128x128xbf16>
    tpu.vector_store %arg7[%c0_60, %c2_61, %c0_62, %c0_63], %139 {strides = array<i32>} : memref<1x4x128x128xbf16, #tpu.memory_space<vmem>>, vector<1x1x128x128xbf16>,
    %140 = arith.truncf %101 : vector<128x128xf32> to vector<128x128xbf16>
    %c0_64 = arith.constant 0 : index
    %c2_65 = arith.constant 2 : index
    %c0_66 = arith.constant 0 : index
    %c0_67 = arith.constant 0 : index
    %141 = vector.load %arg8[%c0_64, %c2_65, %c0_66, %c0_67] : memref<1x4x128x128xbf16, #tpu.memory_space<vmem>>, vector<1x1x128x128xbf16>
    %142 = vector.shape_cast %141 : vector<1x1x128x128xbf16> to vector<128x128xbf16>
    %143 = vector.shape_cast %140 : vector<128x128xbf16> to vector<1x1x128x128xbf16>
    tpu.vector_store %arg8[%c0_64, %c2_65, %c0_66, %c0_67], %143 {strides = array<i32>} : memref<1x4x128x128xbf16, #tpu.memory_space<vmem>>, vector<1x1x128x128xbf16>,
    %144 = vector.extract_strided_slice %4 {offsets = [0, 384], sizes = [128, 128], strides = [1, 1]} : vector<128x1536xf32> to vector<128x128xf32>
    %145 = vector.extract_strided_slice %4 {offsets = [0, 896], sizes = [128, 128], strides = [1, 1]} : vector<128x1536xf32> to vector<128x128xf32>
    %146 = vector.extract_strided_slice %4 {offsets = [0, 1408], sizes = [128, 128], strides = [1, 1]} : vector<128x1536xf32> to vector<128x128xf32>
    %147 = arith.mulf %144, %144 : vector<128x128xf32>
    %cst_68 = arith.constant dense<0.000000e+00> : vector<128xf32>
    %148 = vector.multi_reduction <add>, %147, %cst_68 [1] : vector<128x128xf32> to vector<128xf32>
    %149 = vector.shape_cast %148 : vector<128xf32> to vector<128x1xf32>
    %cst_69 = arith.constant 1.280000e+02 : f32
    %150 = vector.broadcast %cst_69 : f32 to vector<128x1xf32>
    %151 = arith.divf %149, %150 : vector<128x1xf32>
    %cst_70 = arith.constant 1.1920929E-7 : f32
    %152 = vector.broadcast %cst_70 : f32 to vector<128x1xf32>
    %153 = arith.addf %151, %152 : vector<128x1xf32>
    %154 = math.rsqrt %153 : vector<128x1xf32>
    %155 = vector.broadcast %154 : vector<128x1xf32> to vector<128x128xf32>
    %156 = arith.mulf %144, %155 : vector<128x128xf32>
    %157 = arith.mulf %145, %145 : vector<128x128xf32>
    %cst_71 = arith.constant dense<0.000000e+00> : vector<128xf32>
    %158 = vector.multi_reduction <add>, %157, %cst_71 [1] : vector<128x128xf32> to vector<128xf32>
    %159 = vector.shape_cast %158 : vector<128xf32> to vector<128x1xf32>
    %cst_72 = arith.constant 1.280000e+02 : f32
    %160 = vector.broadcast %cst_72 : f32 to vector<128x1xf32>
    %161 = arith.divf %159, %160 : vector<128x1xf32>
    %cst_73 = arith.constant 1.1920929E-7 : f32
    %162 = vector.broadcast %cst_73 : f32 to vector<128x1xf32>
    %163 = arith.addf %161, %162 : vector<128x1xf32>
    %164 = math.rsqrt %163 : vector<128x1xf32>
    %165 = vector.broadcast %164 : vector<128x1xf32> to vector<128x128xf32>
    %166 = arith.mulf %145, %165 : vector<128x128xf32>
    %167 = arith.mulf %156, %6 : vector<128x128xf32>
    %c64_i32_74 = arith.constant 64 : i32
    %168 = tpu.dynamic_rotate %156 by %c64_i32_74 dim 1 : vector<128x128xf32>, i32 -> vector<128x128xf32>
    %169 = arith.mulf %168, %8 : vector<128x128xf32>
    %170 = arith.addf %167, %169 : vector<128x128xf32>
    %171 = arith.mulf %166, %6 : vector<128x128xf32>
    %c64_i32_75 = arith.constant 64 : i32
    %172 = tpu.dynamic_rotate %166 by %c64_i32_75 dim 1 : vector<128x128xf32>, i32 -> vector<128x128xf32>
    %173 = arith.mulf %172, %8 : vector<128x128xf32>
    %174 = arith.addf %171, %173 : vector<128x128xf32>
    %cst_76 = arith.constant 0.0883883461 : f32
    %175 = vector.broadcast %cst_76 : f32 to vector<128x128xf32>
    %176 = arith.mulf %170, %175 : vector<128x128xf32>
    %177 = arith.truncf %176 : vector<128x128xf32> to vector<128x128xbf16>
    %c0_77 = arith.constant 0 : index
    %c3 = arith.constant 3 : index
    %c0_78 = arith.constant 0 : index
    %c0_79 = arith.constant 0 : index
    %178 = vector.load %arg6[%c0_77, %c3, %c0_78, %c0_79] : memref<1x4x128x128xbf16, #tpu.memory_space<vmem>>, vector<1x1x128x128xbf16>
    %179 = vector.shape_cast %178 : vector<1x1x128x128xbf16> to vector<128x128xbf16>
    %180 = vector.shape_cast %177 : vector<128x128xbf16> to vector<1x1x128x128xbf16>
    tpu.vector_store %arg6[%c0_77, %c3, %c0_78, %c0_79], %180 {strides = array<i32>} : memref<1x4x128x128xbf16, #tpu.memory_space<vmem>>, vector<1x1x128x128xbf16>,
    %181 = arith.truncf %174 : vector<128x128xf32> to vector<128x128xbf16>
    %c0_80 = arith.constant 0 : index
    %c3_81 = arith.constant 3 : index
    %c0_82 = arith.constant 0 : index
    %c0_83 = arith.constant 0 : index
    %182 = vector.load %arg7[%c0_80, %c3_81, %c0_82, %c0_83] : memref<1x4x128x128xbf16, #tpu.memory_space<vmem>>, vector<1x1x128x128xbf16>
    %183 = vector.shape_cast %182 : vector<1x1x128x128xbf16> to vector<128x128xbf16>
    %184 = vector.shape_cast %181 : vector<128x128xbf16> to vector<1x1x128x128xbf16>
    tpu.vector_store %arg7[%c0_80, %c3_81, %c0_82, %c0_83], %184 {strides = array<i32>} : memref<1x4x128x128xbf16, #tpu.memory_space<vmem>>, vector<1x1x128x128xbf16>,
    %185 = arith.truncf %146 : vector<128x128xf32> to vector<128x128xbf16>
    %c0_84 = arith.constant 0 : index
    %c3_85 = arith.constant 3 : index
    %c0_86 = arith.constant 0 : index
    %c0_87 = arith.constant 0 : index
    %186 = vector.load %arg8[%c0_84, %c3_85, %c0_86, %c0_87] : memref<1x4x128x128xbf16, #tpu.memory_space<vmem>>, vector<1x1x128x128xbf16>
    %187 = vector.shape_cast %186 : vector<1x1x128x128xbf16> to vector<128x128xbf16>
    %188 = vector.shape_cast %185 : vector<128x128xbf16> to vector<1x1x128x128xbf16>
    tpu.vector_store %arg8[%c0_84, %c3_85, %c0_86, %c0_87], %188 {strides = array<i32>} : memref<1x4x128x128xbf16, #tpu.memory_space<vmem>>, vector<1x1x128x128xbf16>,
    return
  }
  func.func @transform_0(%arg0: i32, %arg1: i32) -> (i32, i32, i32) {
    %c0_i32 = arith.constant 0 : i32
    %c0_i32_0 = arith.constant 0 : i32
    return %arg0, %arg1, %c0_i32 : i32, i32, i32
  }
  func.func @transform_1(%arg0: i32, %arg1: i32) -> (i32, i32) {
    %c0_i32 = arith.constant 0 : i32
    %c0_i32_0 = arith.constant 0 : i32
    %c0_i32_1 = arith.constant 0 : i32
    return %c0_i32, %c0_i32_0 : i32, i32
  }
  func.func @transform_2(%arg0: i32, %arg1: i32) -> (i32, i32) {
    %c0_i32 = arith.constant 0 : i32
    %c0_i32_0 = arith.constant 0 : i32
    return %arg1, %c0_i32 : i32, i32
  }
  func.func @transform_3(%arg0: i32, %arg1: i32) -> (i32, i32) {
    %c0_i32 = arith.constant 0 : i32
    %c0_i32_0 = arith.constant 0 : i32
    return %arg1, %c0_i32 : i32, i32
  }
  func.func @transform_4(%arg0: i32, %arg1: i32) -> (i32, i32, i32, i32) {
    %c0_i32 = arith.constant 0 : i32
    %c0_i32_0 = arith.constant 0 : i32
    %c0_i32_1 = arith.constant 0 : i32
    return %arg0, %c0_i32, %arg1, %c0_i32_0 : i32, i32, i32, i32
  }
  func.func @transform_5(%arg0: i32, %arg1: i32) -> (i32, i32, i32, i32) {
    %c0_i32 = arith.constant 0 : i32
    %c0_i32_0 = arith.constant 0 : i32
    %c0_i32_1 = arith.constant 0 : i32
    return %arg0, %c0_i32, %arg1, %c0_i32_0 : i32, i32, i32, i32
  }
  func.func @transform_6(%arg0: i32, %arg1: i32) -> (i32, i32, i32, i32) {
    %c0_i32 = arith.constant 0 : i32
    %c0_i32_0 = arith.constant 0 : i32
    %c0_i32_1 = arith.constant 0 : i32
    return %arg0, %c0_i32, %arg1, %c0_i32_0 : i32, i32, i32, i32
  }
}

</mosaic_0001>

<bundles_post_ra>
// kernel: tpu_custom_call.1
= control target key start
LH: loop header
LB: loop body
LE: loop exit
PB: predicated region body
PF: predicated region fallthrough
CT: control target
= control target key end

     0   :  { %6 = vsyncpa [#allocation3], 0  ;;  %s441_s0 = inlined_call_operand.hbm [shape: f32[8,128], index: 0, kind: input, shape index: {}]   ;;  %s442_s1 = inlined_call_operand.hbm [shape: f32[16,128], index: 1, kind: output, shape index: {}]  }
   0x1   :  { %7 = vsyncpa [#allocation4], 0 }
   0x2   :  { %9 = vsyncpa [#allocation4 + $0x1], 0  ;;  %s357_s6 = smov 0   ;;  %s359_s7 = smov 0  }
   0x3   :  { %s361_s8 = smov 0   ;;  %s363_s9 = smov 0  }
   0x4 LB: > { %s378_s10 = sadd.s32 4294967295, %s344_s9   ;;  %s188_s11 = sadd.s32 4294967294, %s344_s9   ;;  %s344_s9 = sphi %s363_s9, %s448_s9   ;;  %s340_s8 = sphi %s361_s8, %s447_s8   ;;  %s336_s7 = sphi %s359_s7, %s446_s7   ;;  %s332_s6 = sphi %s357_s6, %s445_s6  }
   0x5   : > { %s382_s12 = sadd.s32 1, %s344_s9   ;;  %s43_s13 = sadd.s32 1, %s340_s8 }
   0x6   : > { %s40_s14 = ssub.s32 %s344_s9, %s382_s12  ;;  %p53_p0 = scmp.ne.s32.totalorder %s340_s8, %s336_s7 }
   0x7   : > { %p41_p1 = scmp.eq.s32.totalorder %s40_s14, 0  ;;  %p54_p2 = scmp.eq.s32.totalorder %s378_s10, 1 }
   0x8   : > { %p59_p3 = scmp.ne.s32.totalorder %s336_s7, %s332_s6  ;;  %p60_p4 = scmp.eq.s32.totalorder %s188_s11, 1 }
   0x9   : > { %s393_s15 = scalar_select %p41_p1, %s340_s8, %s43_s13  }
   0xa   : > { %p395_p5 = por %p54_p2, %p53_p0  ;;  %p399_p6 = por %p60_p4, %p59_p3 }
   0xb   : > { %p189_p7 = scmp.ge.s32.totalorder %s344_s9, 1  ;;  %p67_p8 = scmp.lt.s32.totalorder %s344_s9, 3 }
   0xc   : > { %p212_p9 = scmp.eq.s32.totalorder %s378_s10, 0  ;;  %s79_s20 = sshll.u32 %s441_s0, 4  ;;  %s80_s20 = int_to_ptr.hbm [resolvable:$true] %s79_s20 }
   0xd   : > { %p68_p10 = pnand %p189_p7, %p67_p8  ;;  %s346_s21 = smov [#allocation2]  }
   0xe   : > { %s81_s22 = sshll.u32 %s346_s21, 4  ;;  %s82_s22 = int_to_ptr.vmem [resolvable:$true] %s81_s22 }
   0xf   : > { %p204_p11 = pneg %p68_p10  ;;  %94 = sbr.rel (%p68_p10) target bundleno = 37 (0x25), region = 24 }
  0x11   : > { %p205_p12 = pnand %p212_p9, %p204_p11 }
  0x13   : > { %207 = dma.hbm_to_vmem [thread:$0]  (!%p205_p12), %s80_s20, 128, %s82_s22, [#allocation3]  }
  0x14   : > { %323 = dma.done.wait (%p212_p9), [#allocation3], 128  }
  0x15   : > { %325 = vsyncadd (%p212_p9), [#allocation3], 4294967168  ;;  %s107_s23 = sand.u32 1, %s336_s7   ;;  %s195_s24 = sshll.u32 %s378_s10, 3  ;;  %v110_v0 = vld [vmem:[#allocation2] sm:$0xff] }
  0x16   : > { %s193_s25 = sshll.u32 %s107_s23, 3  ;;  %s124_s28 = scalar_lea.hbm %s442_s1, %s195_s24  ;;  %v111_v1 = vadd.f32 1.0, %v110_v0 }
  0x17   : > { %s109_s29 = scalar_lea.vmem [#allocation5], %s193_s25  ;;  %s128_s2 = sshll.u32 %s124_s28, 4  ;;  %s129_s2 = int_to_ptr.hbm [resolvable:$true] %s128_s2 }
  0x18   : > { %s126_s30 = sshll.u32 %s109_s29, 4  ;;  %112 = vst [vmem:[%s109_s29] sm:$0xff] %v111_v1  ;;  %s114_s3 = scalar_lea.sflag [#allocation4], %s107_s23  ;;  %s127_s30 = int_to_ptr.vmem [resolvable:$true] %s126_s30 }
  0x19   : > { %s292_s4 = sshra.s32 %s129_s2, 4  ;;  %s298_s13 = scalar_lea.hbm %s442_s1, 16  ;;  %s293_s4 = int_to_ptr.hbm [resolvable:$true] %s292_s4 }
  0x1a   : > { %s294_s5 = scalar_lea.hbm %s293_s4, 8  ;;  %p299_p2 = scmp.lt.s32.totalorder %s293_s4, %s442_s1 }
  0x1b   : > { %p295_p13 = scmp.ne.s32.totalorder %s293_s4, %s294_s5  ;;  %p300_p3 = scmp.lt.s32.totalorder %s298_s13, %s294_s5 }
  0x1d   : > { %p296_p0 = pnand %p295_p13, %p395_p5  ;;  %p301_p4 = por %p300_p3, %p299_p2 }
  0x1f   : > { %p297_p1 = pneg %p296_p0 }
  0x21   : > { %p302_p7 = pnand %p301_p4, %p297_p1 }
  0x23   : > { %305 = shalt.err (!%p302_p7)
}
  0x24   : > { %202 = dma.vmem_to_hbm [thread:$0]  (%p395_p5), %s127_s30, 128, %s129_s2, %s114_s3  }
  0x25 PF: > { %p214_p8 = scmp.ge.s32.totalorder %s344_s9, 2  ;;  %s140_s19 = sand.u32 1, %s332_s6  }
  0x26   : > { %s141_s20 = scalar_lea.sflag [#allocation4], %s140_s19 }
  0x27   : > { %p209_p9 = pnand %p214_p8, %p399_p6 }
  0x29   : > { %p210_p10 = pneg %p209_p9 }
  0x2b   : > { %327 = dma.done.wait (%p210_p10), %s141_s20, 128  }
  0x2c   : > { %329 = vsyncadd (%p210_p10), %s141_s20, 4294967168  ;;  %p12_p11 = scmp.ge.s32.totalorder %s382_s12, 4   ;;  %s445_s6 = smov %s336_s7 }
  0x2d   : > { %s446_s7 = smov %s340_s8  ;;  %s447_s8 = smov %s393_s15 }
  0x2e   : > { %s448_s9 = smov %s382_s12  ;;  %14 = sbr.rel (!%p12_p11) target bundleno = 4 (0x4), region = 61 }
  0x33   :  { %147 = vsyncpa [#allocation3], 1 }
  0x34   :  { %149 = vsyncpa [#allocation3 + $0x1], 1 }
  0x35   :  { %150 = vsyncpa [#allocation4], 1 }
  0x36   :  { %152 = vsyncpa [#allocation4 + $0x1], 1 }

// kernel: tpu_custom_call.1
= control target key start
LH: loop header
LB: loop body
LE: loop exit
PB: predicated region body
PF: predicated region fallthrough
CT: control target
= control target key end

     0   :  { %s16547_s0 = inlined_call_operand.hbm [shape: f32[2,128,512], index: 0, kind: input, shape index: {}]   ;;  %s16548_s1 = inlined_call_operand.hbm [shape: bf16[512,1536], index: 1, kind: input, shape index: {}]   ;;  %s16549_s2 = inlined_call_operand.hbm [shape: bf16[128,128], index: 2, kind: input, shape index: {}]   ;;  %s16550_s3 = inlined_call_operand.hbm [shape: bf16[128,128], index: 3, kind: input, shape index: {}]   ;;  %s16551_s4 = inlined_call_operand.hbm [shape: bf16[2,4,128,128], index: 4, kind: output, shape index: {0}]   ;;  %s16552_s5 = inlined_call_operand.hbm [shape: bf16[2,4,128,128], index: 5, kind: output, shape index: {1}]   ;;  %s16553_s6 = inlined_call_operand.hbm [shape: bf16[2,4,128,128], index: 6, kind: output, shape index: {2}]  }
   0x1   :  { %16837 = sst [smem:[#allocation111_spill]] %s16548_s1 }
   0x2   :  { %16838 = sst [smem:[#allocation112_spill]] %s16549_s2 }
   0x3   :  { %16839 = sst [smem:[#allocation113_spill]] %s16550_s3 }
   0x4   :  { %12 = vsyncpa [#allocation3], 0 }
   0x5   :  { %14 = vsyncpa [#allocation3 + $0x1], 0 }
   0x6   :  { %15 = vsyncpa [#allocation6], 0 }
   0x7   :  { %16 = vsyncpa [#allocation9], 0 }
   0x8   :  { %17 = vsyncpa [#allocation4], 0 }
   0x9   :  { %19 = vsyncpa [#allocation4 + $0x1], 0 }
   0xa   :  { %20 = vsyncpa [#allocation12], 0 }
   0xb   :  { %22 = vsyncpa [#allocation12 + $0x1], 0  ;;  %s12045_s21 = smov 0   ;;  %s12047_s22 = smov 0  }
   0xc   :  { %s12049_s23 = smov 0   ;;  %s12051_s24 = smov 0  }
   0xd   :  { %s12053_s25 = smov 0   ;;  %s12055_s26 = smov 0  }
   0xe LB: > { %s12076_s27 = sadd.s32 4294967295, %s11996_s26   ;;  %s16554_s28 = sadd.s32 4294967294, %s11996_s26   ;;  %s11996_s26 = sphi %s12055_s26, %s28_s26   ;;  %s11992_s25 = sphi %s12053_s25, %s17616_s25   ;;  %s11988_s24 = sphi %s12051_s24, %s17615_s24   ;;  %s11984_s23 = sphi %s12049_s23, %s17614_s23   ;;  %s11980_s22 = sphi %s12047_s22, %s17613_s22   ;;  %s11976_s21 = sphi %s12045_s21, %s17612_s21  }
   0xf   : > { %p62_p0 = scmp.ne.s32.totalorder %s11980_s22, %s11976_s21  ;;  %p63_p1 = scmp.eq.s32.totalorder %s12076_s27, 0 }
  0x10   : > { %p161_p2 = scmp.eq.s32.totalorder %s12076_s27, 1  ;;  %p167_p3 = scmp.eq.s32.totalorder %s16554_s28, 1 }
  0x11   : > { %p12087_p4 = por %p63_p1, %p62_p0  ;;  %p8610_p5 = scmp.ge.s32.totalorder %s11996_s26, 1 }
  0x12   : > { %p12092_p6 = por %p167_p3, %p62_p0  ;;  %p230_p7 = scmp.lt.s32.totalorder %s11996_s26, 3 }
  0x13   : > { %s16842_s1 = sld [smem:[#allocation111_spill]]  ;;  %s11998_s11 = smov [#allocation5]  }
  0x14   : > { %p12100_p8 = pnand %p8610_p5, %p230_p7  ;;  %s243_s12 = sshll.u32 %s11998_s11, 4  ;;  %s244_s12 = int_to_ptr.vmem [resolvable:$true] %s243_s12 }
  0x15   : > { %p8614_p11 = scmp.ge.s32.totalorder %s11996_s26, 2  ;;  %s16845_s2 = sld [smem:[#allocation112_spill]] }
  0x16   : > { %p11376_p9 = pneg %p12100_p8  ;;  %s11999_s17 = smov 768  }
  0x17   : > { %s12000_s18 = smov 48   ;;  %s12001_s19 = smov [#allocation7]  }
  0x18   : > { %p12108_p10 = pnand %p11376_p9, %p63_p1  ;;  %s260_s20 = sshll.u32 %s12001_s19, 4  ;;  %s261_s20 = int_to_ptr.vmem [resolvable:$true] %s260_s20 }
  0x19   : > { %s241_s9 = sshll.u32 %s16842_s1, 4  ;;  %s12002_s7 = smov 64   ;;  %s242_s9 = int_to_ptr.hbm [resolvable:$true] %s241_s9 }
  0x1a   : > { %11379 = dma.hbm_to_vmem [thread:$0]  (!%p12108_p10), %s242_s9, 49152, %s244_s12, [#allocation6], %s11999_s17, %s11999_s17, %s12000_s18  }
  0x1b   : > { %s258_s16 = sshll.u32 %s16845_s2, 4  ;;  %s12003_s8 = smov 4   ;;  %s259_s16 = int_to_ptr.hbm [resolvable:$true] %s258_s16 }
  0x1c   : > { %11382 = dma.hbm_to_vmem [thread:$0]  (!%p12108_p10), %s259_s16, 1024, %s261_s20, [#allocation6], %s12002_s7, %s12002_s7, %s12003_s8  }
  0x1d   : > { %s16846_s3 = sld [smem:[#allocation113_spill]]  ;;  %s12004_s28 = smov [#allocation8]  }
  0x1e   : > { %s277_s1 = sshll.u32 %s12004_s28, 4  ;;  %s49_s9 = sadd.s32 1, %s11984_s23  ;;  %s278_s1 = int_to_ptr.vmem [resolvable:$true] %s277_s1 }
  0x1f   : > { %s40_s12 = sadd.s32 1, %s11992_s25  ;;  %p56_p12 = scmp.ne.s32.totalorder %s11984_s23, %s11980_s22 }
  0x20   : > { %p42_p13 = scmp.ge.s32.totalorder %s40_s12, 2  ;;  %p57_p0 = scmp.eq.s32.totalorder %s11996_s26, 0 }
  0x21   : > { %p12132_p3 = por %p161_p2, %p56_p12  ;;  %p11403_p5 = scmp.lt.s32.totalorder %s11996_s26, 2 }
  0x22   : > { %s17618_s12 = smov (%p42_p13, %s40_s12), 0  ;;  %p12139_p7 = por %p57_p0, %p56_p12 }
  0x23   : > { %s275_s15 = sshll.u32 %s16846_s3, 4  ;;  %16848 = sst [smem:[#allocation19_spill]] %s17618_s12  ;;  %s276_s15 = int_to_ptr.hbm [resolvable:$true] %s275_s15 }
  0x24   : > { %11385 = dma.hbm_to_vmem [thread:$0]  (!%p12108_p10), %s276_s15, 1024, %s278_s1, [#allocation9], %s12002_s7, %s12002_s7, %s12003_s8  }
  0x25   : > { %s291_s1 = sand.u32 1, %s11984_s23   ;;  %s44_s13 = ssub.s32 %s11992_s25, %s17618_s12 }
  0x26   : > { %p47_p9 = scmp.eq.s32.totalorder %s44_s13, 0  ;;  %s8615_s17 = sshll.u32 %s291_s1, 9 }
  0x27   : > { %s10317_s18 = sshll.u32 %s11992_s25, 9  ;;  %s295_s11 = scalar_lea.vmem [#allocation2], %s8615_s17 }
  0x28   : > { %s12148_s19 = scalar_select %p47_p9, %s11984_s23, %s49_s9  }
  0x29   : > { %s303_s8 = scalar_lea.hbm %s16547_s0, %s10317_s18  ;;  %s306_s14 = sshll.u32 %s295_s11, 4  ;;  %s307_s14 = int_to_ptr.vmem [resolvable:$true] %s306_s14 }
  0x2a   : > { %s304_s15 = sshll.u32 %s303_s8, 4  ;;  %p11387_p2 = pnand %p11403_p5, %p12139_p7  ;;  %s305_s15 = int_to_ptr.hbm [resolvable:$true] %s304_s15 }
  0x2b   : > { %s292_s2 = scalar_lea.sflag [#allocation3], %s291_s1  ;;  %s12005_s3 = smov 512  }
  0x2c   : > { %s12006_s12 = smov 32   ;;  %318 = sbr.rel (%p12100_p8) target bundleno = 2878 (0xb3e), region = 36 }
  0x2d   : > { %11389 = dma.hbm_to_vmem [thread:$0]  (!%p11387_p2), %s305_s15, 8192, %s307_s14, %s292_s2, %s12005_s3, %s12005_s3, %s12006_s12  }
  0x31   : > { %s12160_s9 = sand.u32 1, %s11980_s22  }
  0x32   : > { %s8619_s13 = sshll.u32 %s12160_s9, 9  ;;  %s321_s17 = scalar_lea.sflag [#allocation3], %s12160_s9 }
  0x33   : > { %s12164_s18 = scalar_lea.vmem [#allocation2], %s8619_s13 }
  0x34   : > { %11955 = dma.done.wait (%p12087_p4), %s321_s17, 8192  }
  0x35   : > { %11957 = vsyncadd (%p12087_p4), %s321_s17, 4294959104 }
  0x36   : > { %11959 = dma.done.wait (%p63_p1), [#allocation6], 50176  }
  0x37   : > { %11961 = vsyncadd (%p63_p1), [#allocation6], 4294917120 }
  0x38   : > { %11963 = dma.done.wait (%p63_p1), [#allocation9], 1024  }
  0x39   : > { %11965 = vsyncadd (%p63_p1), [#allocation9], 4294966272  ;;  %v8964_v0 = vld [vmem:[#allocation5 + $0x2a0] sm:$0xf]  ;;  %v10408_v1 = vld [vmem:[#allocation5 + $0x2cc] sm:$0xf0] }
  0x3a   : > { %v9348_v2 = vld [vmem:[#allocation5 + $0x5a0] sm:$0xf]  ;;  %v8965_v3 = vor.u32 %v10408_v1, %v8964_v0  ;;  %v10504_v4 = vld [vmem:[#allocation5 + $0x5cc] sm:$0xf0]  ;;  %s12008_s2 = smov 64   ;;  %s12672_s3 = sshll.u32 %s12160_s9, 8 }
  0x3b   : > { %v9732_v5 = vld [vmem:[#allocation5 + $0x8a0] sm:$0xf]  ;;  %v10600_v6 = vld [vmem:[#allocation5 + $0x8cc] sm:$0xf0]  ;;  %v9349_v7 = vor.u32 %v10504_v4, %v9348_v2  ;;  %s12683_s29 = scalar_lea.vmem [#allocation10], %s12672_s3  ;;  %s14594_s10 = scalar_lea.vmem [#allocation11], %s12672_s3 }
  0x3c   : > { %v9733_v8 = vor.u32 %v10600_v6, %v9732_v5  ;;  %v10116_v9 = vld [vmem:[#allocation5 + $0xba0] sm:$0xf]  ;;  %v10696_v10 = vld [vmem:[#allocation5 + $0xbcc] sm:$0xf0]  ;;  %2785 = vmatpush.bf16.msra.mxu0 %v8965_v3  ;;  %s15484_s12 = scalar_lea.vmem [#allocation13], %s12672_s3  ;;  %s16358_s28 = sshll.u32 %s11988_s24, 8 }
  0x3d   : > { %v8916_v11 = vld [vmem:[#allocation5 + $0x240] sm:$0xf]  ;;  %v10117_v12 = vor.u32 %v10696_v10, %v10116_v9  ;;  %v10396_v13 = vld [vmem:[#allocation5 + $0x26c] sm:$0xf0]  ;;  %2834 = vmatpush.bf16.msra.mxu1 %v9349_v7  ;;  %s8377_s7 = scalar_lea.hbm %s16551_s4, %s16358_s28  ;;  %s8378_s24 = sshll.u32 %s12683_s29, 4  ;;  %s8379_s24 = int_to_ptr.vmem [resolvable:$true] %s8378_s24 }
  0x3e   : > { %v9300_v14 = vld [vmem:[#allocation5 + $0x540] sm:$0xf]  ;;  %v10492_v15 = vld [vmem:[#allocation5 + $0x56c] sm:$0xf0]  ;;  %2883 = vmatpush.bf16.msra.mxu2 %v9733_v8  ;;  %v8917_v16 = vor.u32 %v10396_v13, %v8916_v11  ;;  %s8380_s8 = sshll.u32 %s8377_s7, 4  ;;  %s8354_s11 = scalar_lea.sflag [#allocation4], %s12160_s9  ;;  %s8381_s8 = int_to_ptr.hbm [resolvable:$true] %s8380_s8 }
  0x3f   : > { %v9301_v17 = vor.u32 %v10492_v15, %v9300_v14  ;;  %v9684_v18 = vld [vmem:[#allocation5 + $0x840] sm:$0xf]  ;;  %v10588_v19 = vld [vmem:[#allocation5 + $0x86c] sm:$0xf0]  ;;  %2932 = vmatpush.bf16.msra.mxu3 %v10117_v12  ;;  %s11860_s14 = sshra.s32 %s8381_s8, 4  ;;  %s11861_s14 = int_to_ptr.hbm [resolvable:$true] %s11860_s14 }
  0x40   : > { %v10068_v20 = vld [vmem:[#allocation5 + $0xb40] sm:$0xf]  ;;  %v9685_v21 = vor.u32 %v10588_v19, %v9684_v18  ;;  %v10684_v22 = vld [vmem:[#allocation5 + $0xb6c] sm:$0xf0]  ;;  %2786 = vmatpush.bf16.msra.mxu0 %v8917_v16  ;;  %s11862_s15 = scalar_lea.hbm %s11861_s14, 256  ;;  %p11867_p10 = scmp.lt.s32.totalorder %s11861_s14, %s16551_s4 }
  0x41   : > { %v8868_v23 = vld [vmem:[#allocation5 + $0x1e0] sm:$0xf]  ;;  %v10384_v24 = vld [vmem:[#allocation5 + $0x20c] sm:$0xf0]  ;;  %v10069_v25 = vor.u32 %v10684_v22, %v10068_v20  ;;  %2835 = vmatpush.bf16.msra.mxu1 %v9301_v17  ;;  %p11863_p1 = scmp.ne.s32.totalorder %s11861_s14, %s11862_s15 }
  0x42   : > { %v9252_v26 = vld [vmem:[#allocation5 + $0x4e0] sm:$0xf]  ;;  %v10480_v27 = vld [vmem:[#allocation5 + $0x50c] sm:$0xf0]  ;;  %v8869_v29 = vor.u32 %v10384_v24, %v8868_v23  ;;  %2884 = vmatpush.bf16.msra.mxu2 %v9685_v21 }
  0x43   : > { %v9636_v28 = vld [vmem:[#allocation5 + $0x7e0] sm:$0xf]  ;;  %v10576_v30 = vld [vmem:[#allocation5 + $0x80c] sm:$0xf0]  ;;  %v9253_v33 = vor.u32 %v10480_v27, %v9252_v26  ;;  %2933 = vmatpush.bf16.msra.mxu3 %v10069_v25  ;;  %p11864_p4 = pnand %p11863_p1, %p12132_p3 }
  0x44   : > { %v10020_v31 = vld [vmem:[#allocation5 + $0xae0] sm:$0xf]  ;;  %v10672_v32 = vld [vmem:[#allocation5 + $0xb0c] sm:$0xf0]  ;;  %v9637_v34 = vor.u32 %v10576_v30, %v9636_v28  ;;  %2787 = vmatpush.bf16.msra.mxu0 %v8869_v29  ;;  %v386_v30 = vld [vmem:[%s12164_s18 + $0x8] sm:$0xff] }
  0x45   : > { %v8820_v35 = vld [vmem:[#allocation5 + $0x180] sm:$0xf]  ;;  %v10372_v36 = vld [vmem:[#allocation5 + $0x1ac] sm:$0xf0]  ;;  %v10021_v38 = vor.u32 %v10672_v32, %v10020_v31  ;;  %2836 = vmatpush.bf16.msra.mxu1 %v9253_v33  ;;  %v390_v31 = vld [vmem:[%s12164_s18 + $0x28] sm:$0xff]  ;;  %p11865_p8 = pneg %p11864_p4 }
  0x46   : > { %v9204_v37 = vld [vmem:[#allocation5 + $0x480] sm:$0xf]  ;;  %v10468_v39 = vld [vmem:[#allocation5 + $0x4ac] sm:$0xf0]  ;;  %v8821_v44 = vor.u32 %v10372_v36, %v8820_v35  ;;  %2885 = vmatpush.bf16.msra.mxu2 %v9637_v34  ;;  %v10594_v32 = vld [vmem:[#allocation5 + $0x8a4] sm:$0xf] }
  0x47   : > { %v9588_v40 = vld [vmem:[#allocation5 + $0x780] sm:$0xf]  ;;  %v10564_v41 = vld [vmem:[#allocation5 + $0x7ac] sm:$0xf0]  ;;  %v9205_v45 = vor.u32 %v10468_v39, %v9204_v37  ;;  %2934 = vmatpush.bf16.msra.mxu3 %v10021_v38  ;;  %v9734_v33 = vld [vmem:[#allocation5 + $0x8d0] sm:$0xf0] }
  0x48   : > { %v9972_v42 = vld [vmem:[#allocation5 + $0xa80] sm:$0xf]  ;;  %v10660_v43 = vld [vmem:[#allocation5 + $0xaac] sm:$0xf0]  ;;  %v9589_v46 = vor.u32 %v10564_v41, %v9588_v40  ;;  %2788 = vmatpush.bf16.msra.mxu0 %v8821_v44  ;;  %v10690_v36 = vld [vmem:[#allocation5 + $0xba4] sm:$0xf]  ;;  %v9737_v44 = vor.u32 %v10594_v32, %v9734_v33 }
  0x49   : > { %v8772_v47 = vld [vmem:[#allocation5 + $0x120] sm:$0xf]  ;;  %v10360_v48 = vld [vmem:[#allocation5 + $0x14c] sm:$0xf0]  ;;  %v9973_v50 = vor.u32 %v10660_v43, %v9972_v42  ;;  %2837 = vmatpush.bf16.msra.mxu1 %v9205_v45  ;;  %v10118_v37 = vld [vmem:[#allocation5 + $0xbd0] sm:$0xf0] }
  0x4a   : > { %v9156_v49 = vld [vmem:[#allocation5 + $0x420] sm:$0xf]  ;;  %v10456_v51 = vld [vmem:[#allocation5 + $0x44c] sm:$0xf0]  ;;  %v8773_v56 = vor.u32 %v10360_v48, %v8772_v47  ;;  %2886 = vmatpush.bf16.msra.mxu2 %v9589_v46  ;;  %v388_v41 = vld [vmem:[%s12164_s18 + $0x18] sm:$0xff] }
  0x4b   : > { %v9540_v52 = vld [vmem:[#allocation5 + $0x720] sm:$0xf]  ;;  %v10552_v53 = vld [vmem:[#allocation5 + $0x74c] sm:$0xf0]  ;;  %v9157_v57 = vor.u32 %v10456_v51, %v9156_v49  ;;  %2935 = vmatpush.bf16.msra.mxu3 %v9973_v50  ;;  %v392_v42 = vld [vmem:[%s12164_s18 + $0x38] sm:$0xff]  ;;  %v10121_v49 = vor.u32 %v10690_v36, %v10118_v37 }
  0x4c   : > { %v9924_v54 = vld [vmem:[#allocation5 + $0xa20] sm:$0xf]  ;;  %v10648_v55 = vld [vmem:[#allocation5 + $0xa4c] sm:$0xf0]  ;;  %v9541_v58 = vor.u32 %v10552_v53, %v9540_v52  ;;  %2789 = vmatpush.bf16.msra.mxu0 %v8773_v56  ;;  %v10402_v45 = vld [vmem:[#allocation5 + $0x2a4] sm:$0xf]  ;;  %v12188_v53 = vpack.c.bf16 %v390_v31, %v386_v30 }
  0x4d   : > { %v8724_v59 = vld [vmem:[#allocation5 + $0xc0] sm:$0xf]  ;;  %v10348_v60 = vld [vmem:[#allocation5 + $0xec] sm:$0xf0]  ;;  %v9925_v62 = vor.u32 %v10648_v55, %v9924_v54  ;;  %2838 = vmatpush.bf16.msra.mxu1 %v9157_v57  ;;  %v8966_v46 = vld [vmem:[#allocation5 + $0x2d0] sm:$0xf0]  ;;  %v12192_v57 = vpack.c.bf16 %v392_v42, %v388_v41 }
  0x4e   : > { %v9108_v61 = vld [vmem:[#allocation5 + $0x3c0] sm:$0xf]  ;;  %v10444_v63 = vld [vmem:[#allocation5 + $0x3ec] sm:$0xf0]  ;;  %v8725_v4 = vor.u32 %v10348_v60, %v8724_v59  ;;  %2887 = vmatpush.bf16.msra.mxu2 %v9541_v58  ;;  %v10498_v47 = vld [vmem:[#allocation5 + $0x5a4] sm:$0xf]  ;;  %v8969_v58 = vor.u32 %v10402_v45, %v8966_v46 }
  0x4f   : > { %v9492_v0 = vld [vmem:[#allocation5 + $0x6c0] sm:$0xf]  ;;  %v10540_v1 = vld [vmem:[#allocation5 + $0x6ec] sm:$0xf0]  ;;  %v9109_v5 = vor.u32 %v10444_v63, %v9108_v61  ;;  %2936 = vmatpush.bf16.msra.mxu3 %v9925_v62  ;;  %v9350_v50 = vld [vmem:[#allocation5 + $0x5d0] sm:$0xf0] }
  0x50   : > { %v9876_v2 = vld [vmem:[#allocation5 + $0x9c0] sm:$0xf]  ;;  %v10636_v3 = vld [vmem:[#allocation5 + $0x9ec] sm:$0xf0]  ;;  %v9493_v6 = vor.u32 %v10540_v1, %v9492_v0  ;;  %2790 = vmatpush.bf16.msra.mxu0 %v8725_v4  ;;  %v10582_v51 = vld [vmem:[#allocation5 + $0x844] sm:$0xf]  ;;  %v9353_v59 = vor.u32 %v10498_v47, %v9350_v50 }
  0x51   : > { %v8676_v7 = vld [vmem:[#allocation5 + $0x60] sm:$0xf]  ;;  %v10336_v8 = vld [vmem:[#allocation5 + $0x8c] sm:$0xf0]  ;;  %v9877_v10 = vor.u32 %v10636_v3, %v9876_v2  ;;  %2839 = vmatpush.bf16.msra.mxu1 %v9109_v5  ;;  %v9686_v52 = vld [vmem:[#allocation5 + $0x870] sm:$0xf0] }
  0x52   : > { %v9060_v9 = vld [vmem:[#allocation5 + $0x360] sm:$0xf]  ;;  %v10432_v11 = vld [vmem:[#allocation5 + $0x38c] sm:$0xf0]  ;;  %v8677_v17 = vor.u32 %v10336_v8, %v8676_v7  ;;  %2888 = vmatpush.bf16.msra.mxu2 %v9493_v6  ;;  %16851 = vst [vmem:[#allocation21_spill] sm:$0xff] %v12188_v53  ;;  %v9689_v60 = vor.u32 %v10582_v51, %v9686_v52  ;;  %v402_v42 = vld [vmem:[%s12164_s18 + $0x88] sm:$0xff] }
  0x53   : > { %v9444_v12 = vld [vmem:[#allocation5 + $0x660] sm:$0xf]  ;;  %v10528_v13 = vld [vmem:[#allocation5 + $0x68c] sm:$0xf0]  ;;  %v9061_v21 = vor.u32 %v10432_v11, %v9060_v9  ;;  %2937 = vmatpush.bf16.msra.mxu3 %v9877_v10  ;;  %v10678_v55 = vld [vmem:[#allocation5 + $0xb44] sm:$0xf] }
  0x54   : > { %v9828_v14 = vld [vmem:[#allocation5 + $0x960] sm:$0xf]  ;;  %v10624_v15 = vld [vmem:[#allocation5 + $0x98c] sm:$0xf0]  ;;  %v9445_v22 = vor.u32 %v10528_v13, %v9444_v12  ;;  %2791 = vmatpush.bf16.msra.mxu0 %v8677_v17  ;;  %v10070_v56 = vld [vmem:[#allocation5 + $0xb70] sm:$0xf0] }
  0x55   : > { %v8628_v16 = vld [vmem:[#allocation5] sm:$0xf]  ;;  %v10324_v18 = vld [vmem:[#allocation5 + $0x2c] sm:$0xf0]  ;;  %v9829_v26 = vor.u32 %v10624_v15, %v9828_v14  ;;  %2840 = vmatpush.bf16.msra.mxu1 %v9061_v21  ;;  %16853 = vst [vmem:[#allocation23_spill] sm:$0xff] %v12192_v57  ;;  %v10073_v63 = vor.u32 %v10678_v55, %v10070_v56  ;;  %v404_v46 = vld [vmem:[%s12164_s18 + $0x98] sm:$0xff] }
  0x56   : > { %v9012_v19 = vld [vmem:[#allocation5 + $0x300] sm:$0xf]  ;;  %v10420_v20 = vld [vmem:[#allocation5 + $0x32c] sm:$0xf0]  ;;  %v8629_v34 = vor.u32 %v10324_v18, %v8628_v16  ;;  %2889 = vmatpush.bf16.msra.mxu2 %v9445_v22  ;;  %v10390_v61 = vld [vmem:[#allocation5 + $0x244] sm:$0xf] }
  0x57   : > { %v9396_v23 = vld [vmem:[#allocation5 + $0x600] sm:$0xf]  ;;  %v10516_v24 = vld [vmem:[#allocation5 + $0x62c] sm:$0xf0]  ;;  %v9013_v38 = vor.u32 %v10420_v20, %v9012_v19  ;;  %2938 = vmatpush.bf16.msra.mxu3 %v9829_v26  ;;  %v8918_v62 = vld [vmem:[#allocation5 + $0x270] sm:$0xf0] }
  0x58   : > { %v9780_v25 = vld [vmem:[#allocation5 + $0x900] sm:$0xf]  ;;  %v10612_v27 = vld [vmem:[#allocation5 + $0x92c] sm:$0xf0]  ;;  %v9397_v39 = vor.u32 %v10516_v24, %v9396_v23  ;;  %2792 = vmatpush.bf16.msra.mxu0 %v8629_v34  ;;  %v10486_v0 = vld [vmem:[#allocation5 + $0x544] sm:$0xf]  ;;  %v8921_v2 = vor.u32 %v10390_v61, %v8918_v62 }
  0x59   : > { %v385_v28 = vld [vmem:[%s12164_s18] sm:$0xff]  ;;  %v387_v35 = vld [vmem:[%s12164_s18 + $0x10] sm:$0xff]  ;;  %v9781_v43 = vor.u32 %v10612_v27, %v9780_v25  ;;  %2841 = vmatpush.bf16.msra.mxu1 %v9013_v38  ;;  %v394_v18 = vld [vmem:[%s12164_s18 + $0x48] sm:$0xff] }
  0x5a   : > { %v389_v29 = vld [vmem:[%s12164_s18 + $0x20] sm:$0xff]  ;;  %v391_v40 = vld [vmem:[%s12164_s18 + $0x30] sm:$0xff]  ;;  %2890 = vmatpush.bf16.msra.mxu2 %v9397_v39  ;;  %v398_v19 = vld [vmem:[%s12164_s18 + $0x68] sm:$0xff] }
  0x5b   : > { %v12186_v48 = vpack.c.bf16 %v389_v29, %v385_v28  ;;  %v12190_v54 = vpack.c.bf16 %v391_v40, %v387_v35  ;;  %2939 = vmatpush.bf16.msra.mxu3 %v9781_v43  ;;  %v9302_v1 = vld [vmem:[#allocation5 + $0x570] sm:$0xf0]  ;;  %v10570_v3 = vld [vmem:[#allocation5 + $0x7e4] sm:$0xf]  ;;  %v396_v22 = vld [vmem:[%s12164_s18 + $0x58] sm:$0xff]  ;;  %v12208_v25 = vpack.c.bf16 %v398_v19, %v394_v18 }
  0x5c   : > { %2842 = vmatmul.bf16.vlgmr.msra.gmra.mxu1 %v12188_v53  ;;  %2981 = vmatpush.bf16.msrb.mxu0 %v8969_v58  ;;  %v9638_v4 = vld [vmem:[#allocation5 + $0x810] sm:$0xf0]  ;;  %v10666_v5 = vld [vmem:[#allocation5 + $0xae4] sm:$0xf]  ;;  %v9305_v6 = vor.u32 %v10486_v0, %v9302_v1  ;;  %v400_v23 = vld [vmem:[%s12164_s18 + $0x78] sm:$0xff] }
  0x5d   : > { %16850 = vst [vmem:[#allocation20_spill] sm:$0xff] %v12186_v48  ;;  %2793 = vmatmul.bf16.vlgmr.msra.gmra.mxu0 %v12186_v48  ;;  %2891 = vmatmul.bf16.vlgmr.msra.gmra.mxu2 %v12190_v54  ;;  %v9641_v7 = vor.u32 %v10570_v3, %v9638_v4  ;;  %v10022_v8 = vld [vmem:[#allocation5 + $0xb10] sm:$0xf0]  ;;  %v10378_v9 = vld [vmem:[#allocation5 + $0x1e4] sm:$0xf]  ;;  %v12212_v27 = vpack.c.bf16 %v400_v23, %v396_v22  ;;  %v406_v43 = vld [vmem:[%s12164_s18 + $0xa8] sm:$0xff] }
  0x5e   : > { %16852 = vst [vmem:[#allocation22_spill] sm:$0xff] %v12190_v54  ;;  %3079 = vmatpush.bf16.msrb.mxu2 %v9737_v44  ;;  %2940 = vmatmul.bf16.vlgmr.msra.gmra.mxu3 %v12192_v57  ;;  %v8870_v10 = vld [vmem:[#allocation5 + $0x210] sm:$0xf0]  ;;  %v10025_v11 = vor.u32 %v10666_v5, %v10022_v8  ;;  %v10474_v12 = vld [vmem:[#allocation5 + $0x4e4] sm:$0xf]  ;;  %v408_v47 = vld [vmem:[%s12164_s18 + $0xb8] sm:$0xff]  ;;  %v12228_v50 = vpack.c.bf16 %v406_v43, %v402_v42 }
  0x5f   : > { %3128 = vmatpush.bf16.msrb.mxu3 %v10121_v49  ;;  %3030 = vmatpush.bf16.msrb.mxu1 %v9353_v59  ;;  %v9254_v13 = vld [vmem:[#allocation5 + $0x510] sm:$0xf0]  ;;  %v8873_v14 = vor.u32 %v10378_v9, %v8870_v10  ;;  %v393_v16 = vld [vmem:[%s12164_s18 + $0x40] sm:$0xff]  ;;  %16855 = vst [vmem:[#allocation25_spill] sm:$0xff] %v12208_v25  ;;  %v12232_v52 = vpack.c.bf16 %v408_v47, %v404_v46  ;;  %v412_v10 = vld [vmem:[%s12164_s18 + $0xd8] sm:$0xff] }
  0x60   : > { %2982 = vmatpush.bf16.msrb.mxu0 %v8921_v2  ;;  %v9257_v15 = vor.u32 %v10474_v12, %v9254_v13  ;;  %v397_v17 = vld [vmem:[%s12164_s18 + $0x60] sm:$0xff]  ;;  %v395_v20 = vld [vmem:[%s12164_s18 + $0x50] sm:$0xff]  ;;  %16857 = vst [vmem:[#allocation27_spill] sm:$0xff] %v12212_v27 }
  0x61   : > { %v399_v21 = vld [vmem:[%s12164_s18 + $0x70] sm:$0xff]  ;;  %v12206_v24 = vpack.c.bf16 %v397_v17, %v393_v16  ;;  %v10558_v28 = vld [vmem:[#allocation5 + $0x784] sm:$0xf]  ;;  %16859 = vst [vmem:[#allocation29_spill] sm:$0xff] %v12228_v50 }
  0x62   : > { %3080 = vmatpush.bf16.msrb.mxu2 %v9689_v60  ;;  %v12210_v26 = vpack.c.bf16 %v399_v21, %v395_v20  ;;  %v9590_v29 = vld [vmem:[#allocation5 + $0x7b0] sm:$0xf0]  ;;  %v10654_v30 = vld [vmem:[#allocation5 + $0xa84] sm:$0xf]  ;;  %16861 = vst [vmem:[#allocation31_spill] sm:$0xff] %v12232_v52 }
  0x63   : > { %3129 = vmatpush.bf16.msrb.mxu3 %v10073_v63  ;;  %3031 = vmatpush.bf16.msrb.mxu1 %v9305_v6  ;;  %16854 = vst [vmem:[#allocation24_spill] sm:$0xff] %v12206_v24  ;;  %v9593_v31 = vor.u32 %v10558_v28, %v9590_v29  ;;  %v9974_v32 = vld [vmem:[#allocation5 + $0xab0] sm:$0xf0]  ;;  %v10366_v33 = vld [vmem:[#allocation5 + $0x184] sm:$0xf]  ;;  %v410_v6 = vld [vmem:[%s12164_s18 + $0xc8] sm:$0xff] }
  0x64   : > { %2983 = vmatpush.bf16.msrb.mxu0 %v8873_v14  ;;  %16856 = vst [vmem:[#allocation26_spill] sm:$0xff] %v12210_v26  ;;  %v8822_v34 = vld [vmem:[#allocation5 + $0x1b0] sm:$0xf0]  ;;  %v9977_v35 = vor.u32 %v10654_v30, %v9974_v32  ;;  %v10462_v37 = vld [vmem:[#allocation5 + $0x484] sm:$0xf] }
  0x65   : > { %v8825_v36 = vor.u32 %v10366_v33, %v8822_v34  ;;  %v9206_v38 = vld [vmem:[#allocation5 + $0x4b0] sm:$0xf0]  ;;  %v401_v40 = vld [vmem:[%s12164_s18 + $0x80] sm:$0xff]  ;;  %v418_v34 = vld [vmem:[%s12164_s18 + $0x108] sm:$0xff] }
  0x66   : > { %3081 = vmatpush.bf16.msrb.mxu2 %v9641_v7  ;;  %v9209_v39 = vor.u32 %v10462_v37, %v9206_v38  ;;  %v405_v41 = vld [vmem:[%s12164_s18 + $0xa0] sm:$0xff]  ;;  %v403_v44 = vld [vmem:[%s12164_s18 + $0x90] sm:$0xff]  ;;  %v414_v7 = vld [vmem:[%s12164_s18 + $0xe8] sm:$0xff] }
  0x67   : > { %3130 = vmatpush.bf16.msrb.mxu3 %v10025_v11  ;;  %3032 = vmatpush.bf16.msrb.mxu1 %v9257_v15  ;;  %v407_v45 = vld [vmem:[%s12164_s18 + $0xb0] sm:$0xff]  ;;  %v12226_v49 = vpack.c.bf16 %v405_v41, %v401_v40  ;;  %v10546_v55 = vld [vmem:[#allocation5 + $0x724] sm:$0xf]  ;;  %v416_v11 = vld [vmem:[%s12164_s18 + $0xf8] sm:$0xff]  ;;  %v12248_v13 = vpack.c.bf16 %v414_v7, %v410_v6 }
  0x68   : > { %2984 = vmatpush.bf16.msrb.mxu0 %v8825_v36  ;;  %v12230_v51 = vpack.c.bf16 %v407_v45, %v403_v44  ;;  %v9542_v56 = vld [vmem:[#allocation5 + $0x750] sm:$0xf0]  ;;  %v10642_v58 = vld [vmem:[#allocation5 + $0xa24] sm:$0xf]  ;;  %v12252_v15 = vpack.c.bf16 %v416_v11, %v412_v10  ;;  %v420_v38 = vld [vmem:[%s12164_s18 + $0x118] sm:$0xff] }
  0x69   : > { %16858 = vst [vmem:[#allocation28_spill] sm:$0xff] %v12226_v49  ;;  %v9545_v59 = vor.u32 %v10546_v55, %v9542_v56  ;;  %v9926_v60 = vld [vmem:[#allocation5 + $0xa50] sm:$0xf0]  ;;  %v10354_v61 = vld [vmem:[#allocation5 + $0x124] sm:$0xf]  ;;  %v428_v6 = vld [vmem:[%s12164_s18 + $0x158] sm:$0xff] }
  0x6a   : > { %3082 = vmatpush.bf16.msrb.mxu2 %v9593_v31  ;;  %16860 = vst [vmem:[#allocation30_spill] sm:$0xff] %v12230_v51  ;;  %v8774_v62 = vld [vmem:[#allocation5 + $0x150] sm:$0xf0]  ;;  %v9929_v63 = vor.u32 %v10642_v58, %v9926_v60  ;;  %v10450_v1 = vld [vmem:[#allocation5 + $0x424] sm:$0xf]  ;;  %v432_v7 = vld [vmem:[%s12164_s18 + $0x178] sm:$0xff] }
  0x6b   : > { %3131 = vmatpush.bf16.msrb.mxu3 %v9977_v35  ;;  %3033 = vmatpush.bf16.msrb.mxu1 %v9209_v39  ;;  %v8777_v0 = vor.u32 %v10354_v61, %v8774_v62  ;;  %v9158_v2 = vld [vmem:[#allocation5 + $0x450] sm:$0xf0]  ;;  %v409_v4 = vld [vmem:[%s12164_s18 + $0xc0] sm:$0xff]  ;;  %16863 = vst [vmem:[#allocation33_spill] sm:$0xff] %v12248_v13  ;;  %v422_v35 = vld [vmem:[%s12164_s18 + $0x128] sm:$0xff]  ;;  %v12292_v11 = vpack.c.bf16 %v432_v7, %v428_v6 }
  0x6c   : > { %2847 = vmatmul.bf16.gmra.mxu1 %v12208_v25  ;;  %v9161_v3 = vor.u32 %v10450_v1, %v9158_v2  ;;  %v413_v5 = vld [vmem:[%s12164_s18 + $0xe0] sm:$0xff]  ;;  %v411_v8 = vld [vmem:[%s12164_s18 + $0xd0] sm:$0xff]  ;;  %16865 = vst [vmem:[#allocation35_spill] sm:$0xff] %v12252_v15  ;;  %v424_v39 = vld [vmem:[%s12164_s18 + $0x138] sm:$0xff]  ;;  %v12268_v41 = vpack.c.bf16 %v422_v35, %v418_v34 }
  0x6d   : > { %2798 = vmatmul.bf16.gmra.mxu0 %v12206_v24  ;;  %2896 = vmatmul.bf16.gmra.mxu2 %v12210_v26  ;;  %v415_v9 = vld [vmem:[%s12164_s18 + $0xf0] sm:$0xff]  ;;  %v12246_v12 = vpack.c.bf16 %v413_v5, %v409_v4  ;;  %v10534_v16 = vld [vmem:[#allocation5 + $0x6c4] sm:$0xf]  ;;  %v12272_v43 = vpack.c.bf16 %v424_v39, %v420_v38  ;;  %v426_v2 = vld [vmem:[%s12164_s18 + $0x148] sm:$0xff]  ;;  %16873 = vst [vmem:[#allocation43_spill] sm:$0xff] %v12292_v11 }
  0x6e   : > { %2945 = vmatmul.bf16.gmra.mxu3 %v12212_v27  ;;  %3083 = vmatpush.bf16.msrb.mxu2 %v9545_v59  ;;  %v12250_v14 = vpack.c.bf16 %v415_v9, %v411_v8  ;;  %v9494_v17 = vld [vmem:[#allocation5 + $0x6f0] sm:$0xf0]  ;;  %v10630_v18 = vld [vmem:[#allocation5 + $0x9c4] sm:$0xf]  ;;  %16867 = vst [vmem:[#allocation37_spill] sm:$0xff] %v12268_v41  ;;  %v434_v34 = vld [vmem:[%s12164_s18 + $0x188] sm:$0xff] }
  0x6f   : > { %3132 = vmatpush.bf16.msrb.mxu3 %v9929_v63  ;;  %2985 = vmatpush.bf16.msrb.mxu0 %v8777_v0  ;;  %16862 = vst [vmem:[#allocation32_spill] sm:$0xff] %v12246_v12  ;;  %v9497_v19 = vor.u32 %v10534_v16, %v9494_v17  ;;  %v9878_v20 = vld [vmem:[#allocation5 + $0x9f0] sm:$0xf0]  ;;  %v10342_v21 = vld [vmem:[#allocation5 + $0xc4] sm:$0xf]  ;;  %v438_v35 = vld [vmem:[%s12164_s18 + $0x1a8] sm:$0xff] }
  0x70   : > { %3034 = vmatpush.bf16.msrb.mxu1 %v9161_v3  ;;  %16864 = vst [vmem:[#allocation34_spill] sm:$0xff] %v12250_v14  ;;  %v8726_v22 = vld [vmem:[#allocation5 + $0xf0] sm:$0xf0]  ;;  %v9881_v23 = vor.u32 %v10630_v18, %v9878_v20  ;;  %v10438_v29 = vld [vmem:[#allocation5 + $0x3c4] sm:$0xf]  ;;  %v430_v3 = vld [vmem:[%s12164_s18 + $0x168] sm:$0xff] }
  0x71   : > { %v8729_v28 = vor.u32 %v10342_v21, %v8726_v22  ;;  %v9110_v30 = vld [vmem:[#allocation5 + $0x3f0] sm:$0xf0]  ;;  %v417_v32 = vld [vmem:[%s12164_s18 + $0x100] sm:$0xff]  ;;  %16869 = vst [vmem:[#allocation39_spill] sm:$0xff] %v12272_v43  ;;  %v12288_v9 = vpack.c.bf16 %v430_v3, %v426_v2  ;;  %v436_v38 = vld [vmem:[%s12164_s18 + $0x198] sm:$0xff] }
  0x72   : > { %3084 = vmatpush.bf16.msrb.mxu2 %v9497_v19  ;;  %v9113_v31 = vor.u32 %v10438_v29, %v9110_v30  ;;  %v421_v33 = vld [vmem:[%s12164_s18 + $0x120] sm:$0xff]  ;;  %v419_v36 = vld [vmem:[%s12164_s18 + $0x110] sm:$0xff]  ;;  %v440_v39 = vld [vmem:[%s12164_s18 + $0x1b8] sm:$0xff] }
  0x73   : > { %3133 = vmatpush.bf16.msrb.mxu3 %v9881_v23  ;;  %2986 = vmatpush.bf16.msrb.mxu0 %v8729_v28  ;;  %v423_v37 = vld [vmem:[%s12164_s18 + $0x130] sm:$0xff]  ;;  %v12266_v40 = vpack.c.bf16 %v421_v33, %v417_v32  ;;  %v10522_v44 = vld [vmem:[#allocation5 + $0x664] sm:$0xf]  ;;  %16871 = vst [vmem:[#allocation41_spill] sm:$0xff] %v12288_v9 }
  0x74   : > { %3035 = vmatpush.bf16.msrb.mxu1 %v9113_v31  ;;  %v12270_v42 = vpack.c.bf16 %v423_v37, %v419_v36  ;;  %v9446_v45 = vld [vmem:[#allocation5 + $0x690] sm:$0xf0]  ;;  %v10618_v46 = vld [vmem:[#allocation5 + $0x964] sm:$0xf] }
  0x75   : > { %16866 = vst [vmem:[#allocation36_spill] sm:$0xff] %v12266_v40  ;;  %v9449_v47 = vor.u32 %v10522_v44, %v9446_v45  ;;  %v9830_v55 = vld [vmem:[#allocation5 + $0x990] sm:$0xf0]  ;;  %v10330_v56 = vld [vmem:[#allocation5 + $0x64] sm:$0xf]  ;;  %v12308_v45 = vpack.c.bf16 %v438_v35, %v434_v34 }
  0x76   : > { %16868 = vst [vmem:[#allocation38_spill] sm:$0xff] %v12270_v42  ;;  %v8678_v58 = vld [vmem:[#allocation5 + $0x90] sm:$0xf0]  ;;  %v9833_v59 = vor.u32 %v10618_v46, %v9830_v55  ;;  %v10426_v61 = vld [vmem:[#allocation5 + $0x364] sm:$0xf] }
  0x77   : > { %v8681_v60 = vor.u32 %v10330_v56, %v8678_v58  ;;  %v9062_v62 = vld [vmem:[#allocation5 + $0x390] sm:$0xf0]  ;;  %3085 = vmatpush.bf16.msrb.mxu2 %v9449_v47  ;;  %v425_v0 = vld [vmem:[%s12164_s18 + $0x140] sm:$0xff]  ;;  %16875 = vst [vmem:[#allocation45_spill] sm:$0xff] %v12308_v45  ;;  %v12312_v47 = vpack.c.bf16 %v440_v39, %v436_v38  ;;  %v442_v58 = vld [vmem:[%s12164_s18 + $0x1c8] sm:$0xff] }
  0x78   : > { %v9065_v63 = vor.u32 %v10426_v61, %v9062_v62  ;;  %3134 = vmatpush.bf16.msrb.mxu3 %v9833_v59  ;;  %v429_v1 = vld [vmem:[%s12164_s18 + $0x160] sm:$0xff]  ;;  %v427_v4 = vld [vmem:[%s12164_s18 + $0x150] sm:$0xff]  ;;  %v446_v59 = vld [vmem:[%s12164_s18 + $0x1e8] sm:$0xff] }
  0x79   : > { %2987 = vmatpush.bf16.msrb.mxu0 %v8681_v60  ;;  %v431_v5 = vld [vmem:[%s12164_s18 + $0x170] sm:$0xff]  ;;  %v12286_v8 = vpack.c.bf16 %v429_v1, %v425_v0  ;;  %v10510_v16 = vld [vmem:[#allocation5 + $0x604] sm:$0xf]  ;;  %16877 = vst [vmem:[#allocation47_spill] sm:$0xff] %v12312_v47  ;;  %v444_v62 = vld [vmem:[%s12164_s18 + $0x1d8] sm:$0xff]  ;;  %v12328_v1 = vpack.c.bf16 %v446_v59, %v442_v58 }
  0x7a   : > { %3036 = vmatpush.bf16.msrb.mxu1 %v9065_v63  ;;  %v12290_v10 = vpack.c.bf16 %v431_v5, %v427_v4  ;;  %v9398_v17 = vld [vmem:[#allocation5 + $0x630] sm:$0xf0]  ;;  %v10606_v18 = vld [vmem:[#allocation5 + $0x904] sm:$0xf]  ;;  %v448_v63 = vld [vmem:[%s12164_s18 + $0x1f8] sm:$0xff] }
  0x7b   : > { %16870 = vst [vmem:[#allocation40_spill] sm:$0xff] %v12286_v8  ;;  %v9401_v19 = vor.u32 %v10510_v16, %v9398_v17  ;;  %v9782_v20 = vld [vmem:[#allocation5 + $0x930] sm:$0xf0]  ;;  %v10318_v21 = vld [vmem:[#allocation5 + $0x4] sm:$0xf]  ;;  %v12332_v3 = vpack.c.bf16 %v448_v63, %v444_v62 }
  0x7c   : > { %2852 = vmatmul.bf16.gmra.mxu1 %v12228_v50  ;;  %16872 = vst [vmem:[#allocation42_spill] sm:$0xff] %v12290_v10  ;;  %v8630_v22 = vld [vmem:[#allocation5 + $0x30] sm:$0xf0]  ;;  %v9785_v23 = vor.u32 %v10606_v18, %v9782_v20  ;;  %v10414_v29 = vld [vmem:[#allocation5 + $0x304] sm:$0xf] }
  0x7d   : > { %2803 = vmatmul.bf16.gmra.mxu0 %v12226_v49  ;;  %2901 = vmatmul.bf16.gmra.mxu2 %v12230_v51  ;;  %v8633_v28 = vor.u32 %v10318_v21, %v8630_v22  ;;  %v9014_v30 = vld [vmem:[#allocation5 + $0x330] sm:$0xf0]  ;;  %v433_v32 = vld [vmem:[%s12164_s18 + $0x180] sm:$0xff]  ;;  %16879 = vst [vmem:[#allocation49_spill] sm:$0xff] %v12328_v1 }
  0x7e   : > { %2950 = vmatmul.bf16.gmra.mxu3 %v12232_v52  ;;  %3086 = vmatpush.bf16.msrb.mxu2 %v9401_v19  ;;  %v9017_v31 = vor.u32 %v10414_v29, %v9014_v30  ;;  %v437_v33 = vld [vmem:[%s12164_s18 + $0x1a0] sm:$0xff]  ;;  %v435_v36 = vld [vmem:[%s12164_s18 + $0x190] sm:$0xff]  ;;  %16881 = vst [vmem:[#allocation51_spill] sm:$0xff] %v12332_v3 }
  0x7f   : > { %3135 = vmatpush.bf16.msrb.mxu3 %v9785_v23  ;;  %2988 = vmatpush.bf16.msrb.mxu0 %v8633_v28  ;;  %v439_v37 = vld [vmem:[%s12164_s18 + $0x1b0] sm:$0xff]  ;;  %v12306_v44 = vpack.c.bf16 %v437_v33, %v433_v32  ;;  %v441_v55 = vld [vmem:[%s12164_s18 + $0x1c0] sm:$0xff] }
  0x80   : > { %3037 = vmatpush.bf16.msrb.mxu1 %v9017_v31  ;;  %v12310_v46 = vpack.c.bf16 %v439_v37, %v435_v36  ;;  %v445_v56 = vld [vmem:[%s12164_s18 + $0x1e0] sm:$0xff]  ;;  %v443_v60 = vld [vmem:[%s12164_s18 + $0x1d0] sm:$0xff] }
  0x81   : > { %16874 = vst [vmem:[#allocation44_spill] sm:$0xff] %v12306_v44  ;;  %v447_v61 = vld [vmem:[%s12164_s18 + $0x1f0] sm:$0xff]  ;;  %v12326_v0 = vpack.c.bf16 %v445_v56, %v441_v55  ;;  %s11866_s18 = scalar_lea.hbm %s16551_s4, 512 }
  0x82   : > { %16876 = vst [vmem:[#allocation46_spill] sm:$0xff] %v12310_v46  ;;  %v12330_v2 = vpack.c.bf16 %v447_v61, %v443_v60  ;;  %p11868_p12 = scmp.lt.s32.totalorder %s11866_s18, %s11862_s15 }
  0x83   : > { %16878 = vst [vmem:[#allocation48_spill] sm:$0xff] %v12326_v0 }
  0x84   : > { %16880 = vst [vmem:[#allocation50_spill] sm:$0xff] %v12330_v2  ;;  %p11869_p13 = por %p11868_p12, %p11867_p10 }
  0x86   : > { %p11870_p0 = pnand %p11869_p13, %p11865_p8 }
  0x8c   : > { %2857 = vmatmul.bf16.gmra.mxu1 %v12248_v13 }
  0x8d   : > { %2808 = vmatmul.bf16.gmra.mxu0 %v12246_v12  ;;  %2906 = vmatmul.bf16.gmra.mxu2 %v12250_v14 }
  0x8e   : > { %2955 = vmatmul.bf16.gmra.mxu3 %v12252_v15 }
  0x9c   : > { %2862 = vmatmul.bf16.gmra.mxu1 %v12268_v41 }
  0x9d   : > { %2813 = vmatmul.bf16.gmra.mxu0 %v12266_v40  ;;  %2911 = vmatmul.bf16.gmra.mxu2 %v12270_v42 }
  0x9e   : > { %2960 = vmatmul.bf16.gmra.mxu3 %v12272_v43 }
  0xac   : > { %2867 = vmatmul.bf16.gmra.mxu1 %v12288_v9 }
  0xad   : > { %2818 = vmatmul.bf16.gmra.mxu0 %v12286_v8  ;;  %2916 = vmatmul.bf16.gmra.mxu2 %v12290_v10 }
  0xae   : > { %2965 = vmatmul.bf16.gmra.mxu3 %v12292_v11 }
  0xbc   : > { %2872 = vmatmul.bf16.gmra.mxu1 %v12308_v45 }
  0xbd   : > { %2823 = vmatmul.bf16.gmra.mxu0 %v12306_v44  ;;  %2921 = vmatmul.bf16.gmra.mxu2 %v12310_v46 }
  0xbe   : > { %2970 = vmatmul.bf16.gmra.mxu3 %v12312_v47 }
  0xcc   : > { %2877 = vmatmul.bf16.gmra.mxu1 %v12328_v1 }
  0xcd   : > { %2828 = vmatmul.bf16.gmra.mxu0 %v12326_v0  ;;  %2926 = vmatmul.bf16.gmra.mxu2 %v12330_v2 }
  0xce   : > { %2975 = vmatmul.bf16.gmra.mxu3 %v12332_v3 }
  0xd9   : > { %v2843_v5 = vpop.f32.mrf.mxu1 }
  0xda   : > { %v2794_v4 = vpop.f32.mrf.mxu0 }
  0xdb   : > { %v2844_v6 = vadd.f32 %v2843_v5, %v2794_v4 }
  0xdc   : > { %3038 = vmatmul.bf16.vlgmr.msrb.gmra.mxu1 %v12188_v53 }
  0xdd   : > { %2989 = vmatmul.bf16.vlgmr.msrb.gmra.mxu0 %v12186_v48  ;;  %3087 = vmatmul.bf16.vlgmr.msrb.gmra.mxu2 %v12190_v54 }
  0xde   : > { %3136 = vmatmul.bf16.vlgmr.msrb.gmra.mxu3 %v12192_v57 }
  0xe0   : > { %v2892_v7 = vpop.f32.mrf.mxu2 }
  0xe1   : > { %v2893_v16 = vadd.f32 %v2892_v7, %v2844_v6  ;;  %v2941_v17 = vpop.f32.mrf.mxu3  ;;  %v2845_v19 = vpop.f32.mrf.mxu1 }
  0xe2   : > { %v2796_v18 = vpop.f32.mrf.mxu0 }
  0xe3   : > { %v12342_v20 = vadd.f32 %v2941_v17, %v2893_v16  ;;  %v2846_v22 = vadd.f32 %v2845_v19, %v2796_v18 }
  0xe5   : > { %v5201_v21 = vmul.f32 %v12342_v20, %v12342_v20 }
  0xe7   : > { %5217 = vadd.xlane.f32.xlu0 %v5201_v21 }
  0xe8   : > { %v2894_v23 = vpop.f32.mrf.mxu2 }
  0xe9   : > { %v2895_v28 = vadd.f32 %v2894_v23, %v2846_v22  ;;  %v2943_v29 = vpop.f32.mrf.mxu3  ;;  %v2848_v31 = vpop.f32.mrf.mxu1 }
  0xea   : > { %v2799_v30 = vpop.f32.mrf.mxu0 }
  0xeb   : > { %v12346_v32 = vadd.f32 %v2943_v29, %v2895_v28  ;;  %v2849_v33 = vadd.f32 %v2848_v31, %v2799_v30 }
  0xec   : > { %3043 = vmatmul.bf16.gmra.mxu1 %v12208_v25 }
  0xed   : > { %2994 = vmatmul.bf16.gmra.mxu0 %v12206_v24  ;;  %3092 = vmatmul.bf16.gmra.mxu2 %v12210_v26  ;;  %v5202_v34 = vmul.f32 %v12346_v32, %v12346_v32 }
  0xee   : > { %3141 = vmatmul.bf16.gmra.mxu3 %v12212_v27 }
  0xef   : > { %5219 = vadd.xlane.f32.xlu0 %v5202_v34 }
  0xf0   : > { %v2897_v35 = vpop.f32.mrf.mxu2 }
  0xf1   : > { %v2898_v36 = vadd.f32 %v2897_v35, %v2849_v33  ;;  %v2946_v37 = vpop.f32.mrf.mxu3  ;;  %v2850_v39 = vpop.f32.mrf.mxu1 }
  0xf2   : > { %v2801_v38 = vpop.f32.mrf.mxu0 }
  0xf3   : > { %v12354_v55 = vadd.f32 %v2946_v37, %v2898_v36  ;;  %v2851_v58 = vadd.f32 %v2850_v39, %v2801_v38 }
  0xf5   : > { %v5203_v56 = vmul.f32 %v12354_v55, %v12354_v55 }
  0xf7   : > { %5221 = vadd.xlane.f32.xlu1 %v5203_v56 }
  0xf8   : > { %v2899_v59 = vpop.f32.mrf.mxu2 }
  0xf9   : > { %v2900_v60 = vadd.f32 %v2899_v59, %v2851_v58  ;;  %v2948_v61 = vpop.f32.mrf.mxu3  ;;  %v2853_v63 = vpop.f32.mrf.mxu1 }
  0xfa   : > { %v2804_v62 = vpop.f32.mrf.mxu0 }
  0xfb   : > { %v12358_v4 = vadd.f32 %v2948_v61, %v2900_v60  ;;  %v2854_v5 = vadd.f32 %v2853_v63, %v2804_v62 }
  0xfc   : > { %3048 = vmatmul.bf16.gmra.mxu1 %v12228_v50 }
  0xfd   : > { %2999 = vmatmul.bf16.gmra.mxu0 %v12226_v49  ;;  %v5204_v6 = vmul.f32 %v12358_v4, %v12358_v4  ;;  %3097 = vmatmul.bf16.gmra.mxu2 %v12230_v51 }
  0xfe   : > { %3146 = vmatmul.bf16.gmra.mxu3 %v12232_v52 }
  0xff   : > { %5223 = vadd.xlane.f32.xlu1 %v5204_v6 }
 0x100   : > { %v2902_v7 = vpop.f32.mrf.mxu2 }
 0x101   : > { %v2903_v16 = vadd.f32 %v2902_v7, %v2854_v5  ;;  %v2951_v17 = vpop.f32.mrf.mxu3  ;;  %v2855_v19 = vpop.f32.mrf.mxu1 }
 0x102   : > { %v2806_v18 = vpop.f32.mrf.mxu0 }
 0x103   : > { %v12366_v21 = vadd.f32 %v2951_v17, %v2903_v16  ;;  %v2856_v23 = vadd.f32 %v2855_v19, %v2806_v18 }
 0x105   : > { %v5205_v22 = vmul.f32 %v12366_v21, %v12366_v21 }
 0x107   : > { %5225 = vadd.xlane.f32.xlu2 %v5205_v22 }
 0x108   : > { %v2904_v28 = vpop.f32.mrf.mxu2 }
 0x109   : > { %v2905_v29 = vadd.f32 %v2904_v28, %v2856_v23  ;;  %v2953_v30 = vpop.f32.mrf.mxu3  ;;  %v2858_v33 = vpop.f32.mrf.mxu1 }
 0x10a   : > { %v2809_v31 = vpop.f32.mrf.mxu0 }
 0x10b   : > { %v12370_v34 = vadd.f32 %v2953_v30, %v2905_v29  ;;  %v2859_v35 = vadd.f32 %v2858_v33, %v2809_v31 }
 0x10c   : > { %3053 = vmatmul.bf16.gmra.mxu1 %v12248_v13 }
 0x10d   : > { %3004 = vmatmul.bf16.gmra.mxu0 %v12246_v12  ;;  %v5206_v36 = vmul.f32 %v12370_v34, %v12370_v34  ;;  %3102 = vmatmul.bf16.gmra.mxu2 %v12250_v14 }
 0x10e   : > { %3151 = vmatmul.bf16.gmra.mxu3 %v12252_v15 }
 0x10f   : > { %5227 = vadd.xlane.f32.xlu2 %v5206_v36 }
 0x110   : > { %v2907_v37 = vpop.f32.mrf.mxu2 }
 0x111   : > { %v2908_v38 = vadd.f32 %v2907_v37, %v2859_v35  ;;  %v2956_v39 = vpop.f32.mrf.mxu3  ;;  %v2860_v58 = vpop.f32.mrf.mxu1 }
 0x112   : > { %v2811_v56 = vpop.f32.mrf.mxu0 }
 0x113   : > { %v12378_v59 = vadd.f32 %v2956_v39, %v2908_v38  ;;  %v2861_v61 = vadd.f32 %v2860_v58, %v2811_v56 }
 0x115   : > { %v5207_v60 = vmul.f32 %v12378_v59, %v12378_v59 }
 0x117   : > { %5229 = vadd.xlane.f32.xlu0 %v5207_v60 }
 0x118   : > { %v2909_v62 = vpop.f32.mrf.mxu2 }
 0x119   : > { %v2910_v63 = vadd.f32 %v2909_v62, %v2861_v61  ;;  %v2958_v5 = vpop.f32.mrf.mxu3  ;;  %v2863_v7 = vpop.f32.mrf.mxu1 }
 0x11a   : > { %v2814_v6 = vpop.f32.mrf.mxu0 }
 0x11b   : > { %v12382_v16 = vadd.f32 %v2958_v5, %v2910_v63  ;;  %v2864_v17 = vadd.f32 %v2863_v7, %v2814_v6 }
 0x11c   : > { %3058 = vmatmul.bf16.gmra.mxu1 %v12268_v41 }
 0x11d   : > { %3009 = vmatmul.bf16.gmra.mxu0 %v12266_v40  ;;  %v5208_v18 = vmul.f32 %v12382_v16, %v12382_v16  ;;  %3107 = vmatmul.bf16.gmra.mxu2 %v12270_v42 }
 0x11e   : > { %3156 = vmatmul.bf16.gmra.mxu3 %v12272_v43 }
 0x11f   : > { %5231 = vadd.xlane.f32.xlu1 %v5208_v18 }
 0x120   : > { %v2912_v19 = vpop.f32.mrf.mxu2 }
 0x121   : > { %v2913_v22 = vadd.f32 %v2912_v19, %v2864_v17  ;;  %v2961_v23 = vpop.f32.mrf.mxu3  ;;  %v2865_v29 = vpop.f32.mrf.mxu1 }
 0x122   : > { %v2816_v28 = vpop.f32.mrf.mxu0 }
 0x123   : > { %v12390_v30 = vadd.f32 %v2961_v23, %v2913_v22  ;;  %v2866_v33 = vadd.f32 %v2865_v29, %v2816_v28 }
 0x125   : > { %16882 = vst [vmem:[#allocation52_spill] sm:$0xff] %v12390_v30  ;;  %v5209_v31 = vmul.f32 %v12390_v30, %v12390_v30 }
 0x127   : > { %5233 = vadd.xlane.f32.xlu2 %v5209_v31 }
 0x128   : > { %v2914_v35 = vpop.f32.mrf.mxu2 }
 0x129   : > { %v2915_v36 = vadd.f32 %v2914_v35, %v2866_v33  ;;  %v2963_v37 = vpop.f32.mrf.mxu3  ;;  %v2868_v39 = vpop.f32.mrf.mxu1 }
 0x12a   : > { %v2819_v38 = vpop.f32.mrf.mxu0 }
 0x12b   : > { %v12394_v56 = vadd.f32 %v2963_v37, %v2915_v36  ;;  %v2869_v58 = vadd.f32 %v2868_v39, %v2819_v38  ;;  %v12007_v36 = vmov 128.0  }
 0x12c   : > { %3063 = vmatmul.bf16.gmra.mxu1 %v12288_v9  ;;  %11468 = vrcp.f32 %v12007_v36  ;;  %v10457_v9 = vld [vmem:[#allocation5 + $0x454] sm:$0xf0] }
 0x12d   : > { %3014 = vmatmul.bf16.gmra.mxu0 %v12286_v8  ;;  %v5210_v60 = vmul.f32 %v12394_v56, %v12394_v56  ;;  %3112 = vmatmul.bf16.gmra.mxu2 %v12290_v10 }
 0x12e   : > { %3161 = vmatmul.bf16.gmra.mxu3 %v12292_v11 }
 0x12f   : > { %5235 = vadd.xlane.f32.xlu0 %v5210_v60 }
 0x130   : > { %v2917_v61 = vpop.f32.mrf.mxu2 }
 0x131   : > { %v2918_v62 = vadd.f32 %v2917_v61, %v2869_v58  ;;  %v2966_v63 = vpop.f32.mrf.mxu3  ;;  %v2870_v6 = vpop.f32.mrf.mxu1 }
 0x132   : > { %v2821_v5 = vpop.f32.mrf.mxu0 }
 0x133   : > { %v12402_v7 = vadd.f32 %v2966_v63, %v2918_v62  ;;  %v2871_v18 = vadd.f32 %v2870_v6, %v2821_v5  ;;  %v11469_v62 = vpop.eup %11468 }
 0x134   : > { %vm5254_vm0 = vweird.f32 %v11469_v62 }
 0x135   : > { %16883 = vst [vmem:[#allocation53_spill] sm:$0xff] %v12402_v7  ;;  %v5211_v17 = vmul.f32 %v12402_v7, %v12402_v7  ;;  %v9980_v7 = vld [vmem:[#allocation5 + $0xa88] sm:$0xf] }
 0x137   : > { %5237 = vadd.xlane.f32.xlu1 %v5211_v17  ;;  %v5250_v17 = vmul.f32 128.0, %v11469_v62 }
 0x138   : > { %v2919_v19 = vpop.f32.mrf.mxu2 }
 0x139   : > { %v2920_v22 = vadd.f32 %v2919_v19, %v2871_v18  ;;  %v2968_v23 = vpop.f32.mrf.mxu3  ;;  %v2873_v29 = vpop.f32.mrf.mxu1 }
 0x13a   : > { %v2824_v28 = vpop.f32.mrf.mxu0 }
 0x13b   : > { %v12406_v31 = vadd.f32 %v2968_v23, %v2920_v22  ;;  %v2874_v33 = vadd.f32 %v2873_v29, %v2824_v28  ;;  %v5251_v29 = vsub.f32 1.0, %v5250_v17 }
 0x13c   : > { %3068 = vmatmul.bf16.gmra.mxu1 %v12308_v45 }
 0x13d   : > { %16884 = vst [vmem:[#allocation54_spill] sm:$0xff] %v12406_v31  ;;  %3019 = vmatmul.bf16.gmra.mxu0 %v12306_v44  ;;  %v5212_v35 = vmul.f32 %v12406_v31, %v12406_v31  ;;  %3117 = vmatmul.bf16.gmra.mxu2 %v12310_v46  ;;  %v9212_v44 = vld [vmem:[#allocation5 + $0x488] sm:$0xf] }
 0x13e   : > { %3166 = vmatmul.bf16.gmra.mxu3 %v12312_v47 }
 0x13f   : > { %5239 = vadd.xlane.f32.xlu2 %v5212_v35 }
 0x140   : > { %v2922_v37 = vpop.f32.mrf.mxu2 }
 0x141   : > { %v2923_v38 = vadd.f32 %v2922_v37, %v2874_v33  ;;  %v2971_v39 = vpop.f32.mrf.mxu3  ;;  %v2875_v60 = vpop.f32.mrf.mxu1  ;;  %v5252_v37 = vmul.f32 %v11469_v62, %v5251_v29 }
 0x142   : > { %v2826_v58 = vpop.f32.mrf.mxu0 }
 0x143   : > { %v12414_v61 = vadd.f32 %v2971_v39, %v2923_v38  ;;  %v2876_v5 = vadd.f32 %v2875_v60, %v2826_v58 }
 0x145   : > { %16885 = vst [vmem:[#allocation55_spill] sm:$0xff] %v12414_v61  ;;  %v5213_v63 = vmul.f32 %v12414_v61, %v12414_v61 }
 0x147   : > { %5241 = vadd.xlane.f32.xlu0 %v5213_v63 }
 0x148   : > { %v2924_v6 = vpop.f32.mrf.mxu2 }
 0x149   : > { %v2925_v18 = vadd.f32 %v2924_v6, %v2876_v5  ;;  %v2973_v19 = vpop.f32.mrf.mxu3  ;;  %v2878_v23 = vpop.f32.mrf.mxu1  ;;  %v5253_v5 = vadd.f32 %v11469_v62, %v5252_v37 }
 0x14a   : > { %v2829_v22 = vpop.f32.mrf.mxu0 }
 0x14b   : > { %v12418_v28 = vadd.f32 %v2973_v19, %v2925_v18  ;;  %v2879_v33 = vadd.f32 %v2878_v23, %v2829_v22  ;;  %v12430_v19 = vsel %vm5254_vm0, %v11469_v62, %v5253_v5 }
 0x14c   : > { %3073 = vmatmul.bf16.gmra.mxu1 %v12328_v1 }
 0x14d   : > { %16886 = vst [vmem:[#allocation56_spill] sm:$0xff] %v12418_v28  ;;  %3024 = vmatmul.bf16.gmra.mxu0 %v12326_v0  ;;  %v5214_v35 = vmul.f32 %v12418_v28, %v12418_v28  ;;  %3122 = vmatmul.bf16.gmra.mxu2 %v12330_v2 }
 0x14e   : > { %3171 = vmatmul.bf16.gmra.mxu3 %v12332_v3  ;;  %v9356_v3 = vld [vmem:[#allocation5 + $0x5a8] sm:$0xf] }
 0x14f   : > { %5243 = vadd.xlane.f32.xlu1 %v5214_v35 }
 0x150   : > { %v2927_v36 = vpop.f32.mrf.mxu2 }
 0x151   : > { %v2928_v38 = vadd.f32 %v2927_v36, %v2879_v33  ;;  %v2976_v39 = vpop.f32.mrf.mxu3  ;;  %v2880_v60 = vpop.f32.mrf.mxu1 }
 0x152   : > { %v2831_v58 = vpop.f32.mrf.mxu0 }
 0x153   : > { %v12426_v63 = vadd.f32 %v2976_v39, %v2928_v38  ;;  %v2881_v17 = vadd.f32 %v2880_v60, %v2831_v58 }
 0x155   : > { %16887 = vst [vmem:[#allocation57_spill] sm:$0xff] %v12426_v63  ;;  %v5215_v6 = vmul.f32 %v12426_v63, %v12426_v63 }
 0x157   : > { %5245 = vadd.xlane.f32.xlu2 %v5215_v6 }
 0x158   : > { %v2929_v18 = vpop.f32.mrf.mxu2 }
 0x159   : > { %v2930_v22 = vadd.f32 %v2929_v18, %v2881_v17  ;;  %v2978_v23 = vpop.f32.mrf.mxu3  ;;  %v3039_v29 = vpop.f32.mrf.mxu1 }
 0x15a   : > { %v2990_v35 = vpop.f32.mrf.mxu0  ;;  %v5218_v33 = vpop.xlane.xlu0 %5217 }
 0x15b   : > { %v12432_v36 = vadd.f32 %v2978_v23, %v2930_v22  ;;  %v5256_v38 = vmul.f32 %v12430_v19, %v5218_v33  ;;  %v3040_v37 = vadd.f32 %v3039_v29, %v2990_v35  ;;  %v9740_v23 = vld [vmem:[#allocation5 + $0x8a8] sm:$0xf]  ;;  %v10601_v33 = vld [vmem:[#allocation5 + $0x8d4] sm:$0xf0] }
 0x15d   : > { %16888 = vst [vmem:[#allocation58_spill] sm:$0xff] %v12432_v36  ;;  %v12435_v39 = vadd.f32 1.1920929e-07, %v5256_v38  ;;  %v5216_v63 = vmul.f32 %v12432_v36, %v12432_v36 }
 0x15f   : > { %11470 = vrsqrt.f32 %v12435_v39  ;;  %5247 = vadd.xlane.f32.xlu0 %v5216_v63  ;;  %v9741_v63 = vor.u32 %v10601_v33, %v9740_v23  ;;  %v10124_v33 = vld [vmem:[#allocation5 + $0xba8] sm:$0xf]  ;;  %vm5294_vm2 = vweird.f32 %v12435_v39 }
 0x160   : > { %v3088_v62 = vpop.f32.mrf.mxu2 }
 0x161   : > { %v3089_v58 = vadd.f32 %v3088_v62, %v3040_v37  ;;  %v3137_v60 = vpop.f32.mrf.mxu3  ;;  %v3041_v6 = vpop.f32.mrf.mxu1  ;;  %3275 = vmatpush.bf16.msra.mxu2 %v9741_v63  ;;  %v8972_v63 = vld [vmem:[#allocation5 + $0x2a8] sm:$0xf] }
 0x162   : > { %v2992_v5 = vpop.f32.mrf.mxu0  ;;  %v5220_v17 = vpop.xlane.xlu0 %5219 }
 0x163   : > { %v12440_v18 = vadd.f32 %v3137_v60, %v3089_v58  ;;  %v5257_v22 = vmul.f32 %v12430_v19, %v5220_v17  ;;  %v3042_v62 = vadd.f32 %v3041_v6, %v2992_v5 }
 0x165   : > { %16889 = vst [vmem:[#allocation59_spill] sm:$0xff] %v12440_v18  ;;  %v12443_v38 = vpop.eup %11470  ;;  %v12445_v35 = vadd.f32 1.1920929e-07, %v5257_v22  ;;  %v5992_v29 = vmul.f32 %v12440_v18, %v12440_v18  ;;  %v10697_v18 = vld [vmem:[#allocation5 + $0xbd4] sm:$0xf0] }
 0x166   : > { %v5289_v37 = vmul.f32 %v12443_v38, %v12435_v39  ;;  %vm5295_vm1 = vweird.f32 %v12443_v38 }
 0x167   : > { %6008 = vadd.xlane.f32.xlu2 %v5992_v29  ;;  %11472 = vrsqrt.f32 %v12445_v35  ;;  %v10125_v29 = vor.u32 %v10697_v18, %v10124_v33  ;;  %v10589_v33 = vld [vmem:[#allocation5 + $0x874] sm:$0xf0]  ;;  %vm5296_vm3 = vmor %vm5294_vm2, %vm5295_vm1  ;;  %vm5304_vm8 = vweird.f32 %v12445_v35 }
 0x168   : > { %v3090_v58 = vpop.f32.mrf.mxu2  ;;  %v5290_v31 = vmul.f32 %v12443_v38, %v5289_v37  ;;  %v10505_v37 = vld [vmem:[#allocation5 + $0x5d4] sm:$0xf0] }
 0x169   : > { %v3091_v60 = vadd.f32 %v3090_v58, %v3042_v62  ;;  %v3139_v17 = vpop.f32.mrf.mxu3  ;;  %v3044_v36 = vpop.f32.mrf.mxu1  ;;  %v10409_v62 = vld [vmem:[#allocation5 + $0x2d4] sm:$0xf0]  ;;  %3324 = vmatpush.bf16.msra.mxu3 %v10125_v29 }
 0x16a   : > { %v2995_v28 = vpop.f32.mrf.mxu0  ;;  %v5222_v22 = vpop.xlane.xlu1 %5221  ;;  %v5291_v58 = vmul.f32 0.5, %v5290_v31  ;;  %v8973_v0 = vor.u32 %v10409_v62, %v8972_v63  ;;  %v9692_v31 = vld [vmem:[#allocation5 + $0x848] sm:$0xf] }
 0x16b   : > { %v12453_v61 = vadd.f32 %v3139_v17, %v3091_v60  ;;  %v5258_v23 = vmul.f32 %v12430_v19, %v5222_v22  ;;  %v3045_v5 = vadd.f32 %v3044_v36, %v2995_v28  ;;  %v9357_v60 = vor.u32 %v10505_v37, %v9356_v3 }
 0x16c   : > { %3177 = vmatpush.bf16.msra.mxu0 %v8973_v0  ;;  %v5292_v36 = vsub.f32 1.5, %v5291_v58 }
 0x16d   : > { %16890 = vst [vmem:[#allocation60_spill] sm:$0xff] %v12453_v61  ;;  %v5274_v1 = vadd.f32 1.1920929e-07, %v5258_v23  ;;  %v5993_v6 = vmul.f32 %v12453_v61, %v12453_v61  ;;  %v12458_v2 = vpop.eup %11472  ;;  %3226 = vmatpush.bf16.msra.mxu1 %v9357_v60 }
 0x16e   : > { %v5299_v18 = vmul.f32 %v12458_v2, %v12445_v35  ;;  %v5293_v0 = vmul.f32 %v12443_v38, %v5292_v36  ;;  %v8924_v36 = vld [vmem:[#allocation5 + $0x248] sm:$0xf]  ;;  %vm5305_vm7 = vweird.f32 %v12458_v2 }
 0x16f   : > { %11474 = vrsqrt.f32 %v5274_v1  ;;  %6010 = vadd.xlane.f32.xlu1 %v5993_v6  ;;  %v9693_v6 = vor.u32 %v10589_v33, %v9692_v31  ;;  %v10397_v33 = vld [vmem:[#allocation5 + $0x274] sm:$0xf0]  ;;  %vm5314_vm5 = vweird.f32 %v5274_v1  ;;  %vm5306_vm9 = vmor %vm5304_vm8, %vm5305_vm7 }
 0x170   : > { %v3093_v17 = vpop.f32.mrf.mxu2  ;;  %v5300_v3 = vmul.f32 %v12458_v2, %v5299_v18  ;;  %v5297_v60 = vsel %vm5296_vm3, %v12443_v38, %v5293_v0 }
 0x171   : > { %v3094_v22 = vadd.f32 %v3093_v17, %v3045_v5  ;;  %v3142_v28 = vpop.f32.mrf.mxu3  ;;  %3276 = vmatpush.bf16.msra.mxu2 %v9693_v6  ;;  %v12472_v18 = vmul.f32 %v5297_v60, %v12342_v20  ;;  %v9308_v6 = vld [vmem:[#allocation5 + $0x548] sm:$0xf]  ;;  %v3046_v20 = vpop.f32.mrf.mxu1 }
 0x172   : > { %v5301_v58 = vmul.f32 0.5, %v5300_v3  ;;  %v2997_v3 = vpop.f32.mrf.mxu0 }
 0x173   : > { %v12462_v23 = vadd.f32 %v3142_v28, %v3094_v22  ;;  %v10076_v22 = vld [vmem:[#allocation5 + $0xb48] sm:$0xf]  ;;  %v10685_v28 = vld [vmem:[#allocation5 + $0xb74] sm:$0xf0] }
 0x174   : > { %v10077_v31 = vor.u32 %v10685_v28, %v10076_v22  ;;  %v5302_v61 = vsub.f32 1.5, %v5301_v58  ;;  %v10577_v58 = vld [vmem:[#allocation5 + $0x814] sm:$0xf0]  ;;  %v10028_v22 = vld [vmem:[#allocation5 + $0xae8] sm:$0xf] }
 0x175   : > { %16891 = vst [vmem:[#allocation61_spill] sm:$0xff] %v12462_v23  ;;  %v11475_v63 = vpop.eup %11474  ;;  %v5994_v62 = vmul.f32 %v12462_v23, %v12462_v23  ;;  %v10493_v23 = vld [vmem:[#allocation5 + $0x574] sm:$0xf0] }
 0x176   : > { %v5309_v29 = vmul.f32 %v11475_v63, %v5274_v1  ;;  %vm5315_vm4 = vweird.f32 %v11475_v63  ;;  %3325 = vmatpush.bf16.msra.mxu3 %v10077_v31  ;;  %v9309_v38 = vor.u32 %v10493_v23, %v9308_v6  ;;  %v10673_v28 = vld [vmem:[#allocation5 + $0xb14] sm:$0xf0] }
 0x177   : > { %6012 = vadd.xlane.f32.xlu0 %v5994_v62  ;;  %v8925_v62 = vor.u32 %v10397_v33, %v8924_v36  ;;  %vm5316_vm6 = vmor %vm5314_vm5, %vm5315_vm4  ;;  %v10029_v31 = vor.u32 %v10673_v28, %v10028_v22  ;;  %v10385_v36 = vld [vmem:[#allocation5 + $0x214] sm:$0xf0] }
 0x178   : > { %v5310_v5 = vmul.f32 %v11475_v63, %v5309_v29  ;;  %3227 = vmatpush.bf16.msra.mxu1 %v9309_v38  ;;  %v5303_v29 = vmul.f32 %v12458_v2, %v5302_v61 }
 0x179   : > { %3178 = vmatpush.bf16.msra.mxu0 %v8925_v62  ;;  %v10481_v62 = vld [vmem:[#allocation5 + $0x514] sm:$0xf0] }
 0x17a   : > { %v5311_v37 = vmul.f32 0.5, %v5310_v5  ;;  %v9644_v5 = vld [vmem:[#allocation5 + $0x7e8] sm:$0xf]  ;;  %v5307_v1 = vsel %vm5306_vm9, %v12458_v2, %v5303_v29  ;;  %v3000_v35 = vpop.f32.mrf.mxu0  ;;  %3326 = vmatpush.bf16.msra.mxu3 %v10029_v31  ;;  %v10661_v31 = vld [vmem:[#allocation5 + $0xab4] sm:$0xf0] }
 0x17b   : > { %v9645_v60 = vor.u32 %v10577_v58, %v9644_v5  ;;  %v12486_v61 = vmul.f32 %v5307_v1, %v12346_v32  ;;  %v9260_v2 = vld [vmem:[#allocation5 + $0x4e8] sm:$0xf]  ;;  %v5224_v32 = vpop.xlane.xlu1 %5223 }
 0x17c   : > { %v5312_v17 = vsub.f32 1.5, %v5311_v37  ;;  %v3095_v37 = vpop.f32.mrf.mxu2  ;;  %v9596_v29 = vld [vmem:[#allocation5 + $0x788] sm:$0xf]  ;;  %v5259_v1 = vmul.f32 %v12430_v19, %v5224_v32 }
 0x17d   : > { %3277 = vmatpush.bf16.msra.mxu2 %v9645_v60 }
 0x17e   : > { %v5313_v39 = vmul.f32 %v11475_v63, %v5312_v17  ;;  %v3049_v17 = vpop.f32.mrf.mxu1  ;;  %v12491_v28 = vadd.f32 1.1920929e-07, %v5259_v1 }
 0x17f   : > { %5736 = vrot.lane.b32.xlu2 %v12472_v18, %s12008_s2 }
 0x180   : > { %v5317_v0 = vsel %vm5316_vm6, %v11475_v63, %v5313_v39  ;;  %v3144_v63 = vpop.f32.mrf.mxu3  ;;  %v9261_v39 = vor.u32 %v10481_v62, %v9260_v2  ;;  %v8828_v62 = vld [vmem:[#allocation5 + $0x188] sm:$0xf]  ;;  %11476 = vrsqrt.f32 %v12491_v28  ;;  %vm5324_vm11 = vweird.f32 %v12491_v28 }
 0x181   : > { %v12480_v23 = vmul.f32 %v5317_v0, %v12354_v55  ;;  %v8876_v55 = vld [vmem:[#allocation5 + $0x1e8] sm:$0xf]  ;;  %v10565_v0 = vld [vmem:[#allocation5 + $0x7b4] sm:$0xf0] }
 0x182   : > { %v8877_v33 = vor.u32 %v10385_v36, %v8876_v55  ;;  %3228 = vmatpush.bf16.msra.mxu1 %v9261_v39  ;;  %v3002_v5 = vpop.f32.mrf.mxu0  ;;  %v9597_v60 = vor.u32 %v10565_v0, %v9596_v29  ;;  %v3047_v55 = vadd.f32 %v3046_v20, %v2997_v3  ;;  %v5226_v36 = vpop.xlane.xlu2 %5225  ;;  %v10373_v39 = vld [vmem:[#allocation5 + $0x1b4] sm:$0xf0] }
 0x183   : > { %v8829_v45 = vor.u32 %v10373_v39, %v8828_v62  ;;  %v10469_v29 = vld [vmem:[#allocation5 + $0x4b4] sm:$0xf0]  ;;  %v5260_v32 = vmul.f32 %v12430_v19, %v5226_v36 }
 0x184   : > { %v3098_v6 = vpop.f32.mrf.mxu2  ;;  %3179 = vmatpush.bf16.msra.mxu0 %v8877_v33  ;;  %3278 = vmatpush.bf16.msra.mxu2 %v9597_v60  ;;  %v9981_v33 = vor.u32 %v10661_v31, %v9980_v7  ;;  %v3096_v30 = vadd.f32 %v3095_v37, %v3047_v55  ;;  %v9213_v3 = vor.u32 %v10469_v29, %v9212_v44  ;;  %v9548_v31 = vld [vmem:[#allocation5 + $0x728] sm:$0xf]  ;;  %v10553_v62 = vld [vmem:[#allocation5 + $0x754] sm:$0xf0] }
 0x185   : > { %v12501_v7 = vadd.f32 1.1920929e-07, %v5260_v32  ;;  %v3050_v55 = vadd.f32 %v3049_v17, %v3000_v35  ;;  %v9549_v36 = vor.u32 %v10553_v62, %v9548_v31  ;;  %v9932_v62 = vld [vmem:[#allocation5 + $0xa28] sm:$0xf] }
 0x186   : > { %v3051_v58 = vpop.f32.mrf.mxu1  ;;  %3327 = vmatpush.bf16.msra.mxu3 %v9981_v33  ;;  %3229 = vmatpush.bf16.msra.mxu1 %v9213_v3  ;;  %v12499_v20 = vadd.f32 %v3144_v63, %v3096_v30  ;;  %v12505_v37 = vpop.eup %11476 }
 0x187   : > { %v5319_v44 = vmul.f32 %v12505_v37, %v12491_v28  ;;  %11478 = vrsqrt.f32 %v12501_v7  ;;  %v3099_v63 = vadd.f32 %v3098_v6, %v3050_v55  ;;  %v8780_v6 = vld [vmem:[#allocation5 + $0x128] sm:$0xf]  ;;  %vm5325_vm10 = vweird.f32 %v12505_v37 }
 0x188   : > { %5740 = vrot.lane.b32.xlu1 %v12480_v23, %s12008_s2  ;;  %v3147_v38 = vpop.f32.mrf.mxu3  ;;  %3180 = vmatpush.bf16.msra.mxu0 %v8829_v45  ;;  %16892 = vst [vmem:[#allocation62_spill] sm:$0xff] %v12499_v20  ;;  %v5995_v47 = vmul.f32 %v12499_v20, %v12499_v20  ;;  %v3052_v45 = vadd.f32 %v3051_v58, %v3002_v5  ;;  %v10649_v20 = vld [vmem:[#allocation5 + $0xa54] sm:$0xf0]  ;;  %vm5326_vm12 = vmor %vm5324_vm11, %vm5325_vm10  ;;  %v9116_v28 = vld [vmem:[#allocation5 + $0x3c8] sm:$0xf]  ;;  %vm5334_vm14 = vweird.f32 %v12501_v7 }
 0x189   : > { %3279 = vmatpush.bf16.msra.mxu2 %v9549_v36  ;;  %v5320_v29 = vmul.f32 %v12505_v37, %v5319_v44  ;;  %v12516_v3 = vadd.f32 %v3147_v38, %v3099_v63  ;;  %v9933_v36 = vor.u32 %v10649_v20, %v9932_v62 }
 0x18a   : > { %v12495_v0 = vpop.f32.mrf.mxu0  ;;  %v5230_v39 = vpop.xlane.xlu0 %5229 }
 0x18b   : > { %5738 = vrot.lane.b32.xlu0 %v12486_v61, %s12008_s2  ;;  %v5262_v35 = vmul.f32 %v12430_v19, %v5230_v39  ;;  %16893 = vst [vmem:[#allocation63_spill] sm:$0xff] %v12516_v3  ;;  %v9164_v39 = vld [vmem:[#allocation5 + $0x428] sm:$0xf]  ;;  %v5321_v8 = vmul.f32 0.5, %v5320_v29  ;;  %3328 = vmatpush.bf16.msra.mxu3 %v9933_v36 }
 0x18c   : > { %v3100_v22 = vpop.f32.mrf.mxu2  ;;  %v9165_v38 = vor.u32 %v10457_v9, %v9164_v39 }
 0x18d   : > { %v3101_v32 = vadd.f32 %v3100_v22, %v3052_v45  ;;  %v12518_v46 = vpop.eup %11478  ;;  %v12520_v5 = vadd.f32 1.1920929e-07, %v5262_v35  ;;  %v5996_v45 = vmul.f32 %v12516_v3, %v12516_v3  ;;  %v5322_v63 = vsub.f32 1.5, %v5321_v8 }
 0x18e   : > { %v12497_v60 = vpop.f32.mrf.mxu1  ;;  %v5329_v22 = vmul.f32 %v12518_v46, %v12501_v7  ;;  %3230 = vmatpush.bf16.msra.mxu1 %v9165_v38  ;;  %v8732_v38 = vld [vmem:[#allocation5 + $0xc8] sm:$0xf]  ;;  %vm5335_vm13 = vweird.f32 %v12518_v46 }
 0x18f   : > { %11480 = vrsqrt.f32 %v12520_v5  ;;  %vm5336_vm15 = vmor %vm5334_vm14, %vm5335_vm13  ;;  %v9836_v7 = vld [vmem:[#allocation5 + $0x968] sm:$0xf]  ;;  %vm5354_vm1 = vweird.f32 %v12520_v5 }
 0x190   : > { %v3149_v2 = vpop.f32.mrf.mxu3  ;;  %v5330_v35 = vmul.f32 %v12518_v46, %v5329_v22  ;;  %v10349_v22 = vld [vmem:[#allocation5 + $0xf4] sm:$0xf0] }
 0x191   : > { %v12522_v11 = vadd.f32 %v3149_v2, %v3101_v32 }
 0x192   : > { %v3007_v17 = vpop.f32.mrf.mxu0  ;;  %v5331_v62 = vmul.f32 0.5, %v5330_v35 }
 0x193   : > { %16894 = vst [vmem:[#allocation64_spill] sm:$0xff] %v12522_v11  ;;  %v5997_v2 = vmul.f32 %v12522_v11, %v12522_v11 }
 0x194   : > { %v12503_v1 = vpop.f32.mrf.mxu2 }
 0x195   : > { %v12534_v32 = vpop.eup %11480 }
 0x196   : > { %v3056_v33 = vpop.f32.mrf.mxu1  ;;  %vm5355_vm0 = vweird.f32 %v12534_v32 }
 0x197   : > { %v3057_v31 = vadd.f32 %v3056_v33, %v3007_v17  ;;  %v9500_v17 = vld [vmem:[#allocation5 + $0x6c8] sm:$0xf]  ;;  %v10541_v33 = vld [vmem:[#allocation5 + $0x6f4] sm:$0xf0]  ;;  %vm12562_vm2 = vmor %vm5354_vm1, %vm5355_vm0 }
 0x198   : > { %v12512_v30 = vpop.f32.mrf.mxu3  ;;  %v9501_v29 = vor.u32 %v10541_v33, %v9500_v17  ;;  %v9452_v17 = vld [vmem:[#allocation5 + $0x668] sm:$0xf]  ;;  %v10529_v33 = vld [vmem:[#allocation5 + $0x694] sm:$0xf0] }
 0x19a   : > { %3280 = vmatpush.bf16.msra.mxu2 %v9501_v29  ;;  %v9453_v29 = vor.u32 %v10529_v33, %v9452_v17  ;;  %v9020_v17 = vld [vmem:[#allocation5 + $0x308] sm:$0xf] }
 0x19c   : > { %v3105_v58 = vpop.f32.mrf.mxu2 }
 0x19d   : > { %v3106_v44 = vadd.f32 %v3105_v58, %v3057_v31  ;;  %v5323_v31 = vmul.f32 %v12505_v37, %v5322_v63  ;;  %v5349_v58 = vmul.f32 %v12534_v32, %v12520_v5  ;;  %v10445_v63 = vld [vmem:[#allocation5 + $0x3f4] sm:$0xf0] }
 0x19e   : > { %3281 = vmatpush.bf16.msra.mxu2 %v9453_v29 }
 0x19f   : > { %v5327_v36 = vsel %vm5326_vm12, %v12505_v37, %v5323_v31 }
 0x1a0   : > { %v3154_v20 = vpop.f32.mrf.mxu3 }
 0x1a1   : > { %v12532_v9 = vadd.f32 %v3154_v20, %v3106_v44  ;;  %v5350_v44 = vmul.f32 %v12534_v32, %v5349_v58  ;;  %v8733_v20 = vor.u32 %v10349_v22, %v8732_v38  ;;  %v10625_v58 = vld [vmem:[#allocation5 + $0x994] sm:$0xf0] }
 0x1a2   : > { %v10433_v38 = vld [vmem:[#allocation5 + $0x394] sm:$0xf0] }
 0x1a3   : > { %16895 = vst [vmem:[#allocation65_spill] sm:$0xff] %v12532_v9  ;;  %v5999_v8 = vmul.f32 %v12532_v9, %v12532_v9  ;;  %v5351_v35 = vmul.f32 0.5, %v5350_v44  ;;  %v10738_v9 = vld [vmem:[#allocation8] sm:$0xff]  }
 0x1a5   : > { %v5352_v31 = vsub.f32 1.5, %v5351_v35  ;;  %v8636_v35 = vld [vmem:[#allocation5 + $0x8] sm:$0xf] }
 0x1a8   : > { %6014 = vadd.xlane.f32.xlu2 %v5995_v47  ;;  %v10361_v47 = vld [vmem:[#allocation5 + $0x154] sm:$0xf0] }
 0x1a9   : > { %v8781_v55 = vor.u32 %v10361_v47, %v8780_v6  ;;  %v5332_v6 = vsub.f32 1.5, %v5331_v62  ;;  %v9884_v47 = vld [vmem:[#allocation5 + $0x9c8] sm:$0xf] }
 0x1ab   : > { %3181 = vmatpush.bf16.msra.mxu0 %v8781_v55  ;;  %v10637_v55 = vld [vmem:[#allocation5 + $0x9f4] sm:$0xf0]  ;;  %v5333_v37 = vmul.f32 %v12518_v46, %v5332_v6 }
 0x1ac   : > { %v9885_v39 = vor.u32 %v10637_v55, %v9884_v47  ;;  %v10337_v6 = vld [vmem:[#allocation5 + $0x94] sm:$0xf0]  ;;  %v5228_v47 = vpop.xlane.xlu2 %5227  ;;  %v3108_v55 = vpop.f32.mrf.mxu2 }
 0x1ae   : > { %3329 = vmatpush.bf16.msra.mxu3 %v9885_v39  ;;  %v9068_v39 = vld [vmem:[#allocation5 + $0x368] sm:$0xf] }
 0x1af   : > { %3182 = vmatpush.bf16.msra.mxu0 %v8733_v20  ;;  %v9069_v44 = vor.u32 %v10433_v38, %v9068_v39  ;;  %v9404_v20 = vld [vmem:[#allocation5 + $0x608] sm:$0xf]  ;;  %v5236_v39 = vpop.xlane.xlu0 %5235 }
 0x1b2   : > { %6016 = vadd.xlane.f32.xlu1 %v5996_v45  ;;  %v12546_v45 = vmul.f32 %v5327_v36, %v12358_v4  ;;  %v5337_v4 = vsel %vm5336_vm15, %v12518_v46, %v5333_v37  ;;  %v9837_v36 = vor.u32 %v10625_v58, %v9836_v7  ;;  %v8684_v46 = vld [vmem:[#allocation5 + $0x68] sm:$0xf]  ;;  %v3010_v7 = vpop.f32.mrf.mxu0  ;;  %v3059_v58 = vpop.f32.mrf.mxu1 }
 0x1b3   : > { %v12555_v62 = vmul.f32 %v5337_v4, %v12366_v21  ;;  %v8685_v21 = vor.u32 %v10337_v6, %v8684_v46  ;;  %v10325_v4 = vld [vmem:[#allocation5 + $0x34] sm:$0xf0]  ;;  %v3055_v6 = vadd.f32 %v12497_v60, %v12495_v0 }
 0x1b4   : > { %3330 = vmatpush.bf16.msra.mxu3 %v9837_v36  ;;  %v8637_v29 = vor.u32 %v10325_v4, %v8636_v35  ;;  %v5232_v36 = vpop.xlane.xlu1 %5231 }
 0x1b5   : > { %6018 = vadd.xlane.f32.xlu0 %v5997_v2  ;;  %v9117_v2 = vor.u32 %v10445_v63, %v9116_v28  ;;  %v10517_v28 = vld [vmem:[#allocation5 + $0x634] sm:$0xf0]  ;;  %v9788_v63 = vld [vmem:[#allocation5 + $0x908] sm:$0xf]  ;;  %3183 = vmatpush.bf16.msra.mxu0 %v8685_v21  ;;  %v5263_v21 = vmul.f32 %v12430_v19, %v5232_v36 }
 0x1b6   : > { %v9405_v5 = vor.u32 %v10517_v28, %v9404_v20 }
 0x1b7   : > { %3231 = vmatpush.bf16.msra.mxu1 %v9117_v2  ;;  %v10613_v2 = vld [vmem:[#allocation5 + $0x934] sm:$0xf0] }
 0x1b8   : > { %v9789_v37 = vor.u32 %v10613_v2, %v9788_v63  ;;  %3282 = vmatpush.bf16.msra.mxu2 %v9405_v5  ;;  %v12608_v2 = vpop.f32.mrf.mxu2 }
 0x1b9   : > { %3184 = vmatpush.bf16.msra.mxu0 %v8637_v29 }
 0x1ba   : > { %6022 = vadd.xlane.f32.xlu1 %v5999_v8  ;;  %v5353_v8 = vmul.f32 %v12534_v32, %v5352_v31  ;;  %v10421_v31 = vld [vmem:[#allocation5 + $0x334] sm:$0xf0]  ;;  %3331 = vmatpush.bf16.msra.mxu3 %v9789_v37  ;;  %v12592_v20 = vpop.f32.mrf.mxu0  ;;  %v12594_v28 = vpop.f32.mrf.mxu1 }
 0x1bb   : > { %3232 = vmatpush.bf16.msra.mxu1 %v9069_v44  ;;  %3283 = vmatmul.bf16.vlgmr.msra.gmra.mxu2 %v12190_v54  ;;  %v12590_v44 = vadd.f32 1.1920929e-07, %v5263_v21  ;;  %v12603_v60 = vpop.xlane.xlu0 %5241 }
 0x1bc   : > { %v5357_v22 = vsel %vm12562_vm2, %v12534_v32, %v5353_v8  ;;  %v9021_v32 = vor.u32 %v10421_v31, %v9020_v17  ;;  %v12575_v8 = vpop.xlane.xlu2 %5233  ;;  %3185 = vmatmul.bf16.vlgmr.msra.gmra.mxu0 %v12186_v48  ;;  %v5265_v31 = vmul.f32 %v12430_v19, %v5236_v39 }
 0x1bd   : > { %v12570_v33 = vmul.f32 %v5357_v22, %v12378_v59  ;;  %3332 = vmatmul.bf16.vlgmr.msra.gmra.mxu3 %v12192_v57  ;;  %v5261_v59 = vmul.f32 %v12430_v19, %v5228_v47  ;;  %v3104_v47 = vadd.f32 %v12503_v1, %v3055_v6  ;;  %v3157_v22 = vpop.f32.mrf.mxu3  ;;  %v3060_v1 = vadd.f32 %v3059_v58, %v3010_v7 }
 0x1be   : > { %vm5364_vm7 = vweird.f32 %v12590_v44 }
 0x1bf   : > { %3233 = vmatpush.bf16.msra.mxu1 %v9021_v32  ;;  %v12581_v46 = vadd.f32 1.1920929e-07, %v5261_v59  ;;  %v12597_v63 = vadd.f32 %v12512_v30, %v3104_v47  ;;  %v3109_v35 = vadd.f32 %v3108_v55, %v3060_v1  ;;  %v12630_v47 = vadd.f32 1.1920929e-07, %v5265_v31 }
 0x1c0   : > { %5742 = vrot.lane.b32.xlu2 %v12546_v45, %s12008_s2  ;;  %v3113_v1 = vpop.f32.mrf.mxu2 }
 0x1c1   : > { %11482 = vrsqrt.f32 %v12581_v46  ;;  %v5998_v30 = vmul.f32 %v12597_v63, %v12597_v63  ;;  %v12626_v36 = vadd.f32 %v3157_v22, %v3109_v35  ;;  %v10706_v35 = vld [vmem:[#allocation7] sm:$0xff]   ;;  %vm5344_vm4 = vweird.f32 %v12581_v46 }
 0x1c2   : > { %3234 = vmatmul.bf16.vlgmr.msra.gmra.mxu1 %v12188_v53  ;;  %11484 = vrsqrt.f32 %v12590_v44  ;;  %v3015_v32 = vpop.f32.mrf.mxu0  ;;  %v3064_v59 = vpop.f32.mrf.mxu1  ;;  %vm5384_vm10 = vweird.f32 %v12630_v47 }
 0x1c3   : > { %16898 = vst [vmem:[#allocation66_spill] sm:$0xff] %v12626_v36  ;;  %v3065_v6 = vadd.f32 %v3064_v59, %v3015_v32  ;;  %v6000_v39 = vmul.f32 %v12626_v36, %v12626_v36  ;;  %11486 = vrsqrt.f32 %v12630_v47  ;;  %v12642_v59 = vunpack.c.l.bf16 %v10738_v9 }
 0x1c4   : > { %v12586_v38 = vpop.xlane.xlu2 %5239  ;;  %v12656_v36 = vunpack.c.h.bf16 %v10738_v9 }
 0x1c5   : > { %v12616_v4 = vpop.f32.mrf.mxu3  ;;  %16900 = vst [vmem:[#allocation68_spill] sm:$0xff] %v12642_v59 }
 0x1c6   : > { %16903 = vst [vmem:[#allocation71_spill] sm:$0xff] %v12656_v36 }
 0x1c7   : > { %v12600_v0 = vpop.eup %11482 }
 0x1c8   : > { %v5339_v37 = vmul.f32 %v12600_v0, %v12581_v46  ;;  %v12618_v17 = vpop.eup %11484  ;;  %vm5345_vm3 = vweird.f32 %v12600_v0 }
 0x1c9   : > { %5744 = vrot.lane.b32.xlu0 %v12555_v62, %s12008_s2  ;;  %v5359_v55 = vmul.f32 %v12618_v17, %v12590_v44  ;;  %vm5346_vm5 = vmor %vm5344_vm4, %vm5345_vm3  ;;  %vm5365_vm6 = vweird.f32 %v12618_v17 }
 0x1ca   : > { %v5340_v29 = vmul.f32 %v12600_v0, %v5339_v37  ;;  %vm5366_vm8 = vmor %vm5364_vm7, %vm5365_vm6 }
 0x1cb   : > { %3288 = vmatmul.bf16.gmra.mxu2 %v12210_v26  ;;  %v5360_v37 = vmul.f32 %v12618_v17, %v5359_v55  ;;  %v12646_v55 = vunpack.c.l.bf16 %v10706_v35 }
 0x1cc   : > { %v12605_v5 = vpop.xlane.xlu2 %5245  ;;  %3190 = vmatmul.bf16.gmra.mxu0 %v12206_v24  ;;  %v5341_v21 = vmul.f32 0.5, %v5340_v29 }
 0x1cd   : > { %3337 = vmatmul.bf16.gmra.mxu3 %v12212_v27  ;;  %v3162_v22 = vpop.f32.mrf.mxu3  ;;  %v5361_v31 = vmul.f32 0.5, %v5360_v37  ;;  %16901 = vst [vmem:[#allocation69_spill] sm:$0xff] %v12646_v55 }
 0x1ce   : > { %v5342_v3 = vsub.f32 1.5, %v5341_v21 }
 0x1cf   : > { %v5362_v37 = vsub.f32 1.5, %v5361_v31 }
 0x1d0   : > { %v5343_v21 = vmul.f32 %v12600_v0, %v5342_v3  ;;  %v5720_v3 = vmul.f32 %v12646_v55, %v12472_v18 }
 0x1d2   : > { %3239 = vmatmul.bf16.gmra.mxu1 %v12208_v25  ;;  %v12622_v7 = vpop.xlane.xlu0 %5247  ;;  %v5347_v11 = vsel %vm5346_vm5, %v12600_v0, %v5343_v21 }
 0x1d3   : > { %5748 = vrot.lane.b32.xlu1 %v12570_v33, %s12008_s2  ;;  %v12668_v9 = vmul.f32 %v5347_v11, %v12370_v34  ;;  %v5238_v34 = vpop.xlane.xlu1 %5237 }
 0x1da   : > { %v12624_v58 = vpop.xlane.xlu2 %6008 }
 0x1db   : > { %3293 = vmatmul.bf16.gmra.mxu2 %v12230_v51 }
 0x1dc   : > { %3195 = vmatmul.bf16.gmra.mxu0 %v12226_v49 }
 0x1dd   : > { %3342 = vmatmul.bf16.gmra.mxu3 %v12232_v52 }
 0x1e2   : > { %3244 = vmatmul.bf16.gmra.mxu1 %v12228_v50 }
 0x1e9   : > { %6020 = vadd.xlane.f32.xlu2 %v5998_v30  ;;  %v3114_v30 = vadd.f32 %v3113_v1, %v3065_v6  ;;  %v5737_v6 = vpop.permute.xlu2 %5736 }
 0x1ea   : > { %v12637_v32 = vpop.xlane.xlu0 %6012 }
 0x1eb   : > { %v12639_v29 = vadd.f32 %v3162_v22, %v3114_v30  ;;  %v12652_v30 = vunpack.c.h.bf16 %v10706_v35  ;;  %v5768_v22 = vmul.f32 %v12642_v59, %v5737_v6  ;;  %v5363_v6 = vmul.f32 %v12618_v17, %v5362_v37  ;;  %3298 = vmatmul.bf16.gmra.mxu2 %v12250_v14  ;;  %v9310_v14 = vld [vmem:[#allocation5 + $0x578] sm:$0xf0] }
 0x1ec   : > { %3200 = vmatmul.bf16.gmra.mxu0 %v12246_v12 }
 0x1ed   : > { %16899 = vst [vmem:[#allocation67_spill] sm:$0xff] %v12639_v29  ;;  %v6002_v1 = vmul.f32 %v12639_v29, %v12639_v29  ;;  %v5721_v35 = vmul.f32 %v12652_v30, %v12486_v61  ;;  %v5784_v46 = vadd.f32 %v5768_v22, %v5720_v3  ;;  %v5367_v21 = vsel %vm5366_vm8, %v12618_v17, %v5363_v6  ;;  %v12690_v17 = vpop.xlane.xlu1 %5243 }
 0x1ee   : > { %16902 = vst [vmem:[#allocation70_spill] sm:$0xff] %v12652_v30  ;;  %v12679_v44 = vmul.f32 %v5367_v21, %v12382_v16  ;;  %3347 = vmatmul.bf16.gmra.mxu3 %v12252_v15  ;;  %v3062_v6 = vadd.f32 %v12594_v28, %v12592_v20  ;;  %v3115_v20 = vpop.f32.mrf.mxu2  ;;  %v10487_v15 = vld [vmem:[#allocation5 + $0x54c] sm:$0xf] }
 0x1ef   : > { %v5880_v61 = vmul.f32 0.088388346, %v5784_v46 }
 0x1f2   : > { %3249 = vmatmul.bf16.gmra.mxu1 %v12248_v13  ;;  %v11259_v13 = vld [vmem:[#allocation8 + $0x20] sm:$0xff]  }
 0x1f3   : > { %6024 = vadd.xlane.f32.xlu0 %v6000_v39  ;;  %v11487_v39 = vpop.eup %11486 }
 0x1f4   : > { %v5379_v50 = vmul.f32 %v11487_v39, %v12630_v47  ;;  %vm5385_vm9 = vweird.f32 %v11487_v39  ;;  %v5264_v47 = vmul.f32 %v12430_v19, %v12575_v8 }
 0x1f5   : > { %vm5386_vm11 = vmor %vm5384_vm10, %vm5385_vm9  ;;  %v12697_v3 = vpop.xlane.xlu1 %6010 }
 0x1f6   : > { %v5380_v0 = vmul.f32 %v11487_v39, %v5379_v50 }
 0x1f8   : > { %v5381_v11 = vmul.f32 0.5, %v5380_v0 }
 0x1fa   : > { %v5382_v50 = vsub.f32 1.5, %v5381_v11  ;;  %v3111_v11 = vadd.f32 %v12608_v2, %v3062_v6 }
 0x1fb   : > { %3303 = vmatmul.bf16.gmra.mxu2 %v12270_v42 }
 0x1fc   : > { %v5383_v37 = vmul.f32 %v11487_v39, %v5382_v50  ;;  %3205 = vmatmul.bf16.gmra.mxu0 %v12266_v40 }
 0x1fd   : > { %6028 = vadd.xlane.f32.xlu1 %v6002_v1  ;;  %v5739_v29 = vpop.permute.xlu0 %5738 }
 0x1fe   : > { %v5769_v31 = vmul.f32 %v12656_v36, %v5739_v29  ;;  %v5387_v16 = vsel %vm5386_vm11, %v11487_v39, %v5383_v37  ;;  %3352 = vmatmul.bf16.gmra.mxu3 %v12272_v43  ;;  %v11256_v39 = vld [vmem:[#allocation8 + $0x8] sm:$0xff]   ;;  %v11251_v43 = vld [vmem:[#allocation7 + $0x18] sm:$0xff]  }
 0x1ff   : > { %v12694_v22 = vmul.f32 %v5387_v16, %v12394_v56  ;;  %v5266_v56 = vmul.f32 %v12430_v19, %v5238_v34  ;;  %v12713_v0 = vunpack.c.l.bf16 %v11256_v39  ;;  %v12724_v50 = vunpack.c.h.bf16 %v11256_v39 }
 0x200   : > { %v5785_v18 = vadd.f32 %v5769_v31, %v5721_v35  ;;  %v11249_v35 = vld [vmem:[#allocation7 + $0x8] sm:$0xff]   ;;  %v12709_v31 = vadd.f32 1.1920929e-07, %v5264_v47  ;;  %v12730_v47 = vadd.f32 %v12616_v4, %v3111_v11  ;;  %v16910_v4 = vld [vmem:[#allocation40_spill] sm:$0xff] }
 0x201   : > { %5746 = vrot.lane.b32.xlu2 %v12668_v9, %s12008_s2  ;;  %16904 = vst [vmem:[#allocation72_spill] sm:$0xff] %v12713_v0  ;;  %v12715_v21 = vunpack.c.l.bf16 %v11249_v35  ;;  %v12719_v8 = vunpack.c.h.bf16 %v11249_v35 }
 0x202   : > { %v5881_v29 = vmul.f32 0.088388346, %v5785_v18  ;;  %3254 = vmatmul.bf16.gmra.mxu1 %v12268_v41  ;;  %v3017_v18 = vpop.f32.mrf.mxu0  ;;  %11488 = vrsqrt.f32 %v12709_v31  ;;  %16907 = vst [vmem:[#allocation75_spill] sm:$0xff] %v12724_v50  ;;  %vm5374_vm13 = vweird.f32 %v12709_v31 }
 0x203   : > { %16905 = vst [vmem:[#allocation73_spill] sm:$0xff] %v12715_v21  ;;  %v5722_v28 = vmul.f32 %v12715_v21, %v12480_v23  ;;  %v5723_v2 = vmul.f32 %v12719_v8, %v12546_v45  ;;  %v16909_v23 = vld [vmem:[#allocation43_spill] sm:$0xff]  ;;  %v12746_v21 = vpop.f32.mrf.mxu2 }
 0x204   : > { %v10772_v1 = vpack.c.bf16 %v5881_v29, %v5880_v61  ;;  %v3066_v61 = vpop.f32.mrf.mxu1  ;;  %v5741_v29 = vpop.permute.xlu1 %5740  ;;  %16906 = vst [vmem:[#allocation74_spill] sm:$0xff] %v12719_v8 }
 0x205   : > { %v5770_v34 = vmul.f32 %v12713_v0, %v5741_v29  ;;  %v3067_v37 = vadd.f32 %v3066_v61, %v3017_v18  ;;  %16908 = vst [vmem:[#allocation76_spill] sm:$0xff] %v12730_v47 }
 0x206   : > { %10773 = vst [vmem:[%s12683_s29] sm:$0xff] %v10772_v1   ;;  %v12717_v1 = vadd.f32 1.1920929e-07, %v5266_v56  ;;  %v3164_v56 = vpop.f32.mrf.mxu3 }
 0x207   : > { %5750 = vrot.lane.b32.xlu0 %v12679_v44, %s12008_s2  ;;  %v5786_v35 = vadd.f32 %v5770_v34, %v5722_v28  ;;  %v3116_v11 = vadd.f32 %v3115_v20, %v3067_v37  ;;  %v16911_v34 = vld [vmem:[#allocation41_spill] sm:$0xff] }
 0x208   : > { %11490 = vrsqrt.f32 %v12717_v1  ;;  %v11489_v18 = vpop.eup %11488  ;;  %vm5394_vm0 = vweird.f32 %v12717_v1 }
 0x209   : > { %v5882_v28 = vmul.f32 0.088388346, %v5786_v35  ;;  %v5369_v8 = vmul.f32 %v11489_v18, %v12709_v31  ;;  %v12748_v36 = vadd.f32 %v3164_v56, %v3116_v11  ;;  %v5268_v35 = vmul.f32 %v12430_v19, %v12603_v60  ;;  %v16919_v31 = vld [vmem:[#allocation53_spill] sm:$0xff] }
 0x20a   : > { %v12736_v39 = vpop.f32.mrf.mxu0  ;;  %v5271_v60 = vmul.f32 %v12430_v19, %v12622_v7  ;;  %vm5375_vm12 = vweird.f32 %v11489_v18 }
 0x20b   : > { %3308 = vmatmul.bf16.gmra.mxu2 %v12290_v10  ;;  %16912 = vst [vmem:[#allocation77_spill] sm:$0xff] %v12748_v36  ;;  %v5370_v20 = vmul.f32 %v11489_v18, %v5369_v8  ;;  %v6003_v30 = vmul.f32 %v12748_v36, %v12748_v36  ;;  %v5284_v56 = vadd.f32 1.1920929e-07, %v5268_v35  ;;  %v3120_v11 = vpop.f32.mrf.mxu2  ;;  %v16914_v8 = vld [vmem:[#allocation47_spill] sm:$0xff]  ;;  %vm5376_vm14 = vmor %vm5374_vm13, %vm5375_vm12  ;;  %v10691_v10 = vld [vmem:[#allocation5 + $0xbac] sm:$0xf] }
 0x20c   : > { %v12738_v29 = vpop.f32.mrf.mxu1  ;;  %3210 = vmatmul.bf16.gmra.mxu0 %v16910_v4  ;;  %v16915_v4 = vld [vmem:[#allocation44_spill] sm:$0xff] }
 0x20d   : > { %v5371_v59 = vmul.f32 0.5, %v5370_v20  ;;  %11492 = vrsqrt.f32 %v5284_v56  ;;  %vm5414_vm3 = vweird.f32 %v5284_v56 }
 0x20e   : > { %3357 = vmatmul.bf16.gmra.mxu3 %v16909_v23  ;;  %v12752_v37 = vpop.f32.mrf.mxu3 }
 0x212   : > { %3259 = vmatmul.bf16.gmra.mxu1 %v16911_v34 }
 0x216   : > { %5754 = vrot.lane.b32.xlu1 %v12694_v22, %s12008_s2  ;;  %v3169_v36 = vpop.f32.mrf.mxu3 }
 0x21b   : > { %v12707_v46 = vpop.xlane.xlu2 %6014 }
 0x21c   : > { %3215 = vmatmul.bf16.gmra.mxu0 %v16915_v4 }
 0x21e   : > { %3362 = vmatmul.bf16.gmra.mxu3 %v16914_v8 }
 0x223   : > { %v5743_v16 = vpop.permute.xlu2 %5742 }
 0x224   : > { %v5771_v6 = vmul.f32 %v12724_v50, %v5743_v16  ;;  %v6001_v16 = vmul.f32 %v12730_v47, %v12730_v47  ;;  %v11491_v50 = vpop.eup %11490 }
 0x225   : > { %vm5395_vm15 = vweird.f32 %v11491_v50 }
 0x226   : > { %v5787_v61 = vadd.f32 %v5771_v6, %v5723_v2  ;;  %v5389_v2 = vmul.f32 %v11491_v50, %v12717_v1  ;;  %v3022_v6 = vpop.f32.mrf.mxu0  ;;  %vm5396_vm1 = vmor %vm5394_vm0, %vm5395_vm15 }
 0x228   : > { %v5883_v45 = vmul.f32 0.088388346, %v5787_v61  ;;  %v3071_v61 = vpop.f32.mrf.mxu1  ;;  %v5390_v55 = vmul.f32 %v11491_v50, %v5389_v2  ;;  %v16916_v2 = vld [vmem:[#allocation45_spill] sm:$0xff] }
 0x229   : > { %3264 = vmatmul.bf16.gmra.mxu1 %v16916_v2  ;;  %v16924_v2 = vld [vmem:[#allocation55_spill] sm:$0xff] }
 0x22a   : > { %v10777_v0 = vpack.c.bf16 %v5883_v45, %v5882_v28  ;;  %6026 = vadd.xlane.f32.xlu2 %v6001_v16  ;;  %v3072_v28 = vadd.f32 %v3071_v61, %v3022_v6  ;;  %v5391_v45 = vmul.f32 0.5, %v5390_v55  ;;  %v16913_v16 = vld [vmem:[#allocation46_spill] sm:$0xff]  ;;  %v11493_v6 = vpop.eup %11492 }
 0x22b   : > { %3313 = vmatmul.bf16.gmra.mxu2 %v16913_v16  ;;  %vm5415_vm2 = vweird.f32 %v11493_v6 }
 0x22c   : > { %11263 = vst [vmem:[%s12683_s29 + $0x8] sm:$0xff] %v10777_v0   ;;  %v5372_v0 = vsub.f32 1.5, %v5371_v59  ;;  %v3121_v34 = vadd.f32 %v3120_v11, %v3072_v28  ;;  %v5287_v59 = vadd.f32 1.1920929e-07, %v5271_v60  ;;  %v5409_v28 = vmul.f32 %v11493_v6, %v5284_v56  ;;  %v16918_v11 = vld [vmem:[#allocation52_spill] sm:$0xff]  ;;  %v16921_v60 = vld [vmem:[#allocation51_spill] sm:$0xff]  ;;  %vm5416_vm4 = vmor %vm5414_vm3, %vm5415_vm2 }
 0x22d   : > { %v11257_v56 = vld [vmem:[#allocation8 + $0x10] sm:$0xff]  }
 0x22e   : > { %v5373_v20 = vmul.f32 %v11489_v18, %v5372_v0  ;;  %v12764_v35 = vadd.f32 %v3169_v36, %v3121_v34  ;;  %11494 = vrsqrt.f32 %v5287_v59  ;;  %v16920_v0 = vld [vmem:[#allocation50_spill] sm:$0xff]  ;;  %3367 = vmatmul.bf16.gmra.mxu3 %v16921_v60  ;;  %vm5444_vm6 = vweird.f32 %v5287_v59 }
 0x230   : > { %16917 = vst [vmem:[#allocation78_spill] sm:$0xff] %v12764_v35  ;;  %v5377_v61 = vsel %vm5376_vm14, %v11489_v18, %v5373_v20  ;;  %v6005_v7 = vmul.f32 %v12764_v35, %v12764_v35  ;;  %v5410_v18 = vmul.f32 %v11493_v6, %v5409_v28  ;;  %v16923_v20 = vld [vmem:[#allocation49_spill] sm:$0xff]  ;;  %v12784_v35 = vpop.xlane.xlu0 %6018 }
 0x231   : > { %6030 = vadd.xlane.f32.xlu0 %v6003_v30  ;;  %v5392_v30 = vsub.f32 1.5, %v5391_v45  ;;  %v12771_v36 = vmul.f32 %v5377_v61, %v16918_v11 }
 0x233   : > { %v5393_v55 = vmul.f32 %v11491_v50, %v5392_v30  ;;  %v16922_v30 = vld [vmem:[#allocation48_spill] sm:$0xff] }
 0x234   : > { %v11495_v1 = vpop.eup %11494  ;;  %3220 = vmatmul.bf16.gmra.mxu0 %v16922_v30 }
 0x235   : > { %v5397_v34 = vsel %vm5396_vm1, %v11491_v50, %v5393_v55  ;;  %v5411_v50 = vmul.f32 0.5, %v5410_v18  ;;  %v5439_v55 = vmul.f32 %v11495_v1, %v5287_v59  ;;  %vm5445_vm5 = vweird.f32 %v11495_v1  ;;  %v16927_v59 = vld [vmem:[#allocation58_spill] sm:$0xff] }
 0x236   : > { %v12776_v45 = vmul.f32 %v5397_v34, %v16919_v31  ;;  %vm5446_vm7 = vmor %vm5444_vm6, %vm5445_vm5 }
 0x237   : > { %v5412_v61 = vsub.f32 1.5, %v5411_v50  ;;  %v3025_v50 = vpop.f32.mrf.mxu0 }
 0x239   : > { %3269 = vmatmul.bf16.gmra.mxu1 %v16923_v20  ;;  %v5413_v34 = vmul.f32 %v11493_v6, %v5412_v61  ;;  %v5267_v20 = vmul.f32 %v12430_v19, %v12586_v38  ;;  %v3172_v38 = vpop.f32.mrf.mxu3 }
 0x23b   : > { %3318 = vmatmul.bf16.gmra.mxu2 %v16920_v0  ;;  %v5417_v31 = vsel %vm5416_vm4, %v11493_v6, %v5413_v34  ;;  %v3074_v0 = vpop.f32.mrf.mxu1  ;;  %v3123_v6 = vpop.f32.mrf.mxu2  ;;  %v12795_v61 = vadd.f32 1.1920929e-07, %v5267_v20 }
 0x23c   : > { %v12787_v60 = vmul.f32 %v5417_v31, %v16924_v2  ;;  %v11250_v2 = vld [vmem:[#allocation7 + $0x10] sm:$0xff]   ;;  %v5745_v31 = vpop.permute.xlu0 %5744  ;;  %v3075_v20 = vadd.f32 %v3074_v0, %v3025_v50 }
 0x23d   : > { %v12805_v30 = vunpack.c.l.bf16 %v11250_v2  ;;  %11496 = vrsqrt.f32 %v12795_v61  ;;  %v12811_v8 = vunpack.c.h.bf16 %v11250_v2  ;;  %vm5404_vm10 = vweird.f32 %v12795_v61 }
 0x23e   : > { %v3124_v2 = vadd.f32 %v3123_v6, %v3075_v20 }
 0x23f   : > { %16926 = vst [vmem:[#allocation53_spill] sm:$0xff] %v12805_v30  ;;  %v12824_v0 = vpop.f32.mrf.mxu0  ;;  %v5724_v50 = vmul.f32 %v12805_v30, %v12555_v62 }
 0x240   : > { %6034 = vadd.xlane.f32.xlu1 %v6005_v7  ;;  %v5440_v7 = vmul.f32 %v11495_v1, %v5439_v55  ;;  %v5269_v55 = vmul.f32 %v12430_v19, %v12690_v17  ;;  %v12803_v17 = vunpack.c.l.bf16 %v11257_v56  ;;  %16929 = vst [vmem:[#allocation58_spill] sm:$0xff] %v12811_v8  ;;  %v12842_v6 = vadd.f32 %v3172_v38, %v3124_v2 }
 0x242   : > { %5752 = vrot.lane.b32.xlu2 %v12771_v36, %s12008_s2  ;;  %v5441_v11 = vmul.f32 0.5, %v5440_v7  ;;  %v12799_v34 = vadd.f32 1.1920929e-07, %v5269_v55  ;;  %16925 = vst [vmem:[#allocation52_spill] sm:$0xff] %v12803_v17  ;;  %v12822_v55 = vunpack.c.h.bf16 %v11257_v56  ;;  %v6006_v38 = vmul.f32 %v12842_v6, %v12842_v6 }
 0x243   : > { %v12836_v56 = vpop.eup %11496  ;;  %16933 = vst [vmem:[#allocation82_spill] sm:$0xff] %v12842_v6  ;;  %v10499_v6 = vld [vmem:[#allocation5 + $0x5ac] sm:$0xf] }
 0x244   : > { %v5442_v28 = vsub.f32 1.5, %v5441_v11  ;;  %11498 = vrsqrt.f32 %v12799_v34  ;;  %16931 = vst [vmem:[#allocation80_spill] sm:$0xff] %v12822_v55  ;;  %vm5405_vm8 = vweird.f32 %v12836_v56  ;;  %vm5424_vm11 = vweird.f32 %v12799_v34 }
 0x245   : > { %5756 = vrot.lane.b32.xlu0 %v12776_v45, %s12008_s2  ;;  %vm5406_vm12 = vmor %vm5404_vm10, %vm5405_vm8 }
 0x246   : > { %v5443_v18 = vmul.f32 %v11495_v1, %v5442_v28  ;;  %v3070_v28 = vadd.f32 %v12738_v29, %v12736_v39  ;;  %v5772_v29 = vmul.f32 %v12803_v17, %v5745_v31  ;;  %v12838_v17 = vpop.f32.mrf.mxu3 }
 0x247   : > { %v12856_v2 = vpop.f32.mrf.mxu0 }
 0x248   : > { %v5447_v11 = vsel %vm5446_vm7, %v11495_v1, %v5443_v18  ;;  %v12813_v1 = vpop.f32.mrf.mxu1  ;;  %v12816_v18 = vpop.xlane.xlu1 %6016  ;;  %v3119_v39 = vadd.f32 %v12746_v21, %v3070_v28  ;;  %v5788_v21 = vadd.f32 %v5772_v29, %v5724_v50  ;;  %v5725_v28 = vmul.f32 %v12811_v8, %v12668_v9  ;;  %v11258_v8 = vld [vmem:[#allocation8 + $0x18] sm:$0xff]  }
 0x249   : > { %v12808_v4 = vmul.f32 %v5447_v11, %v16927_v59  ;;  %16930 = vst [vmem:[#allocation79_spill] sm:$0xff] %v12816_v18  ;;  %v12828_v59 = vpop.f32.mrf.mxu2  ;;  %v10475_v18 = vld [vmem:[#allocation5 + $0x4ec] sm:$0xf] }
 0x24a   : > { %v12831_v16 = vadd.f32 %v12752_v37, %v3119_v39  ;;  %v12840_v23 = vpop.eup %11498  ;;  %v5399_v37 = vmul.f32 %v12836_v56, %v12795_v61  ;;  %v5884_v20 = vmul.f32 0.088388346, %v5788_v21 }
 0x24b   : > { %16928 = vst [vmem:[#allocation55_spill] sm:$0xff] %v12808_v4  ;;  %v5419_v29 = vmul.f32 %v12840_v23, %v12799_v34  ;;  %vm5425_vm9 = vweird.f32 %v12840_v23 }
 0x24c   : > { %16932 = vst [vmem:[#allocation81_spill] sm:$0xff] %v12831_v16  ;;  %v6004_v9 = vmul.f32 %v12831_v16, %v12831_v16  ;;  %v5400_v21 = vmul.f32 %v12836_v56, %v5399_v37  ;;  %vm5426_vm13 = vmor %vm5424_vm11, %vm5425_vm9 }
 0x24e   : > { %v12863_v41 = vpop.f32.mrf.mxu3  ;;  %v5401_v40 = vmul.f32 0.5, %v5400_v21 }
 0x250   : > { %v12850_v50 = vpop.f32.mrf.mxu1 }
 0x251   : > { %v12861_v30 = vpop.f32.mrf.mxu2 }
 0x259   : > { %5760 = vrot.lane.b32.xlu1 %v12787_v60, %s12008_s2 }
 0x25c   : > { %v12797_v7 = vpop.xlane.xlu2 %6020 }
 0x261   : > { %5766 = vrot.lane.b32.xlu1 %v12808_v4, %s12008_s2  ;;  %v12871_v4 = vunpack.c.h.bf16 %v11251_v43 }
 0x263   : > { %16938 = vst [vmem:[#allocation87_spill] sm:$0xff] %v12871_v4 }
 0x264   : > { %v5747_v11 = vpop.permute.xlu2 %5746 }
 0x265   : > { %v5773_v31 = vmul.f32 %v12822_v55, %v5747_v11  ;;  %v12852_v11 = vpop.xlane.xlu1 %6022 }
 0x266   : > { %16934 = vst [vmem:[#allocation83_spill] sm:$0xff] %v12852_v11  ;;  %v10126_v11 = vld [vmem:[#allocation5 + $0xbd8] sm:$0xf0]  ;;  %v12865_v47 = vpop.xlane.xlu0 %6024 }
 0x267   : > { %v5789_v62 = vadd.f32 %v5773_v31, %v5725_v28  ;;  %v10595_v28 = vld [vmem:[#allocation5 + $0x8ac] sm:$0xf]  ;;  %v9742_v31 = vld [vmem:[#allocation5 + $0x8d8] sm:$0xf0]  ;;  %16935 = vst [vmem:[#allocation84_spill] sm:$0xff] %v12865_v47 }
 0x268   : > { %v9745_v16 = vor.u32 %v10595_v28, %v9742_v31  ;;  %v12867_v28 = vunpack.c.l.bf16 %v11258_v8  ;;  %v5402_v31 = vsub.f32 1.5, %v5401_v40  ;;  %v8926_v47 = vld [vmem:[#allocation5 + $0x278] sm:$0xf0] }
 0x269   : > { %v5885_v39 = vmul.f32 0.088388346, %v5789_v62  ;;  %v5420_v62 = vmul.f32 %v12840_v23, %v5419_v29 }
 0x26a   : > { %3471 = vmatpush.bf16.msrb.mxu2 %v9745_v16  ;;  %16936 = vst [vmem:[#allocation85_spill] sm:$0xff] %v12867_v28  ;;  %v5403_v40 = vmul.f32 %v12836_v56, %v5402_v31 }
 0x26b   : > { %v10782_v55 = vpack.c.bf16 %v5885_v39, %v5884_v20  ;;  %6032 = vadd.xlane.f32.xlu2 %v6004_v9  ;;  %v10129_v20 = vor.u32 %v10691_v10, %v10126_v11  ;;  %v10403_v39 = vld [vmem:[#allocation5 + $0x2ac] sm:$0xf]  ;;  %v8974_v9 = vld [vmem:[#allocation5 + $0x2d8] sm:$0xf0]  ;;  %v5421_v42 = vmul.f32 0.5, %v5420_v62  ;;  %v12869_v10 = vunpack.c.l.bf16 %v11251_v43  ;;  %v3237_v11 = vpop.f32.mrf.mxu1 }
 0x26c   : > { %v8977_v37 = vor.u32 %v10403_v39, %v8974_v9  ;;  %v12874_v39 = vunpack.c.h.bf16 %v11258_v8  ;;  %v3188_v9 = vpop.f32.mrf.mxu0  ;;  %v3335_v8 = vpop.f32.mrf.mxu3 }
 0x26d   : > { %11264 = vst [vmem:[%s12683_s29 + $0x10] sm:$0xff] %v10782_v55   ;;  %v9358_v55 = vld [vmem:[#allocation5 + $0x5d8] sm:$0xf0]  ;;  %3520 = vmatpush.bf16.msrb.mxu3 %v10129_v20  ;;  %v5422_v16 = vsub.f32 1.5, %v5421_v42  ;;  %v5726_v62 = vmul.f32 %v12869_v10, %v12570_v33  ;;  %v3286_v20 = vpop.f32.mrf.mxu2 }
 0x26e   : > { %v9361_v29 = vor.u32 %v10499_v6, %v9358_v55  ;;  %3373 = vmatpush.bf16.msrb.mxu0 %v8977_v37  ;;  %16937 = vst [vmem:[#allocation86_spill] sm:$0xff] %v12869_v10  ;;  %v6042_v6 = vmul.f32 %v12637_v32, %v12430_v19  ;;  %v5727_v37 = vmul.f32 %v12871_v4, %v12679_v44  ;;  %v9694_v4 = vld [vmem:[#allocation5 + $0x878] sm:$0xf0]  ;;  %v10679_v10 = vld [vmem:[#allocation5 + $0xb4c] sm:$0xf] }
 0x26f   : > { %6036 = vadd.xlane.f32.xlu0 %v6006_v38  ;;  %v5749_v38 = vpop.permute.xlu1 %5748  ;;  %16939 = vst [vmem:[#allocation88_spill] sm:$0xff] %v12874_v39 }
 0x270   : > { %3422 = vmatpush.bf16.msrb.mxu1 %v9361_v29  ;;  %v5774_v21 = vmul.f32 %v12867_v28, %v5749_v38  ;;  %v5423_v29 = vmul.f32 %v12840_v23, %v5422_v16  ;;  %v12889_v33 = vadd.f32 1.1920929e-07, %v6042_v6  ;;  %v3238_v38 = vadd.f32 %v3237_v11, %v3188_v9  ;;  %v10391_v28 = vld [vmem:[#allocation5 + $0x24c] sm:$0xf] }
 0x272   : > { %v5790_v42 = vadd.f32 %v5774_v21, %v5726_v62  ;;  %v5407_v62 = vsel %vm5406_vm12, %v12836_v56, %v5403_v40  ;;  %v5427_v16 = vsel %vm5426_vm13, %v12840_v23, %v5423_v29  ;;  %11500 = vrsqrt.f32 %v12889_v33 }
 0x273   : > { %v12891_v44 = vpop.f32.mrf.mxu1  ;;  %v3287_v6 = vadd.f32 %v3286_v20, %v3238_v38  ;;  %vm6098_vm14 = vweird.f32 %v12889_v33 }
 0x274   : > { %v5886_v31 = vmul.f32 0.088388346, %v5790_v42  ;;  %v12907_v9 = vpop.f32.mrf.mxu3 }
 0x275   : > { %v12898_v34 = vpop.f32.mrf.mxu2  ;;  %v12913_v23 = vadd.f32 %v3335_v8, %v3287_v6 }
 0x277   : > { %v6780_v29 = vmul.f32 %v12913_v23, %v12913_v23 }
 0x278   : > { %v11501_v56 = vpop.eup %11500 }
 0x279   : > { %v5751_v55 = vpop.permute.xlu0 %5750  ;;  %vm6099_vm15 = vweird.f32 %v11501_v56 }
 0x27a   : > { %v5775_v43 = vmul.f32 %v12874_v39, %v5751_v55  ;;  %v12895_v55 = vpop.f32.mrf.mxu0  ;;  %v16941_v39 = vld [vmem:[#allocation56_spill] sm:$0xff]  ;;  %vm12949_vm0 = vmor %vm6098_vm14, %vm6099_vm15 }
 0x27b   : > { %v12904_v11 = vmul.f32 %v5427_v16, %v16941_v39  ;;  %v12915_v40 = vpop.f32.mrf.mxu1  ;;  %v6093_v39 = vmul.f32 %v11501_v56, %v12889_v33  ;;  %v12932_v16 = vpop.xlane.xlu1 %6028 }
 0x27c   : > { %v5791_v32 = vadd.f32 %v5775_v43, %v5727_v37  ;;  %v16940_v37 = vld [vmem:[#allocation54_spill] sm:$0xff]  ;;  %16943 = vst [vmem:[#allocation56_spill] sm:$0xff] %v12932_v16  ;;  %v5270_v16 = vmul.f32 %v12430_v19, %v12605_v5 }
 0x27d   : > { %v12901_v43 = vmul.f32 %v5407_v62, %v16940_v37  ;;  %16942 = vst [vmem:[#allocation54_spill] sm:$0xff] %v12913_v23  ;;  %v12919_v42 = vpop.f32.mrf.mxu2  ;;  %v6094_v38 = vmul.f32 %v11501_v56, %v6093_v39  ;;  %v10583_v37 = vld [vmem:[#allocation5 + $0x84c] sm:$0xf]  ;;  %v6040_v23 = vmul.f32 %v12624_v58, %v12430_v19  ;;  %v10078_v39 = vld [vmem:[#allocation5 + $0xb78] sm:$0xf0] }
 0x27e   : > { %v5887_v21 = vmul.f32 0.088388346, %v5791_v32  ;;  %v12924_v32 = vpop.f32.mrf.mxu3  ;;  %v10081_v12 = vor.u32 %v10679_v10, %v10078_v39  ;;  %v12947_v10 = vunpack.c.h.bf16 %v11259_v13 }
 0x280   : > { %v10787_v61 = vpack.c.bf16 %v5887_v21, %v5886_v31  ;;  %v6095_v21 = vmul.f32 0.5, %v6094_v38  ;;  %v8929_v38 = vor.u32 %v10391_v28, %v8926_v47  ;;  %3521 = vmatpush.bf16.msrb.mxu3 %v10081_v12  ;;  %16946 = vst [vmem:[#allocation91_spill] sm:$0xff] %v12947_v10  ;;  %v11252_v28 = vld [vmem:[#allocation7 + $0x20] sm:$0xff]   ;;  %v12955_v12 = vadd.f32 1.1920929e-07, %v5270_v16 }
 0x282   : > { %11265 = vst [vmem:[%s12683_s29 + $0x18] sm:$0xff] %v10787_v61   ;;  %v12917_v20 = vpop.f32.mrf.mxu0  ;;  %v6096_v6 = vsub.f32 1.5, %v6095_v21  ;;  %v9313_v21 = vor.u32 %v10487_v15, %v9310_v14  ;;  %3374 = vmatpush.bf16.msrb.mxu0 %v8929_v38  ;;  %v12957_v14 = vunpack.c.h.bf16 %v11252_v28  ;;  %vm5434_vm5 = vweird.f32 %v12955_v12 }
 0x283   : > { %5758 = vrot.lane.b32.xlu2 %v12901_v43, %s12008_s2  ;;  %5762 = vrot.lane.b32.xlu0 %v12904_v11, %s12008_s2  ;;  %v12928_v8 = vpop.f32.mrf.mxu1 }
 0x284   : > { %v6097_v47 = vmul.f32 %v11501_v56, %v6096_v6  ;;  %3423 = vmatpush.bf16.msrb.mxu1 %v9313_v21  ;;  %16950 = vst [vmem:[#allocation93_spill] sm:$0xff] %v12957_v14  ;;  %v3236_v6 = vadd.f32 %v12850_v50, %v12856_v2  ;;  %v5729_v21 = vmul.f32 %v12957_v14, %v12694_v22  ;;  %v16953_v50 = vld [vmem:[#allocation61_spill] sm:$0xff] }
 0x285   : > { %v12930_v62 = vpop.f32.mrf.mxu2  ;;  %v10379_v14 = vld [vmem:[#allocation5 + $0x1ec] sm:$0xf] }
 0x286   : > { %v12934_v61 = vpop.f32.mrf.mxu3  ;;  %v6101_v16 = vsel %vm12949_vm0, %v11501_v56, %v6097_v47 }
 0x287   : > { %v12979_v2 = vmul.f32 %v6101_v16, %v16953_v50  ;;  %v10030_v50 = vld [vmem:[#allocation5 + $0xb18] sm:$0xf0] }
 0x288   : > { %v5755_v39 = vpop.permute.xlu1 %5754 }
 0x289   : > { %v5777_v38 = vmul.f32 %v12947_v10, %v5755_v39  ;;  %16954 = vst [vmem:[#allocation61_spill] sm:$0xff] %v12979_v2  ;;  %v8878_v10 = vld [vmem:[#allocation5 + $0x218] sm:$0xf0] }
 0x28a   : > { %v12926_v31 = vpop.f32.mrf.mxu0 }
 0x28b   : > { %6797 = vadd.xlane.f32.xlu1 %v6780_v29  ;;  %v9697_v29 = vor.u32 %v10583_v37, %v9694_v4  ;;  %v12943_v4 = vpop.f32.mrf.mxu1  ;;  %v12945_v37 = vadd.f32 1.1920929e-07, %v6040_v23  ;;  %v3077_v23 = vadd.f32 %v12813_v1, %v12824_v0  ;;  %v3285_v0 = vadd.f32 %v12861_v30, %v3236_v6  ;;  %v10667_v30 = vld [vmem:[#allocation5 + $0xaec] sm:$0xf] }
 0x28c   : > { %16945 = vst [vmem:[#allocation90_spill] sm:$0xff] %v12943_v4  ;;  %v5793_v39 = vadd.f32 %v5777_v38, %v5729_v21 }
 0x28d   : > { %3472 = vmatpush.bf16.msrb.mxu2 %v9697_v29  ;;  %v12953_v33 = vpop.f32.mrf.mxu2  ;;  %11502 = vrsqrt.f32 %v12945_v37  ;;  %v3126_v1 = vadd.f32 %v12828_v59, %v3077_v23  ;;  %v10571_v59 = vld [vmem:[#allocation5 + $0x7ec] sm:$0xf]  ;;  %v9646_v23 = vld [vmem:[#allocation5 + $0x818] sm:$0xf0]  ;;  %vm6078_vm2 = vweird.f32 %v12945_v37 }
 0x28e   : > { %16949 = vst [vmem:[#allocation92_spill] sm:$0xff] %v12953_v33  ;;  %v12965_v29 = vpop.f32.mrf.mxu3  ;;  %11504 = vrsqrt.f32 %v12955_v12  ;;  %v12974_v33 = vunpack.c.l.bf16 %v11252_v28  ;;  %v9649_v21 = vor.u32 %v10571_v59, %v9646_v23  ;;  %v9598_v59 = vld [vmem:[#allocation5 + $0x7b8] sm:$0xf0]  ;;  %v10655_v23 = vld [vmem:[#allocation5 + $0xa8c] sm:$0xf] }
 0x28f   : > { %16951 = vst [vmem:[#allocation94_spill] sm:$0xff] %v12965_v29  ;;  %v12981_v29 = vunpack.c.l.bf16 %v11259_v13  ;;  %v12990_v16 = vadd.f32 %v12838_v17, %v3126_v1  ;;  %v12993_v13 = vadd.f32 %v12863_v41, %v3285_v0 }
 0x290   : > { %16952 = vst [vmem:[#allocation95_spill] sm:$0xff] %v12974_v33  ;;  %v5728_v22 = vmul.f32 %v12974_v33, %v12771_v36  ;;  %v5889_v36 = vmul.f32 0.088388346, %v5793_v39  ;;  %v10033_v33 = vor.u32 %v10667_v30, %v10030_v50  ;;  %v9982_v39 = vld [vmem:[#allocation5 + $0xab8] sm:$0xf0] }
 0x291   : > { %16955 = vst [vmem:[#allocation96_spill] sm:$0xff] %v12981_v29  ;;  %3473 = vmatpush.bf16.msrb.mxu2 %v9649_v21  ;;  %v10367_v30 = vld [vmem:[#allocation5 + $0x18c] sm:$0xf] }
 0x292   : > { %v12941_v58 = vpop.f32.mrf.mxu0  ;;  %3522 = vmatpush.bf16.msrb.mxu3 %v10033_v33 }
 0x293   : > { %16944 = vst [vmem:[#allocation89_spill] sm:$0xff] %v12941_v58  ;;  %v3250_v47 = vpop.f32.mrf.mxu1  ;;  %v12985_v5 = vpop.eup %11502  ;;  %v8881_v58 = vor.u32 %v10379_v14, %v8878_v10  ;;  %v8830_v10 = vld [vmem:[#allocation5 + $0x1b8] sm:$0xf0] }
 0x294   : > { %v12996_v4 = vpop.eup %11504  ;;  %v6073_v17 = vmul.f32 %v12985_v5, %v12945_v37  ;;  %v8833_v33 = vor.u32 %v10367_v30, %v8830_v10  ;;  %vm6079_vm1 = vweird.f32 %v12985_v5  ;;  %v9934_v10 = vld [vmem:[#allocation5 + $0xa58] sm:$0xf0] }
 0x295   : > { %3375 = vmatpush.bf16.msrb.mxu0 %v8881_v58  ;;  %v5429_v21 = vmul.f32 %v12996_v4, %v12955_v12  ;;  %v6779_v58 = vmul.f32 %v12993_v13, %v12993_v13  ;;  %vm6080_vm3 = vmor %vm6078_vm2, %vm6079_vm1  ;;  %vm5435_vm4 = vweird.f32 %v12996_v4  ;;  %v16957_v37 = vld [vmem:[#allocation59_spill] sm:$0xff] }
 0x296   : > { %v3348_v0 = vpop.f32.mrf.mxu3  ;;  %vm5436_vm6 = vmor %vm5434_vm5, %vm5435_vm4 }
 0x299   : > { %3376 = vmatpush.bf16.msrb.mxu0 %v8833_v33 }
 0x29a   : > { %v3201_v56 = vpop.f32.mrf.mxu0 }
 0x29b   : > { %v3251_v6 = vadd.f32 %v3250_v47, %v3201_v56  ;;  %v9262_v56 = vld [vmem:[#allocation5 + $0x518] sm:$0xf0] }
 0x29c   : > { %v9265_v1 = vor.u32 %v10475_v18, %v9262_v56  ;;  %v10463_v18 = vld [vmem:[#allocation5 + $0x48c] sm:$0xf]  ;;  %v6074_v56 = vmul.f32 %v12985_v5, %v6073_v17  ;;  %v9550_v17 = vld [vmem:[#allocation5 + $0x758] sm:$0xf0] }
 0x29d   : > { %v12959_v15 = vpop.xlane.xlu2 %6026 }
 0x29e   : > { %3424 = vmatpush.bf16.msrb.mxu1 %v9265_v1  ;;  %v6075_v1 = vmul.f32 0.5, %v6074_v56 }
 0x2a4   : > { %6524 = vrot.lane.b32.xlu1 %v12979_v2, %s12008_s2  ;;  %v3299_v2 = vpop.f32.mrf.mxu2 }
 0x2a5   : > { %v5753_v28 = vpop.permute.xlu2 %5752  ;;  %v3300_v47 = vadd.f32 %v3299_v2, %v3251_v6  ;;  %v6007_v2 = vmul.f32 %v12990_v16, %v12990_v16  ;;  %v9985_v6 = vor.u32 %v10655_v23, %v9982_v39  ;;  %v10547_v39 = vld [vmem:[#allocation5 + $0x72c] sm:$0xf] }
 0x2a6   : > { %v5776_v38 = vmul.f32 %v12981_v29, %v5753_v28  ;;  %v10559_v28 = vld [vmem:[#allocation5 + $0x78c] sm:$0xf]  ;;  %v9553_v30 = vor.u32 %v10547_v39, %v9550_v17  ;;  %v3350_v39 = vpop.f32.mrf.mxu3 }
 0x2a7   : > { %v13000_v29 = vadd.f32 %v3348_v0, %v3300_v47  ;;  %3523 = vmatpush.bf16.msrb.mxu3 %v9985_v6 }
 0x2a8   : > { %v5792_v41 = vadd.f32 %v5776_v38, %v5728_v22  ;;  %v9601_v22 = vor.u32 %v10559_v28, %v9598_v59  ;;  %v9214_v38 = vld [vmem:[#allocation5 + $0x4b8] sm:$0xf0]  ;;  %v6076_v28 = vsub.f32 1.5, %v6075_v1 }
 0x2a9   : > { %16956 = vst [vmem:[#allocation97_spill] sm:$0xff] %v13000_v29  ;;  %v9217_v50 = vor.u32 %v10463_v18, %v9214_v38  ;;  %v10451_v18 = vld [vmem:[#allocation5 + $0x42c] sm:$0xf]  ;;  %v9166_v38 = vld [vmem:[#allocation5 + $0x458] sm:$0xf0] }
 0x2aa   : > { %v5888_v14 = vmul.f32 0.088388346, %v5792_v41  ;;  %3474 = vmatpush.bf16.msrb.mxu2 %v9601_v22  ;;  %v5430_v41 = vmul.f32 %v12996_v4, %v5429_v21  ;;  %v6077_v23 = vmul.f32 %v12985_v5, %v6076_v28  ;;  %v3252_v28 = vpop.f32.mrf.mxu1 }
 0x2ab   : > { %3425 = vmatpush.bf16.msrb.mxu1 %v9217_v50 }
 0x2ac   : > { %v10792_v47 = vpack.c.bf16 %v5889_v36, %v5888_v14  ;;  %6038 = vadd.xlane.f32.xlu2 %v6007_v2  ;;  %v5431_v0 = vmul.f32 0.5, %v5430_v41  ;;  %v10643_v36 = vld [vmem:[#allocation5 + $0xa2c] sm:$0xf]  ;;  %v8782_v2 = vld [vmem:[#allocation5 + $0x158] sm:$0xf0]  ;;  %v6081_v33 = vsel %vm6080_vm3, %v12985_v5, %v6077_v23  ;;  %v6046_v5 = vmul.f32 %v12797_v7, %v12430_v19 }
 0x2ad   : > { %6795 = vadd.xlane.f32.xlu0 %v6779_v58  ;;  %v10355_v14 = vld [vmem:[#allocation5 + $0x12c] sm:$0xf]  ;;  %v9937_v22 = vor.u32 %v10643_v36, %v9934_v10  ;;  %v9169_v58 = vor.u32 %v10451_v18, %v9166_v38  ;;  %v13019_v50 = vmul.f32 %v6081_v33, %v16957_v37  ;;  %v8734_v38 = vld [vmem:[#allocation5 + $0xf8] sm:$0xf0] }
 0x2ae   : > { %11266 = vst [vmem:[%s12683_s29 + $0x20] sm:$0xff] %v10792_v47   ;;  %v5432_v59 = vsub.f32 1.5, %v5431_v0  ;;  %v8785_v6 = vor.u32 %v10355_v14, %v8782_v2  ;;  %3475 = vmatpush.bf16.msrb.mxu2 %v9553_v30  ;;  %v3246_v47 = vadd.f32 %v12928_v8, %v12926_v31  ;;  %v16958_v41 = vld [vmem:[#allocation57_spill] sm:$0xff]  ;;  %v3203_v0 = vpop.f32.mrf.mxu0  ;;  %v6043_v14 = vmul.f32 %v12707_v46, %v12430_v19  ;;  %v9118_v37 = vld [vmem:[#allocation5 + $0x3f8] sm:$0xf0] }
 0x2af   : > { %3524 = vmatpush.bf16.msrb.mxu3 %v9937_v22  ;;  %3426 = vmatpush.bf16.msrb.mxu1 %v9169_v58  ;;  %v3253_v8 = vadd.f32 %v3252_v28, %v3203_v0  ;;  %v10535_v30 = vld [vmem:[#allocation5 + $0x6cc] sm:$0xf] }
 0x2b0   : > { %v5433_v21 = vmul.f32 %v12996_v4, %v5432_v59  ;;  %3377 = vmatpush.bf16.msrb.mxu0 %v8785_v6  ;;  %v3295_v12 = vadd.f32 %v12930_v62, %v3246_v47  ;;  %v3301_v59 = vpop.f32.mrf.mxu2  ;;  %v10631_v10 = vld [vmem:[#allocation5 + $0x9cc] sm:$0xf]  ;;  %v9886_v6 = vld [vmem:[#allocation5 + $0x9f8] sm:$0xf0]  ;;  %v13056_v0 = vadd.f32 1.1920929e-07, %v6043_v14 }
 0x2b1   : > { %v3302_v23 = vadd.f32 %v3301_v59, %v3253_v8  ;;  %v10343_v18 = vld [vmem:[#allocation5 + $0xcc] sm:$0xf] }
 0x2b2   : > { %v5437_v56 = vsel %vm5436_vm6, %v12996_v4, %v5433_v21  ;;  %v13034_v4 = vadd.f32 1.1920929e-07, %v6046_v5  ;;  %v13037_v31 = vadd.f32 %v12934_v61, %v3295_v12  ;;  %v9502_v61 = vld [vmem:[#allocation5 + $0x6f8] sm:$0xf0]  ;;  %v9889_v21 = vor.u32 %v10631_v10, %v9886_v6  ;;  %v10439_v33 = vld [vmem:[#allocation5 + $0x3cc] sm:$0xf]  ;;  %v13052_v5 = vpop.xlane.xlu0 %6030 }
 0x2b3   : > { %v13027_v1 = vmul.f32 %v5437_v56, %v16958_v41  ;;  %v13042_v62 = vadd.f32 %v3350_v39, %v3302_v23  ;;  %v9505_v22 = vor.u32 %v10535_v30, %v9502_v61  ;;  %v8737_v58 = vor.u32 %v10343_v18, %v8734_v38  ;;  %v10523_v56 = vld [vmem:[#allocation5 + $0x66c] sm:$0xf]  ;;  %v9454_v41 = vld [vmem:[#allocation5 + $0x698] sm:$0xf0]  ;;  %v3255_v30 = vpop.f32.mrf.mxu1 }
 0x2b4   : > { %11506 = vrsqrt.f32 %v13034_v4  ;;  %v6783_v7 = vmul.f32 %v13037_v31, %v13037_v31  ;;  %v9121_v47 = vor.u32 %v10439_v33, %v9118_v37  ;;  %3525 = vmatpush.bf16.msrb.mxu3 %v9889_v21  ;;  %v9457_v46 = vor.u32 %v10523_v56, %v9454_v41  ;;  %v11260_v8 = vld [vmem:[#allocation8 + $0x28] sm:$0xff]   ;;  %v9838_v10 = vld [vmem:[#allocation5 + $0x998] sm:$0xf0] }
 0x2b5   : > { %16959 = vst [vmem:[#allocation59_spill] sm:$0xff] %v13042_v62  ;;  %v6786_v36 = vmul.f32 %v13042_v62, %v13042_v62  ;;  %3476 = vmatpush.bf16.msrb.mxu2 %v9505_v22  ;;  %3378 = vmatpush.bf16.msrb.mxu0 %v8737_v58  ;;  %v6041_v12 = vmul.f32 %v12697_v3, %v12430_v19  ;;  %11508 = vrsqrt.f32 %v13056_v0  ;;  %v11253_v39 = vld [vmem:[#allocation7 + $0x28] sm:$0xff]   ;;  %v13068_v6 = vunpack.c.l.bf16 %v11260_v8  ;;  %v8686_v38 = vld [vmem:[#allocation5 + $0x98] sm:$0xf0] }
 0x2b6   : > { %3427 = vmatpush.bf16.msrb.mxu1 %v9121_v47  ;;  %v10619_v3 = vld [vmem:[#allocation5 + $0x96c] sm:$0xf]  ;;  %v3241_v22 = vadd.f32 %v12891_v44, %v12895_v55  ;;  %v9070_v58 = vld [vmem:[#allocation5 + $0x398] sm:$0xf0]  ;;  %v13071_v41 = vunpack.c.l.bf16 %v11253_v39  ;;  %vm6138_vm8 = vweird.f32 %v13034_v4  ;;  %vm6108_vm11 = vweird.f32 %v13056_v0 }
 0x2b7   : > { %v13059_v59 = vadd.f32 1.1920929e-07, %v6041_v12  ;;  %16960 = vst [vmem:[#allocation57_spill] sm:$0xff] %v13068_v6  ;;  %v9841_v18 = vor.u32 %v10619_v3, %v9838_v10  ;;  %v10427_v21 = vld [vmem:[#allocation5 + $0x36c] sm:$0xf] }
 0x2b8   : > { %v3304_v33 = vpop.f32.mrf.mxu2  ;;  %v9073_v37 = vor.u32 %v10427_v21, %v9070_v58  ;;  %16961 = vst [vmem:[#allocation98_spill] sm:$0xff] %v13071_v41 }
 0x2b9   : > { %3477 = vmatpush.bf16.msrb.mxu2 %v9457_v46  ;;  %3526 = vmatpush.bf16.msrb.mxu3 %v9841_v18  ;;  %v3353_v46 = vpop.f32.mrf.mxu3  ;;  %11510 = vrsqrt.f32 %v13059_v59  ;;  %vm6088_vm14 = vweird.f32 %v13059_v59 }
 0x2ba   : > { %v13044_v17 = vpop.eup %11506  ;;  %3428 = vmatpush.bf16.msrb.mxu1 %v9073_v37  ;;  %v11261_v37 = vld [vmem:[#allocation8 + $0x30] sm:$0xff]  }
 0x2bb   : > { %v6133_v2 = vmul.f32 %v13044_v17, %v13034_v4  ;;  %v13077_v55 = vpop.eup %11508  ;;  %vm6139_vm7 = vweird.f32 %v13044_v17  ;;  %v10607_v4 = vld [vmem:[#allocation5 + $0x90c] sm:$0xf] }
 0x2bc   : > { %vm13106_vm9 = vmor %vm6138_vm8, %vm6139_vm7  ;;  %vm6109_vm10 = vweird.f32 %v13077_v55 }
 0x2bd   : > { %v6134_v28 = vmul.f32 %v13044_v17, %v6133_v2  ;;  %v10331_v2 = vld [vmem:[#allocation5 + $0x6c] sm:$0xf]  ;;  %vm6110_vm12 = vmor %vm6108_vm11, %vm6109_vm10 }
 0x2bf   : > { %v6135_v23 = vmul.f32 0.5, %v6134_v28  ;;  %v13073_v28 = vunpack.c.h.bf16 %v11253_v39  ;;  %v6103_v39 = vmul.f32 %v13077_v55, %v13056_v0  ;;  %v13102_v18 = vpop.eup %11510  ;;  %v13158_v0 = vpop.f32.mrf.mxu1 }
 0x2c0   : > { %vm6089_vm13 = vweird.f32 %v13102_v18 }
 0x2c1   : > { %6520 = vrot.lane.b32.xlu0 %v13019_v50, %s12008_s2  ;;  %v6136_v12 = vsub.f32 1.5, %v6135_v23  ;;  %16962 = vst [vmem:[#allocation99_spill] sm:$0xff] %v13073_v28  ;;  %v5730_v23 = vmul.f32 %v13071_v41, %v12776_v45  ;;  %v10511_v45 = vld [vmem:[#allocation5 + $0x60c] sm:$0xf]  ;;  %vm6090_vm15 = vmor %vm6088_vm14, %vm6089_vm13 }
 0x2c3   : > { %v6137_v10 = vmul.f32 %v13044_v17, %v6136_v12  ;;  %v6083_v12 = vmul.f32 %v13102_v18, %v13059_v59  ;;  %v16973_v59 = vld [vmem:[#allocation60_spill] sm:$0xff] }
 0x2c4   : > { %5764 = vrot.lane.b32.xlu2 %v13027_v1, %s12008_s2 }
 0x2ce   : > { %6803 = vadd.xlane.f32.xlu1 %v6783_v7  ;;  %v3243_v7 = vadd.f32 %v12915_v40, %v12917_v20  ;;  %v5757_v40 = vpop.permute.xlu0 %5756  ;;  %v8689_v20 = vor.u32 %v10331_v2, %v8686_v38 }
 0x2d0   : > { %v3292_v47 = vadd.f32 %v12919_v42, %v3243_v7  ;;  %3379 = vmatpush.bf16.msrb.mxu0 %v8689_v20  ;;  %v13082_v42 = vunpack.c.h.bf16 %v11260_v8 }
 0x2d2   : > { %16964 = vst [vmem:[#allocation101_spill] sm:$0xff] %v13082_v42  ;;  %v13085_v7 = vadd.f32 %v12924_v32, %v3292_v47  ;;  %v5731_v32 = vmul.f32 %v13073_v28, %v12901_v43  ;;  %v6141_v43 = vsel %vm13106_vm9, %v13044_v17, %v6137_v10 }
 0x2d3   : > { %v13121_v10 = vmul.f32 %v6141_v43, %v12597_v63  ;;  %v13136_v43 = vunpack.c.h.bf16 %v11261_v37 }
 0x2d4   : > { %16965 = vst [vmem:[#allocation102_spill] sm:$0xff] %v13085_v7  ;;  %v6782_v21 = vmul.f32 %v13085_v7, %v13085_v7 }
 0x2d5   : > { %16971 = vst [vmem:[#allocation106_spill] sm:$0xff] %v13136_v43 }
 0x2d6   : > { %6809 = vadd.xlane.f32.xlu1 %v6786_v36  ;;  %v3206_v36 = vpop.f32.mrf.mxu0 }
 0x2d7   : > { %v3256_v14 = vadd.f32 %v3255_v30, %v3206_v36  ;;  %v3290_v36 = vadd.f32 %v12898_v34, %v3241_v22  ;;  %v5778_v30 = vmul.f32 %v13068_v6, %v5757_v40  ;;  %v9406_v22 = vld [vmem:[#allocation5 + $0x638] sm:$0xf0] }
 0x2d8   : > { %v9409_v58 = vor.u32 %v10511_v45, %v9406_v22  ;;  %v9790_v40 = vld [vmem:[#allocation5 + $0x938] sm:$0xf0]  ;;  %v13123_v45 = vunpack.c.l.bf16 %v11261_v37 }
 0x2d9   : > { %v3305_v56 = vadd.f32 %v3304_v33, %v3256_v14  ;;  %v13094_v34 = vadd.f32 %v12907_v9, %v3290_v36  ;;  %v13096_v14 = vpop.xlane.xlu1 %6034  ;;  %v5794_v8 = vadd.f32 %v5778_v30, %v5730_v23  ;;  %v6104_v33 = vmul.f32 %v13077_v55, %v6103_v39  ;;  %v10319_v36 = vld [vmem:[#allocation5 + $0xc] sm:$0xf]  ;;  %v8638_v30 = vld [vmem:[#allocation5 + $0x38] sm:$0xf0]  ;;  %v11254_v39 = vld [vmem:[#allocation7 + $0x30] sm:$0xff]  }
 0x2da   : > { %3478 = vmatpush.bf16.msrb.mxu2 %v9409_v58  ;;  %v10415_v23 = vld [vmem:[#allocation5 + $0x30c] sm:$0xf]  ;;  %16968 = vst [vmem:[#allocation103_spill] sm:$0xff] %v13123_v45  ;;  %v13130_v9 = vunpack.c.l.bf16 %v11254_v39  ;;  %v13133_v63 = vunpack.c.h.bf16 %v11254_v39 }
 0x2db   : > { %v13075_v44 = vadd.f32 %v3353_v46, %v3305_v56  ;;  %v5890_v20 = vmul.f32 0.088388346, %v5794_v8  ;;  %v6781_v47 = vmul.f32 %v13094_v34, %v13094_v34  ;;  %v9793_v46 = vor.u32 %v10607_v4, %v9790_v40 }
 0x2dc   : > { %v8641_v8 = vor.u32 %v10319_v36, %v8638_v30  ;;  %16969 = vst [vmem:[#allocation104_spill] sm:$0xff] %v13130_v9  ;;  %v5732_v40 = vmul.f32 %v13130_v9, %v12787_v60 }
 0x2dd   : > { %16963 = vst [vmem:[#allocation100_spill] sm:$0xff] %v13075_v44  ;;  %3527 = vmatpush.bf16.msrb.mxu3 %v9793_v46  ;;  %3479 = vmatmul.bf16.vlgmr.msrb.gmra.mxu2 %v12190_v54 }
 0x2de   : > { %v13064_v61 = vpop.xlane.xlu2 %6032  ;;  %3380 = vmatpush.bf16.msrb.mxu0 %v8641_v8  ;;  %16970 = vst [vmem:[#allocation105_spill] sm:$0xff] %v13133_v63 }
 0x2e0   : > { %3528 = vmatmul.bf16.vlgmr.msrb.gmra.mxu3 %v12192_v57 }
 0x2e1   : > { %3381 = vmatmul.bf16.vlgmr.msrb.gmra.mxu0 %v12186_v48 }
 0x2e2   : > { %v13118_v17 = vpop.xlane.xlu0 %6036 }
 0x2e6   : > { %v5759_v3 = vpop.permute.xlu2 %5758 }
 0x2e7   : > { %v5779_v2 = vmul.f32 %v13082_v42, %v5759_v3 }
 0x2e9   : > { %v5795_v38 = vadd.f32 %v5779_v2, %v5731_v32  ;;  %v9022_v32 = vld [vmem:[#allocation5 + $0x338] sm:$0xf0]  ;;  %v6105_v2 = vmul.f32 0.5, %v6104_v33 }
 0x2ea   : > { %v9025_v22 = vor.u32 %v10415_v23, %v9022_v32  ;;  %v13156_v32 = vpop.f32.mrf.mxu0 }
 0x2eb   : > { %v5891_v56 = vmul.f32 0.088388346, %v5795_v38  ;;  %6801 = vadd.xlane.f32.xlu0 %v6782_v21  ;;  %v5761_v38 = vpop.permute.xlu1 %5760  ;;  %v6084_v21 = vmul.f32 %v13102_v18, %v6083_v12  ;;  %v6106_v58 = vsub.f32 1.5, %v6105_v2  ;;  %v13165_v2 = vpop.f32.mrf.mxu2 }
 0x2ec   : > { %3429 = vmatpush.bf16.msrb.mxu1 %v9025_v22  ;;  %v5780_v33 = vmul.f32 %v13123_v45, %v5761_v38  ;;  %v13174_v38 = vpop.f32.mrf.mxu3 }
 0x2ed   : > { %v10797_v3 = vpack.c.bf16 %v5891_v56, %v5890_v20  ;;  %6799 = vadd.xlane.f32.xlu2 %v6781_v47  ;;  %v6085_v4 = vmul.f32 0.5, %v6084_v21  ;;  %v5733_v20 = vmul.f32 %v13133_v63, %v12904_v11  ;;  %v6107_v12 = vmul.f32 %v13077_v55, %v6106_v58  ;;  %3484 = vmatmul.bf16.gmra.mxu2 %v12210_v26  ;;  %v3260_v58 = vpop.f32.mrf.mxu1 }
 0x2ee   : > { %v5796_v47 = vadd.f32 %v5780_v33, %v5732_v40  ;;  %v6049_v21 = vmul.f32 %v12959_v15, %v12430_v19  ;;  %v16975_v15 = vld [vmem:[#allocation29_spill] sm:$0xff] }
 0x2ef   : > { %11267 = vst [vmem:[%s12683_s29 + $0x28] sm:$0xff] %v10797_v3   ;;  %6532 = vrot.lane.b32.xlu1 %v13121_v10, %s12008_s2  ;;  %3430 = vmatmul.bf16.vlgmr.msrb.gmra.mxu1 %v12188_v53  ;;  %v6086_v37 = vsub.f32 1.5, %v6085_v4  ;;  %v6111_v60 = vsel %vm6110_vm12, %v13077_v55, %v6107_v12  ;;  %v16972_v3 = vld [vmem:[#allocation62_spill] sm:$0xff] }
 0x2f0   : > { %v5892_v30 = vmul.f32 0.088388346, %v5796_v47  ;;  %v13152_v8 = vmul.f32 %v6111_v60, %v16972_v3  ;;  %3533 = vmatmul.bf16.gmra.mxu3 %v12212_v27  ;;  %v6065_v4 = vadd.f32 1.1920929e-07, %v6049_v21  ;;  %v16979_v21 = vld [vmem:[#allocation90_spill] sm:$0xff] }
 0x2f1   : > { %v6087_v11 = vmul.f32 %v13102_v18, %v6086_v37  ;;  %3386 = vmatmul.bf16.gmra.mxu0 %v12206_v24 }
 0x2f2   : > { %11512 = vrsqrt.f32 %v6065_v4  ;;  %vm6168_vm1 = vweird.f32 %v6065_v4 }
 0x2f3   : > { %v6091_v55 = vsel %vm6090_vm15, %v13102_v18, %v6087_v11  ;;  %v3211_v18 = vpop.f32.mrf.mxu0  ;;  %v3309_v40 = vpop.f32.mrf.mxu2  ;;  %v16977_v11 = vld [vmem:[#allocation34_spill] sm:$0xff] }
 0x2f4   : > { %v13169_v22 = vmul.f32 %v6091_v55, %v16973_v59  ;;  %v3261_v33 = vadd.f32 %v3260_v58, %v3211_v18  ;;  %v16978_v59 = vld [vmem:[#allocation89_spill] sm:$0xff]  ;;  %v11255_v58 = vld [vmem:[#allocation7 + $0x38] sm:$0xff]  }
 0x2f5   : > { %v5763_v56 = vpop.permute.xlu0 %5762  ;;  %v3248_v18 = vadd.f32 %v16979_v21, %v16978_v59  ;;  %v16986_v21 = vld [vmem:[#allocation92_spill] sm:$0xff] }
 0x2f6   : > { %v5781_v46 = vmul.f32 %v13136_v43, %v5763_v56  ;;  %v3358_v56 = vpop.f32.mrf.mxu3 }
 0x2f8   : > { %v5797_v36 = vadd.f32 %v5781_v46, %v5733_v20  ;;  %v3310_v20 = vadd.f32 %v3309_v40, %v3261_v33  ;;  %v6045_v46 = vmul.f32 %v12784_v35, %v12430_v19  ;;  %v13188_v37 = vpop.eup %11512  ;;  %v11262_v35 = vld [vmem:[#allocation8 + $0x38] sm:$0xff]  }
 0x2f9   : > { %v13204_v33 = vunpack.c.h.bf16 %v11262_v35  ;;  %v16981_v40 = vld [vmem:[#allocation35_spill] sm:$0xff]  ;;  %vm6169_vm0 = vweird.f32 %v13188_v37 }
 0x2fa   : > { %v5893_v23 = vmul.f32 0.088388346, %v5797_v36  ;;  %v13180_v47 = vadd.f32 %v3358_v56, %v3310_v20  ;;  %v13190_v36 = vadd.f32 1.1920929e-07, %v6045_v46  ;;  %v5767_v46 = vpop.permute.xlu1 %5766  ;;  %vm6170_vm2 = vmor %vm6168_vm1, %vm6169_vm0 }
 0x2fb   : > { %16980 = vst [vmem:[#allocation60_spill] sm:$0xff] %v13204_v33 }
 0x2fc   : > { %v10802_v39 = vpack.c.bf16 %v5893_v23, %v5892_v30  ;;  %16974 = vst [vmem:[#allocation62_spill] sm:$0xff] %v13180_v47  ;;  %v6789_v12 = vmul.f32 %v13180_v47, %v13180_v47  ;;  %v6163_v30 = vmul.f32 %v13188_v37, %v6065_v4  ;;  %v16976_v23 = vld [vmem:[#allocation79_spill] sm:$0xff]  ;;  %11514 = vrsqrt.f32 %v13190_v36 }
 0x2fd   : > { %3489 = vmatmul.bf16.gmra.mxu2 %v12230_v51  ;;  %v6044_v60 = vmul.f32 %v16976_v23, %v12430_v19  ;;  %v13213_v23 = vunpack.c.l.bf16 %v11255_v58  ;;  %v3297_v47 = vadd.f32 %v16986_v21, %v3248_v18  ;;  %v6785_v18 = vmul.f32 %v13000_v29, %v13000_v29 }
 0x2fe   : > { %11268 = vst [vmem:[%s12683_s29 + $0x30] sm:$0xff] %v10802_v39   ;;  %v6164_v39 = vmul.f32 %v13188_v37, %v6163_v30  ;;  %v16983_v30 = vld [vmem:[#allocation32_spill] sm:$0xff]  ;;  %v13239_v24 = vpop.f32.mrf.mxu3  ;;  %vm6128_vm4 = vweird.f32 %v13190_v36 }
 0x2ff   : > { %6526 = vrot.lane.b32.xlu0 %v13152_v8, %s12008_s2  ;;  %3435 = vmatmul.bf16.gmra.mxu1 %v12208_v25  ;;  %v13198_v3 = vadd.f32 1.1920929e-07, %v6044_v60  ;;  %16984 = vst [vmem:[#allocation89_spill] sm:$0xff] %v13213_v23  ;;  %v16985_v60 = vld [vmem:[#allocation33_spill] sm:$0xff] }
 0x300   : > { %3538 = vmatmul.bf16.gmra.mxu3 %v12232_v52  ;;  %v6165_v56 = vmul.f32 0.5, %v6164_v39  ;;  %v13228_v52 = vpop.f32.mrf.mxu2 }
 0x301   : > { %3391 = vmatmul.bf16.gmra.mxu0 %v12226_v49  ;;  %11516 = vrsqrt.f32 %v13198_v3  ;;  %v13224_v49 = vpop.f32.mrf.mxu1  ;;  %vm6118_vm7 = vweird.f32 %v13198_v3 }
 0x302   : > { %v13207_v20 = vpop.eup %11514  ;;  %v6166_v39 = vsub.f32 1.5, %v6165_v56 }
 0x303   : > { %v6123_v59 = vmul.f32 %v13207_v20, %v13190_v36  ;;  %vm6129_vm3 = vweird.f32 %v13207_v20 }
 0x304   : > { %vm6130_vm5 = vmor %vm6128_vm4, %vm6129_vm3 }
 0x305   : > { %6522 = vrot.lane.b32.xlu2 %v13169_v22, %s12008_s2 }
 0x306   : > { %v3363_v48 = vpop.f32.mrf.mxu3 }
 0x307   : > { %v11517_v25 = vpop.eup %11516 }
 0x308   : > { %v3314_v26 = vpop.f32.mrf.mxu2  ;;  %vm6119_vm6 = vweird.f32 %v11517_v25 }
 0x309   : > { %vm6120_vm8 = vmor %vm6118_vm7, %vm6119_vm6 }
 0x30d   : > { %3494 = vmatmul.bf16.gmra.mxu2 %v16977_v11  ;;  %v13220_v11 = vunpack.c.l.bf16 %v11262_v35  ;;  %v6124_v35 = vmul.f32 %v13207_v20, %v6123_v59 }
 0x30f   : > { %3440 = vmatmul.bf16.gmra.mxu1 %v16975_v15  ;;  %16987 = vst [vmem:[#allocation90_spill] sm:$0xff] %v13220_v11  ;;  %v13222_v15 = vpop.f32.mrf.mxu0  ;;  %v6125_v29 = vmul.f32 0.5, %v6124_v35 }
 0x310   : > { %3543 = vmatmul.bf16.gmra.mxu3 %v16981_v40  ;;  %v5783_v40 = vmul.f32 %v13204_v33, %v5767_v46  ;;  %v16989_v46 = vld [vmem:[#allocation94_spill] sm:$0xff] }
 0x311   : > { %3396 = vmatmul.bf16.gmra.mxu0 %v16983_v30  ;;  %v16988_v30 = vld [vmem:[#allocation55_spill] sm:$0xff]  ;;  %v13236_v56 = vadd.f32 %v16989_v46, %v3297_v47  ;;  %v6126_v4 = vsub.f32 1.5, %v6125_v29 }
 0x313   : > { %v6784_v47 = vmul.f32 %v13236_v56, %v13236_v56  ;;  %v6127_v29 = vmul.f32 %v13207_v20, %v6126_v4  ;;  %v6052_v4 = vmul.f32 %v13064_v61, %v12430_v19  ;;  %v17006_v61 = vld [vmem:[#allocation45_spill] sm:$0xff] }
 0x319   : > { %6815 = vadd.xlane.f32.xlu1 %v6789_v12  ;;  %v13209_v12 = vunpack.c.h.bf16 %v11255_v58 }
 0x31b   : > { %16982 = vst [vmem:[#allocation79_spill] sm:$0xff] %v13209_v12  ;;  %v5735_v58 = vmul.f32 %v13209_v12, %v16988_v30  ;;  %v6167_v30 = vmul.f32 %v13188_v37, %v6166_v39 }
 0x31d   : > { %v5799_v21 = vadd.f32 %v5783_v40, %v5735_v58  ;;  %v6171_v40 = vsel %vm6170_vm2, %v13188_v37, %v6167_v30  ;;  %v3216_v58 = vpop.f32.mrf.mxu0  ;;  %v16995_v30 = vld [vmem:[#allocation37_spill] sm:$0xff] }
 0x31f   : > { %v13200_v55 = vpop.xlane.xlu2 %6038  ;;  %3445 = vmatmul.bf16.gmra.mxu1 %v16985_v60  ;;  %v5734_v60 = vmul.f32 %v13213_v23, %v13027_v1  ;;  %v5895_v27 = vmul.f32 0.088388346, %v5799_v21 }
 0x327   : > { %v5765_v51 = vpop.permute.xlu2 %5764 }
 0x328   : > { %v5782_v62 = vmul.f32 %v13220_v11, %v5765_v51  ;;  %v6113_v51 = vmul.f32 %v11517_v25, %v13198_v3  ;;  %v3218_v3 = vpop.f32.mrf.mxu0 }
 0x329   : > { %6807 = vadd.xlane.f32.xlu0 %v6785_v18  ;;  %v3265_v18 = vpop.f32.mrf.mxu1 }
 0x32a   : > { %v5798_v1 = vadd.f32 %v5782_v62, %v5734_v60  ;;  %v3266_v39 = vadd.f32 %v3265_v18, %v3216_v58  ;;  %v16990_v62 = vld [vmem:[#allocation38_spill] sm:$0xff]  ;;  %v16991_v60 = vld [vmem:[#allocation76_spill] sm:$0xff]  ;;  %v6114_v53 = vmul.f32 %v11517_v25, %v6113_v51 }
 0x32b   : > { %3499 = vmatmul.bf16.gmra.mxu2 %v16990_v62  ;;  %v13250_v35 = vmul.f32 %v6171_v40, %v16991_v60  ;;  %v16996_v51 = vld [vmem:[#allocation64_spill] sm:$0xff]  ;;  %v16997_v58 = vld [vmem:[#allocation42_spill] sm:$0xff] }
 0x32c   : > { %v5894_v59 = vmul.f32 0.088388346, %v5798_v1  ;;  %v3315_v21 = vadd.f32 %v3314_v26, %v3266_v39  ;;  %v16992_v1 = vld [vmem:[#allocation39_spill] sm:$0xff]  ;;  %v6131_v26 = vsel %vm6130_vm5, %v13207_v20, %v6127_v29  ;;  %v16999_v18 = vld [vmem:[#allocation40_spill] sm:$0xff]  ;;  %v17000_v20 = vld [vmem:[#allocation41_spill] sm:$0xff]  ;;  %v13280_v29 = vadd.f32 1.1920929e-07, %v6052_v4 }
 0x32d   : > { %3548 = vmatmul.bf16.gmra.mxu3 %v16992_v1  ;;  %v13264_v40 = vmul.f32 %v6131_v26, %v16996_v51  ;;  %v17003_v26 = vld [vmem:[#allocation47_spill] sm:$0xff] }
 0x32e   : > { %v10807_v46 = vpack.c.bf16 %v5895_v27, %v5894_v59  ;;  %6805 = vadd.xlane.f32.xlu2 %v6784_v47  ;;  %v13255_v37 = vadd.f32 %v3363_v48, %v3315_v21  ;;  %v16994_v27 = vld [vmem:[#allocation36_spill] sm:$0xff]  ;;  %v6115_v59 = vmul.f32 0.5, %v6114_v53  ;;  %v16998_v53 = vld [vmem:[#allocation43_spill] sm:$0xff]  ;;  %11518 = vrsqrt.f32 %v13280_v29 }
 0x32f   : > { %3401 = vmatmul.bf16.gmra.mxu0 %v16994_v27  ;;  %3450 = vmatmul.bf16.gmra.mxu1 %v16995_v30  ;;  %v17010_v27 = vld [vmem:[#allocation51_spill] sm:$0xff]  ;;  %vm6198_vm10 = vweird.f32 %v13280_v29 }
 0x330   : > { %11269 = vst [vmem:[%s12683_s29 + $0x38] sm:$0xff] %v10807_v46   ;;  %v6116_v47 = vsub.f32 1.5, %v6115_v59  ;;  %v17001_v46 = vld [vmem:[#allocation63_spill] sm:$0xff]  ;;  %v3316_v59 = vpop.f32.mrf.mxu2 }
 0x331   : > { %16993 = vst [vmem:[#allocation92_spill] sm:$0xff] %v13255_v37  ;;  %v3267_v60 = vpop.f32.mrf.mxu1 }
 0x332   : > { %6538 = vrot.lane.b32.xlu1 %v13250_v35, %s12008_s2  ;;  %v6117_v48 = vmul.f32 %v11517_v25, %v6116_v47  ;;  %v3268_v21 = vadd.f32 %v3267_v60, %v3218_v3  ;;  %v17004_v47 = vld [vmem:[#allocation84_spill] sm:$0xff]  ;;  %v3258_v60 = vadd.f32 %v13158_v0, %v13156_v32 }
 0x333   : > { %v6048_v51 = vmul.f32 %v17004_v47, %v12430_v19  ;;  %v13298_v47 = vpop.xlane.xlu0 %6795 }
 0x334   : > { %v6121_v36 = vsel %vm6120_vm8, %v11517_v25, %v6117_v48  ;;  %v17002_v25 = vld [vmem:[#allocation46_spill] sm:$0xff]  ;;  %v3317_v48 = vadd.f32 %v3316_v59, %v3268_v21  ;;  %v13293_v3 = vpop.eup %11518  ;;  %v3221_v59 = vpop.f32.mrf.mxu0 }
 0x335   : > { %v13274_v39 = vmul.f32 %v6121_v36, %v17001_v46  ;;  %v17005_v36 = vld [vmem:[#allocation44_spill] sm:$0xff]  ;;  %v3365_v46 = vpop.f32.mrf.mxu3  ;;  %vm6199_vm9 = vweird.f32 %v13293_v3 }
 0x336   : > { %v13291_v4 = vadd.f32 %v3365_v46, %v3317_v48  ;;  %v6193_v48 = vmul.f32 %v13293_v3, %v13280_v29  ;;  %vm6200_vm11 = vmor %vm6198_vm10, %vm6199_vm9 }
 0x338   : > { %17007 = vst [vmem:[#allocation55_spill] sm:$0xff] %v13291_v4  ;;  %v6792_v21 = vmul.f32 %v13291_v4, %v13291_v4 }
 0x33b   : > { %3504 = vmatmul.bf16.gmra.mxu2 %v16997_v58  ;;  %v6194_v58 = vmul.f32 %v13293_v3, %v6193_v48 }
 0x33d   : > { %6530 = vrot.lane.b32.xlu0 %v13264_v40, %s12008_s2  ;;  %3553 = vmatmul.bf16.gmra.mxu3 %v16998_v53  ;;  %v3368_v0 = vpop.f32.mrf.mxu3  ;;  %v17009_v53 = vld [vmem:[#allocation50_spill] sm:$0xff] }
 0x33f   : > { %3406 = vmatmul.bf16.gmra.mxu0 %v16999_v18  ;;  %3455 = vmatmul.bf16.gmra.mxu1 %v17000_v20  ;;  %v13289_v20 = vadd.f32 1.1920929e-07, %v6048_v51 }
 0x341   : > { %11520 = vrsqrt.f32 %v13289_v20  ;;  %vm6158_vm13 = vweird.f32 %v13289_v20 }
 0x346   : > { %6528 = vrot.lane.b32.xlu2 %v13274_v39, %s12008_s2 }
 0x347   : > { %v13307_v32 = vpop.eup %11520 }
 0x348   : > { %vm6159_vm12 = vweird.f32 %v13307_v32 }
 0x349   : > { %vm6160_vm14 = vmor %vm6158_vm13, %vm6159_vm12 }
 0x34b   : > { %3509 = vmatmul.bf16.gmra.mxu2 %v17002_v25  ;;  %v3319_v25 = vpop.f32.mrf.mxu2 }
 0x34d   : > { %3558 = vmatmul.bf16.gmra.mxu3 %v17003_v26  ;;  %v3307_v26 = vadd.f32 %v13165_v2, %v3258_v60  ;;  %v6521_v2 = vpop.permute.xlu0 %6520  ;;  %v17012_v60 = vld [vmem:[#allocation48_spill] sm:$0xff] }
 0x34f   : > { %3411 = vmatmul.bf16.gmra.mxu0 %v17005_v36  ;;  %3460 = vmatmul.bf16.gmra.mxu1 %v17006_v61  ;;  %v3270_v36 = vpop.f32.mrf.mxu1  ;;  %v17008_v61 = vld [vmem:[#allocation83_spill] sm:$0xff] }
 0x350   : > { %v6047_v51 = vmul.f32 %v17008_v61, %v12430_v19  ;;  %v3271_v46 = vadd.f32 %v3270_v36, %v3221_v59  ;;  %v13319_v36 = vadd.f32 %v13174_v38, %v3307_v26  ;;  %v17013_v59 = vld [vmem:[#allocation49_spill] sm:$0xff] }
 0x351   : > { %v17015_v26 = vld [vmem:[#allocation69_spill] sm:$0xff] }
 0x352   : > { %v3320_v18 = vadd.f32 %v3319_v25, %v3271_v46  ;;  %v13310_v4 = vadd.f32 1.1920929e-07, %v6047_v51  ;;  %17011 = vst [vmem:[#allocation94_spill] sm:$0xff] %v13319_v36  ;;  %v6153_v25 = vmul.f32 %v13307_v32, %v13289_v20  ;;  %v6195_v51 = vmul.f32 0.5, %v6194_v58  ;;  %v17017_v58 = vld [vmem:[#allocation71_spill] sm:$0xff] }
 0x353   : > { %v6788_v46 = vmul.f32 %v13319_v36, %v13319_v36 }
 0x354   : > { %v13315_v61 = vadd.f32 %v3368_v0, %v3320_v18  ;;  %11522 = vrsqrt.f32 %v13310_v4  ;;  %v17014_v18 = vld [vmem:[#allocation68_spill] sm:$0xff]  ;;  %v6154_v38 = vmul.f32 %v13307_v32, %v6153_v25  ;;  %v6504_v0 = vmul.f32 %v17015_v26, %v13019_v50 }
 0x355   : > { %v6552_v48 = vmul.f32 %v17014_v18, %v6521_v2  ;;  %vm6148_vm0 = vweird.f32 %v13310_v4 }
 0x356   : > { %v6155_v18 = vmul.f32 0.5, %v6154_v38 }
 0x35a   : > { %v11523_v2 = vpop.eup %11522 }
 0x35b   : > { %3514 = vmatmul.bf16.gmra.mxu2 %v17009_v53  ;;  %v6568_v53 = vadd.f32 %v6552_v48, %v6504_v0  ;;  %v6143_v50 = vmul.f32 %v11523_v2, %v13310_v4  ;;  %v6156_v0 = vsub.f32 1.5, %v6155_v18  ;;  %v17022_v18 = vld [vmem:[#allocation75_spill] sm:$0xff]  ;;  %vm6149_vm15 = vweird.f32 %v11523_v2 }
 0x35c   : > { %6821 = vadd.xlane.f32.xlu1 %v6792_v21  ;;  %v13324_v21 = vpop.xlane.xlu1 %6797  ;;  %vm6150_vm1 = vmor %vm6148_vm0, %vm6149_vm15 }
 0x35d   : > { %3563 = vmatmul.bf16.gmra.mxu3 %v17010_v27  ;;  %v6196_v27 = vsub.f32 1.5, %v6195_v51  ;;  %v6664_v51 = vmul.f32 0.088388346, %v6568_v53  ;;  %v17021_v53 = vld [vmem:[#allocation74_spill] sm:$0xff] }
 0x35e   : > { %v13334_v1 = vpop.xlane.xlu0 %6801 }
 0x35f   : > { %3416 = vmatmul.bf16.gmra.mxu0 %v17012_v60  ;;  %3465 = vmatmul.bf16.gmra.mxu1 %v17013_v59  ;;  %v17016_v59 = vld [vmem:[#allocation70_spill] sm:$0xff]  ;;  %v6197_v25 = vmul.f32 %v13293_v3, %v6196_v27 }
 0x360   : > { %v13313_v30 = vpop.xlane.xlu2 %6799  ;;  %v6505_v62 = vmul.f32 %v17016_v59, %v13169_v22  ;;  %v17018_v22 = vld [vmem:[#allocation72_spill] sm:$0xff]  ;;  %v6144_v59 = vmul.f32 %v11523_v2, %v6143_v50 }
 0x364   : > { %v6525_v54 = vpop.permute.xlu1 %6524 }
 0x367   : > { %6813 = vadd.xlane.f32.xlu0 %v6788_v46  ;;  %v6787_v46 = vmul.f32 %v13075_v44, %v13075_v44 }
 0x368   : > { %v6523_v60 = vpop.permute.xlu2 %6522 }
 0x369   : > { %v6553_v57 = vmul.f32 %v17017_v58, %v6523_v60  ;;  %v6554_v60 = vmul.f32 %v17018_v22, %v6525_v54  ;;  %v6201_v58 = vsel %vm6200_vm11, %v13293_v3, %v6197_v25  ;;  %v6157_v54 = vmul.f32 %v13307_v32, %v6156_v0 }
 0x36b   : > { %v6569_v36 = vadd.f32 %v6553_v57, %v6505_v62  ;;  %v17019_v57 = vld [vmem:[#allocation61_spill] sm:$0xff] }
 0x36c   : > { %v17020_v62 = vld [vmem:[#allocation73_spill] sm:$0xff] }
 0x36d   : > { %v6665_v48 = vmul.f32 0.088388346, %v6569_v36  ;;  %v6506_v27 = vmul.f32 %v17020_v62, %v17019_v57  ;;  %v6507_v36 = vmul.f32 %v17021_v53, %v13152_v8  ;;  %v6145_v8 = vmul.f32 0.5, %v6144_v59  ;;  %v13369_v59 = vpop.f32.mrf.mxu0 }
 0x36f   : > { %v10892_v38 = vpack.c.bf16 %v6665_v48, %v6664_v51  ;;  %6811 = vadd.xlane.f32.xlu2 %v6787_v46  ;;  %v6570_v44 = vadd.f32 %v6554_v60, %v6506_v27  ;;  %v17023_v51 = vld [vmem:[#allocation81_spill] sm:$0xff]  ;;  %v6161_v46 = vsel %vm6160_vm14, %v13307_v32, %v6157_v54  ;;  %v17025_v60 = vld [vmem:[#allocation66_spill] sm:$0xff]  ;;  %v13378_v27 = vpop.f32.mrf.mxu2 }
 0x370   : > { %v13356_v48 = vmul.f32 %v6201_v58, %v17023_v51  ;;  %v13363_v0 = vmul.f32 %v6161_v46, %v17025_v60  ;;  %v17026_v32 = vld [vmem:[#allocation65_spill] sm:$0xff] }
 0x371   : > { %11284 = vst [vmem:[%s12683_s29 + $0x40] sm:$0xff] %v10892_v38   ;;  %v6527_v26 = vpop.permute.xlu0 %6526  ;;  %v6666_v25 = vmul.f32 0.088388346, %v6570_v44  ;;  %v6146_v38 = vsub.f32 1.5, %v6145_v8  ;;  %v13371_v44 = vpop.f32.mrf.mxu1 }
 0x372   : > { %v6555_v29 = vmul.f32 %v17022_v18, %v6527_v26  ;;  %17024 = vst [vmem:[#allocation76_spill] sm:$0xff] %v13356_v48 }
 0x373   : > { %v6147_v20 = vmul.f32 %v11523_v2, %v6146_v38 }
 0x374   : > { %v6571_v3 = vadd.f32 %v6555_v29, %v6507_v36  ;;  %v13380_v36 = vpop.f32.mrf.mxu3  ;;  %v6055_v29 = vmul.f32 %v13200_v55, %v12430_v19 }
 0x375   : > { %6544 = vrot.lane.b32.xlu1 %v13356_v48, %s12008_s2  ;;  %v6151_v58 = vsel %vm6150_vm1, %v11523_v2, %v6147_v20  ;;  %v3382_v4 = vpop.f32.mrf.mxu0  ;;  %v6051_v2 = vmul.f32 %v13052_v5, %v12430_v19  ;;  %v17028_v20 = vld [vmem:[#allocation56_spill] sm:$0xff] }
 0x376   : > { %v6667_v50 = vmul.f32 0.088388346, %v6571_v3  ;;  %v13374_v57 = vmul.f32 %v6151_v58, %v17026_v32  ;;  %v6071_v3 = vadd.f32 1.1920929e-07, %v6055_v29  ;;  %v6050_v58 = vmul.f32 %v17028_v20, %v12430_v19 }
 0x377   : > { %v3480_v8 = vpop.f32.mrf.mxu2 }
 0x378   : > { %v10897_v26 = vpack.c.bf16 %v6667_v50, %v6666_v25  ;;  %v6067_v25 = vadd.f32 1.1920929e-07, %v6051_v2  ;;  %11524 = vrsqrt.f32 %v6071_v3  ;;  %v6066_v2 = vadd.f32 1.1920929e-07, %v6050_v58 }
 0x379   : > { %v3431_v54 = vpop.f32.mrf.mxu1  ;;  %vm6228_vm4 = vweird.f32 %v6071_v3 }
 0x37a   : > { %11285 = vst [vmem:[%s12683_s29 + $0x48] sm:$0xff] %v10897_v26   ;;  %v3432_v51 = vadd.f32 %v3431_v54, %v3382_v4  ;;  %11526 = vrsqrt.f32 %v6067_v25  ;;  %vm6188_vm5 = vweird.f32 %v6067_v25  ;;  %vm6178_vm9 = vweird.f32 %v6066_v2 }
 0x37b   : > { %6536 = vrot.lane.b32.xlu0 %v13363_v0, %s12008_s2  ;;  %11528 = vrsqrt.f32 %v6066_v2 }
 0x37c   : > { %v3481_v50 = vadd.f32 %v3480_v8, %v3432_v51  ;;  %v3529_v46 = vpop.f32.mrf.mxu3  ;;  %v3263_v51 = vadd.f32 %v13224_v49, %v13222_v15 }
 0x37d   : > { %v13392_v29 = vpop.f32.mrf.mxu0 }
 0x37e   : > { %v13386_v26 = vadd.f32 %v3529_v46, %v3481_v50  ;;  %v11525_v38 = vpop.eup %11524  ;;  %v6791_v46 = vmul.f32 %v13255_v37, %v13255_v37 }
 0x37f   : > { %v6223_v32 = vmul.f32 %v11525_v38, %v6071_v3  ;;  %v13400_v8 = vpop.f32.mrf.mxu2  ;;  %vm6229_vm2 = vweird.f32 %v11525_v38 }
 0x380   : > { %17027 = vst [vmem:[#allocation64_spill] sm:$0xff] %v13386_v26  ;;  %v7566_v60 = vmul.f32 %v13386_v26, %v13386_v26  ;;  %v11527_v55 = vpop.eup %11526  ;;  %vm6230_vm6 = vmor %vm6228_vm4, %vm6229_vm2 }
 0x381   : > { %v6183_v5 = vmul.f32 %v11527_v55, %v6067_v25  ;;  %v13394_v4 = vpop.f32.mrf.mxu1  ;;  %v6224_v50 = vmul.f32 %v11525_v38, %v6223_v32  ;;  %v11529_v43 = vpop.eup %11528  ;;  %vm6189_vm3 = vweird.f32 %v11527_v55 }
 0x382   : > { %vm6190_vm7 = vmor %vm6188_vm5, %vm6189_vm3  ;;  %vm6179_vm8 = vweird.f32 %v11529_v43 }
 0x383   : > { %v6184_v20 = vmul.f32 %v11527_v55, %v6183_v5  ;;  %v6225_v18 = vmul.f32 0.5, %v6224_v50  ;;  %vm6180_vm10 = vmor %vm6178_vm9, %vm6179_vm8 }
 0x384   : > { %v13404_v26 = vpop.f32.mrf.mxu3 }
 0x385   : > { %v6185_v58 = vmul.f32 0.5, %v6184_v20  ;;  %v3387_v62 = vpop.f32.mrf.mxu0  ;;  %v6226_v37 = vsub.f32 1.5, %v6225_v18 }
 0x387   : > { %6534 = vrot.lane.b32.xlu2 %v13374_v57, %s12008_s2  ;;  %v3485_v7 = vpop.f32.mrf.mxu2  ;;  %v6186_v63 = vsub.f32 1.5, %v6185_v58  ;;  %v6227_v18 = vmul.f32 %v11525_v38, %v6226_v37  ;;  %v17034_v58 = vld [vmem:[#allocation80_spill] sm:$0xff] }
 0x389   : > { %v3436_v22 = vpop.f32.mrf.mxu1 }
 0x38a   : > { %v3437_v15 = vadd.f32 %v3436_v22, %v3387_v62  ;;  %v6173_v22 = vmul.f32 %v11529_v43, %v6066_v2  ;;  %v6829_v2 = vmul.f32 %v13313_v30, %v12430_v19 }
 0x38c   : > { %v3486_v5 = vadd.f32 %v3485_v7, %v3437_v15  ;;  %v3534_v48 = vpop.f32.mrf.mxu3 }
 0x39c   : > { %v13407_v53 = vpop.xlane.xlu0 %6807 }
 0x39f   : > { %7582 = vadd.xlane.f32.xlu1 %v7566_v60  ;;  %v3312_v60 = vadd.f32 %v13228_v52, %v3263_v51  ;;  %v13413_v52 = vadd.f32 %v3534_v48, %v3486_v5  ;;  %v17032_v51 = vld [vmem:[#allocation53_spill] sm:$0xff]  ;;  %v6174_v48 = vmul.f32 %v11529_v43, %v6173_v22  ;;  %v6231_v5 = vsel %vm6230_vm6, %v11525_v38, %v6227_v18  ;;  %v13433_v38 = vpop.xlane.xlu1 %6803  ;;  %v3389_v22 = vpop.f32.mrf.mxu0 }
 0x3a0   : > { %v6508_v50 = vmul.f32 %v17032_v51, %v13274_v39  ;;  %v13423_v37 = vmul.f32 %v6231_v5, %v12990_v16  ;;  %v17036_v16 = vld [vmem:[#allocation67_spill] sm:$0xff]  ;;  %v3273_v18 = vadd.f32 %v13371_v44, %v13369_v59 }
 0x3a1   : > { %v13396_v54 = vpop.xlane.xlu2 %6805  ;;  %v13410_v32 = vadd.f32 %v13239_v24, %v3312_v60  ;;  %17031 = vst [vmem:[#allocation84_spill] sm:$0xff] %v13413_v52  ;;  %v17033_v24 = vld [vmem:[#allocation58_spill] sm:$0xff] }
 0x3a2   : > { %v6509_v62 = vmul.f32 %v17033_v24, %v13264_v40 }
 0x3a3   : > { %17029 = vst [vmem:[#allocation63_spill] sm:$0xff] %v13410_v32  ;;  %v6790_v20 = vmul.f32 %v13410_v32, %v13410_v32 }
 0x3a5   : > { %6819 = vadd.xlane.f32.xlu0 %v6791_v46  ;;  %v17030_v46 = vld [vmem:[#allocation52_spill] sm:$0xff] }
 0x3a7   : > { %v3392_v30 = vpop.f32.mrf.mxu0 }
 0x3a9   : > { %v6529_v49 = vpop.permute.xlu2 %6528 }
 0x3aa   : > { %v6556_v9 = vmul.f32 %v17030_v46, %v6529_v49  ;;  %v6187_v49 = vmul.f32 %v11527_v55, %v6186_v63 }
 0x3ac   : > { %v6572_v7 = vadd.f32 %v6556_v9, %v6508_v50  ;;  %v6191_v40 = vsel %vm6190_vm7, %v11527_v55, %v6187_v49  ;;  %v6175_v9 = vmul.f32 0.5, %v6174_v48  ;;  %v17035_v50 = vld [vmem:[#allocation77_spill] sm:$0xff] }
 0x3ae   : > { %v6668_v32 = vmul.f32 0.088388346, %v6572_v7  ;;  %v6176_v63 = vsub.f32 1.5, %v6175_v9  ;;  %v3487_v7 = vpop.f32.mrf.mxu2 }
 0x3af   : > { %v6531_v60 = vpop.permute.xlu0 %6530 }
 0x3b0   : > { %v6557_v15 = vmul.f32 %v17034_v58, %v6531_v60  ;;  %6817 = vadd.xlane.f32.xlu2 %v6790_v20  ;;  %v13426_v20 = vmul.f32 %v6191_v40, %v17035_v50  ;;  %v6177_v3 = vmul.f32 %v11529_v43, %v6176_v63  ;;  %v13449_v60 = vadd.f32 1.1920929e-07, %v6829_v2 }
 0x3b2   : > { %v6573_v39 = vadd.f32 %v6557_v15, %v6509_v62  ;;  %v6181_v25 = vsel %vm6180_vm10, %v11529_v43, %v6177_v3  ;;  %v3438_v43 = vpop.f32.mrf.mxu1  ;;  %vm6885_vm15 = vweird.f32 %v13449_v60 }
 0x3b3   : > { %v13436_v55 = vmul.f32 %v6181_v25, %v17036_v16  ;;  %v3439_v62 = vadd.f32 %v3438_v43, %v3389_v22 }
 0x3b4   : > { %v6669_v46 = vmul.f32 0.088388346, %v6573_v39  ;;  %v3322_v39 = vadd.f32 %v13378_v27, %v3273_v18  ;;  %v6053_v27 = vmul.f32 %v13096_v14, %v12430_v19 }
 0x3b5   : > { %v3488_v49 = vadd.f32 %v3487_v7, %v3439_v62 }
 0x3b6   : > { %v10902_v51 = vpack.c.bf16 %v6669_v46, %v6668_v32  ;;  %v6054_v32 = vmul.f32 %v13118_v17, %v12430_v19  ;;  %v13442_v46 = vpop.xlane.xlu1 %6809  ;;  %v3536_v17 = vpop.f32.mrf.mxu3  ;;  %v13462_v59 = vadd.f32 %v13380_v36, %v3322_v39  ;;  %v13481_v14 = vadd.f32 1.1920929e-07, %v6053_v27  ;;  %v17041_v39 = vld [vmem:[#allocation85_spill] sm:$0xff]  ;;  %v17043_v27 = vld [vmem:[#allocation91_spill] sm:$0xff] }
 0x3b7   : > { %v13457_v40 = vadd.f32 %v3536_v17, %v3488_v49  ;;  %v3490_v44 = vpop.f32.mrf.mxu2  ;;  %v6827_v49 = vmul.f32 %v13298_v47, %v12430_v19  ;;  %v17046_v47 = vld [vmem:[#allocation93_spill] sm:$0xff] }
 0x3b8   : > { %11286 = vst [vmem:[%s12683_s29 + $0x50] sm:$0xff] %v10902_v51   ;;  %6550 = vrot.lane.b32.xlu1 %v13423_v37, %s12008_s2  ;;  %v13444_v51 = vadd.f32 1.1920929e-07, %v6054_v32  ;;  %v6794_v36 = vmul.f32 %v13462_v59, %v13462_v59  ;;  %v6513_v24 = vmul.f32 %v17046_v47, %v13250_v35  ;;  %vm6208_vm2 = vweird.f32 %v13481_v14  ;;  %v10542_v47 = vld [vmem:[#allocation5 + $0x6fc] sm:$0xf0] }
 0x3b9   : > { %6542 = vrot.lane.b32.xlu0 %v13426_v20, %s12008_s2  ;;  %17037 = vst [vmem:[#allocation83_spill] sm:$0xff] %v13457_v40  ;;  %v7569_v32 = vmul.f32 %v13457_v40, %v13457_v40 }
 0x3ba   : > { %11530 = vrsqrt.f32 %v13444_v51  ;;  %v3441_v5 = vpop.f32.mrf.mxu1  ;;  %17038 = vst [vmem:[#allocation61_spill] sm:$0xff] %v13462_v59  ;;  %v17045_v59 = vld [vmem:[#allocation88_spill] sm:$0xff]  ;;  %vm6218_vm12 = vweird.f32 %v13444_v51 }
 0x3bb   : > { %11532 = vrsqrt.f32 %v13449_v60  ;;  %v3442_v9 = vadd.f32 %v3441_v5, %v3392_v30 }
 0x3bc   : > { %11534 = vrsqrt.f32 %v13481_v14 }
 0x3bd   : > { %v3491_v63 = vadd.f32 %v3490_v44, %v3442_v9 }
 0x3be   : > { %v6533_v15 = vpop.permute.xlu1 %6532  ;;  %v3539_v16 = vpop.f32.mrf.mxu3 }
 0x3bf   : > { %v13472_v2 = vadd.f32 %v3539_v16, %v3491_v63  ;;  %v6558_v30 = vmul.f32 %v17041_v39, %v6533_v15 }
 0x3c0   : > { %v13455_v48 = vpop.eup %11530 }
 0x3c1   : > { %v6213_v50 = vmul.f32 %v13455_v48, %v13444_v51  ;;  %v13464_v3 = vpop.eup %11532  ;;  %17039 = vst [vmem:[#allocation81_spill] sm:$0xff] %v13472_v2  ;;  %vm6219_vm11 = vweird.f32 %v13455_v48 }
 0x3c2   : > { %v6880_v43 = vmul.f32 %v13464_v3, %v13449_v60  ;;  %v11535_v15 = vpop.eup %11534  ;;  %vm6220_vm13 = vmor %vm6218_vm12, %vm6219_vm11  ;;  %vm6886_vm14 = vweird.f32 %v13464_v3 }
 0x3c3   : > { %v6214_v22 = vmul.f32 %v13455_v48, %v6213_v50  ;;  %v17042_v50 = vld [vmem:[#allocation86_spill] sm:$0xff]  ;;  %vm6887_vm0 = vmor %vm6885_vm15, %vm6886_vm14  ;;  %vm6209_vm1 = vweird.f32 %v11535_v15 }
 0x3c4   : > { %v6881_v17 = vmul.f32 %v13464_v3, %v6880_v43  ;;  %v6510_v44 = vmul.f32 %v17042_v50, %v13121_v10  ;;  %v17044_v43 = vld [vmem:[#allocation87_spill] sm:$0xff]  ;;  %vm6210_vm3 = vmor %vm6208_vm2, %vm6209_vm1 }
 0x3c5   : > { %v6215_v18 = vmul.f32 0.5, %v6214_v22  ;;  %v6843_v22 = vadd.f32 1.1920929e-07, %v6827_v49  ;;  %v6511_v40 = vmul.f32 %v17044_v43, %v13374_v57  ;;  %v17048_v57 = vld [vmem:[#allocation96_spill] sm:$0xff] }
 0x3c6   : > { %v13468_v25 = vpop.xlane.xlu1 %6815  ;;  %v6882_v63 = vmul.f32 0.5, %v6881_v17 }
 0x3c7   : > { %v6216_v9 = vsub.f32 1.5, %v6215_v18  ;;  %v17047_v18 = vld [vmem:[#allocation95_spill] sm:$0xff]  ;;  %11536 = vrsqrt.f32 %v6843_v22  ;;  %vm6865_vm5 = vweird.f32 %v6843_v22 }
 0x3c8   : > { %6540 = vrot.lane.b32.xlu2 %v13436_v55, %s12008_s2  ;;  %v6512_v58 = vmul.f32 %v17047_v18, %v13363_v0  ;;  %v6883_v49 = vsub.f32 1.5, %v6882_v63  ;;  %v6203_v0 = vmul.f32 %v11535_v15, %v13481_v14 }
 0x3c9   : > { %v6217_v17 = vmul.f32 %v13455_v48, %v6216_v9 }
 0x3cb   : > { %v6221_v51 = vsel %vm6220_vm13, %v13455_v48, %v6217_v17 }
 0x3ce   : > { %v6539_v5 = vpop.permute.xlu1 %6538 }
 0x3cf   : > { %v6561_v16 = vmul.f32 %v17043_v27, %v6539_v5 }
 0x3da   : > { %v13483_v7 = vpop.xlane.xlu0 %6813 }
 0x3db   : > { %17040 = vst [vmem:[#allocation66_spill] sm:$0xff] %v13483_v7 }
 0x3e2   : > { %v13479_v62 = vpop.xlane.xlu2 %6811  ;;  %7588 = vadd.xlane.f32.xlu1 %v7569_v32 }
 0x3e3   : > { %6825 = vadd.xlane.f32.xlu0 %v6794_v36  ;;  %v6574_v36 = vadd.f32 %v6558_v30, %v6510_v44  ;;  %v6577_v30 = vadd.f32 %v6561_v16, %v6513_v24  ;;  %v6884_v16 = vmul.f32 %v13464_v3, %v6883_v49 }
 0x3e5   : > { %v6670_v44 = vmul.f32 0.088388346, %v6574_v36  ;;  %v6673_v63 = vmul.f32 0.088388346, %v6577_v30  ;;  %v11537_v36 = vpop.eup %11536 }
 0x3e6   : > { %v6860_v17 = vmul.f32 %v11537_v36, %v6843_v22  ;;  %vm6866_vm4 = vweird.f32 %v11537_v36  ;;  %v13547_v22 = vpop.f32.mrf.mxu3 }
 0x3e7   : > { %vm6867_vm6 = vmor %vm6865_vm5, %vm6866_vm4 }
 0x3e8   : > { %v6861_v30 = vmul.f32 %v11537_v36, %v6860_v17 }
 0x3ea   : > { %v6535_v32 = vpop.permute.xlu2 %6534 }
 0x3eb   : > { %v6559_v7 = vmul.f32 %v17045_v59, %v6535_v32 }
 0x3ed   : > { %v6575_v39 = vadd.f32 %v6559_v7, %v6511_v40  ;;  %v6537_v10 = vpop.permute.xlu0 %6536  ;;  %v6793_v40 = vmul.f32 %v13315_v61, %v13315_v61 }
 0x3ee   : > { %v6560_v5 = vmul.f32 %v17048_v57, %v6537_v10  ;;  %v17049_v10 = vld [vmem:[#allocation82_spill] sm:$0xff] }
 0x3ef   : > { %v6671_v35 = vmul.f32 0.088388346, %v6575_v39  ;;  %v6204_v39 = vmul.f32 %v11535_v15, %v6203_v0  ;;  %v17050_v0 = vld [vmem:[#allocation78_spill] sm:$0xff] }
 0x3f0   : > { %v6576_v7 = vadd.f32 %v6560_v5, %v6512_v58  ;;  %v13513_v58 = vmul.f32 %v6221_v51, %v17049_v10  ;;  %v6888_v5 = vsel %vm6887_vm0, %v13464_v3, %v6884_v16  ;;  %v13532_v51 = vpop.f32.mrf.mxu1 }
 0x3f1   : > { %v10907_v9 = vpack.c.bf16 %v6671_v35, %v6670_v44  ;;  %6823 = vadd.xlane.f32.xlu2 %v6793_v40  ;;  %v6205_v48 = vmul.f32 0.5, %v6204_v39  ;;  %v13520_v49 = vmul.f32 %v6888_v5, %v13094_v34  ;;  %v6862_v44 = vmul.f32 0.5, %v6861_v30  ;;  %v13530_v34 = vpop.f32.mrf.mxu0  ;;  %v8980_v30 = vld [vmem:[#allocation5 + $0x2b0] sm:$0xf] }
 0x3f2   : > { %v6672_v24 = vmul.f32 0.088388346, %v6576_v7  ;;  %v6832_v39 = vmul.f32 %v13396_v54, %v12430_v19  ;;  %v10698_v54 = vld [vmem:[#allocation5 + $0xbdc] sm:$0xf0] }
 0x3f3   : > { %11287 = vst [vmem:[%s12683_s29 + $0x58] sm:$0xff] %v10907_v9   ;;  %v6206_v60 = vsub.f32 1.5, %v6205_v48  ;;  %v6863_v3 = vsub.f32 1.5, %v6862_v44  ;;  %v10602_v48 = vld [vmem:[#allocation5 + $0x8dc] sm:$0xf0] }
 0x3f4   : > { %v10912_v32 = vpack.c.bf16 %v6673_v63, %v6672_v24  ;;  %v6828_v63 = vmul.f32 %v13324_v21, %v12430_v19  ;;  %v13536_v24 = vpop.f32.mrf.mxu2  ;;  %v3434_v21 = vadd.f32 %v13394_v4, %v13392_v29  ;;  %v13552_v10 = vadd.f32 1.1920929e-07, %v6832_v39  ;;  %v10084_v39 = vld [vmem:[#allocation5 + $0xb50] sm:$0xf] }
 0x3f5   : > { %v6207_v35 = vmul.f32 %v11535_v15, %v6206_v60  ;;  %v6864_v9 = vmul.f32 %v11537_v36, %v6863_v3  ;;  %v10132_v60 = vld [vmem:[#allocation5 + $0xbb0] sm:$0xf]  ;;  %v10410_v3 = vld [vmem:[#allocation5 + $0x2dc] sm:$0xf0] }
 0x3f6   : > { %11288 = vst [vmem:[%s12683_s29 + $0x60] sm:$0xff] %v10912_v32   ;;  %v3483_v44 = vadd.f32 %v13400_v8, %v3434_v21  ;;  %v8981_v29 = vor.u32 %v10410_v3, %v8980_v30  ;;  %v8932_v21 = vld [vmem:[#allocation5 + $0x250] sm:$0xf]  ;;  %v10494_v30 = vld [vmem:[#allocation5 + $0x57c] sm:$0xf0]  ;;  %vm6915_vm11 = vweird.f32 %v13552_v10 }
 0x3f7   : > { %6548 = vrot.lane.b32.xlu0 %v13513_v58, %s12008_s2  ;;  %v6211_v40 = vsel %vm6210_vm3, %v11535_v15, %v6207_v35  ;;  %v6868_v14 = vsel %vm6867_vm6, %v11537_v36, %v6864_v9  ;;  %v13538_v15 = vadd.f32 1.1920929e-07, %v6828_v63  ;;  %v10133_v35 = vor.u32 %v10698_v54, %v10132_v60  ;;  %v9700_v63 = vld [vmem:[#allocation5 + $0x850] sm:$0xf]  ;;  %v10398_v60 = vld [vmem:[#allocation5 + $0x27c] sm:$0xf0] }
 0x3f8   : > { %v13526_v7 = vmul.f32 %v6211_v40, %v17050_v0  ;;  %v13541_v16 = vmul.f32 %v6868_v14, %v12993_v13  ;;  %v3446_v36 = vpop.f32.mrf.mxu1  ;;  %v9748_v13 = vld [vmem:[#allocation5 + $0x8b0] sm:$0xf]  ;;  %v10506_v0 = vld [vmem:[#allocation5 + $0x5dc] sm:$0xf0]  ;;  %3569 = vmatpush.bf16.msra.mxu0 %v8981_v29  ;;  %v13558_v27 = vadd.f32 %v13404_v26, %v3483_v44 }
 0x3f9   : > { %11538 = vrsqrt.f32 %v13538_v15  ;;  %v3397_v32 = vpop.f32.mrf.mxu0  ;;  %v9749_v17 = vor.u32 %v10602_v48, %v9748_v13  ;;  %v9364_v40 = vld [vmem:[#allocation5 + $0x5b0] sm:$0xf]  ;;  %v10590_v14 = vld [vmem:[#allocation5 + $0x87c] sm:$0xf0]  ;;  %3716 = vmatpush.bf16.msra.mxu3 %v10133_v35  ;;  %vm6875_vm8 = vweird.f32 %v13538_v15 }
 0x3fa   : > { %v3447_v5 = vadd.f32 %v3446_v36, %v3397_v32  ;;  %v9365_v4 = vor.u32 %v10506_v0, %v9364_v40  ;;  %v9701_v13 = vor.u32 %v10590_v14, %v9700_v63  ;;  %v10686_v48 = vld [vmem:[#allocation5 + $0xb7c] sm:$0xf0]  ;;  %v9316_v54 = vld [vmem:[#allocation5 + $0x550] sm:$0xf]  ;;  %17051 = vst [vmem:[#allocation65_spill] sm:$0xff] %v13558_v27  ;;  %11540 = vrsqrt.f32 %v13552_v10 }
 0x3fb   : > { %7311 = vrot.lane.b32.xlu1 %v13520_v49, %s12008_s2  ;;  %3667 = vmatpush.bf16.msra.mxu2 %v9749_v17  ;;  %v10085_v8 = vor.u32 %v10686_v48, %v10084_v39  ;;  %v8933_v17 = vor.u32 %v10398_v60, %v8932_v21  ;;  %v9317_v35 = vor.u32 %v10494_v30, %v9316_v54  ;;  %v9652_v29 = vld [vmem:[#allocation5 + $0x7f0] sm:$0xf]  ;;  %v10386_v60 = vld [vmem:[#allocation5 + $0x21c] sm:$0xf0] }
 0x3fc   : > { %v3495_v9 = vpop.f32.mrf.mxu2  ;;  %3618 = vmatpush.bf16.msra.mxu1 %v9365_v4  ;;  %v7567_v0 = vmul.f32 %v13558_v27, %v13558_v27  ;;  %v10578_v4 = vld [vmem:[#allocation5 + $0x81c] sm:$0xf0]  ;;  %v8884_v48 = vld [vmem:[#allocation5 + $0x1f0] sm:$0xf] }
 0x3fd   : > { %v3496_v36 = vadd.f32 %v3495_v9, %v3447_v5  ;;  %v3544_v5 = vpop.f32.mrf.mxu3  ;;  %3717 = vmatpush.bf16.msra.mxu3 %v10085_v8  ;;  %3570 = vmatpush.bf16.msra.mxu0 %v8933_v17  ;;  %v9653_v39 = vor.u32 %v10578_v4, %v9652_v29  ;;  %v9268_v54 = vld [vmem:[#allocation5 + $0x4f0] sm:$0xf]  ;;  %v8885_v30 = vor.u32 %v10386_v60, %v8884_v48 }
 0x3fe   : > { %v6514_v29 = vmul.f32 %v13071_v41, %v13436_v55  ;;  %v6831_v55 = vmul.f32 %v13433_v38, %v12430_v19 }
 0x3ff   : > { %v13555_v32 = vpop.eup %11538  ;;  %3668 = vmatpush.bf16.msra.mxu2 %v9701_v13  ;;  %v13563_v40 = vadd.f32 %v3544_v5, %v3496_v36  ;;  %v10036_v36 = vld [vmem:[#allocation5 + $0xaf0] sm:$0xf]  ;;  %v10674_v13 = vld [vmem:[#allocation5 + $0xb1c] sm:$0xf0] }
 0x400   : > { %v6870_v3 = vmul.f32 %v13555_v32, %v13538_v15  ;;  %3619 = vmatpush.bf16.msra.mxu1 %v9317_v35  ;;  %v11541_v9 = vpop.eup %11540  ;;  %v10037_v21 = vor.u32 %v10674_v13, %v10036_v36  ;;  %vm6876_vm7 = vweird.f32 %v13555_v32 }
 0x401   : > { %17052 = vst [vmem:[#allocation56_spill] sm:$0xff] %v13563_v40  ;;  %v7572_v44 = vmul.f32 %v13563_v40, %v13563_v40  ;;  %v6910_v17 = vmul.f32 %v11541_v9, %v13552_v10  ;;  %3571 = vmatpush.bf16.msra.mxu0 %v8885_v30  ;;  %vm6877_vm9 = vmor %vm6875_vm8, %vm6876_vm7  ;;  %v6847_v30 = vadd.f32 1.1920929e-07, %v6831_v55  ;;  %vm6916_vm10 = vweird.f32 %v11541_v9  ;;  %v10458_v40 = vld [vmem:[#allocation5 + $0x45c] sm:$0xf0] }
 0x402   : > { %v6871_v26 = vmul.f32 %v13555_v32, %v6870_v3  ;;  %v10482_v3 = vld [vmem:[#allocation5 + $0x51c] sm:$0xf0]  ;;  %3718 = vmatpush.bf16.msra.mxu3 %v10037_v21  ;;  %vm6917_vm12 = vmor %vm6915_vm11, %vm6916_vm10 }
 0x403   : > { %3669 = vmatpush.bf16.msra.mxu2 %v9653_v39  ;;  %v9269_v5 = vor.u32 %v10482_v3, %v9268_v54  ;;  %11542 = vrsqrt.f32 %v6847_v30  ;;  %vm6905_vm14 = vweird.f32 %v6847_v30 }
 0x404   : > { %v6872_v8 = vmul.f32 0.5, %v6871_v26  ;;  %v6515_v26 = vmul.f32 %v13073_v28, %v13426_v20 }
 0x405   : > { %3620 = vmatpush.bf16.msra.mxu1 %v9269_v5  ;;  %v17053_v5 = vld [vmem:[#allocation54_spill] sm:$0xff] }
 0x406   : > { %v6873_v35 = vsub.f32 1.5, %v6872_v8 }
 0x408   : > { %v6874_v39 = vmul.f32 %v13555_v32, %v6873_v35 }
 0x409   : > { %6546 = vrot.lane.b32.xlu2 %v13526_v7, %s12008_s2 }
 0x40a   : > { %v6878_v54 = vsel %vm6877_vm9, %v13555_v32, %v6874_v39  ;;  %v7568_v32 = vmul.f32 %v13413_v52, %v13413_v52  ;;  %v9988_v39 = vld [vmem:[#allocation5 + $0xa90] sm:$0xf] }
 0x40b   : > { %v13588_v35 = vmul.f32 %v6878_v54, %v17053_v5  ;;  %v10470_v5 = vld [vmem:[#allocation5 + $0x4bc] sm:$0xf0]  ;;  %v9508_v52 = vld [vmem:[#allocation5 + $0x6d0] sm:$0xf] }
 0x411   : > { %7307 = vrot.lane.b32.xlu2 %v13541_v16, %s12008_s2 }
 0x418   : > { %v13570_v63 = vpop.xlane.xlu0 %6819 }
 0x421   : > { %7584 = vadd.xlane.f32.xlu0 %v7567_v0  ;;  %v6911_v0 = vmul.f32 %v11541_v9, %v6910_v17 }
 0x423   : > { %v13572_v14 = vpop.xlane.xlu2 %6817  ;;  %v6912_v48 = vmul.f32 0.5, %v6911_v0  ;;  %v3444_v0 = vadd.f32 %v13532_v51, %v13530_v34 }
 0x425   : > { %7594 = vadd.xlane.f32.xlu1 %v7572_v44  ;;  %v6913_v17 = vsub.f32 1.5, %v6912_v48  ;;  %v3493_v15 = vadd.f32 %v13536_v24, %v3444_v0  ;;  %v13615_v48 = vpop.f32.mrf.mxu2 }
 0x427   : > { %v6914_v38 = vmul.f32 %v11541_v9, %v6913_v17  ;;  %v13600_v34 = vadd.f32 %v13547_v22, %v3493_v15  ;;  %v6830_v22 = vmul.f32 %v13334_v1, %v12430_v19  ;;  %v13621_v1 = vpop.f32.mrf.mxu3 }
 0x429   : > { %17054 = vst [vmem:[#allocation77_spill] sm:$0xff] %v13600_v34  ;;  %v7571_v24 = vmul.f32 %v13600_v34, %v13600_v34 }
 0x42b   : > { %v6541_v4 = vpop.permute.xlu2 %6540  ;;  %v6543_v36 = vpop.permute.xlu0 %6542 }
 0x42c   : > { %v6562_v13 = vmul.f32 %v13068_v6, %v6541_v4  ;;  %v6563_v44 = vmul.f32 %v13082_v42, %v6543_v36  ;;  %v11543_v4 = vpop.eup %11542  ;;  %v13609_v36 = vpop.f32.mrf.mxu0 }
 0x42d   : > { %vm6906_vm13 = vweird.f32 %v11543_v4 }
 0x42e   : > { %v6578_v8 = vadd.f32 %v6562_v13, %v6514_v29  ;;  %v6579_v21 = vadd.f32 %v6563_v44, %v6515_v26  ;;  %v6918_v29 = vsel %vm6917_vm12, %v11541_v9, %v6914_v38  ;;  %v6900_v26 = vmul.f32 %v11543_v4, %v6847_v30  ;;  %v13611_v9 = vpop.f32.mrf.mxu1  ;;  %v9604_v44 = vld [vmem:[#allocation5 + $0x790] sm:$0xf]  ;;  %vm6907_vm15 = vmor %vm6905_vm14, %vm6906_vm13 }
 0x42f   : > { %v13603_v51 = vmul.f32 %v6918_v29, %v13236_v56  ;;  %v10566_v56 = vld [vmem:[#allocation5 + $0x7bc] sm:$0xf0]  ;;  %v13619_v38 = vadd.f32 1.1920929e-07, %v6830_v22  ;;  %v6835_v22 = vmul.f32 %v13479_v62, %v12430_v19  ;;  %v9172_v62 = vld [vmem:[#allocation5 + $0x430] sm:$0xf] }
 0x430   : > { %v6674_v20 = vmul.f32 0.088388346, %v6578_v8  ;;  %v6675_v60 = vmul.f32 0.088388346, %v6579_v21  ;;  %v6901_v10 = vmul.f32 %v11543_v4, %v6900_v26  ;;  %v9605_v55 = vor.u32 %v10566_v56, %v9604_v44  ;;  %v10662_v8 = vld [vmem:[#allocation5 + $0xabc] sm:$0xf0]  ;;  %v13628_v26 = vpop.f32.mrf.mxu2  ;;  %v13634_v44 = vpop.f32.mrf.mxu3 }
 0x431   : > { %v8836_v21 = vld [vmem:[#allocation5 + $0x190] sm:$0xf]  ;;  %v9989_v54 = vor.u32 %v10662_v8, %v9988_v39  ;;  %11544 = vrsqrt.f32 %v13619_v38  ;;  %v9173_v34 = vor.u32 %v10458_v40, %v9172_v62  ;;  %v10446_v40 = vld [vmem:[#allocation5 + $0x3fc] sm:$0xf0]  ;;  %vm6895_vm1 = vweird.f32 %v13619_v38 }
 0x432   : > { %v10917_v3 = vpack.c.bf16 %v6675_v60, %v6674_v20  ;;  %v6902_v13 = vmul.f32 0.5, %v6901_v10  ;;  %v10374_v20 = vld [vmem:[#allocation5 + $0x1bc] sm:$0xf0]  ;;  %v13617_v60 = vpop.xlane.xlu1 %6821  ;;  %3670 = vmatpush.bf16.msra.mxu2 %v9605_v55  ;;  %v9556_v39 = vld [vmem:[#allocation5 + $0x730] sm:$0xf] }
 0x433   : > { %v8837_v17 = vor.u32 %v10374_v20, %v8836_v21  ;;  %3719 = vmatpush.bf16.msra.mxu3 %v9989_v54  ;;  %v10554_v55 = vld [vmem:[#allocation5 + $0x75c] sm:$0xf0]  ;;  %v9940_v8 = vld [vmem:[#allocation5 + $0xa30] sm:$0xf] }
 0x434   : > { %11289 = vst [vmem:[%s12683_s29 + $0x68] sm:$0xff] %v10917_v3   ;;  %v9220_v3 = vld [vmem:[#allocation5 + $0x490] sm:$0xf]  ;;  %v6903_v15 = vsub.f32 1.5, %v6902_v13  ;;  %v9557_v54 = vor.u32 %v10554_v55, %v9556_v39 }
 0x435   : > { %7309 = vrot.lane.b32.xlu0 %v13588_v35, %s12008_s2  ;;  %v9221_v0 = vor.u32 %v10470_v5, %v9220_v3  ;;  %3572 = vmatpush.bf16.msra.mxu0 %v8837_v17  ;;  %v10650_v17 = vld [vmem:[#allocation5 + $0xa5c] sm:$0xf0]  ;;  %v8788_v3 = vld [vmem:[#allocation5 + $0x130] sm:$0xf] }
 0x436   : > { %v13625_v29 = vpop.f32.mrf.mxu1  ;;  %v10362_v5 = vld [vmem:[#allocation5 + $0x15c] sm:$0xf0]  ;;  %3671 = vmatpush.bf16.msra.mxu2 %v9557_v54  ;;  %v9124_v54 = vld [vmem:[#allocation5 + $0x3d0] sm:$0xf] }
 0x437   : > { %3621 = vmatpush.bf16.msra.mxu1 %v9221_v0  ;;  %v13636_v56 = vpop.eup %11544  ;;  %v9941_v0 = vor.u32 %v10650_v17, %v9940_v8  ;;  %v10638_v8 = vld [vmem:[#allocation5 + $0x9fc] sm:$0xf0]  ;;  %v8740_v17 = vld [vmem:[#allocation5 + $0xd0] sm:$0xf]  ;;  %v9125_v18 = vor.u32 %v10446_v40, %v9124_v54 }
 0x438   : > { %v8692_v54 = vld [vmem:[#allocation5 + $0x70] sm:$0xf]  ;;  %v10338_v40 = vld [vmem:[#allocation5 + $0x9c] sm:$0xf0]  ;;  %vm6896_vm0 = vweird.f32 %v13636_v56 }
 0x439   : > { %3720 = vmatpush.bf16.msra.mxu3 %v9941_v0  ;;  %vm6897_vm2 = vmor %vm6895_vm1, %vm6896_vm0 }
 0x43a   : > { %7586 = vadd.xlane.f32.xlu2 %v7568_v32  ;;  %v13623_v32 = vpop.f32.mrf.mxu0  ;;  %v13630_v10 = vpop.permute.xlu1 %6544 }
 0x43b   : > { %3622 = vmatpush.bf16.msra.mxu1 %v9173_v34 }
 0x43e   : > { %7317 = vrot.lane.b32.xlu1 %v13603_v51, %s12008_s2  ;;  %v3453_v20 = vpop.f32.mrf.mxu1 }
 0x43f   : > { %3623 = vmatpush.bf16.msra.mxu1 %v9125_v18 }
 0x442   : > { %7592 = vadd.xlane.f32.xlu2 %v7571_v24  ;;  %v6904_v24 = vmul.f32 %v11543_v4, %v6903_v15  ;;  %v3404_v21 = vpop.f32.mrf.mxu0  ;;  %v8789_v15 = vor.u32 %v10362_v5, %v8788_v3  ;;  %v13645_v39 = vpop.xlane.xlu1 %7582  ;;  %v10350_v5 = vld [vmem:[#allocation5 + $0xfc] sm:$0xf0] }
 0x443   : > { %v3454_v55 = vadd.f32 %v3453_v20, %v3404_v21  ;;  %v3502_v3 = vpop.f32.mrf.mxu2  ;;  %v8741_v62 = vor.u32 %v10350_v5, %v8740_v17  ;;  %v7570_v21 = vmul.f32 %v13472_v2, %v13472_v2  ;;  %v9076_v2 = vld [vmem:[#allocation5 + $0x370] sm:$0xf] }
 0x444   : > { %v6908_v13 = vsel %vm6907_vm15, %v11543_v4, %v6904_v24  ;;  %v6890_v4 = vmul.f32 %v13636_v56, %v13619_v38  ;;  %v13643_v24 = vadd.f32 1.1920929e-07, %v6835_v22  ;;  %3573 = vmatpush.bf16.msra.mxu0 %v8789_v15 }
 0x445   : > { %v13639_v30 = vmul.f32 %v6908_v13, %v13037_v31  ;;  %v9509_v31 = vor.u32 %v10542_v47, %v9508_v52  ;;  %v9892_v13 = vld [vmem:[#allocation5 + $0x9d0] sm:$0xf]  ;;  %v3503_v20 = vadd.f32 %v3502_v3, %v3454_v55  ;;  %v3551_v52 = vpop.f32.mrf.mxu3  ;;  %v10626_v3 = vld [vmem:[#allocation5 + $0x99c] sm:$0xf0] }
 0x446   : > { %v9893_v22 = vor.u32 %v10638_v8, %v9892_v13  ;;  %v6891_v57 = vmul.f32 %v13636_v56, %v6890_v4  ;;  %11546 = vrsqrt.f32 %v13643_v24  ;;  %v9460_v13 = vld [vmem:[#allocation5 + $0x670] sm:$0xf]  ;;  %v10530_v4 = vld [vmem:[#allocation5 + $0x69c] sm:$0xf0]  ;;  %v3456_v5 = vpop.f32.mrf.mxu1  ;;  %vm6945_vm4 = vweird.f32 %v13643_v24 }
 0x447   : > { %3672 = vmatpush.bf16.msra.mxu2 %v9509_v31  ;;  %v13655_v15 = vadd.f32 %v3551_v52, %v3503_v20  ;;  %v9844_v8 = vld [vmem:[#allocation5 + $0x970] sm:$0xf]  ;;  %v9461_v55 = vor.u32 %v10530_v4, %v9460_v13  ;;  %v10434_v20 = vld [vmem:[#allocation5 + $0x39c] sm:$0xf0] }
 0x448   : > { %3721 = vmatpush.bf16.msra.mxu3 %v9893_v22  ;;  %3574 = vmatpush.bf16.msra.mxu0 %v8741_v62  ;;  %v6892_v47 = vmul.f32 0.5, %v6891_v57  ;;  %v9845_v57 = vor.u32 %v10626_v3, %v9844_v8  ;;  %v9077_v41 = vor.u32 %v10434_v20, %v9076_v2  ;;  %v6518_v2 = vmul.f32 %v13213_v23, %v13513_v58  ;;  %v17059_v58 = vld [vmem:[#allocation105_spill] sm:$0xff] }
 0x449   : > { %17055 = vst [vmem:[#allocation67_spill] sm:$0xff] %v13655_v15  ;;  %v7575_v6 = vmul.f32 %v13655_v15, %v13655_v15  ;;  %v17079_v15 = vld [vmem:[#allocation69_spill] sm:$0xff] }
 0x44a   : > { %v6551_v0 = vpop.permute.xlu1 %6550  ;;  %v3407_v17 = vpop.f32.mrf.mxu0  ;;  %v6893_v18 = vsub.f32 1.5, %v6892_v47  ;;  %v6519_v47 = vmul.f32 %v13209_v12, %v13423_v37  ;;  %3624 = vmatpush.bf16.msra.mxu1 %v9077_v41  ;;  %v17058_v37 = vld [vmem:[#allocation104_spill] sm:$0xff] }
 0x44b   : > { %v3457_v22 = vadd.f32 %v3456_v5, %v3407_v17  ;;  %v3505_v52 = vpop.f32.mrf.mxu2  ;;  %v6567_v27 = vmul.f32 %v13204_v33, %v6551_v0  ;;  %3673 = vmatpush.bf16.msra.mxu2 %v9461_v55  ;;  %v6564_v0 = vmul.f32 %v13123_v45, %v13630_v10 }
 0x44c   : > { %v13659_v62 = vpop.eup %11546  ;;  %3722 = vmatpush.bf16.msra.mxu3 %v9845_v57 }
 0x44d   : > { %v3506_v13 = vadd.f32 %v3505_v52, %v3457_v22  ;;  %v3554_v4 = vpop.f32.mrf.mxu3  ;;  %v6940_v17 = vmul.f32 %v13659_v62, %v13643_v24  ;;  %v6583_v55 = vadd.f32 %v6567_v27, %v6519_v47  ;;  %v6894_v22 = vmul.f32 %v13636_v56, %v6893_v18  ;;  %v9028_v24 = vld [vmem:[#allocation5 + $0x310] sm:$0xf] }
 0x44e   : > { %v6517_v27 = vmul.f32 %v17059_v58, %v13526_v7  ;;  %vm6946_vm3 = vweird.f32 %v13659_v62 }
 0x44f   : > { %v13668_v8 = vadd.f32 %v3554_v4, %v3506_v13  ;;  %v6941_v41 = vmul.f32 %v13659_v62, %v6940_v17  ;;  %v6679_v18 = vmul.f32 0.088388346, %v6583_v55  ;;  %v6898_v13 = vsel %vm6897_vm2, %v13636_v56, %v6894_v22  ;;  %vm6947_vm5 = vmor %vm6945_vm4, %vm6946_vm3 }
 0x450   : > { %v6834_v17 = vmul.f32 %v13442_v46, %v12430_v19  ;;  %v3452_v56 = vadd.f32 %v13625_v29, %v13623_v32  ;;  %v9796_v32 = vld [vmem:[#allocation5 + $0x910] sm:$0xf]  ;;  %v10614_v29 = vld [vmem:[#allocation5 + $0x93c] sm:$0xf0] }
 0x451   : > { %17056 = vst [vmem:[#allocation82_spill] sm:$0xff] %v13668_v8  ;;  %v6942_v47 = vmul.f32 0.5, %v6941_v41  ;;  %v10518_v41 = vld [vmem:[#allocation5 + $0x63c] sm:$0xf0] }
 0x452   : > { %v3501_v46 = vadd.f32 %v13628_v26, %v3452_v56  ;;  %v8644_v26 = vld [vmem:[#allocation5 + $0x10] sm:$0xf] }
 0x453   : > { %v6943_v55 = vsub.f32 1.5, %v6942_v47  ;;  %v10422_v47 = vld [vmem:[#allocation5 + $0x33c] sm:$0xf0] }
 0x455   : > { %v6944_v22 = vmul.f32 %v13659_v62, %v6943_v55  ;;  %v6833_v55 = vmul.f32 %v13407_v53, %v12430_v19  ;;  %v17069_v53 = vld [vmem:[#allocation27_spill] sm:$0xff] }
 0x456   : > { %v13653_v34 = vpop.xlane.xlu0 %6825 }
 0x45a   : > { %7315 = vrot.lane.b32.xlu2 %v13639_v30, %s12008_s2 }
 0x45f   : > { %7590 = vadd.xlane.f32.xlu0 %v7570_v21  ;;  %v8693_v21 = vor.u32 %v10338_v40, %v8692_v54  ;;  %v17057_v54 = vld [vmem:[#allocation76_spill] sm:$0xff] }
 0x461   : > { %3575 = vmatpush.bf16.msra.mxu0 %v8693_v21  ;;  %v17060_v21 = vld [vmem:[#allocation106_spill] sm:$0xff] }
 0x464   : > { %v13657_v31 = vpop.xlane.xlu2 %6823 }
 0x468   : > { %7600 = vadd.xlane.f32.xlu1 %v7575_v6  ;;  %v6516_v6 = vmul.f32 %v17058_v37, %v17057_v54  ;;  %v6850_v54 = vadd.f32 1.1920929e-07, %v6834_v17 }
 0x469   : > { %v6549_v5 = vpop.permute.xlu0 %6548 }
 0x46a   : > { %v6566_v3 = vmul.f32 %v13220_v11, %v6549_v5  ;;  %v6580_v57 = vadd.f32 %v6564_v0, %v6516_v6  ;;  %v17061_v0 = vld [vmem:[#allocation102_spill] sm:$0xff]  ;;  %11548 = vrsqrt.f32 %v6850_v54  ;;  %vm6935_vm7 = vweird.f32 %v6850_v54 }
 0x46b   : > { %v9412_v6 = vld [vmem:[#allocation5 + $0x610] sm:$0xf] }
 0x46c   : > { %v6582_v40 = vadd.f32 %v6566_v3, %v6518_v2  ;;  %v6547_v10 = vpop.permute.xlu2 %6546  ;;  %v6676_v2 = vmul.f32 0.088388346, %v6580_v57  ;;  %v13688_v3 = vmul.f32 %v6898_v13, %v17061_v0  ;;  %v13702_v57 = vadd.f32 %v13634_v44, %v3501_v46  ;;  %v10326_v13 = vld [vmem:[#allocation5 + $0x3c] sm:$0xf0] }
 0x46d   : > { %v6565_v20 = vmul.f32 %v17060_v21, %v6547_v10  ;;  %v9413_v10 = vor.u32 %v10518_v41, %v9412_v6  ;;  %v3449_v6 = vadd.f32 %v13611_v9, %v13609_v36  ;;  %v13719_v41 = vpop.f32.mrf.mxu0  ;;  %v17071_v9 = vld [vmem:[#allocation25_spill] sm:$0xff] }
 0x46e   : > { %v6678_v52 = vmul.f32 0.088388346, %v6582_v40  ;;  %v6948_v40 = vsel %vm6947_vm5, %v13659_v62, %v6944_v22  ;;  %17062 = vst [vmem:[#allocation78_spill] sm:$0xff] %v13702_v57  ;;  %v7574_v44 = vmul.f32 %v13702_v57, %v13702_v57  ;;  %v9029_v62 = vor.u32 %v10422_v47, %v9028_v24  ;;  %v17073_v47 = vld [vmem:[#allocation59_spill] sm:$0xff] }
 0x46f   : > { %v6581_v4 = vadd.f32 %v6565_v20, %v6517_v27  ;;  %3674 = vmatpush.bf16.msra.mxu2 %v9413_v10  ;;  %v9797_v27 = vor.u32 %v10614_v29, %v9796_v32  ;;  %v6849_v22 = vadd.f32 1.1920929e-07, %v6833_v55  ;;  %v17068_v10 = vld [vmem:[#allocation26_spill] sm:$0xff]  ;;  %v3498_v29 = vadd.f32 %v13615_v48, %v3449_v6 }
 0x470   : > { %v10927_v38 = vpack.c.bf16 %v6679_v18, %v6678_v52  ;;  %v11549_v20 = vpop.eup %11548  ;;  %v17063_v18 = vld [vmem:[#allocation100_spill] sm:$0xff]  ;;  %3625 = vmatpush.bf16.msra.mxu1 %v9029_v62 }
 0x471   : > { %v6677_v5 = vmul.f32 0.088388346, %v6581_v4  ;;  %v13705_v52 = vmul.f32 %v6948_v40, %v17063_v18  ;;  %3723 = vmatpush.bf16.msra.mxu3 %v9797_v27  ;;  %v8645_v4 = vor.u32 %v10326_v13, %v8644_v26  ;;  %v6930_v17 = vmul.f32 %v11549_v20, %v6850_v54  ;;  %v13721_v40 = vpop.f32.mrf.mxu1  ;;  %v13725_v27 = vpop.f32.mrf.mxu2  ;;  %v17070_v26 = vld [vmem:[#allocation24_spill] sm:$0xff] }
 0x472   : > { %11291 = vst [vmem:[%s12683_s29 + $0x78] sm:$0xff] %v10927_v38   ;;  %v17064_v38 = vld [vmem:[#allocation22_spill] sm:$0xff]  ;;  %11550 = vrsqrt.f32 %v6849_v22  ;;  %vm6936_vm6 = vweird.f32 %v11549_v20  ;;  %v13731_v13 = vadd.f32 %v13621_v1, %v3498_v29  ;;  %v6838_v54 = vmul.f32 %v13572_v14, %v12430_v19 }
 0x473   : > { %v10922_v7 = vpack.c.bf16 %v6677_v5, %v6676_v2  ;;  %7313 = vrot.lane.b32.xlu0 %v13688_v3, %s12008_s2  ;;  %3675 = vmatmul.bf16.vlgmr.msra.gmra.mxu2 %v17064_v38  ;;  %v17065_v2 = vld [vmem:[#allocation23_spill] sm:$0xff]  ;;  %v17066_v5 = vld [vmem:[#allocation20_spill] sm:$0xff]  ;;  %v6931_v0 = vmul.f32 %v11549_v20, %v6930_v17  ;;  %vm6937_vm8 = vmor %vm6935_vm7, %vm6936_vm6  ;;  %vm6925_vm10 = vweird.f32 %v6849_v22 }
 0x474   : > { %3576 = vmatpush.bf16.msra.mxu0 %v8645_v4  ;;  %3724 = vmatmul.bf16.vlgmr.msra.gmra.mxu3 %v17065_v2  ;;  %17072 = vst [vmem:[#allocation54_spill] sm:$0xff] %v13731_v13  ;;  %v13733_v4 = vpop.f32.mrf.mxu3  ;;  %v17074_v29 = vld [vmem:[#allocation30_spill] sm:$0xff] }
 0x475   : > { %11290 = vst [vmem:[%s12683_s29 + $0x70] sm:$0xff] %v10922_v7   ;;  %v17067_v7 = vld [vmem:[#allocation21_spill] sm:$0xff]  ;;  %v6932_v56 = vmul.f32 0.5, %v6931_v0  ;;  %v13744_v0 = vadd.f32 1.1920929e-07, %v6838_v54  ;;  %v17077_v54 = vld [vmem:[#allocation31_spill] sm:$0xff] }
 0x476   : > { %3626 = vmatmul.bf16.vlgmr.msra.gmra.mxu1 %v17067_v7 }
 0x477   : > { %3577 = vmatmul.bf16.vlgmr.msra.gmra.mxu0 %v17066_v5  ;;  %v6933_v46 = vsub.f32 1.5, %v6932_v56  ;;  %v13746_v56 = vpop.xlane.xlu1 %7588  ;;  %11552 = vrsqrt.f32 %v13744_v0  ;;  %vm6975_vm13 = vweird.f32 %v13744_v0 }
 0x478   : > { %v11551_v18 = vpop.eup %11550 }
 0x479   : > { %v6934_v32 = vmul.f32 %v11549_v20, %v6933_v46  ;;  %v6920_v24 = vmul.f32 %v11551_v18, %v6849_v22  ;;  %v3461_v62 = vpop.f32.mrf.mxu1  ;;  %v3510_v55 = vpop.f32.mrf.mxu2  ;;  %vm6926_vm9 = vweird.f32 %v11551_v18  ;;  %v17084_v22 = vld [vmem:[#allocation34_spill] sm:$0xff] }
 0x47a   : > { %vm6927_vm11 = vmor %vm6925_vm10, %vm6926_vm9 }
 0x47b   : > { %v6938_v36 = vsel %vm6937_vm8, %v11549_v20, %v6934_v32  ;;  %v7573_v20 = vmul.f32 %v13731_v13, %v13731_v13  ;;  %v6921_v1 = vmul.f32 %v11551_v18, %v6920_v24  ;;  %v7308_v32 = vpop.permute.xlu2 %7307  ;;  %v17076_v24 = vld [vmem:[#allocation68_spill] sm:$0xff]  ;;  %v7291_v13 = vmul.f32 %v17079_v15, %v13541_v16 }
 0x47c   : > { %v13736_v48 = vmul.f32 %v6938_v36, %v17073_v47  ;;  %v3559_v36 = vpop.f32.mrf.mxu3 }
 0x47d   : > { %v6922_v14 = vmul.f32 0.5, %v6921_v1 }
 0x47f   : > { %v13760_v1 = vpop.permute.xlu1 %7311 }
 0x481   : > { %7323 = vrot.lane.b32.xlu1 %v13705_v52, %s12008_s2 }
 0x483   : > { %7598 = vadd.xlane.f32.xlu2 %v7574_v44  ;;  %3680 = vmatmul.bf16.gmra.mxu2 %v17068_v10  ;;  %v3412_v44 = vpop.f32.mrf.mxu0 }
 0x484   : > { %3729 = vmatmul.bf16.gmra.mxu3 %v17069_v53  ;;  %v3462_v17 = vadd.f32 %v3461_v62, %v3412_v44  ;;  %v6923_v44 = vsub.f32 1.5, %v6922_v14  ;;  %v7339_v62 = vmul.f32 %v17076_v24, %v7308_v32  ;;  %v11553_v14 = vpop.eup %11552 }
 0x485   : > { %vm6976_vm12 = vweird.f32 %v11553_v14 }
 0x486   : > { %3631 = vmatmul.bf16.gmra.mxu1 %v17071_v9  ;;  %v3511_v6 = vadd.f32 %v3510_v55, %v3462_v17  ;;  %v17080_v17 = vld [vmem:[#allocation29_spill] sm:$0xff]  ;;  %v17081_v55 = vld [vmem:[#allocation70_spill] sm:$0xff]  ;;  %v7355_v32 = vadd.f32 %v7339_v62, %v7291_v13  ;;  %vm6977_vm14 = vmor %vm6975_vm13, %vm6976_vm12 }
 0x487   : > { %3582 = vmatmul.bf16.gmra.mxu0 %v17070_v26  ;;  %v17083_v13 = vld [vmem:[#allocation97_spill] sm:$0xff] }
 0x488   : > { %v13752_v47 = vadd.f32 %v3559_v36, %v3511_v6  ;;  %v17082_v36 = vld [vmem:[#allocation71_spill] sm:$0xff]  ;;  %v7451_v26 = vmul.f32 0.088388346, %v7355_v32  ;;  %v17088_v32 = vld [vmem:[#allocation80_spill] sm:$0xff] }
 0x48a   : > { %17075 = vst [vmem:[#allocation76_spill] sm:$0xff] %v13752_v47  ;;  %v7578_v6 = vmul.f32 %v13752_v47, %v13752_v47 }
 0x493   : > { %3685 = vmatmul.bf16.gmra.mxu2 %v17074_v29  ;;  %v7292_v29 = vmul.f32 %v17081_v55, %v13588_v35 }
 0x494   : > { %v13748_v46 = vpop.xlane.xlu0 %7584  ;;  %3734 = vmatmul.bf16.gmra.mxu3 %v17077_v54 }
 0x496   : > { %3636 = vmatmul.bf16.gmra.mxu1 %v17080_v17  ;;  %v6970_v17 = vmul.f32 %v11553_v14, %v13744_v0  ;;  %v17094_v0 = vld [vmem:[#allocation63_spill] sm:$0xff] }
 0x498   : > { %v6971_v47 = vmul.f32 %v11553_v14, %v6970_v17  ;;  %v13770_v7 = vpop.xlane.xlu1 %7594 }
 0x49b   : > { %7321 = vrot.lane.b32.xlu2 %v13736_v48, %s12008_s2 }
 0x49d   : > { %7596 = vadd.xlane.f32.xlu0 %v7573_v20  ;;  %v17078_v20 = vld [vmem:[#allocation28_spill] sm:$0xff] }
 0x49e   : > { %3587 = vmatmul.bf16.gmra.mxu0 %v17078_v20  ;;  %v6924_v20 = vmul.f32 %v11551_v18, %v6923_v44  ;;  %v6972_v44 = vmul.f32 0.5, %v6971_v47 }
 0x4a0   : > { %v6928_v35 = vsel %vm6927_vm11, %v11551_v18, %v6924_v20  ;;  %v17085_v18 = vld [vmem:[#allocation35_spill] sm:$0xff]  ;;  %v6973_v20 = vsub.f32 1.5, %v6972_v44 }
 0x4a2   : > { %v6974_v47 = vmul.f32 %v11553_v14, %v6973_v20 }
 0x4a3   : > { %3690 = vmatmul.bf16.gmra.mxu2 %v17084_v22  ;;  %v17106_v22 = vld [vmem:[#allocation73_spill] sm:$0xff] }
 0x4a4   : > { %3739 = vmatmul.bf16.gmra.mxu3 %v17085_v18  ;;  %v7293_v5 = vmul.f32 %v17106_v22, %v13520_v49 }
 0x4a7   : > { %v7310_v9 = vpop.permute.xlu0 %7309 }
 0x4a8   : > { %v7340_v54 = vmul.f32 %v17082_v36, %v7310_v9  ;;  %v13773_v9 = vmul.f32 %v6928_v35, %v17083_v13 }
 0x4aa   : > { %v7356_v16 = vadd.f32 %v7340_v54, %v7292_v29  ;;  %v6837_v29 = vmul.f32 %v13468_v25, %v12430_v19  ;;  %v3459_v54 = vadd.f32 %v13721_v40, %v13719_v41  ;;  %v17091_v40 = vld [vmem:[#allocation53_spill] sm:$0xff] }
 0x4ab   : > { %7606 = vadd.xlane.f32.xlu1 %v7578_v6  ;;  %v7295_v44 = vmul.f32 %v17091_v40, %v13639_v30  ;;  %v17095_v30 = vld [vmem:[#allocation66_spill] sm:$0xff] }
 0x4ac   : > { %v7452_v53 = vmul.f32 0.088388346, %v7356_v16  ;;  %v3508_v6 = vadd.f32 %v13725_v27, %v3459_v54  ;;  %v17089_v16 = vld [vmem:[#allocation58_spill] sm:$0xff]  ;;  %v6978_v27 = vsel %vm6977_vm14, %v11553_v14, %v6974_v47  ;;  %v6836_v14 = vmul.f32 %v17095_v30, %v12430_v19  ;;  %v17097_v47 = vld [vmem:[#allocation36_spill] sm:$0xff] }
 0x4ad   : > { %v13768_v10 = vpop.xlane.xlu2 %7586  ;;  %v7296_v35 = vmul.f32 %v17089_v16, %v13603_v51 }
 0x4ae   : > { %v11012_v57 = vpack.c.bf16 %v7452_v53, %v7451_v26  ;;  %v17086_v53 = vld [vmem:[#allocation32_spill] sm:$0xff]  ;;  %v6853_v26 = vadd.f32 1.1920929e-07, %v6837_v29  ;;  %v13794_v29 = vadd.f32 %v13733_v4, %v3508_v6 }
 0x4af   : > { %3592 = vmatmul.bf16.gmra.mxu0 %v17086_v53 }
 0x4b0   : > { %11308 = vst [vmem:[%s12683_s29 + $0x80] sm:$0xff] %v11012_v57   ;;  %v17087_v57 = vld [vmem:[#allocation33_spill] sm:$0xff]  ;;  %v7318_v17 = vpop.permute.xlu1 %7317  ;;  %11554 = vrsqrt.f32 %v6853_v26  ;;  %v7577_v4 = vmul.f32 %v13794_v29, %v13794_v29  ;;  %vm6965_vm0 = vweird.f32 %v6853_v26 }
 0x4b1   : > { %7319 = vrot.lane.b32.xlu0 %v13773_v9, %s12008_s2  ;;  %3641 = vmatmul.bf16.gmra.mxu1 %v17087_v57  ;;  %v7344_v25 = vmul.f32 %v17088_v32, %v7318_v17  ;;  %17090 = vst [vmem:[#allocation102_spill] sm:$0xff] %v13794_v29  ;;  %v17092_v57 = vld [vmem:[#allocation52_spill] sm:$0xff]  ;;  %v17093_v17 = vld [vmem:[#allocation38_spill] sm:$0xff]  ;;  %v13801_v32 = vmul.f32 %v6978_v27, %v17094_v0 }
 0x4b2   : > { %v17099_v0 = vld [vmem:[#allocation42_spill] sm:$0xff] }
 0x4b3   : > { %v7360_v41 = vadd.f32 %v7344_v25, %v7296_v35  ;;  %3695 = vmatmul.bf16.gmra.mxu2 %v17093_v17  ;;  %v17098_v35 = vld [vmem:[#allocation37_spill] sm:$0xff] }
 0x4b5   : > { %v13782_v62 = vpop.xlane.xlu2 %7592  ;;  %v7456_v51 = vmul.f32 0.088388346, %v7360_v41  ;;  %v6852_v41 = vadd.f32 1.1920929e-07, %v6836_v14  ;;  %v17100_v14 = vld [vmem:[#allocation43_spill] sm:$0xff] }
 0x4b6   : > { %v11555_v54 = vpop.eup %11554 }
 0x4b7   : > { %v6960_v6 = vmul.f32 %v11555_v54, %v6853_v26  ;;  %11556 = vrsqrt.f32 %v6852_v41  ;;  %vm6966_vm15 = vweird.f32 %v11555_v54  ;;  %vm6955_vm3 = vweird.f32 %v6852_v41 }
 0x4b8   : > { %vm6967_vm1 = vmor %vm6965_vm0, %vm6966_vm15 }
 0x4bd   : > { %v7316_v13 = vpop.permute.xlu2 %7315  ;;  %v11557_v30 = vpop.eup %11556 }
 0x4be   : > { %v7343_v53 = vmul.f32 %v17092_v57, %v7316_v13  ;;  %v6961_v13 = vmul.f32 %v11555_v54, %v6960_v6  ;;  %v13822_v57 = vpop.f32.mrf.mxu3  ;;  %v6950_v40 = vmul.f32 %v11557_v30, %v6852_v41  ;;  %vm6956_vm2 = vweird.f32 %v11557_v30  ;;  %v17115_v41 = vld [vmem:[#allocation51_spill] sm:$0xff] }
 0x4bf   : > { %3597 = vmatmul.bf16.gmra.mxu0 %v17097_v47  ;;  %vm6957_vm4 = vmor %vm6955_vm3, %vm6956_vm2 }
 0x4c0   : > { %v7359_v20 = vadd.f32 %v7343_v53, %v7295_v44  ;;  %v17096_v53 = vld [vmem:[#allocation39_spill] sm:$0xff]  ;;  %v13813_v44 = vpop.f32.mrf.mxu0  ;;  %v6962_v27 = vmul.f32 0.5, %v6961_v13  ;;  %v17101_v13 = vld [vmem:[#allocation40_spill] sm:$0xff]  ;;  %v6951_v47 = vmul.f32 %v11557_v30, %v6950_v40  ;;  %v17104_v40 = vld [vmem:[#allocation46_spill] sm:$0xff] }
 0x4c1   : > { %3744 = vmatmul.bf16.gmra.mxu3 %v17096_v53  ;;  %3646 = vmatmul.bf16.gmra.mxu1 %v17098_v35  ;;  %v7576_v35 = vmul.f32 %v13668_v8, %v13668_v8  ;;  %v17103_v53 = vld [vmem:[#allocation62_spill] sm:$0xff] }
 0x4c2   : > { %v7455_v16 = vmul.f32 0.088388346, %v7359_v20  ;;  %v6963_v20 = vsub.f32 1.5, %v6962_v27  ;;  %v17102_v27 = vld [vmem:[#allocation41_spill] sm:$0xff] }
 0x4c3   : > { %3700 = vmatmul.bf16.gmra.mxu2 %v17099_v0 }
 0x4c4   : > { %v11022_v25 = vpack.c.bf16 %v7456_v51, %v7455_v16  ;;  %7329 = vrot.lane.b32.xlu1 %v13801_v32, %s12008_s2  ;;  %7604 = vadd.xlane.f32.xlu2 %v7577_v4  ;;  %v13815_v16 = vpop.f32.mrf.mxu1  ;;  %v13817_v51 = vpop.f32.mrf.mxu2  ;;  %v6964_v6 = vmul.f32 %v11555_v54, %v6963_v20 }
 0x4c6   : > { %11310 = vst [vmem:[%s12683_s29 + $0x90] sm:$0xff] %v11022_v25   ;;  %v6968_v0 = vsel %vm6967_vm1, %v11555_v54, %v6964_v6  ;;  %v3564_v20 = vpop.f32.mrf.mxu3  ;;  %v6952_v54 = vmul.f32 0.5, %v6951_v47  ;;  %v17108_v47 = vld [vmem:[#allocation47_spill] sm:$0xff] }
 0x4c7   : > { %v13832_v17 = vmul.f32 %v6968_v0, %v17103_v53  ;;  %v17105_v0 = vld [vmem:[#allocation72_spill] sm:$0xff] }
 0x4c8   : > { %v13820_v4 = vpop.f32.mrf.mxu0  ;;  %v6953_v53 = vsub.f32 1.5, %v6952_v54 }
 0x4cc   : > { %v13824_v25 = vpop.f32.mrf.mxu1  ;;  %v3515_v29 = vpop.f32.mrf.mxu2 }
 0x4ce   : > { %v3566_v38 = vpop.f32.mrf.mxu3 }
 0x4cf   : > { %3602 = vmatmul.bf16.gmra.mxu0 %v17101_v13  ;;  %v6841_v13 = vmul.f32 %v13657_v31, %v12430_v19  ;;  %v17107_v31 = vld [vmem:[#allocation74_spill] sm:$0xff] }
 0x4d0   : > { %v3419_v26 = vpop.f32.mrf.mxu0  ;;  %v7294_v24 = vmul.f32 %v17107_v31, %v13688_v3 }
 0x4d1   : > { %3749 = vmatmul.bf16.gmra.mxu3 %v17100_v14  ;;  %3651 = vmatmul.bf16.gmra.mxu1 %v17102_v27  ;;  %v6857_v18 = vadd.f32 1.1920929e-07, %v6841_v13  ;;  %v17109_v13 = vld [vmem:[#allocation44_spill] sm:$0xff] }
 0x4d2   : > { %v13838_v14 = vpop.xlane.xlu0 %7590 }
 0x4d3   : > { %3705 = vmatmul.bf16.gmra.mxu2 %v17104_v40  ;;  %11558 = vrsqrt.f32 %v6857_v18  ;;  %v6954_v40 = vmul.f32 %v11557_v30, %v6953_v53  ;;  %vm7005_vm6 = vweird.f32 %v6857_v18 }
 0x4d4   : > { %v3468_v27 = vpop.f32.mrf.mxu1  ;;  %v3517_v8 = vpop.f32.mrf.mxu2 }
 0x4d5   : > { %v3469_v6 = vadd.f32 %v3468_v27, %v3419_v26  ;;  %v17110_v26 = vld [vmem:[#allocation75_spill] sm:$0xff]  ;;  %v6958_v31 = vsel %vm6957_vm4, %v11557_v30, %v6954_v40  ;;  %v17116_v30 = vld [vmem:[#allocation48_spill] sm:$0xff] }
 0x4d7   : > { %v3518_v2 = vadd.f32 %v3517_v8, %v3469_v6 }
 0x4d9   : > { %v13851_v49 = vadd.f32 %v3566_v38, %v3518_v2  ;;  %v11559_v22 = vpop.eup %11558  ;;  %v17114_v38 = vld [vmem:[#allocation50_spill] sm:$0xff] }
 0x4da   : > { %v7000_v53 = vmul.f32 %v11559_v22, %v6857_v18  ;;  %vm7006_vm5 = vweird.f32 %v11559_v22  ;;  %v6842_v18 = vmul.f32 %v13653_v34, %v12430_v19 }
 0x4db   : > { %7602 = vadd.xlane.f32.xlu0 %v7576_v35  ;;  %v7341_v35 = vmul.f32 %v17105_v0, %v13760_v1  ;;  %v17111_v1 = vld [vmem:[#allocation45_spill] sm:$0xff]  ;;  %17112 = vst [vmem:[#allocation100_spill] sm:$0xff] %v13851_v49  ;;  %vm7007_vm7 = vmor %vm7005_vm6, %vm7006_vm5 }
 0x4dc   : > { %7327 = vrot.lane.b32.xlu2 %v13832_v17, %s12008_s2  ;;  %v7001_v2 = vmul.f32 %v11559_v22, %v7000_v53 }
 0x4dd   : > { %v7357_v27 = vadd.f32 %v7341_v35, %v7293_v5  ;;  %v7581_v5 = vmul.f32 %v13851_v49, %v13851_v49  ;;  %v17113_v35 = vld [vmem:[#allocation94_spill] sm:$0xff] }
 0x4de   : > { %v7002_v40 = vmul.f32 0.5, %v7001_v2 }
 0x4df   : > { %3607 = vmatmul.bf16.gmra.mxu0 %v17109_v13  ;;  %v7453_v6 = vmul.f32 0.088388346, %v7357_v27  ;;  %v17117_v27 = vld [vmem:[#allocation49_spill] sm:$0xff] }
 0x4e1   : > { %3754 = vmatmul.bf16.gmra.mxu3 %v17108_v47  ;;  %3656 = vmatmul.bf16.gmra.mxu1 %v17111_v1 }
 0x4e3   : > { %3710 = vmatmul.bf16.gmra.mxu2 %v17114_v38 }
 0x4e5   : > { %v7314_v15 = vpop.permute.xlu0 %7313 }
 0x4e6   : > { %v7342_v54 = vmul.f32 %v17110_v26, %v7314_v15  ;;  %v13856_v15 = vmul.f32 %v6958_v31, %v17113_v35 }
 0x4e8   : > { %v7358_v8 = vadd.f32 %v7342_v54, %v7294_v24  ;;  %v6840_v24 = vmul.f32 %v13617_v60, %v12430_v19  ;;  %v7003_v54 = vsub.f32 1.5, %v7002_v40 }
 0x4ea   : > { %v7454_v3 = vmul.f32 0.088388346, %v7358_v8  ;;  %v6856_v31 = vadd.f32 1.1920929e-07, %v6840_v24 }
 0x4ec   : > { %v11017_v47 = vpack.c.bf16 %v7454_v3, %v7453_v6  ;;  %11560 = vrsqrt.f32 %v6856_v31  ;;  %v7004_v6 = vmul.f32 %v11559_v22, %v7003_v54  ;;  %vm6995_vm9 = vweird.f32 %v6856_v31 }
 0x4ee   : > { %11309 = vst [vmem:[%s12683_s29 + $0x88] sm:$0xff] %v11017_v47   ;;  %7612 = vadd.xlane.f32.xlu1 %v7581_v5  ;;  %v3467_v47 = vadd.f32 %v13824_v25, %v13820_v4  ;;  %v6839_v5 = vmul.f32 %v13570_v63, %v12430_v19  ;;  %v7008_v35 = vsel %vm7007_vm7, %v11559_v22, %v7004_v6 }
 0x4ef   : > { %7325 = vrot.lane.b32.xlu0 %v13856_v15, %s12008_s2  ;;  %3612 = vmatmul.bf16.gmra.mxu0 %v17116_v30  ;;  %v13876_v4 = vmul.f32 %v7008_v35, %v13315_v61  ;;  %v3464_v63 = vadd.f32 %v13815_v16, %v13813_v44 }
 0x4f0   : > { %v3516_v8 = vadd.f32 %v3515_v29, %v3467_v47  ;;  %v6855_v29 = vadd.f32 1.1920929e-07, %v6839_v5 }
 0x4f1   : > { %3759 = vmatmul.bf16.gmra.mxu3 %v17115_v41  ;;  %3661 = vmatmul.bf16.gmra.mxu1 %v17117_v27  ;;  %v3513_v24 = vadd.f32 %v13817_v51, %v3464_v63  ;;  %v7615_v63 = vmul.f32 %v13748_v46, %v12430_v19 }
 0x4f2   : > { %v13869_v3 = vadd.f32 %v3564_v20, %v3516_v8  ;;  %v11561_v60 = vpop.eup %11560  ;;  %11562 = vrsqrt.f32 %v6855_v29  ;;  %v6858_v20 = vadd.f32 1.1920929e-07, %v6842_v18  ;;  %vm6985_vm12 = vweird.f32 %v6855_v29 }
 0x4f3   : > { %v6990_v2 = vmul.f32 %v11561_v60, %v6856_v31  ;;  %v13886_v54 = vadd.f32 %v13822_v57, %v3513_v24  ;;  %vm6996_vm8 = vweird.f32 %v11561_v60  ;;  %v3627_v24 = vpop.f32.mrf.mxu1 }
 0x4f4   : > { %17118 = vst [vmem:[#allocation59_spill] sm:$0xff] %v13869_v3  ;;  %v7580_v53 = vmul.f32 %v13869_v3, %v13869_v3  ;;  %11564 = vrsqrt.f32 %v6858_v20  ;;  %vm6997_vm10 = vmor %vm6995_vm9, %vm6996_vm8  ;;  %vm7015_vm15 = vweird.f32 %v6858_v20 }
 0x4f5   : > { %v6991_v25 = vmul.f32 %v11561_v60, %v6990_v2  ;;  %17119 = vst [vmem:[#allocation97_spill] sm:$0xff] %v13886_v54  ;;  %v7579_v44 = vmul.f32 %v13886_v54, %v13886_v54 }
 0x4f6   : > { %v13888_v8 = vpop.xlane.xlu2 %7598 }
 0x4f7   : > { %v6992_v22 = vmul.f32 0.5, %v6991_v25 }
 0x4f8   : > { %v11563_v40 = vpop.eup %11562 }
 0x4f9   : > { %v6993_v47 = vsub.f32 1.5, %v6992_v22  ;;  %v6980_v61 = vmul.f32 %v11563_v40, %v6855_v29  ;;  %v3578_v22 = vpop.f32.mrf.mxu0  ;;  %vm6986_vm11 = vweird.f32 %v11563_v40 }
 0x4fa   : > { %v11565_v5 = vpop.eup %11564  ;;  %vm6987_vm13 = vmor %vm6985_vm12, %vm6986_vm11 }
 0x4fb   : > { %v6994_v6 = vmul.f32 %v11561_v60, %v6993_v47  ;;  %v6981_v34 = vmul.f32 %v11563_v40, %v6980_v61  ;;  %v7010_v57 = vmul.f32 %v11565_v5, %v6858_v20  ;;  %v13902_v47 = vpop.xlane.xlu1 %7600  ;;  %v3628_v61 = vadd.f32 %v3627_v24, %v3578_v22 }
 0x4fc   : > { %vm7016_vm14 = vweird.f32 %v11565_v5 }
 0x4fd   : > { %v6998_v16 = vsel %vm6997_vm10, %v11561_v60, %v6994_v6  ;;  %v6982_v51 = vmul.f32 0.5, %v6981_v34  ;;  %v7011_v18 = vmul.f32 %v11565_v5, %v7010_v57  ;;  %v7298_v6 = vmul.f32 %v17044_v43, %v13736_v48  ;;  %v3676_v57 = vpop.f32.mrf.mxu2  ;;  %vm7017_vm0 = vmor %vm7015_vm15, %vm7016_vm14 }
 0x4fe   : > { %v7322_v25 = vpop.permute.xlu2 %7321  ;;  %v7297_v34 = vmul.f32 %v17042_v50, %v13773_v9  ;;  %v3677_v49 = vadd.f32 %v3676_v57, %v3628_v61  ;;  %v3629_v57 = vpop.f32.mrf.mxu1  ;;  %v10500_v50 = vld [vmem:[#allocation5 + $0x5b4] sm:$0xf] }
 0x4ff   : > { %v6983_v31 = vsub.f32 1.5, %v6982_v51  ;;  %v7346_v60 = vmul.f32 %v17045_v59, %v7322_v25  ;;  %v7012_v51 = vmul.f32 0.5, %v7011_v18  ;;  %v17121_v25 = vld [vmem:[#allocation85_spill] sm:$0xff] }
 0x501   : > { %v7362_v46 = vadd.f32 %v7346_v60, %v7298_v6  ;;  %v7013_v48 = vsub.f32 1.5, %v7012_v51  ;;  %v17123_v60 = vld [vmem:[#allocation92_spill] sm:$0xff] }
 0x503   : > { %v7458_v9 = vmul.f32 0.088388346, %v7362_v46  ;;  %v13912_v43 = vpop.permute.xlu1 %7323  ;;  %v7014_v29 = vmul.f32 %v11565_v5, %v7013_v48  ;;  %v3580_v46 = vpop.f32.mrf.mxu0 }
 0x505   : > { %7610 = vadd.xlane.f32.xlu2 %v7580_v53  ;;  %v17120_v53 = vld [vmem:[#allocation55_spill] sm:$0xff]  ;;  %v7018_v61 = vsel %vm7017_vm0, %v11565_v5, %v7014_v29  ;;  %v3678_v48 = vpop.f32.mrf.mxu2  ;;  %v7302_v29 = vmul.f32 %v13073_v28, %v13801_v32 }
 0x506   : > { %v13895_v2 = vmul.f32 %v6998_v16, %v17120_v53  ;;  %v6984_v16 = vmul.f32 %v11563_v40, %v6983_v31  ;;  %v13908_v53 = vadd.f32 1.1920929e-07, %v7615_v63  ;;  %v3725_v31 = vpop.f32.mrf.mxu3 }
 0x507   : > { %7335 = vrot.lane.b32.xlu1 %v13876_v4, %s12008_s2  ;;  %v13914_v18 = vadd.f32 %v3725_v31, %v3677_v49 }
 0x508   : > { %v6988_v24 = vsel %vm6987_vm13, %v11563_v40, %v6984_v16  ;;  %11566 = vrsqrt.f32 %v13908_v53  ;;  %v7614_v16 = vmul.f32 %v13645_v39, %v12430_v19  ;;  %vm7662_vm2 = vweird.f32 %v13908_v53 }
 0x509   : > { %17122 = vst [vmem:[#allocation63_spill] sm:$0xff] %v13914_v18  ;;  %v13917_v6 = vmul.f32 %v6988_v24, %v17123_v60  ;;  %v5464_v40 = vmul.f32 %v13914_v18, %v13914_v18 }
 0x50a   : > { %v13936_v5 = vadd.f32 1.1920929e-07, %v7614_v16 }
 0x50c   : > { %11568 = vrsqrt.f32 %v13936_v5  ;;  %vm7652_vm5 = vweird.f32 %v13936_v5 }
 0x50e   : > { %v3727_v60 = vpop.f32.mrf.mxu3 }
 0x510   : > { %v13892_v35 = vpop.xlane.xlu0 %7596 }
 0x519   : > { %7608 = vadd.xlane.f32.xlu0 %v7579_v44 }
 0x51d   : > { %7333 = vrot.lane.b32.xlu2 %v13895_v2, %s12008_s2 }
 0x523   : > { %v7320_v44 = vpop.permute.xlu0 %7319 }
 0x524   : > { %v7345_v54 = vmul.f32 %v17121_v25, %v7320_v44 }
 0x526   : > { %v7361_v22 = vadd.f32 %v7345_v54, %v7297_v34  ;;  %v11567_v54 = vpop.eup %11566  ;;  %v13925_v34 = vpop.xlane.xlu1 %7606 }
 0x527   : > { %v7657_v49 = vmul.f32 %v11567_v54, %v13908_v53  ;;  %vm7663_vm1 = vweird.f32 %v11567_v54  ;;  %v7616_v53 = vmul.f32 %v13768_v10, %v12430_v19  ;;  %v10134_v10 = vld [vmem:[#allocation5 + $0xbe0] sm:$0xf0] }
 0x528   : > { %v7457_v59 = vmul.f32 0.088388346, %v7361_v22  ;;  %v3630_v22 = vadd.f32 %v3629_v57, %v3580_v46  ;;  %vm7664_vm3 = vmor %vm7662_vm2, %vm7663_vm1 }
 0x529   : > { %v7658_v51 = vmul.f32 %v11567_v54, %v7657_v49 }
 0x52a   : > { %v11027_v63 = vpack.c.bf16 %v7458_v9, %v7457_v59  ;;  %v17124_v59 = vld [vmem:[#allocation61_spill] sm:$0xff]  ;;  %v3679_v31 = vadd.f32 %v3678_v48, %v3630_v22  ;;  %v11569_v22 = vpop.eup %11568 }
 0x52b   : > { %v13928_v44 = vmul.f32 %v7018_v61, %v17124_v59  ;;  %v7659_v24 = vmul.f32 0.5, %v7658_v51  ;;  %v17126_v59 = vld [vmem:[#allocation98_spill] sm:$0xff]  ;;  %v17127_v51 = vld [vmem:[#allocation57_spill] sm:$0xff]  ;;  %vm7653_vm4 = vweird.f32 %v11569_v22 }
 0x52c   : > { %11311 = vst [vmem:[%s12683_s29 + $0x98] sm:$0xff] %v11027_v63   ;;  %v13942_v61 = vadd.f32 %v3727_v60, %v3679_v31  ;;  %v7301_v16 = vmul.f32 %v17126_v59, %v13832_v17  ;;  %vm7654_vm6 = vmor %vm7652_vm5, %vm7653_vm4 }
 0x52d   : > { %7331 = vrot.lane.b32.xlu0 %v13917_v6, %s12008_s2  ;;  %v7660_v39 = vsub.f32 1.5, %v7659_v24  ;;  %v3632_v24 = vpop.f32.mrf.mxu1 }
 0x52e   : > { %17125 = vst [vmem:[#allocation66_spill] sm:$0xff] %v13942_v61  ;;  %v5465_v31 = vmul.f32 %v13942_v61, %v13942_v61  ;;  %v13959_v61 = vadd.f32 1.1920929e-07, %v7616_v53 }
 0x52f   : > { %v7661_v57 = vmul.f32 %v11567_v54, %v7660_v39  ;;  %v3681_v39 = vpop.f32.mrf.mxu2 }
 0x530   : > { %11570 = vrsqrt.f32 %v13959_v61  ;;  %vm7672_vm8 = vweird.f32 %v13959_v61 }
 0x531   : > { %5480 = vadd.xlane.f32.xlu1 %v5464_v40  ;;  %v7665_v17 = vsel %vm7664_vm3, %v11567_v54, %v7661_v57 }
 0x535   : > { %7337 = vrot.lane.b32.xlu0 %v13928_v44, %s12008_s2  ;;  %v3634_v54 = vpop.f32.mrf.mxu1 }
 0x536   : > { %v7330_v9 = vpop.permute.xlu1 %7329 }
 0x537   : > { %v13934_v20 = vpop.xlane.xlu2 %7604  ;;  %v7350_v63 = vmul.f32 %v13082_v42, %v7330_v9  ;;  %v3583_v9 = vpop.f32.mrf.mxu0 }
 0x538   : > { %v3633_v57 = vadd.f32 %v3632_v24, %v3583_v9  ;;  %v13966_v24 = vpop.eup %11570 }
 0x539   : > { %v7366_v49 = vadd.f32 %v7350_v63, %v7302_v29  ;;  %v7647_v63 = vmul.f32 %v11569_v22, %v13936_v5  ;;  %v17128_v29 = vld [vmem:[#allocation65_spill] sm:$0xff]  ;;  %vm7673_vm7 = vweird.f32 %v13966_v24 }
 0x53a   : > { %v3682_v59 = vadd.f32 %v3681_v39, %v3633_v57  ;;  %v7667_v57 = vmul.f32 %v13966_v24, %v13959_v61  ;;  %vm7674_vm9 = vmor %vm7672_vm8, %vm7673_vm7 }
 0x53b   : > { %v7462_v18 = vmul.f32 0.088388346, %v7366_v49  ;;  %v3730_v49 = vpop.f32.mrf.mxu3 }
 0x53f   : > { %v7328_v40 = vpop.permute.xlu2 %7327 }
 0x540   : > { %v7349_v46 = vmul.f32 %v17127_v51, %v7328_v40  ;;  %v13953_v40 = vmul.f32 %v7665_v17, %v17128_v29  ;;  %v9750_v17 = vld [vmem:[#allocation5 + $0x8e0] sm:$0xf0]  ;;  %v10404_v29 = vld [vmem:[#allocation5 + $0x2b4] sm:$0xf] }
 0x541   : > { %v8982_v51 = vld [vmem:[#allocation5 + $0x2e0] sm:$0xf0] }
 0x542   : > { %v7365_v48 = vadd.f32 %v7349_v46, %v7301_v16  ;;  %v7648_v16 = vmul.f32 %v11569_v22, %v7647_v63  ;;  %v3585_v46 = vpop.f32.mrf.mxu0  ;;  %v10692_v63 = vld [vmem:[#allocation5 + $0xbb4] sm:$0xf]  ;;  %v8985_v42 = vor.u32 %v10404_v29, %v8982_v51  ;;  %v13974_v51 = vadd.f32 %v3730_v49, %v3682_v59 }
 0x543   : > { %v13962_v28 = vpop.f32.mrf.mxu3  ;;  %v10137_v53 = vor.u32 %v10692_v63, %v10134_v10  ;;  %v3635_v27 = vadd.f32 %v3634_v54, %v3585_v46  ;;  %v10086_v46 = vld [vmem:[#allocation5 + $0xb80] sm:$0xf0]  ;;  %v10392_v54 = vld [vmem:[#allocation5 + $0x254] sm:$0xf] }
 0x544   : > { %v7461_v32 = vmul.f32 0.088388346, %v7365_v48  ;;  %v7649_v48 = vmul.f32 0.5, %v7648_v16  ;;  %3765 = vmatpush.bf16.msrb.mxu0 %v8985_v42  ;;  %17129 = vst [vmem:[#allocation62_spill] sm:$0xff] %v13974_v51  ;;  %v5466_v5 = vmul.f32 %v13974_v51, %v13974_v51  ;;  %v7668_v42 = vmul.f32 %v13966_v24, %v7667_v57  ;;  %v17134_v57 = vld [vmem:[#allocation91_spill] sm:$0xff] }
 0x545   : > { %3912 = vmatpush.bf16.msrb.mxu3 %v10137_v53 }
 0x546   : > { %v11037_v60 = vpack.c.bf16 %v7462_v18, %v7461_v32  ;;  %5482 = vadd.xlane.f32.xlu2 %v5465_v31  ;;  %v7650_v18 = vsub.f32 1.5, %v7649_v48  ;;  %v3683_v32 = vpop.f32.mrf.mxu2  ;;  %v10596_v31 = vld [vmem:[#allocation5 + $0x8b4] sm:$0xf]  ;;  %v9366_v48 = vld [vmem:[#allocation5 + $0x5e0] sm:$0xf0] }
 0x547   : > { %v9369_v9 = vor.u32 %v10500_v50, %v9366_v48  ;;  %v7669_v48 = vmul.f32 0.5, %v7668_v42  ;;  %v3684_v41 = vadd.f32 %v3683_v32, %v3635_v27  ;;  %v8934_v32 = vld [vmem:[#allocation5 + $0x280] sm:$0xf0] }
 0x548   : > { %11313 = vst [vmem:[%s12683_s29 + $0xa8] sm:$0xff] %v11037_v60   ;;  %v9753_v60 = vor.u32 %v10596_v31, %v9750_v17  ;;  %v7651_v16 = vmul.f32 %v11569_v22, %v7650_v18  ;;  %v13969_v31 = vpop.f32.mrf.mxu1  ;;  %v17130_v17 = vld [vmem:[#allocation64_spill] sm:$0xff] }
 0x549   : > { %3814 = vmatpush.bf16.msrb.mxu1 %v9369_v9 }
 0x54a   : > { %8096 = vrot.lane.b32.xlu1 %v13953_v40, %s12008_s2  ;;  %v13964_v25 = vpop.f32.mrf.mxu0  ;;  %3863 = vmatpush.bf16.msrb.mxu2 %v9753_v60  ;;  %v7655_v18 = vsel %vm7654_vm6, %v11569_v22, %v7651_v16  ;;  %v17131_v60 = vld [vmem:[#allocation96_spill] sm:$0xff]  ;;  %v17132_v22 = vld [vmem:[#allocation95_spill] sm:$0xff] }
 0x54b   : > { %v13981_v63 = vmul.f32 %v7655_v18, %v17130_v17  ;;  %v7347_v10 = vmul.f32 %v17131_v60, %v13912_v43  ;;  %v13990_v59 = vpop.f32.mrf.mxu3  ;;  %v7299_v49 = vmul.f32 %v17132_v22, %v13705_v52  ;;  %v17133_v18 = vld [vmem:[#allocation93_spill] sm:$0xff] }
 0x54c   : > { %v7300_v43 = vmul.f32 %v17133_v18, %v13856_v15  ;;  %v9702_v15 = vld [vmem:[#allocation5 + $0x880] sm:$0xf0] }
 0x54d   : > { %v7363_v9 = vadd.f32 %v7347_v10, %v7299_v49  ;;  %v10584_v10 = vld [vmem:[#allocation5 + $0x854] sm:$0xf]  ;;  %v7619_v49 = vmul.f32 %v13782_v62, %v12430_v19  ;;  %v14014_v62 = vadd.f32 %v13962_v28, %v3684_v41  ;;  %v7617_v41 = vmul.f32 %v13746_v56, %v12430_v19 }
 0x54e   : > { %v13972_v39 = vpop.xlane.xlu0 %7602  ;;  %v13978_v50 = vpop.f32.mrf.mxu2  ;;  %v10668_v56 = vld [vmem:[#allocation5 + $0xaf4] sm:$0xf] }
 0x54f   : > { %v7459_v3 = vmul.f32 0.088388346, %v7363_v9  ;;  %v10680_v9 = vld [vmem:[#allocation5 + $0xb54] sm:$0xf]  ;;  %17135 = vst [vmem:[#allocation94_spill] sm:$0xff] %v14014_v62 }
 0x550   : > { %v13996_v53 = vpop.f32.mrf.mxu1  ;;  %v10089_v27 = vor.u32 %v10680_v9, %v10086_v46  ;;  %v3638_v46 = vadd.f32 %v13969_v31, %v13964_v25 }
 0x552   : > { %v13994_v29 = vpop.f32.mrf.mxu0  ;;  %3913 = vmatpush.bf16.msrb.mxu3 %v10089_v27  ;;  %v10572_v27 = vld [vmem:[#allocation5 + $0x7f4] sm:$0xf] }
 0x553   : > { %v14003_v30 = vpop.f32.mrf.mxu3 }
 0x556   : > { %v14001_v60 = vpop.f32.mrf.mxu2 }
 0x55b   : > { %v3740_v9 = vpop.f32.mrf.mxu3 }
 0x55e   : > { %8094 = vrot.lane.b32.xlu2 %v13981_v63, %s12008_s2  ;;  %v3691_v61 = vpop.f32.mrf.mxu2 }
 0x55f   : > { %5484 = vadd.xlane.f32.xlu0 %v5466_v5  ;;  %v7670_v5 = vsub.f32 1.5, %v7669_v48  ;;  %v9705_v48 = vor.u32 %v10584_v10, %v9702_v15  ;;  %v14017_v10 = vadd.f32 1.1920929e-07, %v7619_v49  ;;  %v14033_v49 = vadd.f32 1.1920929e-07, %v7617_v41  ;;  %v9606_v41 = vld [vmem:[#allocation5 + $0x7c0] sm:$0xf0] }
 0x561   : > { %v7326_v16 = vpop.permute.xlu0 %7325  ;;  %v7671_v42 = vmul.f32 %v13966_v24, %v7670_v5  ;;  %3864 = vmatpush.bf16.msrb.mxu2 %v9705_v48  ;;  %v5467_v48 = vmul.f32 %v14014_v62, %v14014_v62  ;;  %11572 = vrsqrt.f32 %v14017_v10  ;;  %vm7702_vm11 = vweird.f32 %v14017_v10  ;;  %v10620_v62 = vld [vmem:[#allocation5 + $0x974] sm:$0xf] }
 0x562   : > { %v7348_v17 = vmul.f32 %v17134_v57, %v7326_v16  ;;  %v3593_v16 = vpop.f32.mrf.mxu0  ;;  %11574 = vrsqrt.f32 %v14033_v49  ;;  %vm7682_vm14 = vweird.f32 %v14033_v49 }
 0x564   : > { %v7364_v51 = vadd.f32 %v7348_v17, %v7300_v43  ;;  %v3642_v43 = vpop.f32.mrf.mxu1  ;;  %v8937_v17 = vor.u32 %v10392_v54, %v8934_v32  ;;  %v9654_v32 = vld [vmem:[#allocation5 + $0x820] sm:$0xf0] }
 0x566   : > { %v7460_v52 = vmul.f32 0.088388346, %v7364_v51  ;;  %v10488_v51 = vld [vmem:[#allocation5 + $0x554] sm:$0xf]  ;;  %3766 = vmatpush.bf16.msrb.mxu0 %v8937_v17 }
 0x567   : > { %v10380_v17 = vld [vmem:[#allocation5 + $0x1f4] sm:$0xf] }
 0x568   : > { %v11032_v22 = vpack.c.bf16 %v7460_v52, %v7459_v3  ;;  %v3643_v3 = vadd.f32 %v3642_v43, %v3593_v16  ;;  %v7675_v52 = vsel %vm7674_vm9, %v13966_v24, %v7671_v42  ;;  %v17136_v16 = vld [vmem:[#allocation84_spill] sm:$0xff]  ;;  %v11573_v42 = vpop.eup %11572 }
 0x569   : > { %v14020_v43 = vmul.f32 %v7675_v52, %v17136_v16  ;;  %v7697_v54 = vmul.f32 %v11573_v42, %v14017_v10  ;;  %v9270_v16 = vld [vmem:[#allocation5 + $0x520] sm:$0xf0]  ;;  %vm7703_vm10 = vweird.f32 %v11573_v42 }
 0x56a   : > { %11312 = vst [vmem:[%s12683_s29 + $0xa0] sm:$0xff] %v11032_v22   ;;  %v9318_v22 = vld [vmem:[#allocation5 + $0x580] sm:$0xf0]  ;;  %v3692_v15 = vadd.f32 %v3691_v61, %v3643_v3  ;;  %v3687_v3 = vadd.f32 %v13978_v50, %v3638_v46  ;;  %vm7704_vm12 = vmor %vm7702_vm11, %vm7703_vm10 }
 0x56b   : > { %v9321_v5 = vor.u32 %v10488_v51, %v9318_v22  ;;  %v9657_v51 = vor.u32 %v10572_v27, %v9654_v32  ;;  %v10038_v22 = vld [vmem:[#allocation5 + $0xb20] sm:$0xf0]  ;;  %v10656_v32 = vld [vmem:[#allocation5 + $0xa94] sm:$0xf] }
 0x56c   : > { %v14027_v28 = vadd.f32 %v3740_v9, %v3692_v15  ;;  %v10041_v52 = vor.u32 %v10668_v56, %v10038_v22  ;;  %v8886_v61 = vld [vmem:[#allocation5 + $0x220] sm:$0xf0]  ;;  %v10476_v15 = vld [vmem:[#allocation5 + $0x4f4] sm:$0xf]  ;;  %v14041_v25 = vadd.f32 %v13990_v59, %v3687_v3  ;;  %v7618_v3 = vmul.f32 %v13838_v14, %v12430_v19 }
 0x56d   : > { %3815 = vmatpush.bf16.msrb.mxu1 %v9321_v5  ;;  %v7698_v5 = vmul.f32 %v11573_v42, %v7697_v54  ;;  %3865 = vmatpush.bf16.msrb.mxu2 %v9657_v51  ;;  %v8889_v31 = vor.u32 %v10380_v17, %v8886_v61  ;;  %v10560_v9 = vld [vmem:[#allocation5 + $0x794] sm:$0xf]  ;;  %v9990_v51 = vld [vmem:[#allocation5 + $0xac0] sm:$0xf0] }
 0x56e   : > { %17137 = vst [vmem:[#allocation55_spill] sm:$0xff] %v14027_v28  ;;  %v5470_v24 = vmul.f32 %v14027_v28, %v14027_v28  ;;  %3914 = vmatpush.bf16.msrb.mxu3 %v10041_v52  ;;  %v9609_v50 = vor.u32 %v10560_v9, %v9606_v41  ;;  %v5468_v54 = vmul.f32 %v14041_v25, %v14041_v25  ;;  %v10368_v22 = vld [vmem:[#allocation5 + $0x194] sm:$0xf]  ;;  %v8838_v17 = vld [vmem:[#allocation5 + $0x1c0] sm:$0xf0] }
 0x56f   : > { %17138 = vst [vmem:[#allocation92_spill] sm:$0xff] %v14041_v25  ;;  %3767 = vmatpush.bf16.msrb.mxu0 %v8889_v31  ;;  %v7699_v46 = vmul.f32 0.5, %v7698_v5  ;;  %v9993_v56 = vor.u32 %v10656_v32, %v9990_v51  ;;  %v10464_v52 = vld [vmem:[#allocation5 + $0x494] sm:$0xf]  ;;  %v8841_v61 = vor.u32 %v10368_v22, %v8838_v17  ;;  %v3640_v9 = vadd.f32 %v13996_v53, %v13994_v29  ;;  %v9558_v51 = vld [vmem:[#allocation5 + $0x760] sm:$0xf0]  ;;  %v14082_v22 = vpop.xlane.xlu1 %7612 }
 0x570   : > { %v10548_v32 = vld [vmem:[#allocation5 + $0x734] sm:$0xf]  ;;  %v9462_v25 = vld [vmem:[#allocation5 + $0x6a0] sm:$0xf0] }
 0x571   : > { %3866 = vmatpush.bf16.msrb.mxu2 %v9609_v50  ;;  %v7700_v27 = vsub.f32 1.5, %v7699_v46  ;;  %v9561_v17 = vor.u32 %v10548_v32, %v9558_v51 }
 0x572   : > { %3915 = vmatpush.bf16.msrb.mxu3 %v9993_v56  ;;  %v10644_v56 = vld [vmem:[#allocation5 + $0xa34] sm:$0xf] }
 0x573   : > { %8098 = vrot.lane.b32.xlu0 %v14020_v43, %s12008_s2  ;;  %3768 = vmatpush.bf16.msrb.mxu0 %v8841_v61 }
 0x574   : > { %5486 = vadd.xlane.f32.xlu1 %v5467_v48  ;;  %v9273_v48 = vor.u32 %v10476_v15, %v9270_v16  ;;  %v9222_v15 = vld [vmem:[#allocation5 + $0x4c0] sm:$0xf0]  ;;  %v14052_v16 = vadd.f32 1.1920929e-07, %v7618_v3 }
 0x575   : > { %v9225_v31 = vor.u32 %v10464_v52, %v9222_v15  ;;  %v9942_v52 = vld [vmem:[#allocation5 + $0xa60] sm:$0xf0]  ;;  %3867 = vmatpush.bf16.msrb.mxu2 %v9561_v17 }
 0x576   : > { %3816 = vmatpush.bf16.msrb.mxu1 %v9273_v48  ;;  %v7701_v48 = vmul.f32 %v11573_v42, %v7700_v27  ;;  %11576 = vrsqrt.f32 %v14052_v16  ;;  %v9945_v15 = vor.u32 %v10644_v56, %v9942_v52  ;;  %v14102_v56 = vpop.f32.mrf.mxu2  ;;  %vm7692_vm1 = vweird.f32 %v14052_v16 }
 0x578   : > { %v14058_v41 = vpop.xlane.xlu2 %7610  ;;  %v7705_v50 = vsel %vm7704_vm12, %v11573_v42, %v7701_v48  ;;  %v10452_v48 = vld [vmem:[#allocation5 + $0x434] sm:$0xf]  ;;  %3916 = vmatpush.bf16.msrb.mxu3 %v9945_v15 }
 0x57a   : > { %3817 = vmatpush.bf16.msrb.mxu1 %v9225_v31 }
 0x57c   : > { %5492 = vadd.xlane.f32.xlu1 %v5470_v24  ;;  %v14043_v24 = vpop.eup %11574 }
 0x57d   : > { %v7677_v59 = vmul.f32 %v14043_v24, %v14033_v49  ;;  %vm7683_vm13 = vweird.f32 %v14043_v24  ;;  %v14065_v27 = vpop.eup %11576 }
 0x57e   : > { %vm14076_vm15 = vmor %vm7682_vm14, %vm7683_vm13  ;;  %v7687_v42 = vmul.f32 %v14065_v27, %v14052_v16  ;;  %vm7693_vm0 = vweird.f32 %v14065_v27  ;;  %v10632_v16 = vld [vmem:[#allocation5 + $0x9d4] sm:$0xf] }
 0x57f   : > { %v7678_v5 = vmul.f32 %v14043_v24, %v7677_v59  ;;  %v17139_v59 = vld [vmem:[#allocation77_spill] sm:$0xff]  ;;  %vm14125_vm2 = vmor %vm7692_vm1, %vm7693_vm0 }
 0x580   : > { %v14062_v3 = vmul.f32 %v7705_v50, %v17139_v59  ;;  %v7334_v49 = vpop.permute.xlu2 %7333  ;;  %v14092_v59 = vpop.f32.mrf.mxu1 }
 0x581   : > { %v7679_v14 = vmul.f32 0.5, %v7678_v5  ;;  %v10356_v5 = vld [vmem:[#allocation5 + $0x134] sm:$0xf]  ;;  %v7352_v32 = vmul.f32 %v17060_v21, %v7334_v49  ;;  %v7303_v49 = vmul.f32 %v17058_v37, %v13917_v6 }
 0x583   : > { %v7680_v46 = vsub.f32 1.5, %v7679_v14  ;;  %v9174_v14 = vld [vmem:[#allocation5 + $0x460] sm:$0xf0] }
 0x584   : > { %v9177_v50 = vor.u32 %v10452_v48, %v9174_v14 }
 0x585   : > { %v7681_v29 = vmul.f32 %v14043_v24, %v7680_v46  ;;  %v7688_v46 = vmul.f32 %v14065_v27, %v7687_v42 }
 0x586   : > { %3818 = vmatpush.bf16.msrb.mxu1 %v9177_v50  ;;  %v7305_v50 = vmul.f32 %v13213_v23, %v13876_v4 }
 0x587   : > { %5488 = vadd.xlane.f32.xlu2 %v5468_v54  ;;  %v3689_v54 = vadd.f32 %v14001_v60, %v3640_v9  ;;  %v7685_v61 = vsel %vm14076_vm15, %v14043_v24, %v7681_v29  ;;  %v17143_v24 = vld [vmem:[#allocation83_spill] sm:$0xff]  ;;  %v7304_v60 = vmul.f32 %v17059_v58, %v13895_v2  ;;  %v7689_v51 = vmul.f32 0.5, %v7688_v46 }
 0x588   : > { %v14096_v29 = vmul.f32 %v7685_v61, %v17143_v24  ;;  %v14107_v61 = vpop.f32.mrf.mxu3  ;;  %v7306_v46 = vmul.f32 %v13209_v12, %v13928_v44 }
 0x589   : > { %v14072_v53 = vadd.f32 %v14003_v30, %v3689_v54  ;;  %v8790_v30 = vld [vmem:[#allocation5 + $0x160] sm:$0xf0]  ;;  %v14090_v54 = vpop.f32.mrf.mxu0  ;;  %v7368_v17 = vadd.f32 %v7352_v32, %v7304_v60  ;;  %v7690_v15 = vsub.f32 1.5, %v7689_v51 }
 0x58a   : > { %v8793_v31 = vor.u32 %v10356_v5, %v8790_v30  ;;  %v7336_v5 = vpop.permute.xlu1 %7335 }
 0x58b   : > { %17140 = vst [vmem:[#allocation61_spill] sm:$0xff] %v14072_v53  ;;  %v5469_v9 = vmul.f32 %v14072_v53, %v14072_v53  ;;  %v7353_v2 = vmul.f32 %v13220_v11, %v7336_v5  ;;  %v7691_v51 = vmul.f32 %v14065_v27, %v7690_v15  ;;  %v10536_v15 = vld [vmem:[#allocation5 + $0x6d4] sm:$0xf] }
 0x58c   : > { %v14074_v10 = vpop.xlane.xlu0 %7608  ;;  %3769 = vmatpush.bf16.msrb.mxu0 %v8793_v31  ;;  %v7464_v31 = vmul.f32 0.088388346, %v7368_v17  ;;  %v10524_v53 = vld [vmem:[#allocation5 + $0x674] sm:$0xf] }
 0x58d   : > { %v7369_v24 = vadd.f32 %v7353_v2, %v7305_v50  ;;  %v7695_v5 = vsel %vm14125_vm2, %v14065_v27, %v7691_v51  ;;  %v9510_v2 = vld [vmem:[#allocation5 + $0x700] sm:$0xf0]  ;;  %v10440_v27 = vld [vmem:[#allocation5 + $0x3d4] sm:$0xf] }
 0x58e   : > { %v9126_v51 = vld [vmem:[#allocation5 + $0x400] sm:$0xf0] }
 0x591   : > { %v14110_v14 = vpop.f32.mrf.mxu0 }
 0x595   : > { %8104 = vrot.lane.b32.xlu1 %v14062_v3, %s12008_s2 }
 0x59d   : > { %5490 = vadd.xlane.f32.xlu0 %v5469_v9  ;;  %v14112_v9 = vpop.f32.mrf.mxu1 }
 0x59f   : > { %8100 = vrot.lane.b32.xlu2 %v14096_v29, %s12008_s2  ;;  %v7332_v42 = vpop.permute.xlu0 %7331 }
 0x5a0   : > { %v7351_v52 = vmul.f32 %v13123_v45, %v7332_v42  ;;  %v14120_v42 = vpop.f32.mrf.mxu2 }
 0x5a2   : > { %v7367_v30 = vadd.f32 %v7351_v52, %v7303_v49  ;;  %v7465_v49 = vmul.f32 0.088388346, %v7369_v24  ;;  %v14129_v52 = vpop.f32.mrf.mxu3  ;;  %v8742_v24 = vld [vmem:[#allocation5 + $0x100] sm:$0xf0] }
 0x5a4   : > { %v7463_v48 = vmul.f32 0.088388346, %v7367_v30  ;;  %v7622_v30 = vmul.f32 %v13888_v8, %v12430_v19  ;;  %v9129_v8 = vor.u32 %v10440_v27, %v9126_v51  ;;  %v14144_v27 = vpop.xlane.xlu1 %5480 }
 0x5a5   : > { %v3649_v50 = vpop.f32.mrf.mxu1 }
 0x5a6   : > { %v11042_v6 = vpack.c.bf16 %v7464_v31, %v7463_v48  ;;  %v3600_v48 = vpop.f32.mrf.mxu0  ;;  %3819 = vmatpush.bf16.msrb.mxu1 %v9129_v8 }
 0x5a7   : > { %v7338_v32 = vpop.permute.xlu0 %7337 }
 0x5a8   : > { %11314 = vst [vmem:[%s12683_s29 + $0xb0] sm:$0xff] %v11042_v6   ;;  %v7354_v60 = vmul.f32 %v13204_v33, %v7338_v32  ;;  %v9513_v6 = vor.u32 %v10536_v15, %v9510_v2  ;;  %v10344_v32 = vld [vmem:[#allocation5 + $0xd4] sm:$0xf]  ;;  %v9465_v15 = vor.u32 %v10524_v53, %v9462_v25 }
 0x5a9   : > { %v8745_v4 = vor.u32 %v10344_v32, %v8742_v24  ;;  %v10332_v2 = vld [vmem:[#allocation5 + $0x74] sm:$0xf]  ;;  %v8694_v32 = vld [vmem:[#allocation5 + $0xa0] sm:$0xf0] }
 0x5aa   : > { %v7370_v17 = vadd.f32 %v7354_v60, %v7306_v46  ;;  %v9894_v46 = vld [vmem:[#allocation5 + $0xa00] sm:$0xf0]  ;;  %v17146_v60 = vld [vmem:[#allocation81_spill] sm:$0xff]  ;;  %3868 = vmatpush.bf16.msrb.mxu2 %v9513_v6  ;;  %v8697_v24 = vor.u32 %v10332_v2, %v8694_v32  ;;  %v3747_v25 = vpop.f32.mrf.mxu3 }
 0x5ab   : > { %v9897_v28 = vor.u32 %v10632_v16, %v9894_v46  ;;  %v3698_v16 = vpop.f32.mrf.mxu2  ;;  %3770 = vmatpush.bf16.msrb.mxu0 %v8745_v4  ;;  %v9078_v6 = vld [vmem:[#allocation5 + $0x3a0] sm:$0xf0] }
 0x5ac   : > { %v7466_v44 = vmul.f32 0.088388346, %v7370_v17  ;;  %v14137_v17 = vmul.f32 %v7695_v5, %v17146_v60  ;;  %v9846_v5 = vld [vmem:[#allocation5 + $0x9a0] sm:$0xf0] }
 0x5ad   : > { %3917 = vmatpush.bf16.msrb.mxu3 %v9897_v28  ;;  %v9849_v46 = vor.u32 %v10620_v62, %v9846_v5  ;;  %v7620_v28 = vmul.f32 %v13770_v7, %v12430_v19  ;;  %v8079_v5 = vmul.f32 %v17081_v55, %v13953_v40  ;;  %v17150_v32 = vld [vmem:[#allocation68_spill] sm:$0xff] }
 0x5ae   : > { %v11047_v31 = vpack.c.bf16 %v7466_v44, %v7465_v49  ;;  %v14140_v49 = vadd.f32 1.1920929e-07, %v7622_v30  ;;  %v3650_v44 = vadd.f32 %v3649_v50, %v3600_v48  ;;  %3869 = vmatpush.bf16.msrb.mxu2 %v9465_v15  ;;  %v3645_v50 = vadd.f32 %v14092_v59, %v14090_v54  ;;  %v9798_v40 = vld [vmem:[#allocation5 + $0x940] sm:$0xf0] }
 0x5af   : > { %3771 = vmatpush.bf16.msrb.mxu0 %v8697_v24  ;;  %v14153_v48 = vadd.f32 1.1920929e-07, %v7620_v28  ;;  %v9414_v24 = vld [vmem:[#allocation5 + $0x640] sm:$0xf0] }
 0x5b0   : > { %11315 = vst [vmem:[%s12683_s29 + $0xb8] sm:$0xff] %v11047_v31   ;;  %v10428_v31 = vld [vmem:[#allocation5 + $0x374] sm:$0xf]  ;;  %v3699_v30 = vadd.f32 %v3698_v16, %v3650_v44  ;;  %11578 = vrsqrt.f32 %v14140_v49  ;;  %v3694_v44 = vadd.f32 %v14102_v56, %v3645_v50  ;;  %v17149_v16 = vld [vmem:[#allocation69_spill] sm:$0xff]  ;;  %v7621_v50 = vmul.f32 %v13892_v35, %v12430_v19 }
 0x5b1   : > { %8102 = vrot.lane.b32.xlu0 %v14137_v17, %s12008_s2  ;;  %v9081_v60 = vor.u32 %v10428_v31, %v9078_v6  ;;  %3918 = vmatpush.bf16.msrb.mxu3 %v9849_v46  ;;  %11580 = vrsqrt.f32 %v14153_v48  ;;  %v8078_v46 = vmul.f32 %v17149_v16, %v13981_v63  ;;  %v10512_v6 = vld [vmem:[#allocation5 + $0x614] sm:$0xf]  ;;  %vm7732_vm4 = vweird.f32 %v14140_v49 }
 0x5b2   : > { %v14149_v53 = vadd.f32 %v3747_v25, %v3699_v30  ;;  %v14169_v2 = vadd.f32 %v14107_v61, %v3694_v44  ;;  %v10608_v25 = vld [vmem:[#allocation5 + $0x914] sm:$0xf]  ;;  %v8646_v44 = vld [vmem:[#allocation5 + $0x40] sm:$0xf0]  ;;  %vm7712_vm7 = vweird.f32 %v14153_v48 }
 0x5b3   : > { %3820 = vmatpush.bf16.msrb.mxu1 %v9081_v60  ;;  %v9417_v60 = vor.u32 %v10512_v6, %v9414_v24  ;;  %v9801_v61 = vor.u32 %v10608_v25, %v9798_v40  ;;  %v7637_v24 = vadd.f32 1.1920929e-07, %v7621_v50  ;;  %v17153_v40 = vld [vmem:[#allocation20_spill] sm:$0xff] }
 0x5b4   : > { %17147 = vst [vmem:[#allocation65_spill] sm:$0xff] %v14149_v53  ;;  %v5473_v7 = vmul.f32 %v14149_v53, %v14149_v53  ;;  %v5471_v63 = vmul.f32 %v14169_v2, %v14169_v2  ;;  %v17166_v53 = vld [vmem:[#allocation29_spill] sm:$0xff] }
 0x5b5   : > { %17148 = vst [vmem:[#allocation64_spill] sm:$0xff] %v14169_v2  ;;  %3870 = vmatpush.bf16.msrb.mxu2 %v9417_v60  ;;  %3919 = vmatpush.bf16.msrb.mxu3 %v9801_v61  ;;  %v17152_v60 = vld [vmem:[#allocation23_spill] sm:$0xff]  ;;  %11582 = vrsqrt.f32 %v7637_v24  ;;  %v17154_v61 = vld [vmem:[#allocation21_spill] sm:$0xff]  ;;  %vm7722_vm10 = vweird.f32 %v7637_v24 }
 0x5b6   : > { %v14157_v4 = vpop.eup %11578 }
 0x5b7   : > { %v7727_v15 = vmul.f32 %v14157_v4, %v14140_v49  ;;  %v11581_v30 = vpop.eup %11580  ;;  %vm7733_vm3 = vweird.f32 %v14157_v4  ;;  %v17157_v49 = vld [vmem:[#allocation26_spill] sm:$0xff] }
 0x5b8   : > { %3920 = vmatmul.bf16.vlgmr.msrb.gmra.mxu3 %v17152_v60  ;;  %vm7734_vm5 = vmor %vm7732_vm4, %vm7733_vm3  ;;  %vm7713_vm6 = vweird.f32 %v11581_v30 }
 0x5b9   : > { %v14151_v62 = vpop.xlane.xlu2 %5482  ;;  %v7728_v56 = vmul.f32 %v14157_v4, %v7727_v15  ;;  %v7707_v15 = vmul.f32 %v11581_v30, %v14153_v48  ;;  %vm7714_vm8 = vmor %vm7712_vm7, %vm7713_vm6  ;;  %v3701_v48 = vpop.f32.mrf.mxu2 }
 0x5bc   : > { %v8097_v51 = vpop.permute.xlu1 %8096 }
 0x5bd   : > { %v8127_v8 = vmul.f32 %v17082_v36, %v8097_v51 }
 0x5bf   : > { %5498 = vadd.xlane.f32.xlu1 %v5473_v7  ;;  %v8143_v54 = vadd.f32 %v8127_v8, %v8079_v5  ;;  %v10320_v7 = vld [vmem:[#allocation5 + $0x14] sm:$0xf]  ;;  %v7729_v5 = vmul.f32 0.5, %v7728_v56  ;;  %v3648_v56 = vadd.f32 %v14112_v9, %v14110_v14 }
 0x5c0   : > { %v17156_v9 = vld [vmem:[#allocation78_spill] sm:$0xff] }
 0x5c1   : > { %v8095_v59 = vpop.permute.xlu2 %8094  ;;  %v8239_v51 = vmul.f32 0.088388346, %v8143_v54  ;;  %v17151_v54 = vld [vmem:[#allocation22_spill] sm:$0xff]  ;;  %v7730_v25 = vsub.f32 1.5, %v7729_v5  ;;  %v3697_v50 = vadd.f32 %v14120_v42, %v3648_v56  ;;  %v17161_v56 = vld [vmem:[#allocation56_spill] sm:$0xff] }
 0x5c2   : > { %v8126_v31 = vmul.f32 %v17150_v32, %v8095_v59  ;;  %v8649_v59 = vor.u32 %v10320_v7, %v8646_v44  ;;  %3871 = vmatmul.bf16.vlgmr.msrb.gmra.mxu2 %v17151_v54 }
 0x5c4   : > { %v8142_v28 = vadd.f32 %v8126_v31, %v8078_v46  ;;  %v10416_v46 = vld [vmem:[#allocation5 + $0x314] sm:$0xf]  ;;  %v9030_v31 = vld [vmem:[#allocation5 + $0x340] sm:$0xf0]  ;;  %3772 = vmatpush.bf16.msrb.mxu0 %v8649_v59 }
 0x5c5   : > { %v9033_v35 = vor.u32 %v10416_v46, %v9030_v31  ;;  %v17159_v31 = vld [vmem:[#allocation24_spill] sm:$0xff] }
 0x5c6   : > { %v8238_v8 = vmul.f32 0.088388346, %v8142_v28  ;;  %v7708_v28 = vmul.f32 %v11581_v30, %v7707_v15  ;;  %v14193_v15 = vadd.f32 %v14129_v52, %v3697_v50  ;;  %v17158_v52 = vld [vmem:[#allocation27_spill] sm:$0xff]  ;;  %v3750_v50 = vpop.f32.mrf.mxu3 }
 0x5c7   : > { %3821 = vmatpush.bf16.msrb.mxu1 %v9033_v35  ;;  %3773 = vmatmul.bf16.vlgmr.msrb.gmra.mxu0 %v17153_v40  ;;  %v3652_v35 = vpop.f32.mrf.mxu1 }
 0x5c8   : > { %v11132_v6 = vpack.c.bf16 %v8239_v51, %v8238_v8  ;;  %5494 = vadd.xlane.f32.xlu2 %v5471_v63  ;;  %v7709_v51 = vmul.f32 0.5, %v7708_v28  ;;  %v7731_v8 = vmul.f32 %v14157_v4, %v7730_v25  ;;  %v11583_v63 = vpop.eup %11582  ;;  %17155 = vst [vmem:[#allocation84_spill] sm:$0xff] %v14193_v15  ;;  %v5472_v42 = vmul.f32 %v14193_v15, %v14193_v15  ;;  %v17160_v28 = vld [vmem:[#allocation25_spill] sm:$0xff] }
 0x5c9   : > { %v7717_v14 = vmul.f32 %v11583_v63, %v7637_v24  ;;  %3925 = vmatmul.bf16.gmra.mxu3 %v17158_v52  ;;  %vm7723_vm9 = vweird.f32 %v11583_v63  ;;  %v7625_v24 = vmul.f32 %v13934_v20, %v12430_v19  ;;  %v17169_v20 = vld [vmem:[#allocation35_spill] sm:$0xff] }
 0x5ca   : > { %11332 = vst [vmem:[%s12683_s29 + $0xc0] sm:$0xff] %v11132_v6   ;;  %3822 = vmatmul.bf16.vlgmr.msrb.gmra.mxu1 %v17154_v61  ;;  %v7710_v7 = vsub.f32 1.5, %v7709_v51  ;;  %v7735_v44 = vsel %vm7734_vm5, %v14157_v4, %v7731_v8  ;;  %v3603_v6 = vpop.f32.mrf.mxu0  ;;  %vm7724_vm11 = vmor %vm7722_vm10, %vm7723_vm9 }
 0x5cb   : > { %v14196_v5 = vmul.f32 %v7735_v44, %v17156_v9  ;;  %v7718_v4 = vmul.f32 %v11583_v63, %v7717_v14  ;;  %v17162_v14 = vld [vmem:[#allocation30_spill] sm:$0xff] }
 0x5cc   : > { %v7711_v59 = vmul.f32 %v11581_v30, %v7710_v7 }
 0x5cd   : > { %v7719_v25 = vmul.f32 0.5, %v7718_v4  ;;  %v17164_v4 = vld [vmem:[#allocation28_spill] sm:$0xff] }
 0x5ce   : > { %v7715_v46 = vsel %vm7714_vm8, %v11581_v30, %v7711_v59  ;;  %v17163_v59 = vld [vmem:[#allocation31_spill] sm:$0xff] }
 0x5cf   : > { %v14208_v51 = vmul.f32 %v7715_v46, %v17161_v56  ;;  %v7720_v8 = vsub.f32 1.5, %v7719_v25  ;;  %v3654_v30 = vpop.f32.mrf.mxu1  ;;  %v17165_v46 = vld [vmem:[#allocation54_spill] sm:$0xff]  ;;  %v3752_v25 = vpop.f32.mrf.mxu3 }
 0x5d1   : > { %v7721_v7 = vmul.f32 %v11583_v63, %v7720_v8 }
 0x5d2   : > { %3876 = vmatmul.bf16.gmra.mxu2 %v17157_v49  ;;  %v3605_v44 = vpop.f32.mrf.mxu0 }
 0x5d3   : > { %v7725_v9 = vsel %vm7724_vm11, %v11583_v63, %v7721_v7  ;;  %v14223_v7 = vpop.xlane.xlu0 %5484 }
 0x5d4   : > { %v14216_v56 = vmul.f32 %v7725_v9, %v17165_v46  ;;  %v7623_v9 = vmul.f32 %v13902_v47, %v12430_v19  ;;  %v17167_v46 = vld [vmem:[#allocation34_spill] sm:$0xff] }
 0x5d7   : > { %3778 = vmatmul.bf16.gmra.mxu0 %v17159_v31  ;;  %v14233_v31 = vadd.f32 1.1920929e-07, %v7623_v9 }
 0x5d8   : > { %8110 = vrot.lane.b32.xlu1 %v14196_v5, %s12008_s2 }
 0x5d9   : > { %3930 = vmatmul.bf16.gmra.mxu3 %v17163_v59  ;;  %v7641_v59 = vadd.f32 1.1920929e-07, %v7625_v24  ;;  %v17170_v24 = vld [vmem:[#allocation32_spill] sm:$0xff]  ;;  %vm7742_vm0 = vweird.f32 %v14233_v31 }
 0x5da   : > { %3827 = vmatmul.bf16.gmra.mxu1 %v17160_v28  ;;  %v3608_v8 = vpop.f32.mrf.mxu0 }
 0x5db   : > { %5496 = vadd.xlane.f32.xlu0 %v5472_v42  ;;  %v3703_v42 = vpop.f32.mrf.mxu2  ;;  %11584 = vrsqrt.f32 %v7641_v59  ;;  %vm7762_vm13 = vweird.f32 %v7641_v59 }
 0x5dc   : > { %11586 = vrsqrt.f32 %v14233_v31 }
 0x5e0   : > { %8106 = vrot.lane.b32.xlu2 %v14208_v51, %s12008_s2 }
 0x5e2   : > { %3881 = vmatmul.bf16.gmra.mxu2 %v17162_v14  ;;  %v3657_v14 = vpop.f32.mrf.mxu1 }
 0x5e3   : > { %v3658_v63 = vadd.f32 %v3657_v14, %v3608_v8  ;;  %v3706_v15 = vpop.f32.mrf.mxu2  ;;  %v3653_v14 = vadd.f32 %v3652_v35, %v3603_v6  ;;  %v17173_v6 = vld [vmem:[#allocation74_spill] sm:$0xff] }
 0x5e4   : > { %v8081_v35 = vmul.f32 %v17173_v6, %v14096_v29  ;;  %v17175_v6 = vld [vmem:[#allocation38_spill] sm:$0xff] }
 0x5e5   : > { %v8099_v8 = vpop.permute.xlu0 %8098 }
 0x5e7   : > { %3783 = vmatmul.bf16.gmra.mxu0 %v17164_v4  ;;  %v3707_v4 = vadd.f32 %v3706_v15, %v3658_v63  ;;  %v17171_v15 = vld [vmem:[#allocation33_spill] sm:$0xff]  ;;  %v11585_v63 = vpop.eup %11584 }
 0x5e8   : > { %v7757_v9 = vmul.f32 %v11585_v63, %v7641_v59  ;;  %vm7763_vm12 = vweird.f32 %v11585_v63  ;;  %v17182_v59 = vld [vmem:[#allocation43_spill] sm:$0xff] }
 0x5e9   : > { %3935 = vmatmul.bf16.gmra.mxu3 %v17169_v20  ;;  %vm7764_vm14 = vmor %vm7762_vm13, %vm7763_vm12 }
 0x5ea   : > { %3832 = vmatmul.bf16.gmra.mxu1 %v17166_v53  ;;  %v3755_v53 = vpop.f32.mrf.mxu3 }
 0x5eb   : > { %v14228_v2 = vadd.f32 %v3755_v53, %v3707_v4  ;;  %v3702_v53 = vadd.f32 %v3701_v48, %v3653_v14  ;;  %v8128_v4 = vmul.f32 %v17105_v0, %v8099_v8  ;;  %v11587_v48 = vpop.eup %11586  ;;  %v7758_v8 = vmul.f32 %v11585_v63, %v7757_v9 }
 0x5ec   : > { %vm7743_vm15 = vweird.f32 %v11587_v48 }
 0x5ed   : > { %17168 = vst [vmem:[#allocation77_spill] sm:$0xff] %v14228_v2  ;;  %v5476_v47 = vmul.f32 %v14228_v2, %v14228_v2  ;;  %vm7744_vm1 = vmor %vm7742_vm0, %vm7743_vm15 }
 0x5ef   : > { %8108 = vrot.lane.b32.xlu0 %v14216_v56, %s12008_s2 }
 0x5f2   : > { %3886 = vmatmul.bf16.gmra.mxu2 %v17167_v46  ;;  %v17172_v46 = vld [vmem:[#allocation73_spill] sm:$0xff] }
 0x5f3   : > { %v8080_v20 = vmul.f32 %v17172_v46, %v14020_v43 }
 0x5f5   : > { %v8144_v2 = vadd.f32 %v8128_v4, %v8080_v20  ;;  %v17176_v20 = vld [vmem:[#allocation39_spill] sm:$0xff] }
 0x5f7   : > { %3788 = vmatmul.bf16.gmra.mxu0 %v17170_v24  ;;  %v14247_v24 = vadd.f32 %v3750_v50, %v3702_v53  ;;  %v8240_v43 = vmul.f32 0.088388346, %v8144_v2  ;;  %v7759_v50 = vmul.f32 0.5, %v7758_v8  ;;  %v17178_v53 = vld [vmem:[#allocation37_spill] sm:$0xff] }
 0x5f9   : > { %17174 = vst [vmem:[#allocation83_spill] sm:$0xff] %v14247_v24  ;;  %v5474_v29 = vmul.f32 %v14247_v24, %v14247_v24  ;;  %3940 = vmatmul.bf16.gmra.mxu3 %v17176_v20  ;;  %v7760_v4 = vsub.f32 1.5, %v7759_v50  ;;  %v17181_v50 = vld [vmem:[#allocation102_spill] sm:$0xff] }
 0x5fa   : > { %v14230_v28 = vpop.xlane.xlu2 %5488  ;;  %3837 = vmatmul.bf16.gmra.mxu1 %v17171_v15  ;;  %v7624_v15 = vmul.f32 %v13972_v39, %v12430_v19 }
 0x5fc   : > { %v14250_v0 = vadd.f32 1.1920929e-07, %v7624_v15  ;;  %v17177_v15 = vld [vmem:[#allocation36_spill] sm:$0xff] }
 0x5fe   : > { %11588 = vrsqrt.f32 %v14250_v0  ;;  %vm7752_vm3 = vweird.f32 %v14250_v0 }
 0x602   : > { %v8101_v52 = vpop.permute.xlu2 %8100  ;;  %5504 = vadd.xlane.f32.xlu1 %v5476_v47  ;;  %v7737_v47 = vmul.f32 %v11587_v48, %v14233_v31  ;;  %3891 = vmatmul.bf16.gmra.mxu2 %v17175_v6  ;;  %v17186_v31 = vld [vmem:[#allocation80_spill] sm:$0xff] }
 0x603   : > { %v8129_v49 = vmul.f32 %v17110_v26, %v8101_v52  ;;  %v3655_v52 = vadd.f32 %v3654_v30, %v3605_v44 }
 0x604   : > { %v7738_v2 = vmul.f32 %v11587_v48, %v7737_v47 }
 0x605   : > { %v8145_v14 = vadd.f32 %v8129_v49, %v8081_v35  ;;  %v14258_v49 = vpop.xlane.xlu1 %5486  ;;  %v3704_v9 = vadd.f32 %v3703_v42, %v3655_v52  ;;  %v17180_v42 = vld [vmem:[#allocation42_spill] sm:$0xff] }
 0x606   : > { %v7739_v35 = vmul.f32 0.5, %v7738_v2 }
 0x607   : > { %v8241_v46 = vmul.f32 0.088388346, %v8145_v14  ;;  %3793 = vmatmul.bf16.gmra.mxu0 %v17177_v15  ;;  %v11589_v14 = vpop.eup %11588  ;;  %v14263_v8 = vadd.f32 %v3752_v25, %v3704_v9 }
 0x608   : > { %vm7753_vm2 = vweird.f32 %v11589_v14 }
 0x609   : > { %v11137_v39 = vpack.c.bf16 %v8241_v46, %v8240_v43  ;;  %5500 = vadd.xlane.f32.xlu2 %v5474_v29  ;;  %v7761_v46 = vmul.f32 %v11585_v63, %v7760_v4  ;;  %17179 = vst [vmem:[#allocation81_spill] sm:$0xff] %v14263_v8  ;;  %v7740_v43 = vsub.f32 1.5, %v7739_v35  ;;  %v7747_v29 = vmul.f32 %v11589_v14, %v14250_v0  ;;  %v17183_v4 = vld [vmem:[#allocation40_spill] sm:$0xff]  ;;  %v17184_v35 = vld [vmem:[#allocation41_spill] sm:$0xff]  ;;  %vm7754_vm4 = vmor %vm7752_vm3, %vm7753_vm2 }
 0x60a   : > { %3842 = vmatmul.bf16.gmra.mxu1 %v17178_v53  ;;  %v5475_v30 = vmul.f32 %v14263_v8, %v14263_v8  ;;  %3945 = vmatmul.bf16.gmra.mxu3 %v17182_v59  ;;  %v17187_v8 = vld [vmem:[#allocation58_spill] sm:$0xff] }
 0x60b   : > { %11333 = vst [vmem:[%s12683_s29 + $0xc8] sm:$0xff] %v11137_v39   ;;  %v7765_v44 = vsel %vm7764_vm14, %v11585_v63, %v7761_v46  ;;  %v7748_v47 = vmul.f32 %v11589_v14, %v7747_v29  ;;  %v7741_v39 = vmul.f32 %v11587_v48, %v7740_v43  ;;  %v17185_v46 = vld [vmem:[#allocation67_spill] sm:$0xff]  ;;  %v17190_v53 = vld [vmem:[#allocation46_spill] sm:$0xff] }
 0x60c   : > { %v14272_v25 = vmul.f32 %v7765_v44, %v17181_v50  ;;  %v3659_v50 = vpop.f32.mrf.mxu1 }
 0x60d   : > { %v14266_v24 = vpop.xlane.xlu1 %5492  ;;  %v7749_v63 = vmul.f32 0.5, %v7748_v47  ;;  %v7745_v2 = vsel %vm7744_vm1, %v11587_v48, %v7741_v39  ;;  %v8083_v47 = vmul.f32 %v17187_v8, %v14062_v3  ;;  %v17188_v48 = vld [vmem:[#allocation53_spill] sm:$0xff]  ;;  %v3757_v3 = vpop.f32.mrf.mxu3 }
 0x60e   : > { %v14283_v43 = vmul.f32 %v7745_v2, %v17185_v46  ;;  %v8082_v39 = vmul.f32 %v17188_v48, %v14137_v17 }
 0x60f   : > { %v7750_v29 = vsub.f32 1.5, %v7749_v63  ;;  %v3708_v63 = vpop.f32.mrf.mxu2 }
 0x610   : > { %v14276_v52 = vpop.xlane.xlu0 %5490 }
 0x611   : > { %v7751_v2 = vmul.f32 %v11589_v14, %v7750_v29 }
 0x612   : > { %3896 = vmatmul.bf16.gmra.mxu2 %v17180_v42 }
 0x613   : > { %v7755_v26 = vsel %vm7754_vm4, %v11589_v14, %v7751_v2  ;;  %v17193_v2 = vld [vmem:[#allocation51_spill] sm:$0xff] }
 0x614   : > { %v3662_v48 = vpop.f32.mrf.mxu1 }
 0x615   : > { %v8105_v9 = vpop.permute.xlu1 %8104  ;;  %v3760_v14 = vpop.f32.mrf.mxu3 }
 0x616   : > { %v8131_v44 = vmul.f32 %v17186_v31, %v8105_v9 }
 0x617   : > { %3798 = vmatmul.bf16.gmra.mxu0 %v17183_v4  ;;  %v3711_v0 = vpop.f32.mrf.mxu2 }
 0x618   : > { %v8147_v59 = vadd.f32 %v8131_v44, %v8083_v47  ;;  %v17191_v44 = vld [vmem:[#allocation47_spill] sm:$0xff]  ;;  %v7626_v47 = vmul.f32 %v13925_v34, %v12430_v19  ;;  %v7629_v34 = vmul.f32 %v14082_v22, %v12430_v19 }
 0x619   : > { %5502 = vadd.xlane.f32.xlu0 %v5475_v30  ;;  %v3610_v30 = vpop.f32.mrf.mxu0 }
 0x61a   : > { %3847 = vmatmul.bf16.gmra.mxu1 %v17184_v35  ;;  %v17189_v35 = vld [vmem:[#allocation52_spill] sm:$0xff]  ;;  %v8243_v46 = vmul.f32 0.088388346, %v8147_v59  ;;  %3950 = vmatmul.bf16.gmra.mxu3 %v17191_v44 }
 0x61b   : > { %8116 = vrot.lane.b32.xlu1 %v14272_v25, %s12008_s2 }
 0x621   : > { %8112 = vrot.lane.b32.xlu2 %v14283_v43, %s12008_s2  ;;  %v3613_v17 = vpop.f32.mrf.mxu0 }
 0x622   : > { %3901 = vmatmul.bf16.gmra.mxu2 %v17190_v53 }
 0x623   : > { %v8103_v4 = vpop.permute.xlu0 %8102 }
 0x624   : > { %v8130_v42 = vmul.f32 %v17189_v35, %v8103_v4  ;;  %v17192_v4 = vld [vmem:[#allocation82_spill] sm:$0xff] }
 0x625   : > { %v14297_v29 = vmul.f32 %v7755_v26, %v17192_v4  ;;  %v3660_v4 = vadd.f32 %v3659_v50, %v3610_v30  ;;  %v14320_v30 = vadd.f32 1.1920929e-07, %v7629_v34 }
 0x626   : > { %v8146_v9 = vadd.f32 %v8130_v42, %v8082_v39  ;;  %v7628_v42 = vmul.f32 %v14058_v41, %v12430_v19  ;;  %v17195_v41 = vld [vmem:[#allocation49_spill] sm:$0xff] }
 0x627   : > { %3803 = vmatmul.bf16.gmra.mxu0 %v17109_v13  ;;  %v17194_v13 = vld [vmem:[#allocation48_spill] sm:$0xff]  ;;  %vm7802_vm13 = vweird.f32 %v14320_v30 }
 0x628   : > { %v8242_v31 = vmul.f32 0.088388346, %v8146_v9  ;;  %v7644_v39 = vadd.f32 1.1920929e-07, %v7628_v42  ;;  %v7642_v9 = vadd.f32 1.1920929e-07, %v7626_v47  ;;  %v3709_v42 = vadd.f32 %v3708_v63, %v3660_v4 }
 0x629   : > { %v3615_v59 = vpop.f32.mrf.mxu0  ;;  %v3663_v63 = vadd.f32 %v3662_v48, %v3613_v17 }
 0x62a   : > { %v11142_v8 = vpack.c.bf16 %v8243_v46, %v8242_v31  ;;  %3852 = vmatmul.bf16.gmra.mxu1 %v17111_v1  ;;  %v3664_v31 = vpop.f32.mrf.mxu1  ;;  %3955 = vmatmul.bf16.gmra.mxu3 %v17193_v2  ;;  %11590 = vrsqrt.f32 %v7644_v39  ;;  %v3762_v1 = vpop.f32.mrf.mxu3  ;;  %v14322_v50 = vadd.f32 %v3757_v3, %v3709_v42  ;;  %vm7792_vm6 = vweird.f32 %v7644_v39 }
 0x62b   : > { %v3665_v26 = vadd.f32 %v3664_v31, %v3615_v59  ;;  %11592 = vrsqrt.f32 %v7642_v9  ;;  %v7627_v59 = vmul.f32 %v14074_v10, %v12430_v19  ;;  %v3712_v3 = vadd.f32 %v3711_v0, %v3663_v63 }
 0x62c   : > { %11334 = vst [vmem:[%s12683_s29 + $0xd0] sm:$0xff] %v11142_v8   ;;  %v3713_v8 = vpop.f32.mrf.mxu2  ;;  %11594 = vrsqrt.f32 %v14320_v30  ;;  %v5477_v22 = vmul.f32 %v14322_v50, %v14322_v50  ;;  %vm7772_vm9 = vweird.f32 %v7642_v9 }
 0x62d   : > { %8114 = vrot.lane.b32.xlu0 %v14297_v29, %s12008_s2  ;;  %v3714_v46 = vadd.f32 %v3713_v8, %v3665_v26  ;;  %17197 = vst [vmem:[#allocation23_spill] sm:$0xff] %v14322_v50 }
 0x62f   : > { %v14312_v44 = vadd.f32 %v3762_v1, %v3714_v46 }
 0x630   : > { %v11591_v31 = vpop.eup %11590 }
 0x631   : > { %17196 = vst [vmem:[#allocation22_spill] sm:$0xff] %v14312_v44  ;;  %v5479_v47 = vmul.f32 %v14312_v44, %v14312_v44  ;;  %v11593_v26 = vpop.eup %11592  ;;  %v7787_v8 = vmul.f32 %v11591_v31, %v7644_v39  ;;  %vm7793_vm5 = vweird.f32 %v11591_v31 }
 0x632   : > { %3906 = vmatmul.bf16.gmra.mxu2 %v17114_v38  ;;  %v7767_v1 = vmul.f32 %v11593_v26, %v7642_v9  ;;  %v11595_v34 = vpop.eup %11594  ;;  %vm7794_vm7 = vmor %vm7792_vm6, %vm7793_vm5  ;;  %vm7773_vm8 = vweird.f32 %v11593_v26 }
 0x633   : > { %v7788_v10 = vmul.f32 %v11591_v31, %v7787_v8  ;;  %vm7774_vm10 = vmor %vm7772_vm9, %vm7773_vm8  ;;  %vm7803_vm11 = vweird.f32 %v11595_v34 }
 0x634   : > { %v7768_v46 = vmul.f32 %v11593_v26, %v7767_v1  ;;  %vm7804_vm15 = vmor %vm7802_vm13, %vm7803_vm11 }
 0x635   : > { %v7789_v4 = vmul.f32 0.5, %v7788_v10 }
 0x636   : > { %v7769_v44 = vmul.f32 0.5, %v7768_v46 }
 0x637   : > { %3808 = vmatmul.bf16.gmra.mxu0 %v17194_v13  ;;  %v14331_v13 = vadd.f32 %v3760_v14, %v3712_v3 }
 0x638   : > { %v7770_v8 = vsub.f32 1.5, %v7769_v44  ;;  %v17199_v44 = vld [vmem:[#allocation59_spill] sm:$0xff] }
 0x639   : > { %17198 = vst [vmem:[#allocation78_spill] sm:$0xff] %v14331_v13  ;;  %v5478_v48 = vmul.f32 %v14331_v13, %v14331_v13 }
 0x63a   : > { %3857 = vmatmul.bf16.gmra.mxu1 %v17195_v41  ;;  %v14324_v41 = vadd.f32 1.1920929e-07, %v7627_v59  ;;  %v7797_v59 = vmul.f32 %v11595_v34, %v14320_v30  ;;  %v7771_v10 = vmul.f32 %v11593_v26, %v7770_v8  ;;  %v17202_v8 = vld [vmem:[#allocation76_spill] sm:$0xff] }
 0x63b   : > { %v14333_v2 = vpop.xlane.xlu2 %5494 }
 0x63c   : > { %11596 = vrsqrt.f32 %v14324_v41  ;;  %v7798_v38 = vmul.f32 %v11595_v34, %v7797_v59  ;;  %v7775_v59 = vsel %vm7774_vm10, %v11593_v26, %v7771_v10  ;;  %v17204_v10 = vld [vmem:[#allocation88_spill] sm:$0xff]  ;;  %vm7782_vm14 = vweird.f32 %v14324_v41 }
 0x63e   : > { %v7799_v1 = vmul.f32 0.5, %v7798_v38  ;;  %v17201_v38 = vld [vmem:[#allocation86_spill] sm:$0xff] }
 0x640   : > { %v7800_v3 = vsub.f32 1.5, %v7799_v1 }
 0x642   : > { %v11597_v42 = vpop.eup %11596  ;;  %v7801_v1 = vmul.f32 %v11595_v34, %v7800_v3 }
 0x643   : > { %v7777_v50 = vmul.f32 %v11597_v42, %v14324_v41  ;;  %v8107_v46 = vpop.permute.xlu2 %8106  ;;  %vm7783_vm12 = vweird.f32 %v11597_v42 }
 0x644   : > { %v3774_v9 = vpop.f32.mrf.mxu0  ;;  %vm7784_vm0 = vmor %vm7782_vm14, %vm7783_vm12 }
 0x645   : > { %5510 = vadd.xlane.f32.xlu1 %v5479_v47  ;;  %v7790_v47 = vsub.f32 1.5, %v7789_v4  ;;  %v7778_v0 = vmul.f32 %v11597_v42, %v7777_v50  ;;  %v17200_v50 = vld [vmem:[#allocation85_spill] sm:$0xff] }
 0x646   : > { %v8132_v39 = vmul.f32 %v17200_v50, %v8107_v46  ;;  %v3921_v50 = vpop.f32.mrf.mxu3 }
 0x647   : > { %v7791_v17 = vmul.f32 %v11591_v31, %v7790_v47  ;;  %v7779_v63 = vmul.f32 0.5, %v7778_v0 }
 0x649   : > { %v7795_v14 = vsel %vm7794_vm7, %v11591_v31, %v7791_v17  ;;  %v7780_v47 = vsub.f32 1.5, %v7779_v63  ;;  %v8084_v31 = vmul.f32 %v17201_v38, %v14208_v51  ;;  %v17203_v17 = vld [vmem:[#allocation87_spill] sm:$0xff] }
 0x64a   : > { %5506 = vadd.xlane.f32.xlu2 %v5477_v22  ;;  %v14341_v4 = vmul.f32 %v7795_v14, %v17199_v44  ;;  %v8085_v0 = vmul.f32 %v17203_v17, %v14216_v56  ;;  %v3823_v44 = vpop.f32.mrf.mxu1  ;;  %v3872_v56 = vpop.f32.mrf.mxu2  ;;  %v5513_v17 = vmul.f32 %v14151_v62, %v12430_v19 }
 0x64b   : > { %v8148_v26 = vadd.f32 %v8132_v39, %v8084_v31  ;;  %v7781_v46 = vmul.f32 %v11597_v42, %v7780_v47  ;;  %v17206_v47 = vld [vmem:[#allocation97_spill] sm:$0xff] }
 0x64c   : > { %v3776_v41 = vpop.f32.mrf.mxu0  ;;  %v14390_v6 = vadd.f32 1.1920929e-07, %v5513_v17 }
 0x64d   : > { %v8244_v3 = vmul.f32 0.088388346, %v8148_v26  ;;  %v7785_v39 = vsel %vm7784_vm0, %v11597_v42, %v7781_v46  ;;  %v14369_v26 = vpop.xlane.xlu1 %5498  ;;  %v3824_v46 = vadd.f32 %v3823_v44, %v3774_v9 }
 0x64e   : > { %v14338_v22 = vpop.xlane.xlu0 %5496  ;;  %v14362_v38 = vmul.f32 %v7785_v39, %v17206_v47  ;;  %vm5560_vm8 = vweird.f32 %v14390_v6 }
 0x64f   : > { %v3873_v39 = vadd.f32 %v3872_v56, %v3824_v46 }
 0x651   : > { %v14382_v9 = vadd.f32 %v3921_v50, %v3873_v39 }
 0x652   : > { %v3825_v30 = vpop.f32.mrf.mxu1 }
 0x653   : > { %17209 = vst [vmem:[#allocation54_spill] sm:$0xff] %v14382_v9 }
 0x654   : > { %v3779_v42 = vpop.f32.mrf.mxu0 }
 0x657   : > { %5508 = vadd.xlane.f32.xlu0 %v5478_v48  ;;  %v14349_v48 = vmul.f32 %v7775_v59, %v17202_v8  ;;  %v7805_v59 = vsel %vm7804_vm15, %v11595_v34, %v7801_v1  ;;  %v3874_v34 = vpop.f32.mrf.mxu2 }
 0x65a   : > { %v3828_v1 = vpop.f32.mrf.mxu1 }
 0x65e   : > { %8122 = vrot.lane.b32.xlu1 %v14341_v4, %s12008_s2 }
 0x661   : > { %v8109_v14 = vpop.permute.xlu0 %8108 }
 0x662   : > { %v8133_v63 = vmul.f32 %v17204_v10, %v8109_v14  ;;  %8118 = vrot.lane.b32.xlu2 %v14349_v48, %s12008_s2  ;;  %v17205_v14 = vld [vmem:[#allocation100_spill] sm:$0xff]  ;;  %v3830_v47 = vpop.f32.mrf.mxu1 }
 0x663   : > { %v14359_v13 = vmul.f32 %v7805_v59, %v17205_v14  ;;  %v3781_v14 = vpop.f32.mrf.mxu0  ;;  %v17208_v10 = vld [vmem:[#allocation96_spill] sm:$0xff] }
 0x664   : > { %v8149_v51 = vadd.f32 %v8133_v63, %v8085_v0  ;;  %v3923_v0 = vpop.f32.mrf.mxu3  ;;  %v3877_v63 = vpop.f32.mrf.mxu2  ;;  %v3831_v44 = vadd.f32 %v3830_v47, %v3781_v14 }
 0x666   : > { %v8245_v8 = vmul.f32 0.088388346, %v8149_v51 }
 0x668   : > { %v11147_v31 = vpack.c.bf16 %v8245_v8, %v8244_v3  ;;  %v5512_v3 = vmul.f32 %v14144_v27, %v12430_v19  ;;  %v8111_v8 = vpop.permute.xlu1 %8110  ;;  %v17210_v27 = vld [vmem:[#allocation95_spill] sm:$0xff] }
 0x669   : > { %v8134_v53 = vmul.f32 %v17208_v10, %v8111_v8  ;;  %v8086_v56 = vmul.f32 %v17210_v27, %v14196_v5  ;;  %v6248_v8 = vmul.f32 %v14382_v9, %v14382_v9  ;;  %v3826_v5 = vadd.f32 %v3825_v30, %v3776_v41 }
 0x66a   : > { %11335 = vst [vmem:[%s12683_s29 + $0xd8] sm:$0xff] %v11147_v31   ;;  %8124 = vrot.lane.b32.xlu2 %v14359_v13, %s12008_s2  ;;  %v5514_v31 = vmul.f32 %v14223_v7, %v12430_v19  ;;  %v14380_v35 = vadd.f32 1.1920929e-07, %v5512_v3  ;;  %v8087_v7 = vmul.f32 %v17133_v18, %v14283_v43 }
 0x66b   : > { %8120 = vrot.lane.b32.xlu0 %v14362_v38, %s12008_s2  ;;  %v8150_v62 = vadd.f32 %v8134_v53, %v8086_v56 }
 0x66c   : > { %v3926_v59 = vpop.f32.mrf.mxu3  ;;  %v14384_v15 = vadd.f32 1.1920929e-07, %v5514_v31  ;;  %v3879_v46 = vpop.f32.mrf.mxu2  ;;  %11598 = vrsqrt.f32 %v14380_v35  ;;  %vm5550_vm3 = vweird.f32 %v14380_v35 }
 0x66d   : > { %v3880_v50 = vadd.f32 %v3879_v46, %v3831_v44  ;;  %v8246_v43 = vmul.f32 0.088388346, %v8150_v62 }
 0x66e   : > { %11600 = vrsqrt.f32 %v14384_v15  ;;  %vm5570_vm6 = vweird.f32 %v14384_v15 }
 0x66f   : > { %11602 = vrsqrt.f32 %v14390_v6 }
 0x672   : > { %v11599_v14 = vpop.eup %11598 }
 0x673   : > { %v5545_v56 = vmul.f32 %v11599_v14, %v14380_v35  ;;  %vm5551_vm1 = vweird.f32 %v11599_v14  ;;  %v17219_v35 = vld [vmem:[#allocation62_spill] sm:$0xff] }
 0x674   : > { %v3928_v39 = vpop.f32.mrf.mxu3  ;;  %v11601_v47 = vpop.eup %11600  ;;  %vm5552_vm4 = vmor %vm5550_vm3, %vm5551_vm1 }
 0x675   : > { %v11603_v30 = vpop.eup %11602  ;;  %vm5571_vm2 = vweird.f32 %v11601_v47 }
 0x676   : > { %vm5561_vm5 = vweird.f32 %v11603_v30  ;;  %vm5572_vm7 = vmor %vm5570_vm6, %vm5571_vm2 }
 0x677   : > { %vm5562_vm9 = vmor %vm5560_vm8, %vm5561_vm5 }
 0x67c   : > { %v14371_v51 = vpop.xlane.xlu2 %5500 }
 0x67d   : > { %17207 = vst [vmem:[#allocation56_spill] sm:$0xff] %v14371_v51  ;;  %v3829_v51 = vadd.f32 %v3828_v1, %v3779_v42  ;;  %v14398_v42 = vadd.f32 %v3928_v39, %v3880_v50 }
 0x67f   : > { %v3878_v53 = vadd.f32 %v3877_v63, %v3829_v51  ;;  %17211 = vst [vmem:[#allocation102_spill] sm:$0xff] %v14398_v42  ;;  %v6251_v41 = vmul.f32 %v14398_v42, %v14398_v42  ;;  %v5565_v63 = vmul.f32 %v11601_v47, %v14384_v15  ;;  %v14409_v51 = vpop.xlane.xlu1 %5504 }
 0x681   : > { %v14400_v44 = vadd.f32 %v3926_v59, %v3878_v53  ;;  %v5555_v59 = vmul.f32 %v11603_v30, %v14390_v6  ;;  %v17220_v6 = vld [vmem:[#allocation66_spill] sm:$0xff] }
 0x683   : > { %17212 = vst [vmem:[#allocation67_spill] sm:$0xff] %v14400_v44  ;;  %v5556_v50 = vmul.f32 %v11603_v30, %v5555_v59 }
 0x684   : > { %v8113_v20 = vpop.permute.xlu2 %8112 }
 0x685   : > { %v8135_v3 = vmul.f32 %v17134_v57, %v8113_v20  ;;  %v3875_v20 = vadd.f32 %v3874_v34, %v3826_v5  ;;  %v6250_v34 = vmul.f32 %v14400_v44, %v14400_v44 }
 0x687   : > { %v8151_v31 = vadd.f32 %v8135_v3, %v8087_v7  ;;  %v14406_v46 = vadd.f32 %v3923_v0, %v3875_v20  ;;  %v5546_v7 = vmul.f32 %v11599_v14, %v5545_v56  ;;  %v5566_v3 = vmul.f32 %v11601_v47, %v5565_v63  ;;  %v17216_v63 = vld [vmem:[#allocation98_spill] sm:$0xff] }
 0x688   : > { %6264 = vadd.xlane.f32.xlu1 %v6248_v8 }
 0x689   : > { %v8247_v17 = vmul.f32 0.088388346, %v8151_v31  ;;  %17213 = vst [vmem:[#allocation82_spill] sm:$0xff] %v14406_v46  ;;  %v6249_v62 = vmul.f32 %v14406_v46, %v14406_v46  ;;  %v5547_v0 = vmul.f32 0.5, %v5546_v7  ;;  %v5567_v5 = vmul.f32 0.5, %v5566_v3  ;;  %v17217_v3 = vld [vmem:[#allocation57_spill] sm:$0xff] }
 0x68a   : > { %v5557_v31 = vmul.f32 0.5, %v5556_v50  ;;  %v5516_v46 = vmul.f32 %v14230_v28, %v12430_v19 }
 0x68b   : > { %v11152_v1 = vpack.c.bf16 %v8247_v17, %v8246_v43  ;;  %v5548_v43 = vsub.f32 1.5, %v5547_v0  ;;  %v5568_v53 = vsub.f32 1.5, %v5567_v5  ;;  %v17214_v17 = vld [vmem:[#allocation101_spill] sm:$0xff] }
 0x68c   : > { %v14416_v8 = vpop.xlane.xlu0 %5502 }
 0x68d   : > { %11336 = vst [vmem:[%s12683_s29 + $0xe0] sm:$0xff] %v11152_v1   ;;  %v8117_v39 = vpop.permute.xlu1 %8116  ;;  %v5558_v1 = vsub.f32 1.5, %v5557_v31  ;;  %v5549_v42 = vmul.f32 %v11599_v14, %v5548_v43  ;;  %v5569_v7 = vmul.f32 %v11601_v47, %v5568_v53  ;;  %v17218_v53 = vld [vmem:[#allocation63_spill] sm:$0xff] }
 0x68e   : > { %v8137_v20 = vmul.f32 %v17214_v17, %v8117_v39 }
 0x68f   : > { %v5559_v50 = vmul.f32 %v11603_v30, %v5558_v1  ;;  %v5553_v0 = vsel %vm5552_vm4, %v11599_v14, %v5549_v42  ;;  %v5573_v39 = vsel %vm5572_vm7, %v11601_v47, %v5569_v7  ;;  %v3784_v42 = vpop.f32.mrf.mxu0  ;;  %v3833_v14 = vpop.f32.mrf.mxu1  ;;  %v9756_v47 = vld [vmem:[#allocation5 + $0x8b8] sm:$0xf] }
 0x690   : > { %6270 = vadd.xlane.f32.xlu1 %v6251_v41  ;;  %v17215_v41 = vld [vmem:[#allocation99_spill] sm:$0xff]  ;;  %v14443_v1 = vpop.f32.mrf.mxu2 }
 0x691   : > { %v8089_v56 = vmul.f32 %v17215_v41, %v14272_v25  ;;  %v5563_v43 = vsel %vm5562_vm9, %v11603_v30, %v5559_v50  ;;  %v10140_v30 = vld [vmem:[#allocation5 + $0xbb8] sm:$0xf] }
 0x692   : > { %v14439_v15 = vmul.f32 %v5563_v43, %v17220_v6  ;;  %v8988_v7 = vld [vmem:[#allocation5 + $0x2b8] sm:$0xf] }
 0x693   : > { %6268 = vadd.xlane.f32.xlu2 %v6250_v34  ;;  %v8088_v34 = vmul.f32 %v17216_v63, %v14297_v29 }
 0x695   : > { %6266 = vadd.xlane.f32.xlu0 %v6249_v62  ;;  %v8153_v62 = vadd.f32 %v8137_v20, %v8089_v56  ;;  %v14428_v20 = vmul.f32 %v5553_v0, %v17218_v53  ;;  %v14431_v56 = vmul.f32 %v5573_v39, %v17219_v35  ;;  %v9372_v0 = vld [vmem:[#allocation5 + $0x5b8] sm:$0xf]  ;;  %v14445_v39 = vpop.f32.mrf.mxu3  ;;  %v5515_v35 = vmul.f32 %v14258_v49, %v12430_v19 }
 0x696   : > { %v5517_v49 = vmul.f32 %v14276_v52, %v12430_v19  ;;  %v9660_v52 = vld [vmem:[#allocation5 + $0x7f8] sm:$0xf] }
 0x697   : > { %v8249_v29 = vmul.f32 0.088388346, %v8153_v62  ;;  %v10411_v62 = vld [vmem:[#allocation5 + $0x2e4] sm:$0xf0]  ;;  %v3835_v43 = vpop.f32.mrf.mxu1  ;;  %v14451_v9 = vadd.f32 1.1920929e-07, %v5515_v35 }
 0x698   : > { %v3884_v53 = vpop.f32.mrf.mxu2  ;;  %v14460_v35 = vadd.f32 1.1920929e-07, %v5517_v49  ;;  %v10483_v49 = vld [vmem:[#allocation5 + $0x524] sm:$0xf0] }
 0x699   : > { %11604 = vrsqrt.f32 %v14451_v9  ;;  %vm5580_vm11 = vweird.f32 %v14451_v9 }
 0x69a   : > { %vm5600_vm1 = vweird.f32 %v14460_v35 }
 0x69f   : > { %v8115_v59 = vpop.permute.xlu0 %8114 }
 0x6a0   : > { %v8136_v44 = vmul.f32 %v17217_v3, %v8115_v59  ;;  %v10699_v59 = vld [vmem:[#allocation5 + $0xbe4] sm:$0xf0]  ;;  %v9276_v3 = vld [vmem:[#allocation5 + $0x4f8] sm:$0xf] }
 0x6a1   : > { %v10141_v50 = vor.u32 %v10699_v59, %v10140_v30  ;;  %v10092_v30 = vld [vmem:[#allocation5 + $0xb58] sm:$0xf] }
 0x6a2   : > { %v8152_v25 = vadd.f32 %v8136_v44, %v8088_v34  ;;  %v10603_v44 = vld [vmem:[#allocation5 + $0x8e4] sm:$0xf0] }
 0x6a3   : > { %v9757_v34 = vor.u32 %v10603_v44, %v9756_v47  ;;  %4108 = vmatpush.bf16.msra.mxu3 %v10141_v50  ;;  %v9708_v47 = vld [vmem:[#allocation5 + $0x858] sm:$0xf]  ;;  %v10591_v44 = vld [vmem:[#allocation5 + $0x884] sm:$0xf0]  ;;  %v3933_v50 = vpop.f32.mrf.mxu3 }
 0x6a4   : > { %v8248_v5 = vmul.f32 0.088388346, %v8152_v25  ;;  %v8989_v25 = vor.u32 %v10411_v62, %v8988_v7  ;;  %v9709_v59 = vor.u32 %v10591_v44, %v9708_v47  ;;  %v10687_v7 = vld [vmem:[#allocation5 + $0xb84] sm:$0xf0]  ;;  %v3838_v47 = vpop.f32.mrf.mxu1 }
 0x6a5   : > { %4059 = vmatpush.bf16.msra.mxu2 %v9757_v34  ;;  %v8940_v34 = vld [vmem:[#allocation5 + $0x258] sm:$0xf]  ;;  %v10399_v62 = vld [vmem:[#allocation5 + $0x284] sm:$0xf0] }
 0x6a6   : > { %v11157_v31 = vpack.c.bf16 %v8249_v29, %v8248_v5  ;;  %v10507_v29 = vld [vmem:[#allocation5 + $0x5e4] sm:$0xf0]  ;;  %3961 = vmatpush.bf16.msra.mxu0 %v8989_v25  ;;  %v10093_v25 = vor.u32 %v10687_v7, %v10092_v30  ;;  %v14458_v30 = vadd.f32 1.1920929e-07, %v5516_v46  ;;  %v3834_v7 = vadd.f32 %v3833_v14, %v3784_v42 }
 0x6a7   : > { %v9373_v5 = vor.u32 %v10507_v29, %v9372_v0  ;;  %v8941_v0 = vor.u32 %v10399_v62, %v8940_v34  ;;  %v9324_v29 = vld [vmem:[#allocation5 + $0x558] sm:$0xf]  ;;  %v3887_v62 = vpop.f32.mrf.mxu2  ;;  %v9277_v14 = vor.u32 %v10483_v49, %v9276_v3  ;;  %v10663_v3 = vld [vmem:[#allocation5 + $0xac4] sm:$0xf0] }
 0x6a8   : > { %11337 = vst [vmem:[%s12683_s29 + $0xe8] sm:$0xff] %v11157_v31   ;;  %v3786_v31 = vpop.f32.mrf.mxu0  ;;  %4109 = vmatpush.bf16.msra.mxu3 %v10093_v25  ;;  %v10675_v25 = vld [vmem:[#allocation5 + $0xb24] sm:$0xf0]  ;;  %11606 = vrsqrt.f32 %v14458_v30  ;;  %v3883_v42 = vadd.f32 %v14443_v1, %v3834_v7  ;;  %v8844_v7 = vld [vmem:[#allocation5 + $0x198] sm:$0xf]  ;;  %vm5590_vm15 = vweird.f32 %v14458_v30 }
 0x6a9   : > { %5816 = vrot.lane.b32.xlu0 %v14428_v20, %s12008_s2  ;;  %5820 = vrot.lane.b32.xlu1 %v14431_v56, %s12008_s2  ;;  %v3836_v28 = vadd.f32 %v3835_v43, %v3786_v31  ;;  %11608 = vrsqrt.f32 %v14460_v35 }
 0x6aa   : > { %4010 = vmatpush.bf16.msra.mxu1 %v9373_v5  ;;  %v10495_v5 = vld [vmem:[#allocation5 + $0x584] sm:$0xf0]  ;;  %4060 = vmatpush.bf16.msra.mxu2 %v9709_v59 }
 0x6ab   : > { %5818 = vrot.lane.b32.xlu2 %v14439_v15, %s12008_s2  ;;  %v9325_v17 = vor.u32 %v10495_v5, %v9324_v29  ;;  %3962 = vmatpush.bf16.msra.mxu0 %v8941_v0  ;;  %v10579_v59 = vld [vmem:[#allocation5 + $0x824] sm:$0xf0]  ;;  %v10044_v29 = vld [vmem:[#allocation5 + $0xaf8] sm:$0xf]  ;;  %v3885_v31 = vadd.f32 %v3884_v53, %v3836_v28  ;;  %v3936_v43 = vpop.f32.mrf.mxu3 }
 0x6ac   : > { %v9661_v63 = vor.u32 %v10579_v59, %v9660_v52  ;;  %v8892_v0 = vld [vmem:[#allocation5 + $0x1f8] sm:$0xf]  ;;  %v10567_v59 = vld [vmem:[#allocation5 + $0x7c4] sm:$0xf0] }
 0x6ad   : > { %v9612_v52 = vld [vmem:[#allocation5 + $0x798] sm:$0xf]  ;;  %v14478_v28 = vadd.f32 %v3933_v50, %v3885_v31 }
 0x6ae   : > { %4011 = vmatpush.bf16.msra.mxu1 %v9325_v17  ;;  %4061 = vmatpush.bf16.msra.mxu2 %v9661_v63  ;;  %v9613_v63 = vor.u32 %v10567_v59, %v9612_v52 }
 0x6af   : > { %17222 = vst [vmem:[#allocation76_spill] sm:$0xff] %v14478_v28 }
 0x6b0   : > { %v3789_v41 = vpop.f32.mrf.mxu0 }
 0x6b1   : > { %v3839_v44 = vadd.f32 %v3838_v47, %v3789_v41  ;;  %v10387_v41 = vld [vmem:[#allocation5 + $0x224] sm:$0xf0]  ;;  %v10045_v47 = vor.u32 %v10675_v25, %v10044_v29  ;;  %v9996_v29 = vld [vmem:[#allocation5 + $0xa98] sm:$0xf]  ;;  %v14474_v25 = vadd.f32 %v14445_v39, %v3883_v42  ;;  %v8093_v42 = vmul.f32 %v13209_v12, %v14359_v13 }
 0x6b2   : > { %v8893_v46 = vor.u32 %v10387_v41, %v8892_v0  ;;  %4012 = vmatpush.bf16.msra.mxu1 %v9277_v14  ;;  %v10375_v41 = vld [vmem:[#allocation5 + $0x1c4] sm:$0xf0]  ;;  %4062 = vmatpush.bf16.msra.mxu2 %v9613_v63  ;;  %v6253_v13 = vmul.f32 %v14478_v28, %v14478_v28 }
 0x6b3   : > { %v3888_v5 = vadd.f32 %v3887_v62, %v3839_v44  ;;  %4110 = vmatpush.bf16.msra.mxu3 %v10045_v47  ;;  %v14469_v44 = vpop.eup %11604  ;;  %v9228_v47 = vld [vmem:[#allocation5 + $0x498] sm:$0xf]  ;;  %v8845_v14 = vor.u32 %v10375_v41, %v8844_v7  ;;  %v6252_v31 = vmul.f32 %v14474_v25, %v14474_v25 }
 0x6b4   : > { %3963 = vmatpush.bf16.msra.mxu0 %v8893_v46  ;;  %v5575_v53 = vmul.f32 %v14469_v44, %v14451_v9  ;;  %v10471_v46 = vld [vmem:[#allocation5 + $0x4c4] sm:$0xf0]  ;;  %v14481_v49 = vpop.eup %11606  ;;  %vm5581_vm10 = vweird.f32 %v14469_v44  ;;  %v17223_v9 = vld [vmem:[#allocation94_spill] sm:$0xff] }
 0x6b5   : > { %v14471_v62 = vadd.f32 %v3936_v43, %v3888_v5  ;;  %v9997_v5 = vor.u32 %v10663_v3, %v9996_v29  ;;  %v11609_v43 = vpop.eup %11608  ;;  %v9229_v50 = vor.u32 %v10471_v46, %v9228_v47  ;;  %v8092_v29 = vmul.f32 %v13213_v23, %v14341_v4  ;;  %vm5582_vm12 = vmor %vm5580_vm11, %vm5581_vm10 }
 0x6b6   : > { %v5576_v3 = vmul.f32 %v14469_v44, %v5575_v53  ;;  %v5585_v63 = vmul.f32 %v14481_v49, %v14458_v30  ;;  %v5595_v7 = vmul.f32 %v11609_v43, %v14460_v35  ;;  %vm5591_vm13 = vweird.f32 %v14481_v49 }
 0x6b7   : > { %17221 = vst [vmem:[#allocation59_spill] sm:$0xff] %v14471_v62  ;;  %v6254_v39 = vmul.f32 %v14471_v62, %v14471_v62  ;;  %4111 = vmatpush.bf16.msra.mxu3 %v9997_v5  ;;  %4013 = vmatpush.bf16.msra.mxu1 %v9229_v50  ;;  %vm5601_vm14 = vweird.f32 %v11609_v43  ;;  %vm5592_vm0 = vmor %vm5590_vm15, %vm5591_vm13 }
 0x6b8   : > { %v14464_v17 = vpop.xlane.xlu1 %5510  ;;  %3964 = vmatpush.bf16.msra.mxu0 %v8845_v14  ;;  %v5577_v47 = vmul.f32 0.5, %v5576_v3  ;;  %v5586_v53 = vmul.f32 %v14481_v49, %v5585_v63  ;;  %v5596_v46 = vmul.f32 %v11609_v43, %v5595_v7  ;;  %vm5602_vm2 = vmor %vm5600_vm1, %vm5601_vm14  ;;  %v3791_v35 = vpop.f32.mrf.mxu0 }
 0x6ba   : > { %v5578_v14 = vsub.f32 1.5, %v5577_v47  ;;  %v5587_v50 = vmul.f32 0.5, %v5586_v53  ;;  %v5597_v62 = vmul.f32 0.5, %v5596_v46  ;;  %v17224_v53 = vld [vmem:[#allocation92_spill] sm:$0xff] }
 0x6bc   : > { %v5598_v63 = vsub.f32 1.5, %v5597_v62 }
 0x6bd   : > { %v14449_v6 = vpop.xlane.xlu2 %5506 }
 0x6c5   : > { %v14462_v34 = vpop.permute.xlu2 %8118 }
 0x6ca   : > { %v14498_v4 = vpop.xlane.xlu0 %5508 }
 0x6cd   : > { %v8125_v1 = vpop.permute.xlu2 %8124 }
 0x6ce   : > { %v8141_v0 = vmul.f32 %v13204_v33, %v8125_v1 }
 0x6d0   : > { %v8123_v52 = vpop.permute.xlu1 %8122  ;;  %v8157_v59 = vadd.f32 %v8141_v0, %v8093_v42 }
 0x6d1   : > { %v8140_v1 = vmul.f32 %v13220_v11, %v8123_v52  ;;  %v8138_v52 = vmul.f32 %v13123_v45, %v14462_v34 }
 0x6d2   : > { %v8253_v0 = vmul.f32 0.088388346, %v8157_v59 }
 0x6d3   : > { %v8156_v5 = vadd.f32 %v8140_v1, %v8092_v29  ;;  %6272 = vadd.xlane.f32.xlu0 %v6252_v31  ;;  %6276 = vadd.xlane.f32.xlu1 %v6254_v39  ;;  %v8090_v39 = vmul.f32 %v17058_v37, %v14349_v48  ;;  %v8091_v31 = vmul.f32 %v17059_v58, %v14362_v38 }
 0x6d4   : > { %6274 = vadd.xlane.f32.xlu2 %v6253_v13  ;;  %v5579_v29 = vmul.f32 %v14469_v44, %v5578_v14  ;;  %v5588_v13 = vsub.f32 1.5, %v5587_v50  ;;  %v3840_v14 = vpop.f32.mrf.mxu1  ;;  %v9564_v50 = vld [vmem:[#allocation5 + $0x738] sm:$0xf] }
 0x6d5   : > { %v8252_v41 = vmul.f32 0.088388346, %v8156_v5  ;;  %v8154_v1 = vadd.f32 %v8138_v52, %v8090_v39  ;;  %v3889_v52 = vpop.f32.mrf.mxu2  ;;  %v10555_v39 = vld [vmem:[#allocation5 + $0x764] sm:$0xf0] }
 0x6d6   : > { %v5583_v38 = vsel %vm5582_vm12, %v14469_v44, %v5579_v29  ;;  %v5589_v5 = vmul.f32 %v14481_v49, %v5588_v13  ;;  %v10651_v29 = vld [vmem:[#allocation5 + $0xa64] sm:$0xf0] }
 0x6d7   : > { %v11167_v42 = vpack.c.bf16 %v8253_v0, %v8252_v41  ;;  %v8250_v48 = vmul.f32 0.088388346, %v8154_v1  ;;  %v5599_v0 = vmul.f32 %v11609_v43, %v5598_v63  ;;  %v14518_v62 = vmul.f32 %v5583_v38, %v17223_v9  ;;  %v3794_v1 = vpop.f32.mrf.mxu0  ;;  %v8796_v63 = vld [vmem:[#allocation5 + $0x138] sm:$0xf]  ;;  %v10459_v38 = vld [vmem:[#allocation5 + $0x464] sm:$0xf0] }
 0x6d8   : > { %v5593_v44 = vsel %vm5592_vm0, %v14481_v49, %v5589_v5  ;;  %v5518_v49 = vmul.f32 %v14266_v24, %v12430_v19  ;;  %v9516_v5 = vld [vmem:[#allocation5 + $0x6d8] sm:$0xf] }
 0x6d9   : > { %11339 = vst [vmem:[%s12683_s29 + $0xf8] sm:$0xff] %v11167_v42   ;;  %v5603_v47 = vsel %vm5602_vm2, %v11609_v43, %v5599_v0  ;;  %v14525_v46 = vmul.f32 %v5593_v44, %v17224_v53  ;;  %v17225_v42 = vld [vmem:[#allocation61_spill] sm:$0xff]  ;;  %v14536_v43 = vpop.f32.mrf.mxu3  ;;  %v9900_v44 = vld [vmem:[#allocation5 + $0x9d8] sm:$0xf] }
 0x6da   : > { %v14528_v30 = vmul.f32 %v5603_v47, %v17225_v42  ;;  %v10543_v0 = vld [vmem:[#allocation5 + $0x704] sm:$0xf0] }
 0x6db   : > { %v9517_v24 = vor.u32 %v10543_v0, %v9516_v5  ;;  %v10639_v47 = vld [vmem:[#allocation5 + $0xa04] sm:$0xf0]  ;;  %v5520_v5 = vmul.f32 %v14338_v22, %v12430_v19 }
 0x6dc   : > { %v9901_v42 = vor.u32 %v10639_v47, %v9900_v44  ;;  %v10627_v44 = vld [vmem:[#allocation5 + $0x9a4] sm:$0xf0]  ;;  %v8700_v47 = vld [vmem:[#allocation5 + $0x78] sm:$0xf] }
 0x6dd   : > { %v8121_v59 = vpop.permute.xlu0 %8120  ;;  %v3892_v53 = vpop.f32.mrf.mxu2  ;;  %v14549_v22 = vadd.f32 1.1920929e-07, %v5520_v5 }
 0x6de   : > { %v8139_v3 = vmul.f32 %v17060_v21, %v8121_v59  ;;  %v9948_v59 = vld [vmem:[#allocation5 + $0xa38] sm:$0xf] }
 0x6df   : > { %v9949_v13 = vor.u32 %v10651_v29, %v9948_v59  ;;  %v10447_v29 = vld [vmem:[#allocation5 + $0x404] sm:$0xf0]  ;;  %v3796_v0 = vpop.f32.mrf.mxu0  ;;  %vm5630_vm10 = vweird.f32 %v14549_v22 }
 0x6e0   : > { %v8155_v34 = vadd.f32 %v8139_v3, %v8091_v31  ;;  %v9565_v31 = vor.u32 %v10555_v39, %v9564_v50  ;;  %v3843_v3 = vpop.f32.mrf.mxu1  ;;  %v8748_v50 = vld [vmem:[#allocation5 + $0xd8] sm:$0xf]  ;;  %v10351_v39 = vld [vmem:[#allocation5 + $0x104] sm:$0xf0] }
 0x6e1   : > { %4112 = vmatpush.bf16.msra.mxu3 %v9949_v13  ;;  %v8749_v59 = vor.u32 %v10351_v39, %v8748_v50  ;;  %v10339_v50 = vld [vmem:[#allocation5 + $0xa4] sm:$0xf0]  ;;  %v9084_v39 = vld [vmem:[#allocation5 + $0x378] sm:$0xf] }
 0x6e2   : > { %v8251_v7 = vmul.f32 0.088388346, %v8155_v34  ;;  %4063 = vmatpush.bf16.msra.mxu2 %v9565_v31  ;;  %v10363_v34 = vld [vmem:[#allocation5 + $0x164] sm:$0xf0]  ;;  %v9132_v31 = vld [vmem:[#allocation5 + $0x3d8] sm:$0xf] }
 0x6e3   : > { %v9133_v13 = vor.u32 %v10447_v29, %v9132_v31 }
 0x6e4   : > { %v11162_v41 = vpack.c.bf16 %v8251_v7, %v8250_v48  ;;  %v9180_v48 = vld [vmem:[#allocation5 + $0x438] sm:$0xf]  ;;  %v8797_v7 = vor.u32 %v10363_v34, %v8796_v63  ;;  %v10531_v34 = vld [vmem:[#allocation5 + $0x6a4] sm:$0xf0] }
 0x6e5   : > { %v9181_v9 = vor.u32 %v10459_v38, %v9180_v48  ;;  %4113 = vmatpush.bf16.msra.mxu3 %v9901_v42  ;;  %v9468_v63 = vld [vmem:[#allocation5 + $0x678] sm:$0xf]  ;;  %v3841_v48 = vadd.f32 %v3840_v14, %v3791_v35  ;;  %v3941_v38 = vpop.f32.mrf.mxu3  ;;  %v3844_v35 = vadd.f32 %v3843_v3, %v3794_v1  ;;  %v8701_v14 = vor.u32 %v10339_v50, %v8700_v47 }
 0x6e6   : > { %11338 = vst [vmem:[%s12683_s29 + $0xf0] sm:$0xff] %v11162_v41   ;;  %v14538_v41 = vadd.f32 1.1920929e-07, %v5518_v49  ;;  %3965 = vmatpush.bf16.msra.mxu0 %v8797_v7  ;;  %4064 = vmatpush.bf16.msra.mxu2 %v9517_v24  ;;  %v5519_v49 = vmul.f32 %v14333_v2, %v12430_v19  ;;  %v9469_v7 = vor.u32 %v10531_v34, %v9468_v63  ;;  %v9852_v24 = vld [vmem:[#allocation5 + $0x978] sm:$0xf]  ;;  %v3894_v34 = vpop.f32.mrf.mxu2 }
 0x6e7   : > { %5822 = vrot.lane.b32.xlu0 %v14518_v62, %s12008_s2  ;;  %4014 = vmatpush.bf16.msra.mxu1 %v9181_v9  ;;  %v9853_v42 = vor.u32 %v10627_v44, %v9852_v24  ;;  %v3890_v2 = vadd.f32 %v3889_v52, %v3841_v48  ;;  %v10519_v24 = vld [vmem:[#allocation5 + $0x644] sm:$0xf0]  ;;  %v9804_v44 = vld [vmem:[#allocation5 + $0x918] sm:$0xf] }
 0x6e8   : > { %11610 = vrsqrt.f32 %v14538_v41  ;;  %v3845_v9 = vpop.f32.mrf.mxu1  ;;  %v14545_v31 = vadd.f32 1.1920929e-07, %v5519_v49  ;;  %v3893_v49 = vadd.f32 %v3892_v53, %v3844_v35  ;;  %v8652_v50 = vld [vmem:[#allocation5 + $0x18] sm:$0xf]  ;;  %v10327_v35 = vld [vmem:[#allocation5 + $0x44] sm:$0xf0]  ;;  %vm5610_vm4 = vweird.f32 %v14538_v41 }
 0x6e9   : > { %v3846_v29 = vadd.f32 %v3845_v9, %v3796_v0  ;;  %4114 = vmatpush.bf16.msra.mxu3 %v9853_v42  ;;  %v9420_v9 = vld [vmem:[#allocation5 + $0x618] sm:$0xf]  ;;  %v10615_v42 = vld [vmem:[#allocation5 + $0x944] sm:$0xf0] }
 0x6ea   : > { %3966 = vmatpush.bf16.msra.mxu0 %v8749_v59  ;;  %4065 = vmatpush.bf16.msra.mxu2 %v9469_v7  ;;  %v10435_v59 = vld [vmem:[#allocation5 + $0x3a4] sm:$0xf0]  ;;  %11612 = vrsqrt.f32 %v14545_v31  ;;  %v14553_v7 = vadd.f32 %v14536_v43, %v3890_v2  ;;  %v14562_v0 = vadd.f32 %v3941_v38, %v3893_v49  ;;  %v9421_v47 = vor.u32 %v10519_v24, %v9420_v9 }
 0x6eb   : > { %4015 = vmatpush.bf16.msra.mxu1 %v9133_v13  ;;  %v9085_v13 = vor.u32 %v10435_v59, %v9084_v39  ;;  %v3895_v1 = vadd.f32 %v3894_v34, %v3846_v29  ;;  %11614 = vrsqrt.f32 %v14549_v22  ;;  %v9805_v2 = vor.u32 %v10615_v42, %v9804_v44  ;;  %v10423_v59 = vld [vmem:[#allocation5 + $0x344] sm:$0xf0] }
 0x6ec   : > { %5824 = vrot.lane.b32.xlu2 %v14525_v46, %s12008_s2  ;;  %5826 = vrot.lane.b32.xlu1 %v14528_v30, %s12008_s2  ;;  %17226 = vst [vmem:[#allocation100_spill] sm:$0xff] %v14553_v7  ;;  %v6255_v5 = vmul.f32 %v14553_v7, %v14553_v7  ;;  %v8653_v38 = vor.u32 %v10327_v35, %v8652_v50  ;;  %vm5620_vm7 = vweird.f32 %v14545_v31  ;;  %v17243_v7 = vld [vmem:[#allocation32_spill] sm:$0xff] }
 0x6ed   : > { %v3943_v48 = vpop.f32.mrf.mxu3  ;;  %17227 = vst [vmem:[#allocation97_spill] sm:$0xff] %v14562_v0  ;;  %v6256_v34 = vmul.f32 %v14562_v0, %v14562_v0  ;;  %4115 = vmatpush.bf16.msra.mxu3 %v9805_v2  ;;  %v5801_v42 = vmul.f32 %v17081_v55, %v14439_v15  ;;  %v5800_v50 = vmul.f32 %v17149_v16, %v14428_v20  ;;  %v17229_v20 = vld [vmem:[#allocation55_spill] sm:$0xff] }
 0x6ee   : > { %v14547_v63 = vpop.eup %11610  ;;  %3967 = vmatpush.bf16.msra.mxu0 %v8701_v14  ;;  %v14565_v53 = vadd.f32 %v3943_v48, %v3895_v1  ;;  %v9036_v14 = vld [vmem:[#allocation5 + $0x318] sm:$0xf]  ;;  %4066 = vmatpush.bf16.msra.mxu2 %v9421_v47 }
 0x6ef   : > { %4016 = vmatpush.bf16.msra.mxu1 %v9085_v13  ;;  %v5605_v52 = vmul.f32 %v14547_v63, %v14538_v41  ;;  %v9037_v29 = vor.u32 %v10423_v59, %v9036_v14  ;;  %vm5611_vm3 = vweird.f32 %v14547_v63  ;;  %v17230_v41 = vld [vmem:[#allocation26_spill] sm:$0xff]  ;;  %v17242_v0 = vld [vmem:[#allocation35_spill] sm:$0xff] }
 0x6f0   : > { %17228 = vst [vmem:[#allocation63_spill] sm:$0xff] %v14565_v53  ;;  %v14567_v39 = vpop.eup %11612  ;;  %v6257_v48 = vmul.f32 %v14565_v53, %v14565_v53  ;;  %4116 = vmatmul.bf16.vlgmr.msra.gmra.mxu3 %v17152_v60  ;;  %vm5612_vm5 = vmor %vm5610_vm4, %vm5611_vm3 }
 0x6f1   : > { %v5606_v43 = vmul.f32 %v14547_v63, %v5605_v52  ;;  %v11615_v13 = vpop.eup %11614  ;;  %v5615_v1 = vmul.f32 %v14567_v39, %v14545_v31  ;;  %4067 = vmatmul.bf16.vlgmr.msra.gmra.mxu2 %v17151_v54  ;;  %vm5621_vm6 = vweird.f32 %v14567_v39  ;;  %v17235_v31 = vld [vmem:[#allocation84_spill] sm:$0xff] }
 0x6f2   : > { %3968 = vmatpush.bf16.msra.mxu0 %v8653_v38  ;;  %vm5631_vm8 = vweird.f32 %v11615_v13  ;;  %vm5622_vm9 = vmor %vm5620_vm7, %vm5621_vm6 }
 0x6f3   : > { %v5607_v52 = vmul.f32 0.5, %v5606_v43  ;;  %4017 = vmatpush.bf16.msra.mxu1 %v9037_v29  ;;  %v5616_v44 = vmul.f32 %v14567_v39, %v5615_v1  ;;  %vm5632_vm11 = vmor %vm5630_vm10, %vm5631_vm8 }
 0x6f5   : > { %3969 = vmatmul.bf16.vlgmr.msra.gmra.mxu0 %v17153_v40  ;;  %v5608_v24 = vsub.f32 1.5, %v5607_v52  ;;  %v5617_v14 = vmul.f32 0.5, %v5616_v44  ;;  %v17232_v44 = vld [vmem:[#allocation24_spill] sm:$0xff] }
 0x6f6   : > { %4018 = vmatmul.bf16.vlgmr.msra.gmra.mxu1 %v17154_v61 }
 0x6f7   : > { %v5609_v35 = vmul.f32 %v14547_v63, %v5608_v24  ;;  %v5618_v52 = vsub.f32 1.5, %v5617_v14  ;;  %v17231_v24 = vld [vmem:[#allocation27_spill] sm:$0xff]  ;;  %v3799_v14 = vpop.f32.mrf.mxu0 }
 0x6f9   : > { %v5613_v1 = vsel %vm5612_vm5, %v14547_v63, %v5609_v35 }
 0x700   : > { %4121 = vmatmul.bf16.gmra.mxu3 %v17231_v24 }
 0x701   : > { %4072 = vmatmul.bf16.gmra.mxu2 %v17230_v41 }
 0x705   : > { %3974 = vmatmul.bf16.gmra.mxu0 %v17232_v44 }
 0x706   : > { %v14558_v3 = vpop.xlane.xlu2 %6268 }
 0x708   : > { %v14571_v49 = vpop.xlane.xlu0 %6266 }
 0x70e   : > { %v5819_v9 = vpop.permute.xlu2 %5818 }
 0x70f   : > { %v5849_v47 = vmul.f32 %v17082_v36, %v5819_v9  ;;  %v5619_v9 = vmul.f32 %v14567_v39, %v5618_v52  ;;  %v17244_v36 = vld [vmem:[#allocation33_spill] sm:$0xff] }
 0x711   : > { %6278 = vadd.xlane.f32.xlu0 %v6255_v5  ;;  %v5625_v5 = vmul.f32 %v11615_v13, %v14549_v22  ;;  %v5865_v29 = vadd.f32 %v5849_v47, %v5801_v42  ;;  %v5623_v47 = vsel %vm5622_vm9, %v14567_v39, %v5619_v9  ;;  %v17237_v22 = vld [vmem:[#allocation31_spill] sm:$0xff]  ;;  %v17238_v39 = vld [vmem:[#allocation28_spill] sm:$0xff] }
 0x712   : > { %4126 = vmatmul.bf16.gmra.mxu3 %v17237_v22  ;;  %v17257_v22 = vld [vmem:[#allocation52_spill] sm:$0xff] }
 0x713   : > { %v5626_v43 = vmul.f32 %v11615_v13, %v5625_v5  ;;  %v14598_v5 = vmul.f32 %v5613_v1, %v17229_v20  ;;  %v3946_v1 = vpop.f32.mrf.mxu3 }
 0x715   : > { %6280 = vadd.xlane.f32.xlu2 %v6256_v34  ;;  %v5627_v38 = vmul.f32 0.5, %v5626_v43  ;;  %v17233_v43 = vld [vmem:[#allocation25_spill] sm:$0xff]  ;;  %3979 = vmatmul.bf16.gmra.mxu0 %v17238_v39 }
 0x716   : > { %6282 = vadd.xlane.f32.xlu1 %v6257_v48  ;;  %4023 = vmatmul.bf16.gmra.mxu1 %v17233_v43 }
 0x717   : > { %v5628_v48 = vsub.f32 1.5, %v5627_v38  ;;  %v17236_v38 = vld [vmem:[#allocation30_spill] sm:$0xff] }
 0x718   : > { %4077 = vmatmul.bf16.gmra.mxu2 %v17236_v38 }
 0x719   : > { %v5629_v63 = vmul.f32 %v11615_v13, %v5628_v48  ;;  %v3801_v48 = vpop.f32.mrf.mxu0 }
 0x71b   : > { %v5817_v2 = vpop.permute.xlu0 %5816  ;;  %v5633_v42 = vsel %vm5632_vm11, %v11615_v13, %v5629_v63  ;;  %v17239_v13 = vld [vmem:[#allocation29_spill] sm:$0xff] }
 0x71c   : > { %v5848_v59 = vmul.f32 %v17150_v32, %v5817_v2  ;;  %v14617_v35 = vmul.f32 %v5633_v42, %v17235_v31  ;;  %v17241_v31 = vld [vmem:[#allocation34_spill] sm:$0xff] }
 0x71e   : > { %v5864_v34 = vadd.f32 %v5848_v59, %v5800_v50  ;;  %v17234_v50 = vld [vmem:[#allocation64_spill] sm:$0xff]  ;;  %v3848_v59 = vpop.f32.mrf.mxu1 }
 0x71f   : > { %v14612_v2 = vmul.f32 %v5623_v47, %v17234_v50  ;;  %v3849_v9 = vadd.f32 %v3848_v59, %v3799_v14  ;;  %v17240_v47 = vld [vmem:[#allocation56_spill] sm:$0xff]  ;;  %v5523_v14 = vmul.f32 %v14416_v8, %v12430_v19 }
 0x720   : > { %v10812_v15 = vpack.c.bf16 %v5865_v29, %v5864_v34  ;;  %v5521_v29 = vmul.f32 %v14369_v26, %v12430_v19  ;;  %v3897_v34 = vpop.f32.mrf.mxu2  ;;  %v5522_v42 = vmul.f32 %v17240_v47, %v12430_v19 }
 0x721   : > { %v3898_v50 = vadd.f32 %v3897_v34, %v3849_v9  ;;  %v3804_v34 = vpop.f32.mrf.mxu0  ;;  %v14651_v28 = vadd.f32 1.1920929e-07, %v5523_v14 }
 0x722   : > { %10813 = vst [vmem:[%s14594_s10] sm:$0xff] %v10812_v15   ;;  %v14627_v52 = vadd.f32 1.1920929e-07, %v5521_v29  ;;  %v14629_v15 = vpop.xlane.xlu1 %6264  ;;  %v3948_v29 = vpop.f32.mrf.mxu3  ;;  %4131 = vmatmul.bf16.gmra.mxu3 %v17242_v0  ;;  %v14642_v55 = vadd.f32 1.1920929e-07, %v5522_v42 }
 0x723   : > { %v14648_v16 = vadd.f32 %v3946_v1, %v3898_v50  ;;  %vm5660_vm3 = vweird.f32 %v14651_v28 }
 0x724   : > { %11616 = vrsqrt.f32 %v14627_v52  ;;  %vm5640_vm13 = vweird.f32 %v14627_v52  ;;  %vm5650_vm0 = vweird.f32 %v14642_v55 }
 0x725   : > { %5828 = vrot.lane.b32.xlu0 %v14598_v5, %s12008_s2  ;;  %3984 = vmatmul.bf16.gmra.mxu0 %v17243_v7  ;;  %17245 = vst [vmem:[#allocation62_spill] sm:$0xff] %v14648_v16  ;;  %11618 = vrsqrt.f32 %v14642_v55  ;;  %v6258_v8 = vmul.f32 %v14648_v16, %v14648_v16  ;;  %v17253_v16 = vld [vmem:[#allocation72_spill] sm:$0xff] }
 0x726   : > { %4028 = vmatmul.bf16.gmra.mxu1 %v17239_v13  ;;  %v3850_v20 = vpop.f32.mrf.mxu1  ;;  %11620 = vrsqrt.f32 %v14651_v28 }
 0x727   : > { %v3851_v59 = vadd.f32 %v3850_v20, %v3801_v48 }
 0x728   : > { %v3899_v63 = vpop.f32.mrf.mxu2  ;;  %4082 = vmatmul.bf16.gmra.mxu2 %v17241_v31 }
 0x729   : > { %v3900_v7 = vadd.f32 %v3899_v63, %v3851_v59 }
 0x72a   : > { %v14635_v53 = vpop.eup %11616  ;;  %v14637_v26 = vpop.xlane.xlu1 %6270 }
 0x72b   : > { %v5635_v47 = vmul.f32 %v14635_v53, %v14627_v52  ;;  %v14657_v0 = vadd.f32 %v3948_v29, %v3900_v7  ;;  %v3951_v50 = vpop.f32.mrf.mxu3  ;;  %v11619_v59 = vpop.eup %11618  ;;  %v17248_v7 = vld [vmem:[#allocation38_spill] sm:$0xff]  ;;  %vm5641_vm12 = vweird.f32 %v14635_v53 }
 0x72c   : > { %v11621_v29 = vpop.eup %11620  ;;  %vm5642_vm14 = vmor %vm5640_vm13, %vm5641_vm12  ;;  %vm5651_vm15 = vweird.f32 %v11619_v59 }
 0x72d   : > { %5830 = vrot.lane.b32.xlu2 %v14612_v2, %s12008_s2  ;;  %v5636_v42 = vmul.f32 %v14635_v53, %v5635_v47  ;;  %17246 = vst [vmem:[#allocation66_spill] sm:$0xff] %v14657_v0  ;;  %vm5652_vm1 = vmor %vm5650_vm0, %vm5651_vm15  ;;  %vm5661_vm2 = vweird.f32 %v11621_v29 }
 0x72e   : > { %v3853_v9 = vpop.f32.mrf.mxu1  ;;  %vm5662_vm4 = vmor %vm5660_vm3, %vm5661_vm2 }
 0x72f   : > { %5832 = vrot.lane.b32.xlu1 %v14617_v35, %s12008_s2  ;;  %v3854_v32 = vadd.f32 %v3853_v9, %v3804_v34  ;;  %v5637_v34 = vmul.f32 0.5, %v5636_v42  ;;  %v6259_v9 = vmul.f32 %v14657_v0, %v14657_v0  ;;  %v17250_v42 = vld [vmem:[#allocation39_spill] sm:$0xff] }
 0x731   : > { %v5638_v47 = vsub.f32 1.5, %v5637_v34 }
 0x732   : > { %v5821_v20 = vpop.permute.xlu1 %5820  ;;  %4136 = vmatmul.bf16.gmra.mxu3 %v17250_v42  ;;  %v17255_v42 = vld [vmem:[#allocation74_spill] sm:$0xff] }
 0x733   : > { %v5850_v0 = vmul.f32 %v17253_v16, %v5821_v20  ;;  %v5639_v34 = vmul.f32 %v14635_v53, %v5638_v47 }
 0x735   : > { %v5643_v38 = vsel %vm5642_vm14, %v14635_v53, %v5639_v34 }
 0x736   : > { %4033 = vmatmul.bf16.gmra.mxu1 %v17244_v36  ;;  %v3902_v36 = vpop.f32.mrf.mxu2 }
 0x737   : > { %v3903_v48 = vadd.f32 %v3902_v36, %v3854_v32  ;;  %v5645_v36 = vmul.f32 %v11619_v59, %v14642_v55 }
 0x738   : > { %4087 = vmatmul.bf16.gmra.mxu2 %v17248_v7 }
 0x739   : > { %v14663_v63 = vadd.f32 %v3951_v50, %v3903_v48  ;;  %v17251_v48 = vld [vmem:[#allocation36_spill] sm:$0xff]  ;;  %v17252_v50 = vld [vmem:[#allocation37_spill] sm:$0xff]  ;;  %v5646_v31 = vmul.f32 %v11619_v59, %v5645_v36 }
 0x73a   : > { %3989 = vmatmul.bf16.gmra.mxu0 %v17251_v48  ;;  %v5803_v48 = vmul.f32 %v17255_v42, %v14518_v62  ;;  %v17259_v62 = vld [vmem:[#allocation58_spill] sm:$0xff]  ;;  %v5526_v42 = vmul.f32 %v14498_v4, %v12430_v19 }
 0x73b   : > { %17247 = vst [vmem:[#allocation94_spill] sm:$0xff] %v14663_v63  ;;  %v6260_v32 = vmul.f32 %v14663_v63, %v14663_v63  ;;  %v5655_v63 = vmul.f32 %v11621_v29, %v14651_v28  ;;  %v5647_v36 = vmul.f32 0.5, %v5646_v31  ;;  %v17269_v28 = vld [vmem:[#allocation47_spill] sm:$0xff] }
 0x73d   : > { %v5656_v16 = vmul.f32 %v11621_v29, %v5655_v63  ;;  %v5648_v31 = vsub.f32 1.5, %v5647_v36 }
 0x73f   : > { %v5657_v63 = vmul.f32 0.5, %v5656_v16  ;;  %v5649_v34 = vmul.f32 %v11619_v59, %v5648_v31  ;;  %v3855_v31 = vpop.f32.mrf.mxu1 }
 0x741   : > { %v5653_v16 = vsel %vm5652_vm1, %v11619_v59, %v5649_v34  ;;  %v17268_v59 = vld [vmem:[#allocation46_spill] sm:$0xff] }
 0x746   : > { %v14661_v14 = vpop.xlane.xlu0 %6272  ;;  %4038 = vmatmul.bf16.gmra.mxu1 %v17252_v50  ;;  %v17256_v50 = vld [vmem:[#allocation75_spill] sm:$0xff] }
 0x747   : > { %v14659_v1 = vpop.xlane.xlu2 %6274  ;;  %v3858_v34 = vpop.f32.mrf.mxu1 }
 0x74f   : > { %6284 = vadd.xlane.f32.xlu0 %v6258_v8  ;;  %v14671_v8 = vpop.xlane.xlu1 %6276  ;;  %v5825_v13 = vpop.permute.xlu2 %5824 }
 0x750   : > { %17249 = vst [vmem:[#allocation92_spill] sm:$0xff] %v14671_v8  ;;  %v17254_v8 = vld [vmem:[#allocation73_spill] sm:$0xff] }
 0x756   : > { %6286 = vadd.xlane.f32.xlu2 %v6259_v9  ;;  %v5802_v9 = vmul.f32 %v17254_v8, %v14431_v56  ;;  %v17258_v8 = vld [vmem:[#allocation53_spill] sm:$0xff] }
 0x757   : > { %v5804_v23 = vmul.f32 %v17258_v8, %v14525_v46  ;;  %v5658_v46 = vsub.f32 1.5, %v5657_v63  ;;  %v3904_v63 = vpop.f32.mrf.mxu2  ;;  %v9758_v8 = vld [vmem:[#allocation5 + $0x8e8] sm:$0xf0] }
 0x758   : > { %v5866_v20 = vadd.f32 %v5850_v0, %v5802_v9  ;;  %v17261_v0 = vld [vmem:[#allocation65_spill] sm:$0xff]  ;;  %v17262_v9 = vld [vmem:[#allocation42_spill] sm:$0xff] }
 0x759   : > { %6288 = vadd.xlane.f32.xlu1 %v6260_v32  ;;  %v5823_v7 = vpop.permute.xlu0 %5822  ;;  %v5852_v32 = vmul.f32 %v17257_v22, %v5825_v13  ;;  %4092 = vmatmul.bf16.gmra.mxu2 %v17262_v9  ;;  %v9326_v9 = vld [vmem:[#allocation5 + $0x588] sm:$0xf0] }
 0x75a   : > { %v5851_v39 = vmul.f32 %v17256_v50, %v5823_v7  ;;  %v5805_v7 = vmul.f32 %v17259_v62, %v14528_v30  ;;  %v17260_v50 = vld [vmem:[#allocation80_spill] sm:$0xff]  ;;  %v17263_v30 = vld [vmem:[#allocation43_spill] sm:$0xff] }
 0x75b   : > { %v5868_v13 = vadd.f32 %v5852_v32, %v5804_v23  ;;  %4141 = vmatmul.bf16.gmra.mxu3 %v17263_v30  ;;  %v5659_v23 = vmul.f32 %v11621_v29, %v5658_v46  ;;  %v17267_v32 = vld [vmem:[#allocation81_spill] sm:$0xff]  ;;  %v10597_v62 = vld [vmem:[#allocation5 + $0x8bc] sm:$0xf] }
 0x75c   : > { %v5867_v47 = vadd.f32 %v5851_v39, %v5803_v48  ;;  %v14695_v39 = vmul.f32 %v5643_v38, %v17261_v0  ;;  %v17265_v38 = vld [vmem:[#allocation41_spill] sm:$0xff]  ;;  %v3806_v0 = vpop.f32.mrf.mxu0 }
 0x75d   : > { %4043 = vmatmul.bf16.gmra.mxu1 %v17265_v38  ;;  %v5663_v36 = vsel %vm5662_vm4, %v11621_v29, %v5659_v23  ;;  %v8942_v30 = vld [vmem:[#allocation5 + $0x288] sm:$0xf0] }
 0x75e   : > { %v10817_v11 = vpack.c.bf16 %v5867_v47, %v5866_v20  ;;  %v5827_v56 = vpop.permute.xlu1 %5826  ;;  %v17266_v20 = vld [vmem:[#allocation83_spill] sm:$0xff]  ;;  %v14712_v55 = vmul.f32 %v5663_v36, %v17267_v32  ;;  %v17272_v32 = vld [vmem:[#allocation50_spill] sm:$0xff] }
 0x75f   : > { %v5853_v52 = vmul.f32 %v17260_v50, %v5827_v56  ;;  %v14707_v47 = vmul.f32 %v5653_v16, %v17266_v20  ;;  %v5524_v56 = vmul.f32 %v14409_v51, %v12430_v19  ;;  %v3953_v51 = vpop.f32.mrf.mxu3  ;;  %v5525_v20 = vmul.f32 %v14449_v6, %v12430_v19  ;;  %v3907_v36 = vpop.f32.mrf.mxu2  ;;  %v17273_v50 = vld [vmem:[#allocation51_spill] sm:$0xff] }
 0x760   : > { %11270 = vst [vmem:[%s14594_s10 + $0x8] sm:$0xff] %v10817_v11   ;;  %v17264_v11 = vld [vmem:[#allocation40_spill] sm:$0xff] }
 0x761   : > { %v5869_v48 = vadd.f32 %v5853_v52, %v5805_v7  ;;  %3994 = vmatmul.bf16.gmra.mxu0 %v17264_v11  ;;  %v17270_v7 = vld [vmem:[#allocation44_spill] sm:$0xff]  ;;  %v17271_v52 = vld [vmem:[#allocation45_spill] sm:$0xff]  ;;  %v14722_v29 = vadd.f32 1.1920929e-07, %v5524_v56 }
 0x763   : > { %v10822_v53 = vpack.c.bf16 %v5869_v48, %v5868_v13  ;;  %5834 = vrot.lane.b32.xlu0 %v14695_v39, %s12008_s2  ;;  %11622 = vrsqrt.f32 %v14722_v29  ;;  %v5527_v13 = vmul.f32 %v14464_v17, %v12430_v19  ;;  %v3856_v48 = vadd.f32 %v3855_v31, %v3806_v0  ;;  %v17275_v0 = vld [vmem:[#allocation48_spill] sm:$0xff]  ;;  %v17276_v31 = vld [vmem:[#allocation49_spill] sm:$0xff] }
 0x764   : > { %vm5670_vm6 = vweird.f32 %v14722_v29 }
 0x765   : > { %11271 = vst [vmem:[%s14594_s10 + $0x10] sm:$0xff] %v10822_v53   ;;  %v3809_v53 = vpop.f32.mrf.mxu0  ;;  %v14729_v23 = vadd.f32 1.1920929e-07, %v5527_v13  ;;  %v3905_v16 = vadd.f32 %v3904_v63, %v3856_v48  ;;  %v14742_v63 = vadd.f32 1.1920929e-07, %v5525_v20 }
 0x766   : > { %v3859_v13 = vadd.f32 %v3858_v34, %v3809_v53 }
 0x767   : > { %11624 = vrsqrt.f32 %v14729_v23  ;;  %v14738_v17 = vadd.f32 %v3953_v51, %v3905_v16  ;;  %v3956_v6 = vpop.f32.mrf.mxu3  ;;  %v3909_v4 = vpop.f32.mrf.mxu2  ;;  %vm5700_vm9 = vweird.f32 %v14729_v23  ;;  %vm5680_vm12 = vweird.f32 %v14742_v63 }
 0x768   : > { %11626 = vrsqrt.f32 %v14742_v63  ;;  %v3908_v53 = vadd.f32 %v3907_v36, %v3859_v13 }
 0x769   : > { %4097 = vmatmul.bf16.gmra.mxu2 %v17268_v59  ;;  %v14727_v46 = vpop.eup %11622  ;;  %17274 = vst [vmem:[#allocation61_spill] sm:$0xff] %v14738_v17  ;;  %v6261_v51 = vmul.f32 %v14738_v17, %v14738_v17  ;;  %v9374_v59 = vld [vmem:[#allocation5 + $0x5e8] sm:$0xf0] }
 0x76a   : > { %v5665_v56 = vmul.f32 %v14727_v46, %v14722_v29  ;;  %v14760_v38 = vadd.f32 %v3956_v6, %v3908_v53  ;;  %v10585_v6 = vld [vmem:[#allocation5 + $0x85c] sm:$0xf]  ;;  %v9710_v53 = vld [vmem:[#allocation5 + $0x888] sm:$0xf0]  ;;  %vm5671_vm5 = vweird.f32 %v14727_v46 }
 0x76b   : > { %4146 = vmatmul.bf16.gmra.mxu3 %v17269_v28  ;;  %v10501_v28 = vld [vmem:[#allocation5 + $0x5bc] sm:$0xf]  ;;  %vm5672_vm7 = vmor %vm5670_vm6, %vm5671_vm5  ;;  %v17285_v29 = vld [vmem:[#allocation77_spill] sm:$0xff] }
 0x76c   : > { %v5666_v22 = vmul.f32 %v14727_v46, %v5665_v56  ;;  %17279 = vst [vmem:[#allocation27_spill] sm:$0xff] %v14760_v38 }
 0x76d   : > { %4048 = vmatmul.bf16.gmra.mxu1 %v17271_v52  ;;  %v3811_v16 = vpop.f32.mrf.mxu0  ;;  %v14751_v20 = vpop.eup %11624  ;;  %v10405_v52 = vld [vmem:[#allocation5 + $0x2bc] sm:$0xf] }
 0x76e   : > { %5836 = vrot.lane.b32.xlu2 %v14707_v47, %s12008_s2  ;;  %v5667_v34 = vmul.f32 0.5, %v5666_v22  ;;  %v5695_v17 = vmul.f32 %v14751_v20, %v14729_v23  ;;  %v9377_v22 = vor.u32 %v10501_v28, %v9374_v59  ;;  %vm5701_vm8 = vweird.f32 %v14751_v20 }
 0x76f   : > { %v3958_v13 = vpop.f32.mrf.mxu3  ;;  %vm5702_vm10 = vmor %vm5700_vm9, %vm5701_vm8 }
 0x770   : > { %4206 = vmatpush.bf16.msrb.mxu1 %v9377_v22 }
 0x771   : > { %3999 = vmatmul.bf16.gmra.mxu0 %v17270_v7  ;;  %v8990_v7 = vld [vmem:[#allocation5 + $0x2e8] sm:$0xf0] }
 0x772   : > { %5838 = vrot.lane.b32.xlu1 %v14712_v55, %s12008_s2  ;;  %v8993_v36 = vor.u32 %v10405_v52, %v8990_v7  ;;  %v17281_v7 = vld [vmem:[#allocation88_spill] sm:$0xff] }
 0x774   : > { %4157 = vmatpush.bf16.msrb.mxu0 %v8993_v36  ;;  %v17283_v36 = vld [vmem:[#allocation86_spill] sm:$0xff] }
 0x775   : > { %v5806_v22 = vmul.f32 %v17283_v36, %v14598_v5  ;;  %v10369_v36 = vld [vmem:[#allocation5 + $0x19c] sm:$0xf] }
 0x779   : > { %4102 = vmatmul.bf16.gmra.mxu2 %v17272_v32 }
 0x77b   : > { %4151 = vmatmul.bf16.gmra.mxu3 %v17273_v50  ;;  %v9761_v50 = vor.u32 %v10597_v62, %v9758_v8  ;;  %v10693_v8 = vld [vmem:[#allocation5 + $0xbbc] sm:$0xf]  ;;  %v10142_v62 = vld [vmem:[#allocation5 + $0xbe8] sm:$0xf0] }
 0x77d   : > { %4053 = vmatmul.bf16.gmra.mxu1 %v17276_v31  ;;  %4255 = vmatpush.bf16.msrb.mxu2 %v9761_v50  ;;  %v14754_v31 = vadd.f32 1.1920929e-07, %v5526_v42  ;;  %v10145_v50 = vor.u32 %v10693_v8, %v10142_v62  ;;  %v5696_v8 = vmul.f32 %v14751_v20, %v5695_v17  ;;  %v6262_v62 = vmul.f32 %v14760_v38, %v14760_v38 }
 0x77f   : > { %4304 = vmatpush.bf16.msrb.mxu3 %v10145_v50  ;;  %11628 = vrsqrt.f32 %v14754_v31  ;;  %v10094_v50 = vld [vmem:[#allocation5 + $0xb88] sm:$0xf0]  ;;  %vm5690_vm15 = vweird.f32 %v14754_v31 }
 0x781   : > { %4004 = vmatmul.bf16.gmra.mxu0 %v17275_v0  ;;  %v3860_v0 = vpop.f32.mrf.mxu1 }
 0x782   : > { %v3861_v56 = vadd.f32 %v3860_v0, %v3811_v16  ;;  %v14762_v0 = vpop.eup %11626  ;;  %v5668_v16 = vsub.f32 1.5, %v5667_v34  ;;  %v17282_v34 = vld [vmem:[#allocation87_spill] sm:$0xff] }
 0x783   : > { %v5675_v59 = vmul.f32 %v14762_v0, %v14742_v63  ;;  %v5807_v17 = vmul.f32 %v17282_v34, %v14612_v2  ;;  %vm5681_vm11 = vweird.f32 %v14762_v0 }
 0x784   : > { %v14756_v32 = vpop.xlane.xlu0 %6278  ;;  %v3910_v42 = vadd.f32 %v3909_v4, %v3861_v56  ;;  %v9713_v56 = vor.u32 %v10585_v6, %v9710_v53  ;;  %v10681_v4 = vld [vmem:[#allocation5 + $0xb5c] sm:$0xf]  ;;  %v17284_v6 = vld [vmem:[#allocation85_spill] sm:$0xff]  ;;  %vm5682_vm13 = vmor %vm5680_vm12, %vm5681_vm11 }
 0x785   : > { %17278 = vst [vmem:[#allocation26_spill] sm:$0xff] %v14756_v32  ;;  %v10097_v11 = vor.u32 %v10681_v4, %v10094_v50  ;;  %v11629_v32 = vpop.eup %11628  ;;  %v5676_v5 = vmul.f32 %v14762_v0, %v5675_v59 }
 0x786   : > { %v14770_v28 = vadd.f32 %v3958_v13, %v3910_v42  ;;  %v10489_v42 = vld [vmem:[#allocation5 + $0x55c] sm:$0xf]  ;;  %v5669_v13 = vmul.f32 %v14727_v46, %v5668_v16  ;;  %4256 = vmatpush.bf16.msrb.mxu2 %v9713_v56  ;;  %vm5691_vm14 = vweird.f32 %v11629_v32 }
 0x787   : > { %4305 = vmatpush.bf16.msrb.mxu3 %v10097_v11  ;;  %v9329_v2 = vor.u32 %v10489_v42, %v9326_v9  ;;  %v5677_v9 = vmul.f32 0.5, %v5676_v5  ;;  %vm5692_vm0 = vmor %vm5690_vm15, %vm5691_vm14  ;;  %v14817_v5 = vpop.f32.mrf.mxu2 }
 0x788   : > { %v14744_v48 = vpop.xlane.xlu2 %6280  ;;  %17280 = vst [vmem:[#allocation24_spill] sm:$0xff] %v14770_v28  ;;  %v5673_v11 = vsel %vm5672_vm7, %v14727_v46, %v5669_v13 }
 0x789   : > { %17277 = vst [vmem:[#allocation55_spill] sm:$0xff] %v14744_v48  ;;  %v10393_v48 = vld [vmem:[#allocation5 + $0x25c] sm:$0xf]  ;;  %4207 = vmatpush.bf16.msrb.mxu1 %v9329_v2  ;;  %v14790_v16 = vmul.f32 %v5673_v11, %v17285_v29 }
 0x78a   : > { %v10573_v29 = vld [vmem:[#allocation5 + $0x7fc] sm:$0xf] }
 0x78d   : > { %6290 = vadd.xlane.f32.xlu0 %v6261_v51 }
 0x790   : > { %v5831_v51 = vpop.permute.xlu2 %5830 }
 0x791   : > { %v5855_v52 = vmul.f32 %v17281_v7, %v5831_v51  ;;  %v5697_v51 = vmul.f32 0.5, %v5696_v8  ;;  %v8945_v7 = vor.u32 %v10393_v48, %v8942_v30 }
 0x793   : > { %v5871_v4 = vadd.f32 %v5855_v52, %v5807_v17  ;;  %4158 = vmatpush.bf16.msrb.mxu0 %v8945_v7  ;;  %v5698_v30 = vsub.f32 1.5, %v5697_v51  ;;  %v5678_v7 = vsub.f32 1.5, %v5677_v9  ;;  %v17286_v17 = vld [vmem:[#allocation22_spill] sm:$0xff]  ;;  %v14807_v51 = vpop.f32.mrf.mxu0 }
 0x795   : > { %v5699_v8 = vmul.f32 %v14751_v20, %v5698_v30  ;;  %v5679_v56 = vmul.f32 %v14762_v0, %v5678_v7 }
 0x797   : > { %6292 = vadd.xlane.f32.xlu2 %v6262_v62  ;;  %v5829_v38 = vpop.permute.xlu0 %5828  ;;  %v6263_v62 = vmul.f32 %v14770_v28, %v14770_v28  ;;  %v5703_v46 = vsel %vm5702_vm10, %v14751_v20, %v5699_v8  ;;  %v5683_v23 = vsel %vm5682_vm13, %v14762_v0, %v5679_v56  ;;  %v14809_v20 = vpop.f32.mrf.mxu1  ;;  %v9662_v8 = vld [vmem:[#allocation5 + $0x828] sm:$0xf0] }
 0x798   : > { %v5854_v53 = vmul.f32 %v17284_v6, %v5829_v38  ;;  %v5685_v38 = vmul.f32 %v11629_v32, %v14754_v31  ;;  %v6297_v31 = vmul.f32 %v14571_v49, %v12430_v19  ;;  %v9665_v7 = vor.u32 %v10573_v29, %v9662_v8  ;;  %v8894_v56 = vld [vmem:[#allocation5 + $0x228] sm:$0xf0] }
 0x799   : > { %v9998_v28 = vld [vmem:[#allocation5 + $0xac8] sm:$0xf0]  ;;  %v6296_v6 = vmul.f32 %v14629_v15, %v12430_v19  ;;  %v14837_v15 = vpop.xlane.xlu1 %6282 }
 0x79a   : > { %v5870_v50 = vadd.f32 %v5854_v53, %v5806_v22  ;;  %v5686_v59 = vmul.f32 %v11629_v32, %v5685_v38  ;;  %v14801_v22 = vmul.f32 %v5703_v46, %v17286_v17  ;;  %v17287_v53 = vld [vmem:[#allocation23_spill] sm:$0xff]  ;;  %v4070_v38 = vpop.f32.mrf.mxu2  ;;  %v14830_v11 = vadd.f32 1.1920929e-07, %v6297_v31  ;;  %4257 = vmatpush.bf16.msrb.mxu2 %v9665_v7 }
 0x79b   : > { %v14812_v2 = vmul.f32 %v5683_v23, %v17287_v53  ;;  %v10381_v46 = vld [vmem:[#allocation5 + $0x1fc] sm:$0xf] }
 0x79c   : > { %v10827_v48 = vpack.c.bf16 %v5871_v4, %v5870_v50  ;;  %6294 = vadd.xlane.f32.xlu1 %v6263_v62  ;;  %v5687_v52 = vmul.f32 0.5, %v5686_v59  ;;  %v17288_v62 = vld [vmem:[#allocation78_spill] sm:$0xff]  ;;  %v14822_v4 = vpop.f32.mrf.mxu3  ;;  %v3972_v50 = vpop.f32.mrf.mxu0  ;;  %v10669_v59 = vld [vmem:[#allocation5 + $0xafc] sm:$0xf]  ;;  %11630 = vrsqrt.f32 %v14830_v11  ;;  %vm6344_vm2 = vweird.f32 %v14830_v11 }
 0x79d   : > { %v10477_v23 = vld [vmem:[#allocation5 + $0x4fc] sm:$0xf] }
 0x79e   : > { %11272 = vst [vmem:[%s14594_s10 + $0x18] sm:$0xff] %v10827_v48   ;;  %v5688_v42 = vsub.f32 1.5, %v5687_v52  ;;  %v10046_v52 = vld [vmem:[#allocation5 + $0xb28] sm:$0xf0]  ;;  %v10561_v53 = vld [vmem:[#allocation5 + $0x79c] sm:$0xf] }
 0x79f   : > { %v4021_v30 = vpop.f32.mrf.mxu1  ;;  %v10049_v17 = vor.u32 %v10669_v59, %v10046_v52  ;;  %v10657_v31 = vld [vmem:[#allocation5 + $0xa9c] sm:$0xf]  ;;  %v8846_v59 = vld [vmem:[#allocation5 + $0x1c8] sm:$0xf0] }
 0x7a0   : > { %v5689_v13 = vmul.f32 %v11629_v32, %v5688_v42  ;;  %v8897_v42 = vor.u32 %v10381_v46, %v8894_v56  ;;  %v10001_v8 = vor.u32 %v10657_v31, %v9998_v28  ;;  %v10465_v52 = vld [vmem:[#allocation5 + $0x49c] sm:$0xf]  ;;  %v14835_v56 = vadd.f32 1.1920929e-07, %v6296_v6 }
 0x7a1   : > { %5840 = vrot.lane.b32.xlu0 %v14790_v16, %s12008_s2  ;;  %4306 = vmatpush.bf16.msrb.mxu3 %v10049_v17  ;;  %v4022_v28 = vadd.f32 %v4021_v30, %v3972_v50  ;;  %v10357_v30 = vld [vmem:[#allocation5 + $0x13c] sm:$0xf] }
 0x7a2   : > { %v5693_v63 = vsel %vm5692_vm0, %v11629_v32, %v5689_v13  ;;  %v9278_v13 = vld [vmem:[#allocation5 + $0x528] sm:$0xf0]  ;;  %v4073_v34 = vpop.f32.mrf.mxu2  ;;  %4159 = vmatpush.bf16.msrb.mxu0 %v8897_v42  ;;  %v14839_v17 = vpop.eup %11630  ;;  %11632 = vrsqrt.f32 %v14835_v56  ;;  %vm6334_vm5 = vweird.f32 %v14835_v56 }
 0x7a3   : > { %v14820_v0 = vmul.f32 %v5693_v63, %v17288_v62  ;;  %v9281_v49 = vor.u32 %v10477_v23, %v9278_v13  ;;  %v9614_v62 = vld [vmem:[#allocation5 + $0x7c8] sm:$0xf0]  ;;  %v10549_v13 = vld [vmem:[#allocation5 + $0x73c] sm:$0xf]  ;;  %v4071_v31 = vadd.f32 %v4070_v38, %v4022_v28  ;;  %vm6345_vm1 = vweird.f32 %v14839_v17 }
 0x7a4   : > { %v14828_v48 = vpop.f32.mrf.mxu3  ;;  %v3975_v32 = vpop.f32.mrf.mxu0  ;;  %v9617_v29 = vor.u32 %v10561_v53, %v9614_v62  ;;  %v9566_v53 = vld [vmem:[#allocation5 + $0x768] sm:$0xf0]  ;;  %v6339_v62 = vmul.f32 %v14839_v17, %v14830_v11  ;;  %vm6346_vm3 = vmor %vm6344_vm2, %vm6345_vm1  ;;  %v17295_v11 = vld [vmem:[#allocation99_spill] sm:$0xff] }
 0x7a5   : > { %4208 = vmatpush.bf16.msrb.mxu1 %v9281_v49  ;;  %4307 = vmatpush.bf16.msrb.mxu3 %v10001_v8  ;;  %v10453_v8 = vld [vmem:[#allocation5 + $0x43c] sm:$0xf]  ;;  %v14856_v28 = vadd.f32 %v14828_v48, %v4071_v31 }
 0x7a6   : > { %4258 = vmatpush.bf16.msrb.mxu2 %v9617_v29  ;;  %v8798_v29 = vld [vmem:[#allocation5 + $0x168] sm:$0xf0]  ;;  %v6340_v38 = vmul.f32 %v14839_v17, %v6339_v62  ;;  %v5809_v62 = vmul.f32 %v17133_v18, %v14695_v39  ;;  %v10652_v18 = vld [vmem:[#allocation5 + $0xa6c] sm:$0xf0] }
 0x7a7   : > { %v4024_v9 = vpop.f32.mrf.mxu1  ;;  %17290 = vst [vmem:[#allocation64_spill] sm:$0xff] %v14856_v28 }
 0x7a8   : > { %v4025_v63 = vadd.f32 %v4024_v9, %v3975_v32  ;;  %v8849_v32 = vor.u32 %v10369_v36, %v8846_v59  ;;  %v9230_v9 = vld [vmem:[#allocation5 + $0x4c8] sm:$0xf0]  ;;  %v10645_v36 = vld [vmem:[#allocation5 + $0xa3c] sm:$0xf]  ;;  %v5833_v59 = vpop.permute.xlu1 %5832 }
 0x7a9   : > { %5846 = vrot.lane.b32.xlu0 %v14801_v22, %s12008_s2  ;;  %v9233_v7 = vor.u32 %v10465_v52, %v9230_v9  ;;  %v4020_v52 = vadd.f32 %v14809_v20, %v14807_v51  ;;  %v9182_v9 = vld [vmem:[#allocation5 + $0x468] sm:$0xf0]  ;;  %v5856_v51 = vmul.f32 %v17208_v10, %v5833_v59  ;;  %v10364_v10 = vld [vmem:[#allocation5 + $0x16c] sm:$0xf0] }
 0x7aa   : > { %v4074_v46 = vadd.f32 %v4073_v34, %v4025_v63  ;;  %4160 = vmatpush.bf16.msrb.mxu0 %v8849_v32  ;;  %v9569_v34 = vor.u32 %v10549_v13, %v9566_v53  ;;  %v9950_v63 = vld [vmem:[#allocation5 + $0xa68] sm:$0xf0]  ;;  %v8801_v32 = vor.u32 %v10357_v30, %v8798_v29  ;;  %v9185_v13 = vor.u32 %v10453_v8, %v9182_v9 }
 0x7ab   : > { %4209 = vmatpush.bf16.msrb.mxu1 %v9233_v7  ;;  %v9953_v49 = vor.u32 %v10645_v36, %v9950_v63  ;;  %v10537_v7 = vld [vmem:[#allocation5 + $0x6dc] sm:$0xf]  ;;  %v4069_v48 = vadd.f32 %v14817_v5, %v4020_v52  ;;  %v6341_v29 = vmul.f32 0.5, %v6340_v38  ;;  %v7036_v8 = vmul.f32 %v14856_v28, %v14856_v28 }
 0x7ac   : > { %v4122_v23 = vpop.f32.mrf.mxu3  ;;  %4259 = vmatpush.bf16.msrb.mxu2 %v9569_v34  ;;  %v10633_v36 = vld [vmem:[#allocation5 + $0x9dc] sm:$0xf]  ;;  %v9902_v34 = vld [vmem:[#allocation5 + $0xa08] sm:$0xf0]  ;;  %v3977_v30 = vpop.f32.mrf.mxu0 }
 0x7ad   : > { %v14841_v42 = vadd.f32 %v4122_v23, %v4074_v46  ;;  %4308 = vmatpush.bf16.msrb.mxu3 %v9953_v49  ;;  %v9518_v46 = vld [vmem:[#allocation5 + $0x708] sm:$0xf0]  ;;  %v14852_v23 = vpop.eup %11632  ;;  %v9905_v63 = vor.u32 %v10633_v36, %v9902_v34  ;;  %v5808_v49 = vmul.f32 %v17210_v27, %v14617_v35  ;;  %v14874_v39 = vadd.f32 %v14822_v4, %v4069_v48  ;;  %v8804_v27 = vld [vmem:[#allocation5 + $0x140] sm:$0xf] }
 0x7ae   : > { %v9521_v53 = vor.u32 %v10537_v7, %v9518_v46  ;;  %4161 = vmatpush.bf16.msrb.mxu0 %v8801_v32  ;;  %v6329_v20 = vmul.f32 %v14852_v23, %v14835_v56  ;;  %v6342_v46 = vsub.f32 1.5, %v6341_v29  ;;  %v17294_v29 = vld [vmem:[#allocation98_spill] sm:$0xff]  ;;  %vm6335_vm4 = vweird.f32 %v14852_v23 }
 0x7af   : > { %5842 = vrot.lane.b32.xlu2 %v14812_v2, %s12008_s2  ;;  %17289 = vst [vmem:[#allocation25_spill] sm:$0xff] %v14841_v42  ;;  %v7037_v50 = vmul.f32 %v14841_v42, %v14841_v42  ;;  %4210 = vmatpush.bf16.msrb.mxu1 %v9185_v13  ;;  %v4026_v32 = vpop.f32.mrf.mxu1  ;;  %v5872_v5 = vadd.f32 %v5856_v51, %v5808_v49  ;;  %v4075_v13 = vpop.f32.mrf.mxu2  ;;  %vm6336_vm6 = vmor %vm6334_vm5, %vm6335_vm4  ;;  %v9572_v42 = vld [vmem:[#allocation5 + $0x740] sm:$0xf] }
 0x7b0   : > { %4260 = vmatpush.bf16.msrb.mxu2 %v9521_v53  ;;  %17291 = vst [vmem:[#allocation84_spill] sm:$0xff] %v14874_v39  ;;  %v4027_v9 = vadd.f32 %v4026_v32, %v3977_v30  ;;  %v6330_v7 = vmul.f32 %v14852_v23, %v6329_v20  ;;  %v7035_v36 = vmul.f32 %v14874_v39, %v14874_v39  ;;  %v10472_v39 = vld [vmem:[#allocation5 + $0x4cc] sm:$0xf0] }
 0x7b1   : > { %4309 = vmatpush.bf16.msrb.mxu3 %v9905_v63  ;;  %v6343_v51 = vmul.f32 %v14839_v17, %v6342_v46 }
 0x7b2   : > { %v4076_v34 = vadd.f32 %v4075_v13, %v4027_v9  ;;  %v6331_v63 = vmul.f32 0.5, %v6330_v7  ;;  %v17297_v7 = vld [vmem:[#allocation82_spill] sm:$0xff] }
 0x7b4   : > { %v4124_v4 = vpop.f32.mrf.mxu3  ;;  %v6332_v48 = vsub.f32 1.5, %v6331_v63  ;;  %v17298_v63 = vld [vmem:[#allocation54_spill] sm:$0xff] }
 0x7b5   : > { %5844 = vrot.lane.b32.xlu1 %v14820_v0, %s12008_s2  ;;  %v14885_v49 = vadd.f32 %v4124_v4, %v4076_v34 }
 0x7b7   : > { %17292 = vst [vmem:[#allocation56_spill] sm:$0xff] %v14885_v49  ;;  %v7038_v32 = vmul.f32 %v14885_v49, %v14885_v49 }
 0x7c2   : > { %v14844_v6 = vpop.xlane.xlu0 %6284 }
 0x7c9   : > { %v14870_v59 = vpop.xlane.xlu2 %6286 }
 0x7cc   : > { %v14877_v53 = vpop.xlane.xlu1 %6288 }
 0x7d1   : > { %v5837_v20 = vpop.permute.xlu2 %5836 }
 0x7d3   : > { %7055 = vadd.xlane.f32.xlu0 %v7037_v50  ;;  %v6298_v50 = vmul.f32 %v14558_v3, %v12430_v19 }
 0x7d5   : > { %v5835_v31 = vpop.permute.xlu0 %5834  ;;  %v6314_v3 = vadd.f32 1.1920929e-07, %v6298_v50 }
 0x7d6   : > { %v5857_v35 = vmul.f32 %v17134_v57, %v5835_v31  ;;  %v17293_v31 = vld [vmem:[#allocation57_spill] sm:$0xff]  ;;  %v10556_v57 = vld [vmem:[#allocation5 + $0x76c] sm:$0xf0] }
 0x7d7   : > { %11634 = vrsqrt.f32 %v6314_v3  ;;  %v5858_v30 = vmul.f32 %v17293_v31, %v5837_v20  ;;  %vm6354_vm8 = vweird.f32 %v6314_v3 }
 0x7d8   : > { %v5873_v52 = vadd.f32 %v5857_v35, %v5809_v62  ;;  %7053 = vadd.xlane.f32.xlu2 %v7036_v8  ;;  %v6347_v62 = vsel %vm6346_vm3, %v14839_v17, %v6343_v51  ;;  %v5810_v8 = vmul.f32 %v17294_v29, %v14707_v47  ;;  %v6333_v17 = vmul.f32 %v14852_v23, %v6332_v48  ;;  %v3980_v48 = vpop.f32.mrf.mxu0 }
 0x7d9   : > { %v14897_v46 = vmul.f32 %v6347_v62, %v17297_v7  ;;  %v4029_v62 = vpop.f32.mrf.mxu1  ;;  %v6300_v7 = vmul.f32 %v14661_v14, %v12430_v19 }
 0x7da   : > { %v10832_v38 = vpack.c.bf16 %v5873_v52, %v5872_v5  ;;  %v5811_v5 = vmul.f32 %v17295_v11, %v14712_v55  ;;  %v17296_v52 = vld [vmem:[#allocation101_spill] sm:$0xff]  ;;  %v5874_v13 = vadd.f32 %v5858_v30, %v5810_v8  ;;  %v6337_v34 = vsel %vm6336_vm6, %v14852_v23, %v6333_v17  ;;  %v10345_v30 = vld [vmem:[#allocation5 + $0xdc] sm:$0xf]  ;;  %v4078_v23 = vpop.f32.mrf.mxu2 }
 0x7db   : > { %v14907_v51 = vmul.f32 %v6337_v34, %v17298_v63  ;;  %v8750_v8 = vld [vmem:[#allocation5 + $0x108] sm:$0xf0]  ;;  %v10525_v63 = vld [vmem:[#allocation5 + $0x67c] sm:$0xf] }
 0x7dc   : > { %11273 = vst [vmem:[%s14594_s10 + $0x20] sm:$0xff] %v10832_v38   ;;  %v8753_v56 = vor.u32 %v10345_v30, %v8750_v8  ;;  %v9854_v30 = vld [vmem:[#allocation5 + $0x9a8] sm:$0xf0] }
 0x7dd   : > { %v11635_v50 = vpop.eup %11634  ;;  %v8654_v11 = vld [vmem:[#allocation5 + $0x48] sm:$0xf0] }
 0x7de   : > { %v6349_v38 = vmul.f32 %v11635_v50, %v6314_v3  ;;  %vm6355_vm7 = vweird.f32 %v11635_v50  ;;  %4162 = vmatpush.bf16.msrb.mxu0 %v8753_v56  ;;  %v10621_v3 = vld [vmem:[#allocation5 + $0x97c] sm:$0xf]  ;;  %v8702_v56 = vld [vmem:[#allocation5 + $0xa8] sm:$0xf0] }
 0x7df   : > { %7051 = vadd.xlane.f32.xlu1 %v7035_v36  ;;  %vm6356_vm9 = vmor %vm6354_vm8, %vm6355_vm7 }
 0x7e0   : > { %v6350_v55 = vmul.f32 %v11635_v50, %v6349_v38  ;;  %v14913_v38 = vpop.f32.mrf.mxu3 }
 0x7e1   : > { %v4031_v34 = vpop.f32.mrf.mxu1 }
 0x7e2   : > { %v6351_v4 = vmul.f32 0.5, %v6350_v55  ;;  %v3982_v55 = vpop.f32.mrf.mxu0  ;;  %v4080_v8 = vpop.f32.mrf.mxu2 }
 0x7e3   : > { %v4032_v14 = vadd.f32 %v4031_v34, %v3982_v55  ;;  %v10417_v55 = vld [vmem:[#allocation5 + $0x31c] sm:$0xf] }
 0x7e4   : > { %v5839_v35 = vpop.permute.xlu1 %5838  ;;  %v6352_v20 = vsub.f32 1.5, %v6351_v4  ;;  %v9470_v4 = vld [vmem:[#allocation5 + $0x6a8] sm:$0xf0] }
 0x7e5   : > { %v5859_v9 = vmul.f32 %v17296_v52, %v5839_v35  ;;  %v10441_v35 = vld [vmem:[#allocation5 + $0x3dc] sm:$0xf]  ;;  %v4081_v49 = vadd.f32 %v4080_v8, %v4032_v14 }
 0x7e6   : > { %v10321_v52 = vld [vmem:[#allocation5 + $0x1c] sm:$0xf] }
 0x7e7   : > { %v5875_v47 = vadd.f32 %v5859_v9, %v5811_v5  ;;  %7057 = vadd.xlane.f32.xlu1 %v7038_v32  ;;  %6602 = vrot.lane.b32.xlu0 %v14897_v46, %s12008_s2  ;;  %v9134_v32 = vld [vmem:[#allocation5 + $0x408] sm:$0xf0]  ;;  %v6353_v9 = vmul.f32 %v11635_v50, %v6352_v20  ;;  %v9473_v20 = vor.u32 %v10525_v63, %v9470_v4  ;;  %v10609_v63 = vld [vmem:[#allocation5 + $0x91c] sm:$0xf] }
 0x7e8   : > { %v9137_v5 = vor.u32 %v10441_v35, %v9134_v32  ;;  %v10333_v35 = vld [vmem:[#allocation5 + $0x7c] sm:$0xf]  ;;  %v9806_v4 = vld [vmem:[#allocation5 + $0x948] sm:$0xf0]  ;;  %v4129_v34 = vpop.f32.mrf.mxu3 }
 0x7e9   : > { %v10837_v36 = vpack.c.bf16 %v5875_v47, %v5874_v13  ;;  %v6357_v17 = vsel %vm6356_vm9, %v11635_v50, %v6353_v9  ;;  %v14915_v13 = vadd.f32 1.1920929e-07, %v6300_v7  ;;  %v17299_v47 = vld [vmem:[#allocation67_spill] sm:$0xff]  ;;  %4261 = vmatpush.bf16.msrb.mxu2 %v9473_v20  ;;  %v9857_v50 = vor.u32 %v10621_v3, %v9854_v30  ;;  %v9086_v9 = vld [vmem:[#allocation5 + $0x3a8] sm:$0xf0] }
 0x7ea   : > { %4211 = vmatpush.bf16.msrb.mxu1 %v9137_v5  ;;  %v10429_v32 = vld [vmem:[#allocation5 + $0x37c] sm:$0xf]  ;;  %v8705_v5 = vor.u32 %v10333_v35, %v8702_v56  ;;  %v9809_v20 = vor.u32 %v10609_v63, %v9806_v4  ;;  %v8657_v3 = vor.u32 %v10321_v52, %v8654_v11  ;;  %v9038_v30 = vld [vmem:[#allocation5 + $0x348] sm:$0xf0]  ;;  %v4030_v56 = vadd.f32 %v4029_v62, %v3980_v48  ;;  %v9764_v48 = vld [vmem:[#allocation5 + $0x8c0] sm:$0xf] }
 0x7eb   : > { %11274 = vst [vmem:[%s14594_s10 + $0x28] sm:$0xff] %v10837_v36   ;;  %v14918_v36 = vmul.f32 %v6357_v17, %v17299_v47  ;;  %11636 = vrsqrt.f32 %v14915_v13  ;;  %4310 = vmatpush.bf16.msrb.mxu3 %v9857_v50  ;;  %v10513_v7 = vld [vmem:[#allocation5 + $0x61c] sm:$0xf]  ;;  %v9089_v17 = vor.u32 %v10429_v32, %v9086_v9  ;;  %v9422_v47 = vld [vmem:[#allocation5 + $0x648] sm:$0xf0]  ;;  %v6299_v50 = vmul.f32 %v14637_v26, %v12430_v19 }
 0x7ec   : > { %4163 = vmatpush.bf16.msrb.mxu0 %v8705_v5  ;;  %v9425_v28 = vor.u32 %v10513_v7, %v9422_v47  ;;  %v9041_v35 = vor.u32 %v10417_v55, %v9038_v30  ;;  %v14927_v14 = vadd.f32 %v4129_v34, %v4081_v49  ;;  %v4079_v26 = vadd.f32 %v4078_v23, %v4030_v56  ;;  %v10604_v62 = vld [vmem:[#allocation5 + $0x8ec] sm:$0xf0]  ;;  %v10148_v5 = vld [vmem:[#allocation5 + $0xbc0] sm:$0xf] }
 0x7ed   : > { %v14934_v11 = vadd.f32 1.1920929e-07, %v6299_v50  ;;  %v9765_v9 = vor.u32 %v10604_v62, %v9764_v48  ;;  %v10700_v7 = vld [vmem:[#allocation5 + $0xbec] sm:$0xf0]  ;;  %v8996_v47 = vld [vmem:[#allocation5 + $0x2c0] sm:$0xf]  ;;  %v5813_v50 = vmul.f32 %v17059_v58, %v14812_v2  ;;  %vm6374_vm11 = vweird.f32 %v14915_v13 }
 0x7ee   : > { %4212 = vmatpush.bf16.msrb.mxu1 %v9089_v17  ;;  %4262 = vmatpush.bf16.msrb.mxu2 %v9425_v28  ;;  %17300 = vst [vmem:[#allocation65_spill] sm:$0xff] %v14927_v14  ;;  %v7040_v28 = vmul.f32 %v14927_v14, %v14927_v14  ;;  %v14946_v17 = vadd.f32 %v14913_v38, %v4079_v26  ;;  %v10412_v63 = vld [vmem:[#allocation5 + $0x2ec] sm:$0xf0]  ;;  %v9380_v4 = vld [vmem:[#allocation5 + $0x5c0] sm:$0xf] }
 0x7ef   : > { %4311 = vmatpush.bf16.msrb.mxu3 %v9809_v20  ;;  %11638 = vrsqrt.f32 %v14934_v11  ;;  %v10149_v23 = vor.u32 %v10700_v7, %v10148_v5  ;;  %v8997_v20 = vor.u32 %v10412_v63, %v8996_v47  ;;  %v9716_v30 = vld [vmem:[#allocation5 + $0x860] sm:$0xf]  ;;  %v6301_v14 = vmul.f32 %v14659_v1, %v12430_v19  ;;  %v4083_v1 = vpop.f32.mrf.mxu2 }
 0x7f0   : > { %6600 = vrot.lane.b32.xlu2 %v14907_v51, %s12008_s2  ;;  %4164 = vmatpush.bf16.msrb.mxu0 %v8657_v3  ;;  %17302 = vst [vmem:[#allocation81_spill] sm:$0xff] %v14946_v17  ;;  %v10508_v3 = vld [vmem:[#allocation5 + $0x5ec] sm:$0xf0]  ;;  %v10100_v26 = vld [vmem:[#allocation5 + $0xb60] sm:$0xf]  ;;  %v7039_v48 = vmul.f32 %v14946_v17, %v14946_v17  ;;  %vm6364_vm14 = vweird.f32 %v14934_v11 }
 0x7f1   : > { %v14923_v29 = vpop.eup %11636  ;;  %4263 = vmatmul.bf16.vlgmr.msrb.gmra.mxu2 %v17151_v54  ;;  %v9381_v38 = vor.u32 %v10508_v3, %v9380_v4  ;;  %v8948_v5 = vld [vmem:[#allocation5 + $0x260] sm:$0xf] }
 0x7f2   : > { %v6369_v8 = vmul.f32 %v14923_v29, %v14915_v13  ;;  %4213 = vmatpush.bf16.msrb.mxu1 %v9041_v35  ;;  %4312 = vmatmul.bf16.vlgmr.msrb.gmra.mxu3 %v17152_v60  ;;  %v9332_v7 = vld [vmem:[#allocation5 + $0x560] sm:$0xf]  ;;  %vm6375_vm10 = vweird.f32 %v14923_v29 }
 0x7f3   : > { %4165 = vmatmul.bf16.vlgmr.msrb.gmra.mxu0 %v17153_v40  ;;  %4451 = vmatpush.bf16.msra.mxu2 %v9765_v9  ;;  %v10400_v9 = vld [vmem:[#allocation5 + $0x28c] sm:$0xf0]  ;;  %vm6376_vm12 = vmor %vm6374_vm11, %vm6375_vm10 }
 0x7f4   : > { %v6370_v49 = vmul.f32 %v14923_v29, %v6369_v8  ;;  %4500 = vmatpush.bf16.msra.mxu3 %v10149_v23  ;;  %v10592_v8 = vld [vmem:[#allocation5 + $0x88c] sm:$0xf0]  ;;  %4353 = vmatpush.bf16.msra.mxu0 %v8997_v20  ;;  %v8949_v4 = vor.u32 %v10400_v9, %v8948_v5 }
 0x7f5   : > { %4214 = vmatmul.bf16.vlgmr.msrb.gmra.mxu1 %v17154_v61  ;;  %v14956_v2 = vpop.eup %11638  ;;  %v9717_v47 = vor.u32 %v10592_v8, %v9716_v30 }
 0x7f6   : > { %v6371_v55 = vmul.f32 0.5, %v6370_v49  ;;  %v5812_v49 = vmul.f32 %v17058_v37, %v14790_v16  ;;  %4402 = vmatpush.bf16.msra.mxu1 %v9381_v38  ;;  %v6359_v16 = vmul.f32 %v14956_v2, %v14934_v11  ;;  %vm6365_vm13 = vweird.f32 %v14956_v2 }
 0x7f7   : > { %4452 = vmatpush.bf16.msra.mxu2 %v9717_v47  ;;  %vm6366_vm15 = vmor %vm6364_vm14, %vm6365_vm13 }
 0x7f8   : > { %v6372_v20 = vsub.f32 1.5, %v6371_v55  ;;  %4354 = vmatpush.bf16.msra.mxu0 %v8949_v4  ;;  %v6360_v38 = vmul.f32 %v14956_v2, %v6359_v16  ;;  %v6317_v55 = vadd.f32 1.1920929e-07, %v6301_v14 }
 0x7fa   : > { %v6373_v8 = vmul.f32 %v14923_v29, %v6372_v20  ;;  %11640 = vrsqrt.f32 %v6317_v55  ;;  %vm6384_vm1 = vweird.f32 %v6317_v55 }
 0x800   : > { %6604 = vrot.lane.b32.xlu1 %v14918_v36, %s12008_s2  ;;  %v14936_v52 = vpop.xlane.xlu0 %6290 }
 0x801   : > { %4268 = vmatmul.bf16.gmra.mxu2 %v17230_v41 }
 0x802   : > { %4317 = vmatmul.bf16.gmra.mxu3 %v17231_v24 }
 0x803   : > { %4170 = vmatmul.bf16.gmra.mxu0 %v17232_v44 }
 0x805   : > { %4219 = vmatmul.bf16.gmra.mxu1 %v17233_v43 }
 0x80a   : > { %v14931_v32 = vpop.xlane.xlu2 %6292 }
 0x80b   : > { %17301 = vst [vmem:[#allocation83_spill] sm:$0xff] %v14931_v32 }
 0x811   : > { %7061 = vadd.xlane.f32.xlu0 %v7040_v28  ;;  %v10688_v28 = vld [vmem:[#allocation5 + $0xb8c] sm:$0xf0] }
 0x812   : > { %v5843_v34 = vpop.permute.xlu2 %5842  ;;  %v10101_v63 = vor.u32 %v10688_v28, %v10100_v26  ;;  %v14971_v26 = vpop.xlane.xlu1 %6294  ;;  %v6361_v28 = vmul.f32 0.5, %v6360_v38  ;;  %v17309_v38 = vld [vmem:[#allocation28_spill] sm:$0xff] }
 0x813   : > { %v5861_v35 = vmul.f32 %v17060_v21, %v5843_v34  ;;  %v5841_v56 = vpop.permute.xlu0 %5840  ;;  %v10496_v34 = vld [vmem:[#allocation5 + $0x58c] sm:$0xf0]  ;;  %17303 = vst [vmem:[#allocation77_spill] sm:$0xff] %v14971_v26  ;;  %4175 = vmatmul.bf16.gmra.mxu0 %v17309_v38  ;;  %v9236_v21 = vld [vmem:[#allocation5 + $0x4a0] sm:$0xf] }
 0x814   : > { %v5860_v62 = vmul.f32 %v13123_v45, %v5841_v56  ;;  %v9333_v17 = vor.u32 %v10496_v34, %v9332_v7  ;;  %4501 = vmatpush.bf16.msra.mxu3 %v10101_v63  ;;  %v6362_v14 = vsub.f32 1.5, %v6361_v28  ;;  %v17306_v34 = vld [vmem:[#allocation90_spill] sm:$0xff] }
 0x815   : > { %v5877_v23 = vadd.f32 %v5861_v35, %v5813_v50  ;;  %v3985_v50 = vpop.f32.mrf.mxu0  ;;  %v4034_v35 = vpop.f32.mrf.mxu1  ;;  %v10484_v45 = vld [vmem:[#allocation5 + $0x52c] sm:$0xf0] }
 0x816   : > { %v5876_v3 = vadd.f32 %v5860_v62, %v5812_v49  ;;  %4403 = vmatpush.bf16.msra.mxu1 %v9333_v17  ;;  %v4035_v30 = vadd.f32 %v4034_v35, %v3985_v50  ;;  %v4132_v49 = vpop.f32.mrf.mxu3  ;;  %v6363_v63 = vmul.f32 %v14956_v2, %v6362_v14  ;;  %v17307_v50 = vld [vmem:[#allocation30_spill] sm:$0xff] }
 0x817   : > { %4273 = vmatmul.bf16.gmra.mxu2 %v17307_v50  ;;  %v10448_v26 = vld [vmem:[#allocation5 + $0x40c] sm:$0xf0] }
 0x818   : > { %v10842_v56 = vpack.c.bf16 %v5877_v23, %v5876_v3  ;;  %v4084_v17 = vadd.f32 %v4083_v1, %v4035_v30  ;;  %v11641_v23 = vpop.eup %11640  ;;  %v6367_v30 = vsel %vm6366_vm15, %v14956_v2, %v6363_v63  ;;  %v17311_v1 = vld [vmem:[#allocation102_spill] sm:$0xff]  ;;  %v4085_v2 = vpop.f32.mrf.mxu2  ;;  %v17314_v63 = vld [vmem:[#allocation35_spill] sm:$0xff] }
 0x819   : > { %7059 = vadd.xlane.f32.xlu2 %v7039_v48  ;;  %v6377_v48 = vsel %vm6376_vm12, %v14923_v29, %v6373_v8  ;;  %v5815_v29 = vmul.f32 %v13209_v12, %v14801_v22  ;;  %v6379_v16 = vmul.f32 %v11641_v23, %v6317_v55  ;;  %v17308_v22 = vld [vmem:[#allocation31_spill] sm:$0xff]  ;;  %v17310_v8 = vld [vmem:[#allocation29_spill] sm:$0xff]  ;;  %v14999_v11 = vmul.f32 %v6367_v30, %v17311_v1  ;;  %v9668_v30 = vld [vmem:[#allocation5 + $0x800] sm:$0xf] }
 0x81a   : > { %11275 = vst [vmem:[%s14594_s10 + $0x30] sm:$0xff] %v10842_v56   ;;  %v14974_v62 = vadd.f32 %v4132_v49, %v4084_v17  ;;  %v14977_v9 = vmul.f32 %v6377_v48, %v14474_v25  ;;  %v17305_v25 = vld [vmem:[#allocation89_spill] sm:$0xff]  ;;  %4322 = vmatmul.bf16.gmra.mxu3 %v17308_v22  ;;  %4224 = vmatmul.bf16.gmra.mxu1 %v17310_v8  ;;  %v17312_v49 = vld [vmem:[#allocation26_spill] sm:$0xff]  ;;  %vm6385_vm0 = vweird.f32 %v11641_v23  ;;  %v10052_v1 = vld [vmem:[#allocation5 + $0xb00] sm:$0xf] }
 0x81b   : > { %v5847_v5 = vpop.permute.xlu0 %5846  ;;  %v5814_v4 = vmul.f32 %v17305_v25, %v14820_v0  ;;  %v6380_v0 = vmul.f32 %v11641_v23, %v6379_v16  ;;  %v17315_v16 = vld [vmem:[#allocation32_spill] sm:$0xff]  ;;  %vm6386_vm2 = vmor %vm6384_vm1, %vm6385_vm0 }
 0x81c   : > { %17304 = vst [vmem:[#allocation22_spill] sm:$0xff] %v14974_v62  ;;  %v5863_v13 = vmul.f32 %v13204_v33, %v5847_v5  ;;  %v7041_v7 = vmul.f32 %v14974_v62, %v14974_v62  ;;  %v6303_v5 = vmul.f32 %v17312_v49, %v12430_v19  ;;  %v10388_v62 = vld [vmem:[#allocation5 + $0x22c] sm:$0xf0]  ;;  %v17317_v55 = vld [vmem:[#allocation76_spill] sm:$0xff] }
 0x81d   : > { %v6381_v17 = vmul.f32 0.5, %v6380_v0  ;;  %v3987_v28 = vpop.f32.mrf.mxu0  ;;  %v4036_v48 = vpop.f32.mrf.mxu1  ;;  %v10580_v0 = vld [vmem:[#allocation5 + $0x82c] sm:$0xf0]  ;;  %v9284_v33 = vld [vmem:[#allocation5 + $0x500] sm:$0xf] }
 0x81e   : > { %v5879_v20 = vadd.f32 %v5863_v13, %v5815_v29  ;;  %v15005_v13 = vadd.f32 1.1920929e-07, %v6303_v5  ;;  %v17313_v29 = vld [vmem:[#allocation34_spill] sm:$0xff]  ;;  %v9669_v49 = vor.u32 %v10580_v0, %v9668_v30  ;;  %v9285_v37 = vor.u32 %v10484_v45, %v9284_v33  ;;  %v17323_v0 = vld [vmem:[#allocation36_spill] sm:$0xff] }
 0x81f   : > { %v6382_v14 = vsub.f32 1.5, %v6381_v17  ;;  %v10676_v5 = vld [vmem:[#allocation5 + $0xb2c] sm:$0xf0] }
 0x820   : > { %11642 = vrsqrt.f32 %v15005_v13  ;;  %v4088_v17 = vpop.f32.mrf.mxu2  ;;  %v10053_v25 = vor.u32 %v10676_v5, %v10052_v1  ;;  %4453 = vmatpush.bf16.msra.mxu2 %v9669_v49  ;;  %4404 = vmatpush.bf16.msra.mxu1 %v9285_v37  ;;  %v17320_v33 = vld [vmem:[#allocation38_spill] sm:$0xff]  ;;  %v4037_v37 = vadd.f32 %v4036_v48, %v3987_v28  ;;  %v17324_v49 = vld [vmem:[#allocation37_spill] sm:$0xff]  ;;  %vm6404_vm4 = vweird.f32 %v15005_v13 }
 0x822   : > { %4502 = vmatpush.bf16.msra.mxu3 %v10053_v25  ;;  %v17322_v25 = vld [vmem:[#allocation39_spill] sm:$0xff]  ;;  %v4086_v28 = vadd.f32 %v4085_v2, %v4037_v37  ;;  %v8805_v37 = vor.u32 %v10364_v10, %v8804_v27  ;;  %v9908_v10 = vld [vmem:[#allocation5 + $0x9e0] sm:$0xf]  ;;  %v10640_v27 = vld [vmem:[#allocation5 + $0xa0c] sm:$0xf0] }
 0x823   : > { %4180 = vmatmul.bf16.gmra.mxu0 %v17315_v16 }
 0x825   : > { %6608 = vrot.lane.b32.xlu0 %v14977_v9, %s12008_s2 }
 0x826   : > { %v15017_v58 = vpop.eup %11642 }
 0x827   : > { %v5845_v47 = vpop.permute.xlu1 %5844  ;;  %4278 = vmatmul.bf16.gmra.mxu2 %v17313_v29  ;;  %vm6405_vm3 = vweird.f32 %v15017_v58 }
 0x828   : > { %v5862_v3 = vmul.f32 %v17306_v34, %v5845_v47  ;;  %v15008_v47 = vpop.f32.mrf.mxu3  ;;  %vm6406_vm5 = vmor %vm6404_vm4, %vm6405_vm3 }
 0x82a   : > { %v5878_v56 = vadd.f32 %v5862_v3, %v5814_v4  ;;  %7063 = vadd.xlane.f32.xlu1 %v7041_v7  ;;  %v6383_v7 = vmul.f32 %v11641_v23, %v6382_v14  ;;  %4327 = vmatmul.bf16.gmra.mxu3 %v17314_v63  ;;  %v3990_v4 = vpop.f32.mrf.mxu0  ;;  %v4039_v3 = vpop.f32.mrf.mxu1  ;;  %v8900_v14 = vld [vmem:[#allocation5 + $0x200] sm:$0xf] }
 0x82b   : > { %v8901_v12 = vor.u32 %v10388_v62, %v8900_v14  ;;  %v17319_v62 = vld [vmem:[#allocation92_spill] sm:$0xff] }
 0x82c   : > { %v10847_v35 = vpack.c.bf16 %v5879_v20, %v5878_v56  ;;  %v17316_v20 = vld [vmem:[#allocation33_spill] sm:$0xff]  ;;  %v6387_v56 = vsel %vm6386_vm2, %v11641_v23, %v6383_v7  ;;  %v9620_v14 = vld [vmem:[#allocation5 + $0x7a0] sm:$0xf] }
 0x82d   : > { %4229 = vmatmul.bf16.gmra.mxu1 %v17316_v20  ;;  %v15015_v34 = vmul.f32 %v6387_v56, %v17317_v55  ;;  %4355 = vmatpush.bf16.msra.mxu0 %v8901_v12  ;;  %v6302_v56 = vmul.f32 %v17319_v62, %v12430_v19  ;;  %v10568_v55 = vld [vmem:[#allocation5 + $0x7cc] sm:$0xf0] }
 0x82e   : > { %11276 = vst [vmem:[%s14594_s10 + $0x38] sm:$0xff] %v10847_v35   ;;  %v4040_v35 = vadd.f32 %v4039_v3, %v3990_v4  ;;  %v6399_v4 = vmul.f32 %v15017_v58, %v15005_v13  ;;  %v10664_v62 = vld [vmem:[#allocation5 + $0xacc] sm:$0xf0] }
 0x82f   : > { %v15034_v12 = vadd.f32 1.1920929e-07, %v6302_v56  ;;  %v8852_v56 = vld [vmem:[#allocation5 + $0x1a0] sm:$0xf] }
 0x830   : > { %v4089_v23 = vadd.f32 %v4088_v17, %v4040_v35  ;;  %v4137_v7 = vpop.f32.mrf.mxu3  ;;  %v6400_v45 = vmul.f32 %v15017_v58, %v6399_v4  ;;  %v10004_v4 = vld [vmem:[#allocation5 + $0xaa0] sm:$0xf] }
 0x831   : > { %6606 = vrot.lane.b32.xlu2 %v14999_v11, %s12008_s2  ;;  %11644 = vrsqrt.f32 %v15034_v12  ;;  %v10005_v48 = vor.u32 %v10664_v62, %v10004_v4  ;;  %v9188_v4 = vld [vmem:[#allocation5 + $0x440] sm:$0xf]  ;;  %v10460_v62 = vld [vmem:[#allocation5 + $0x46c] sm:$0xf0]  ;;  %vm6394_vm7 = vweird.f32 %v15034_v12 }
 0x832   : > { %v15023_v3 = vadd.f32 %v4137_v7, %v4089_v23  ;;  %v15037_v1 = vpop.f32.mrf.mxu0  ;;  %v15039_v17 = vpop.f32.mrf.mxu1  ;;  %v15042_v5 = vmul.f32 0.5, %v6400_v45  ;;  %v9621_v7 = vor.u32 %v10568_v55, %v9620_v14  ;;  %v9956_v14 = vld [vmem:[#allocation5 + $0xa40] sm:$0xf]  ;;  %v9573_v55 = vor.u32 %v10556_v57, %v9572_v42  ;;  %v10544_v42 = vld [vmem:[#allocation5 + $0x70c] sm:$0xf0] }
 0x833   : > { %4185 = vmatmul.bf16.gmra.mxu0 %v17323_v0  ;;  %v15044_v23 = vpop.f32.mrf.mxu2  ;;  %4503 = vmatpush.bf16.msra.mxu3 %v10005_v48  ;;  %v9957_v2 = vor.u32 %v10652_v18, %v9956_v14  ;;  %v9524_v57 = vld [vmem:[#allocation5 + $0x6e0] sm:$0xf]  ;;  %v10352_v48 = vld [vmem:[#allocation5 + $0x10c] sm:$0xf0] }
 0x834   : > { %17318 = vst [vmem:[#allocation23_spill] sm:$0xff] %v15023_v3  ;;  %v7043_v30 = vmul.f32 %v15023_v3, %v15023_v3  ;;  %v10376_v3 = vld [vmem:[#allocation5 + $0x1cc] sm:$0xf0]  ;;  %4454 = vmatpush.bf16.msra.mxu2 %v9621_v7  ;;  %v15052_v7 = vadd.f32 %v15008_v47, %v4086_v28  ;;  %v9525_v18 = vor.u32 %v10544_v42, %v9524_v57  ;;  %v8756_v28 = vld [vmem:[#allocation5 + $0xe0] sm:$0xf] }
 0x835   : > { %v8757_v32 = vor.u32 %v10352_v48, %v8756_v28  ;;  %v17332_v48 = vld [vmem:[#allocation43_spill] sm:$0xff] }
 0x836   : > { %17326 = vst [vmem:[#allocation54_spill] sm:$0xff] %v15052_v7  ;;  %v7042_v14 = vmul.f32 %v15052_v7, %v15052_v7 }
 0x837   : > { %4283 = vmatmul.bf16.gmra.mxu2 %v17320_v33  ;;  %4504 = vmatpush.bf16.msra.mxu3 %v9957_v2  ;;  %v17328_v2 = vld [vmem:[#allocation69_spill] sm:$0xff] }
 0x838   : > { %v15049_v45 = vpop.f32.mrf.mxu3  ;;  %4455 = vmatpush.bf16.msra.mxu2 %v9573_v55  ;;  %v17327_v55 = vld [vmem:[#allocation68_spill] sm:$0xff] }
 0x83a   : > { %4332 = vmatmul.bf16.gmra.mxu3 %v17322_v25 }
 0x83b   : > { %v15061_v47 = vpop.f32.mrf.mxu2 }
 0x83c   : > { %4456 = vmatpush.bf16.msra.mxu2 %v9525_v18 }
 0x83d   : > { %4234 = vmatmul.bf16.gmra.mxu1 %v17324_v49 }
 0x840   : > { %v15072_v49 = vpop.f32.mrf.mxu3 }
 0x843   : > { %6610 = vrot.lane.b32.xlu1 %v15015_v34, %s12008_s2 }
 0x846   : > { %v15047_v31 = vpop.xlane.xlu0 %7055 }
 0x847   : > { %17325 = vst [vmem:[#allocation82_spill] sm:$0xff] %v15047_v31 }
 0x84a   : > { %4337 = vmatmul.bf16.gmra.mxu3 %v17332_v48  ;;  %v9092_v48 = vld [vmem:[#allocation5 + $0x380] sm:$0xf] }
 0x84b   : > { %v15031_v35 = vpop.xlane.xlu2 %7053 }
 0x84c   : > { %17321 = vst [vmem:[#allocation78_spill] sm:$0xff] %v15031_v35  ;;  %v8853_v35 = vor.u32 %v10376_v3, %v8852_v56  ;;  %v9189_v3 = vor.u32 %v10460_v62, %v9188_v4  ;;  %v15058_v56 = vpop.eup %11644  ;;  %v9909_v62 = vor.u32 %v10640_v27, %v9908_v10  ;;  %v17331_v27 = vld [vmem:[#allocation42_spill] sm:$0xff] }
 0x84d   : > { %4288 = vmatmul.bf16.gmra.mxu2 %v17331_v27  ;;  %vm6395_vm6 = vweird.f32 %v15058_v56  ;;  %v10436_v27 = vld [vmem:[#allocation5 + $0x3ac] sm:$0xf0] }
 0x84e   : > { %4356 = vmatpush.bf16.msra.mxu0 %v8853_v35  ;;  %v6402_v35 = vsub.f32 1.5, %v15042_v5  ;;  %v6389_v5 = vmul.f32 %v15058_v56, %v15034_v12  ;;  %4505 = vmatpush.bf16.msra.mxu3 %v9909_v62  ;;  %v15092_v62 = vpop.f32.mrf.mxu2  ;;  %vm6396_vm8 = vmor %vm6394_vm7, %vm6395_vm6  ;;  %v17343_v12 = vld [vmem:[#allocation59_spill] sm:$0xff]  ;;  %v9093_v0 = vor.u32 %v10436_v27, %v9092_v48 }
 0x84f   : > { %7067 = vadd.xlane.f32.xlu0 %v7043_v30  ;;  %v9237_v30 = vor.u32 %v10472_v39, %v9236_v21  ;;  %v15054_v21 = vpop.f32.mrf.mxu0  ;;  %v15056_v39 = vpop.f32.mrf.mxu1 }
 0x850   : > { %v6403_v7 = vmul.f32 %v15017_v58, %v6402_v35  ;;  %v17334_v35 = vld [vmem:[#allocation40_spill] sm:$0xff] }
 0x851   : > { %4405 = vmatpush.bf16.msra.mxu1 %v9237_v30  ;;  %v9140_v30 = vld [vmem:[#allocation5 + $0x3e0] sm:$0xf]  ;;  %4190 = vmatmul.bf16.gmra.mxu0 %v17334_v35 }
 0x852   : > { %4357 = vmatpush.bf16.msra.mxu0 %v8805_v37  ;;  %v6584_v37 = vmul.f32 %v17328_v2, %v14907_v51  ;;  %v9141_v28 = vor.u32 %v10448_v26, %v9140_v30  ;;  %v6407_v30 = vsel %vm6406_vm5, %v15017_v58, %v6403_v7  ;;  %v15097_v58 = vpop.f32.mrf.mxu3 }
 0x853   : > { %v6601_v31 = vpop.permute.xlu2 %6600 }
 0x854   : > { %v6632_v4 = vmul.f32 %v17327_v55, %v6601_v31  ;;  %v17330_v31 = vld [vmem:[#allocation71_spill] sm:$0xff] }
 0x855   : > { %4406 = vmatpush.bf16.msra.mxu1 %v9189_v3  ;;  %v17329_v3 = vld [vmem:[#allocation70_spill] sm:$0xff] }
 0x856   : > { %v6585_v57 = vmul.f32 %v17329_v3, %v14897_v46  ;;  %4358 = vmatpush.bf16.msra.mxu0 %v8757_v32  ;;  %v17333_v46 = vld [vmem:[#allocation55_spill] sm:$0xff]  ;;  %v6648_v18 = vadd.f32 %v6632_v4, %v6584_v37  ;;  %v4042_v32 = vadd.f32 %v15039_v17, %v15037_v1  ;;  %v17336_v37 = vld [vmem:[#allocation100_spill] sm:$0xff] }
 0x857   : > { %v6304_v51 = vmul.f32 %v17333_v46, %v12430_v19  ;;  %v3997_v13 = vpop.f32.mrf.mxu0 }
 0x859   : > { %v6603_v42 = vpop.permute.xlu0 %6602  ;;  %4407 = vmatpush.bf16.msra.mxu1 %v9141_v28  ;;  %v6320_v46 = vadd.f32 1.1920929e-07, %v6304_v51 }
 0x85a   : > { %v6633_v10 = vmul.f32 %v17330_v31, %v6603_v42  ;;  %7065 = vadd.xlane.f32.xlu2 %v7042_v14  ;;  %v6390_v42 = vmul.f32 %v15058_v56, %v6389_v5  ;;  %v17335_v14 = vld [vmem:[#allocation41_spill] sm:$0xff]  ;;  %v4046_v31 = vpop.f32.mrf.mxu1  ;;  %v4091_v5 = vadd.f32 %v15044_v23, %v4042_v32  ;;  %v17339_v23 = vld [vmem:[#allocation46_spill] sm:$0xff] }
 0x85b   : > { %4239 = vmatmul.bf16.gmra.mxu1 %v17335_v14  ;;  %11646 = vrsqrt.f32 %v6320_v46  ;;  %v17342_v32 = vld [vmem:[#allocation45_spill] sm:$0xff]  ;;  %v17347_v14 = vld [vmem:[#allocation51_spill] sm:$0xff]  ;;  %vm6414_vm10 = vweird.f32 %v6320_v46 }
 0x85c   : > { %v6649_v3 = vadd.f32 %v6633_v10, %v6585_v57  ;;  %v6391_v4 = vmul.f32 0.5, %v6390_v42  ;;  %v15090_v57 = vmul.f32 %v6407_v30, %v17336_v37  ;;  %v15100_v1 = vadd.f32 %v15049_v45, %v4091_v5  ;;  %v15115_v45 = vpop.f32.mrf.mxu2  ;;  %v17341_v42 = vld [vmem:[#allocation44_spill] sm:$0xff] }
 0x85d   : > { %4293 = vmatmul.bf16.gmra.mxu2 %v17339_v23  ;;  %v17346_v23 = vld [vmem:[#allocation50_spill] sm:$0xff]  ;;  %4408 = vmatpush.bf16.msra.mxu1 %v9093_v0 }
 0x85e   : > { %v10932_v26 = vpack.c.bf16 %v6649_v3, %v6648_v18  ;;  %17337 = vst [vmem:[#allocation67_spill] sm:$0xff] %v15090_v57  ;;  %v6392_v7 = vsub.f32 1.5, %v6391_v4  ;;  %v7044_v51 = vmul.f32 %v15100_v1, %v15100_v1  ;;  %v17340_v18 = vld [vmem:[#allocation47_spill] sm:$0xff]  ;;  %v15121_v4 = vpop.f32.mrf.mxu3 }
 0x85f   : > { %17338 = vst [vmem:[#allocation30_spill] sm:$0xff] %v15100_v1  ;;  %v15104_v3 = vpop.f32.mrf.mxu0  ;;  %4342 = vmatmul.bf16.gmra.mxu3 %v17340_v18 }
 0x860   : > { %11292 = vst [vmem:[%s14594_s10 + $0x40] sm:$0xff] %v10932_v26   ;;  %v6393_v17 = vmul.f32 %v15058_v56, %v6392_v7 }
 0x861   : > { %v15108_v28 = vpop.eup %11646  ;;  %4195 = vmatmul.bf16.gmra.mxu0 %v17341_v42 }
 0x862   : > { %v15106_v10 = vpop.f32.mrf.mxu1  ;;  %v6409_v26 = vmul.f32 %v15108_v28, %v6320_v46  ;;  %v6397_v30 = vsel %vm6396_vm8, %v15058_v56, %v6393_v17  ;;  %v6306_v17 = vmul.f32 %v14844_v6, %v12430_v19  ;;  %vm6415_vm9 = vweird.f32 %v15108_v28  ;;  %v15141_v6 = vpop.xlane.xlu1 %7051 }
 0x863   : > { %6614 = vrot.lane.b32.xlu0 %v15090_v57, %s12008_s2  ;;  %v15124_v37 = vmul.f32 %v6397_v30, %v17343_v12  ;;  %17350 = vst [vmem:[#allocation29_spill] sm:$0xff] %v15141_v6  ;;  %vm15143_vm11 = vmor %vm6414_vm10, %vm6415_vm9 }
 0x864   : > { %v6410_v5 = vmul.f32 %v15108_v28, %v6409_v26  ;;  %v4100_v55 = vpop.f32.mrf.mxu2  ;;  %v15134_v26 = vadd.f32 1.1920929e-07, %v6306_v17 }
 0x865   : > { %17344 = vst [vmem:[#allocation31_spill] sm:$0xff] %v15124_v37 }
 0x866   : > { %v4149_v18 = vpop.f32.mrf.mxu3  ;;  %11648 = vrsqrt.f32 %v15134_v26  ;;  %vm6434_vm13 = vweird.f32 %v15134_v26 }
 0x867   : > { %v4002_v7 = vpop.f32.mrf.mxu0 }
 0x86a   : > { %v4051_v1 = vpop.f32.mrf.mxu1 }
 0x86b   : > { %4244 = vmatmul.bf16.gmra.mxu1 %v17342_v32  ;;  %v4052_v2 = vadd.f32 %v4051_v1, %v4002_v7  ;;  %v17349_v1 = vld [vmem:[#allocation49_spill] sm:$0xff] }
 0x86c   : > { %v4103_v35 = vpop.f32.mrf.mxu2  ;;  %v17353_v7 = vld [vmem:[#allocation97_spill] sm:$0xff]  ;;  %v15157_v27 = vpop.eup %11648 }
 0x86d   : > { %7069 = vadd.xlane.f32.xlu1 %v7044_v51  ;;  %v4101_v42 = vadd.f32 %v4100_v55, %v4052_v2  ;;  %v6411_v51 = vmul.f32 0.5, %v6410_v5  ;;  %4298 = vmatmul.bf16.gmra.mxu2 %v17346_v23  ;;  %v17348_v55 = vld [vmem:[#allocation48_spill] sm:$0xff]  ;;  %v10532_v5 = vld [vmem:[#allocation5 + $0x6ac] sm:$0xf0]  ;;  %vm6435_vm12 = vweird.f32 %v15157_v27 }
 0x86e   : > { %v8708_v23 = vld [vmem:[#allocation5 + $0x80] sm:$0xf]  ;;  %vm15210_vm14 = vmor %vm6434_vm13, %vm6435_vm12 }
 0x86f   : > { %v15129_v56 = vadd.f32 %v4149_v18, %v4101_v42  ;;  %v6412_v32 = vsub.f32 1.5, %v6411_v51  ;;  %v4005_v30 = vpop.f32.mrf.mxu0  ;;  %4347 = vmatmul.bf16.gmra.mxu3 %v17347_v14  ;;  %v4152_v18 = vpop.f32.mrf.mxu3  ;;  %v9476_v42 = vld [vmem:[#allocation5 + $0x680] sm:$0xf]  ;;  %v4047_v51 = vadd.f32 %v4046_v31, %v3997_v13  ;;  %v10520_v13 = vld [vmem:[#allocation5 + $0x64c] sm:$0xf0] }
 0x870   : > { %v9477_v17 = vor.u32 %v10532_v5, %v9476_v42  ;;  %v9860_v14 = vld [vmem:[#allocation5 + $0x980] sm:$0xf] }
 0x871   : > { %17345 = vst [vmem:[#allocation28_spill] sm:$0xff] %v15129_v56  ;;  %4200 = vmatmul.bf16.gmra.mxu0 %v17348_v55  ;;  %v6413_v2 = vmul.f32 %v15108_v28, %v6412_v32  ;;  %v10628_v55 = vld [vmem:[#allocation5 + $0x9ac] sm:$0xf0]  ;;  %v9428_v31 = vld [vmem:[#allocation5 + $0x620] sm:$0xf]  ;;  %v4096_v5 = vadd.f32 %v15092_v62, %v4047_v51 }
 0x872   : > { %6612 = vrot.lane.b32.xlu2 %v15124_v37, %s12008_s2  ;;  %v4054_v12 = vpop.f32.mrf.mxu1  ;;  %4457 = vmatpush.bf16.msra.mxu2 %v9477_v17  ;;  %v9861_v6 = vor.u32 %v10628_v55, %v9860_v14  ;;  %v9812_v55 = vld [vmem:[#allocation5 + $0x920] sm:$0xf]  ;;  %v10328_v62 = vld [vmem:[#allocation5 + $0x4c] sm:$0xf0]  ;;  %v6305_v17 = vmul.f32 %v14837_v15, %v12430_v19  ;;  %v4045_v15 = vadd.f32 %v15056_v39, %v15054_v21  ;;  %v10406_v21 = vld [vmem:[#allocation5 + $0x2c4] sm:$0xf] }
 0x873   : > { %v4055_v32 = vadd.f32 %v4054_v12, %v4005_v30  ;;  %v6417_v46 = vsel %vm15143_vm11, %v15108_v28, %v6413_v2  ;;  %v9429_v30 = vor.u32 %v10520_v13, %v9428_v31  ;;  %v10616_v2 = vld [vmem:[#allocation5 + $0x94c] sm:$0xf0]  ;;  %v15164_v0 = vadd.f32 %v15097_v58, %v4096_v5  ;;  %v17360_v39 = vld [vmem:[#allocation72_spill] sm:$0xff] }
 0x874   : > { %4506 = vmatpush.bf16.msra.mxu3 %v9861_v6  ;;  %v4105_v12 = vpop.f32.mrf.mxu2  ;;  %v15153_v28 = vmul.f32 %v6417_v46, %v17353_v7  ;;  %v9813_v48 = vor.u32 %v10616_v2, %v9812_v55  ;;  %v15168_v6 = vpop.xlane.xlu1 %7057  ;;  %v4094_v55 = vadd.f32 %v15061_v47, %v4045_v15  ;;  %v17361_v47 = vld [vmem:[#allocation74_spill] sm:$0xff] }
 0x875   : > { %v4104_v25 = vadd.f32 %v4103_v35, %v4055_v32  ;;  %17357 = vst [vmem:[#allocation76_spill] sm:$0xff] %v15164_v0  ;;  %v7046_v58 = vmul.f32 %v15164_v0, %v15164_v0  ;;  %v9382_v0 = vld [vmem:[#allocation5 + $0x5f0] sm:$0xf0] }
 0x876   : > { %17354 = vst [vmem:[#allocation102_spill] sm:$0xff] %v15153_v28  ;;  %4458 = vmatpush.bf16.msra.mxu2 %v9429_v30 }
 0x877   : > { %v4007_v56 = vpop.f32.mrf.mxu0  ;;  %v15155_v14 = vadd.f32 %v4152_v18, %v4104_v25  ;;  %v4154_v35 = vpop.f32.mrf.mxu3  ;;  %v6429_v18 = vmul.f32 %v15157_v27, %v15134_v26  ;;  %17358 = vst [vmem:[#allocation92_spill] sm:$0xff] %v15168_v6  ;;  %v9718_v26 = vld [vmem:[#allocation5 + $0x890] sm:$0xf0] }
 0x878   : > { %4507 = vmatpush.bf16.msra.mxu3 %v9813_v48  ;;  %v9766_v48 = vld [vmem:[#allocation5 + $0x8f0] sm:$0xf0] }
 0x879   : > { %17355 = vst [vmem:[#allocation26_spill] sm:$0xff] %v15155_v14  ;;  %v6430_v31 = vmul.f32 %v15157_v27, %v6429_v18 }
 0x87a   : > { %v4056_v57 = vpop.f32.mrf.mxu1 }
 0x87b   : > { %4249 = vmatmul.bf16.gmra.mxu1 %v17349_v1  ;;  %v10340_v1 = vld [vmem:[#allocation5 + $0xac] sm:$0xf0]  ;;  %v4057_v42 = vadd.f32 %v4056_v57, %v4007_v56  ;;  %v8660_v57 = vld [vmem:[#allocation5 + $0x20] sm:$0xf] }
 0x87c   : > { %v8709_v37 = vor.u32 %v10340_v1, %v8708_v23  ;;  %v9044_v56 = vld [vmem:[#allocation5 + $0x320] sm:$0xf]  ;;  %v8661_v25 = vor.u32 %v10328_v62, %v8660_v57  ;;  %v4264_v5 = vpop.f32.mrf.mxu2  ;;  %v6605_v7 = vpop.permute.xlu1 %6604 }
 0x87d   : > { %v4106_v23 = vadd.f32 %v4105_v12, %v4057_v42  ;;  %4459 = vmatmul.bf16.vlgmr.msra.gmra.mxu2 %v17151_v54  ;;  %v15180_v42 = vadd.f32 1.1920929e-07, %v6305_v17  ;;  %v6431_v12 = vmul.f32 0.5, %v6430_v31  ;;  %v10502_v31 = vld [vmem:[#allocation5 + $0x5c4] sm:$0xf] }
 0x87e   : > { %4359 = vmatpush.bf16.msra.mxu0 %v8709_v37  ;;  %v10424_v37 = vld [vmem:[#allocation5 + $0x34c] sm:$0xf0]  ;;  %v9385_v15 = vor.u32 %v10502_v31, %v9382_v0  ;;  %v10102_v31 = vld [vmem:[#allocation5 + $0xb90] sm:$0xf0] }
 0x87f   : > { %v15161_v1 = vadd.f32 %v4154_v35, %v4106_v23  ;;  %v9045_v51 = vor.u32 %v10424_v37, %v9044_v56  ;;  %v4166_v32 = vpop.f32.mrf.mxu0  ;;  %4508 = vmatmul.bf16.vlgmr.msra.gmra.mxu3 %v17152_v60  ;;  %v4313_v30 = vpop.f32.mrf.mxu3  ;;  %11650 = vrsqrt.f32 %v15180_v42  ;;  %v10598_v23 = vld [vmem:[#allocation5 + $0x8c4] sm:$0xf]  ;;  %v6634_v37 = vmul.f32 %v17360_v39, %v6605_v7 }
 0x880   : > { %v9769_v57 = vor.u32 %v10598_v23, %v9766_v48  ;;  %v10694_v56 = vld [vmem:[#allocation5 + $0xbc4] sm:$0xf]  ;;  %v17362_v23 = vld [vmem:[#allocation73_spill] sm:$0xff]  ;;  %vm6424_vm0 = vweird.f32 %v15180_v42 }
 0x881   : > { %17356 = vst [vmem:[#allocation34_spill] sm:$0xff] %v15161_v1  ;;  %4409 = vmatpush.bf16.msra.mxu1 %v9045_v51  ;;  %v6586_v48 = vmul.f32 %v17362_v23, %v14918_v36 }
 0x882   : > { %4360 = vmatpush.bf16.msra.mxu0 %v8661_v25  ;;  %v4215_v46 = vpop.f32.mrf.mxu1  ;;  %v10150_v25 = vld [vmem:[#allocation5 + $0xbf0] sm:$0xf0]  ;;  %4647 = vmatpush.bf16.msrb.mxu2 %v9769_v57 }
 0x883   : > { %v4216_v2 = vadd.f32 %v4215_v46, %v4166_v32  ;;  %v10153_v17 = vor.u32 %v10694_v56, %v10150_v25  ;;  %v6587_v32 = vmul.f32 %v17361_v47, %v14999_v11  ;;  %v6650_v0 = vadd.f32 %v6634_v37, %v6586_v48 }
 0x885   : > { %4361 = vmatmul.bf16.vlgmr.msra.gmra.mxu0 %v17153_v40  ;;  %v4265_v18 = vadd.f32 %v4264_v5, %v4216_v2  ;;  %v17364_v5 = vld [vmem:[#allocation75_spill] sm:$0xff]  ;;  %4696 = vmatpush.bf16.msrb.mxu3 %v10153_v17  ;;  %v15198_v57 = vpop.eup %11650 }
 0x886   : > { %6616 = vrot.lane.b32.xlu1 %v15153_v28, %s12008_s2  ;;  %v15193_v28 = vadd.f32 %v15072_v49, %v4094_v55  ;;  %4598 = vmatpush.bf16.msrb.mxu1 %v9385_v15  ;;  %v6419_v56 = vmul.f32 %v15198_v57, %v15180_v42  ;;  %vm6425_vm15 = vweird.f32 %v15198_v57 }
 0x887   : > { %v4168_v35 = vpop.f32.mrf.mxu0  ;;  %v15196_v2 = vadd.f32 %v4313_v30, %v4265_v18  ;;  %v4315_v11 = vpop.f32.mrf.mxu3  ;;  %v10586_v18 = vld [vmem:[#allocation5 + $0x864] sm:$0xf]  ;;  %vm6426_vm1 = vmor %vm6424_vm0, %vm6425_vm15 }
 0x888   : > { %17363 = vst [vmem:[#allocation55_spill] sm:$0xff] %v15193_v28  ;;  %v7045_v49 = vmul.f32 %v15193_v28, %v15193_v28  ;;  %v9721_v17 = vor.u32 %v10586_v18, %v9718_v26  ;;  %v10562_v28 = vld [vmem:[#allocation5 + $0x7a4] sm:$0xf] }
 0x889   : > { %17365 = vst [vmem:[#allocation100_spill] sm:$0xff] %v15196_v2 }
 0x88a   : > { %v4217_v62 = vpop.f32.mrf.mxu1  ;;  %4648 = vmatpush.bf16.msrb.mxu2 %v9721_v17 }
 0x88b   : > { %4410 = vmatmul.bf16.vlgmr.msra.gmra.mxu1 %v17154_v61  ;;  %v4218_v51 = vadd.f32 %v4217_v62, %v4168_v35  ;;  %v4266_v35 = vpop.f32.mrf.mxu2 }
 0x88c   : > { %v15177_v13 = vpop.xlane.xlu2 %7059 }
 0x88d   : > { %17359 = vst [vmem:[#allocation38_spill] sm:$0xff] %v15177_v13  ;;  %7073 = vadd.xlane.f32.xlu0 %v7046_v58  ;;  %v8998_v58 = vld [vmem:[#allocation5 + $0x2f0] sm:$0xf0]  ;;  %v6432_v13 = vsub.f32 1.5, %v6431_v12  ;;  %v4267_v12 = vadd.f32 %v4266_v35, %v4218_v51  ;;  %4464 = vmatmul.bf16.gmra.mxu2 %v17230_v41 }
 0x88e   : > { %v9001_v46 = vor.u32 %v10406_v21, %v8998_v58  ;;  %v10682_v58 = vld [vmem:[#allocation5 + $0xb64] sm:$0xf]  ;;  %v8950_v35 = vld [vmem:[#allocation5 + $0x290] sm:$0xf0] }
 0x88f   : > { %v6433_v36 = vmul.f32 %v15157_v27, %v6432_v13  ;;  %v15204_v30 = vadd.f32 %v4315_v11, %v4267_v12  ;;  %v4171_v55 = vpop.f32.mrf.mxu0  ;;  %4513 = vmatmul.bf16.gmra.mxu3 %v17231_v24  ;;  %v4318_v48 = vpop.f32.mrf.mxu3  ;;  %v10490_v12 = vld [vmem:[#allocation5 + $0x564] sm:$0xf]  ;;  %v17369_v11 = vld [vmem:[#allocation62_spill] sm:$0xff] }
 0x890   : > { %4549 = vmatpush.bf16.msrb.mxu0 %v9001_v46  ;;  %v6420_v46 = vmul.f32 %v15198_v57, %v6419_v56 }
 0x891   : > { %17366 = vst [vmem:[#allocation59_spill] sm:$0xff] %v15204_v30  ;;  %v6437_v13 = vsel %vm15210_vm14, %v15157_v27, %v6433_v36  ;;  %v6307_v27 = vmul.f32 %v14870_v59, %v12430_v19  ;;  %v9334_v36 = vld [vmem:[#allocation5 + $0x590] sm:$0xf0] }
 0x892   : > { %v4220_v25 = vpop.f32.mrf.mxu1  ;;  %v6421_v56 = vmul.f32 0.5, %v6420_v46 }
 0x893   : > { %v4221_v37 = vadd.f32 %v4220_v25, %v4171_v55  ;;  %v4269_v51 = vpop.f32.mrf.mxu2  ;;  %v4050_v25 = vadd.f32 %v15106_v10, %v15104_v3  ;;  %v15233_v21 = vadd.f32 1.1920929e-07, %v6307_v27  ;;  %v17374_v27 = vld [vmem:[#allocation63_spill] sm:$0xff] }
 0x894   : > { %v6607_v6 = vpop.permute.xlu2 %6606  ;;  %v6422_v18 = vsub.f32 1.5, %v6421_v56 }
 0x895   : > { %v6635_v7 = vmul.f32 %v17364_v5, %v6607_v6  ;;  %4366 = vmatmul.bf16.gmra.mxu0 %v17232_v44  ;;  %v4270_v15 = vadd.f32 %v4269_v51, %v4221_v37  ;;  %v4099_v26 = vadd.f32 %v15115_v45, %v4050_v25  ;;  %11652 = vrsqrt.f32 %v15233_v21  ;;  %v17375_v25 = vld [vmem:[#allocation52_spill] sm:$0xff]  ;;  %v17394_v5 = vld [vmem:[#allocation67_spill] sm:$0xff] }
 0x896   : > { %v6423_v3 = vmul.f32 %v15198_v57, %v6422_v18  ;;  %vm6444_vm3 = vweird.f32 %v15233_v21 }
 0x897   : > { %v6651_v62 = vadd.f32 %v6635_v7, %v6587_v32  ;;  %v10394_v32 = vld [vmem:[#allocation5 + $0x264] sm:$0xf]  ;;  %v10105_v7 = vor.u32 %v10682_v58, %v10102_v31  ;;  %v4173_v55 = vpop.f32.mrf.mxu0  ;;  %v4320_v17 = vpop.f32.mrf.mxu3  ;;  %v15244_v10 = vadd.f32 %v15121_v4, %v4099_v26 }
 0x898   : > { %v15239_v31 = vpop.xlane.xlu0 %7061 }
 0x899   : > { %v10937_v6 = vpack.c.bf16 %v6651_v62, %v6650_v0  ;;  %v15225_v0 = vmul.f32 %v6437_v13, %v17369_v11  ;;  %v8953_v62 = vor.u32 %v10394_v32, %v8950_v35  ;;  %4697 = vmatpush.bf16.msrb.mxu3 %v10105_v7  ;;  %17372 = vst [vmem:[#allocation107_spill] sm:$0xff] %v15244_v10 }
 0x89a   : > { %v4222_v59 = vpop.f32.mrf.mxu1  ;;  %v7047_v4 = vmul.f32 %v15244_v10, %v15244_v10  ;;  %v6427_v7 = vsel %vm6426_vm1, %v15198_v57, %v6423_v3  ;;  %v17378_v3 = vld [vmem:[#allocation80_spill] sm:$0xff] }
 0x89b   : > { %11293 = vst [vmem:[%s14594_s10 + $0x48] sm:$0xff] %v10937_v6   ;;  %7071 = vadd.xlane.f32.xlu2 %v7045_v49  ;;  %4415 = vmatmul.bf16.gmra.mxu1 %v17233_v43  ;;  %v15227_v49 = vadd.f32 %v4318_v48, %v4270_v15  ;;  %v9337_v6 = vor.u32 %v10490_v12, %v9334_v36  ;;  %v4271_v37 = vpop.f32.mrf.mxu2  ;;  %v15250_v45 = vpop.eup %11652 }
 0x89c   : > { %4550 = vmatpush.bf16.msrb.mxu0 %v8953_v62  ;;  %v4223_v13 = vadd.f32 %v4222_v59, %v4173_v55  ;;  %v6439_v12 = vmul.f32 %v15250_v45, %v15233_v21  ;;  %v15261_v11 = vmul.f32 %v6427_v7, %v17374_v27  ;;  %vm6445_vm2 = vweird.f32 %v15250_v45 }
 0x89d   : > { %17370 = vst [vmem:[#allocation97_spill] sm:$0xff] %v15227_v49  ;;  %4599 = vmatpush.bf16.msrb.mxu1 %v9337_v6  ;;  %4469 = vmatmul.bf16.gmra.mxu2 %v17307_v50  ;;  %v15252_v15 = vpop.xlane.xlu1 %7063  ;;  %vm15289_vm4 = vmor %vm6444_vm3, %vm6445_vm2 }
 0x89e   : > { %v4272_v51 = vadd.f32 %v4271_v37, %v4223_v13  ;;  %17373 = vst [vmem:[#allocation108_spill] sm:$0xff] %v15252_v15  ;;  %v6440_v56 = vmul.f32 %v15250_v45, %v6439_v12  ;;  %v6309_v13 = vmul.f32 %v14936_v52, %v12430_v19  ;;  %v17376_v37 = vld [vmem:[#allocation53_spill] sm:$0xff]  ;;  %v10646_v15 = vld [vmem:[#allocation5 + $0xa44] sm:$0xf] }
 0x89f   : > { %v4176_v32 = vpop.f32.mrf.mxu0  ;;  %4518 = vmatmul.bf16.gmra.mxu3 %v17308_v22  ;;  %v4323_v35 = vpop.f32.mrf.mxu3  ;;  %v6588_v18 = vmul.f32 %v17376_v37, %v14977_v9  ;;  %v10006_v37 = vld [vmem:[#allocation5 + $0xad0] sm:$0xf0] }
 0x8a0   : > { %v15237_v58 = vadd.f32 %v4320_v17, %v4272_v51  ;;  %v6609_v42 = vpop.permute.xlu0 %6608  ;;  %v17377_v17 = vld [vmem:[#allocation58_spill] sm:$0xff]  ;;  %v15278_v52 = vadd.f32 1.1920929e-07, %v6309_v13 }
 0x8a1   : > { %6620 = vrot.lane.b32.xlu0 %v15225_v0, %s12008_s2  ;;  %v6636_v57 = vmul.f32 %v17375_v25, %v6609_v42  ;;  %v6441_v42 = vmul.f32 0.5, %v6440_v56  ;;  %v9670_v13 = vld [vmem:[#allocation5 + $0x830] sm:$0xf0] }
 0x8a2   : > { %17371 = vst [vmem:[#allocation62_spill] sm:$0xff] %v15237_v58  ;;  %v4225_v46 = vpop.f32.mrf.mxu1  ;;  %11654 = vrsqrt.f32 %v15278_v52  ;;  %vm6464_vm6 = vweird.f32 %v15278_v52 }
 0x8a3   : > { %v4274_v48 = vpop.f32.mrf.mxu2  ;;  %v4226_v36 = vadd.f32 %v4225_v46, %v4176_v32  ;;  %v6589_v32 = vmul.f32 %v17377_v17, %v15015_v34  ;;  %v6442_v34 = vsub.f32 1.5, %v6441_v42 }
 0x8a5   : > { %4371 = vmatmul.bf16.gmra.mxu0 %v17309_v38  ;;  %v4275_v59 = vadd.f32 %v4274_v48, %v4226_v36  ;;  %v6652_v48 = vadd.f32 %v6636_v57, %v6588_v18  ;;  %v6443_v56 = vmul.f32 %v15250_v45, %v6442_v34  ;;  %v10670_v18 = vld [vmem:[#allocation5 + $0xb04] sm:$0xf]  ;;  %v9286_v34 = vld [vmem:[#allocation5 + $0x530] sm:$0xf0] }
 0x8a7   : > { %v4178_v62 = vpop.f32.mrf.mxu0  ;;  %v4325_v12 = vpop.f32.mrf.mxu3  ;;  %v6447_v25 = vsel %vm15289_vm4, %v15250_v45, %v6443_v56  ;;  %v17384_v45 = vld [vmem:[#allocation66_spill] sm:$0xff] }
 0x8a8   : > { %v15303_v56 = vmul.f32 %v6447_v25, %v17384_v45  ;;  %v8854_v45 = vld [vmem:[#allocation5 + $0x1d0] sm:$0xf0] }
 0x8aa   : > { %v4227_v6 = vpop.f32.mrf.mxu1 }
 0x8ab   : > { %4420 = vmatmul.bf16.gmra.mxu1 %v17310_v8  ;;  %v4228_v55 = vadd.f32 %v4227_v6, %v4178_v62  ;;  %v4276_v51 = vpop.f32.mrf.mxu2 }
 0x8ad   : > { %v4277_v7 = vadd.f32 %v4276_v51, %v4228_v55  ;;  %4474 = vmatmul.bf16.gmra.mxu2 %v17313_v29 }
 0x8af   : > { %v15276_v62 = vadd.f32 %v4325_v12, %v4277_v7  ;;  %v4181_v9 = vpop.f32.mrf.mxu0  ;;  %4523 = vmatmul.bf16.gmra.mxu3 %v17314_v63  ;;  %v4328_v55 = vpop.f32.mrf.mxu3  ;;  %v10382_v7 = vld [vmem:[#allocation5 + $0x204] sm:$0xf]  ;;  %v8902_v12 = vld [vmem:[#allocation5 + $0x230] sm:$0xf0] }
 0x8b0   : > { %7075 = vadd.xlane.f32.xlu1 %v7047_v4  ;;  %v15274_v4 = vadd.f32 %v4323_v35, %v4275_v59  ;;  %v10574_v59 = vld [vmem:[#allocation5 + $0x804] sm:$0xf]  ;;  %v8905_v21 = vor.u32 %v10382_v7, %v8902_v12 }
 0x8b1   : > { %17380 = vst [vmem:[#allocation109_spill] sm:$0xff] %v15276_v62  ;;  %v9958_v62 = vld [vmem:[#allocation5 + $0xa70] sm:$0xf0] }
 0x8b2   : > { %17379 = vst [vmem:[#allocation63_spill] sm:$0xff] %v15274_v4  ;;  %v4230_v6 = vpop.f32.mrf.mxu1  ;;  %4551 = vmatpush.bf16.msrb.mxu0 %v8905_v21  ;;  %v8806_v4 = vld [vmem:[#allocation5 + $0x170] sm:$0xf0] }
 0x8b3   : > { %6618 = vrot.lane.b32.xlu2 %v15261_v11, %s12008_s2  ;;  %v4279_v35 = vpop.f32.mrf.mxu2 }
 0x8b5   : > { %v6611_v26 = vpop.permute.xlu1 %6610  ;;  %4376 = vmatmul.bf16.gmra.mxu0 %v17315_v16 }
 0x8b6   : > { %v6637_v46 = vmul.f32 %v17378_v3, %v6611_v26  ;;  %v4231_v26 = vadd.f32 %v4230_v6, %v4181_v9  ;;  %v9622_v6 = vld [vmem:[#allocation5 + $0x7d0] sm:$0xf0] }
 0x8b7   : > { %v4183_v51 = vpop.f32.mrf.mxu0  ;;  %v4330_v57 = vpop.f32.mrf.mxu3 }
 0x8b8   : > { %v6653_v27 = vadd.f32 %v6637_v46, %v6589_v32  ;;  %v9673_v32 = vor.u32 %v10574_v59, %v9670_v13  ;;  %v10054_v46 = vld [vmem:[#allocation5 + $0xb30] sm:$0xf0]  ;;  %v4280_v10 = vadd.f32 %v4279_v35, %v4231_v26  ;;  %v10658_v13 = vld [vmem:[#allocation5 + $0xaa4] sm:$0xf] }
 0x8ba   : > { %v10942_v36 = vpack.c.bf16 %v6653_v27, %v6652_v48  ;;  %v4232_v42 = vpop.f32.mrf.mxu1  ;;  %v15293_v48 = vpop.eup %11654  ;;  %v10057_v27 = vor.u32 %v10670_v18, %v10054_v46  ;;  %4649 = vmatpush.bf16.msrb.mxu2 %v9673_v32  ;;  %v15298_v17 = vadd.f32 %v4328_v55, %v4280_v10  ;;  %v9625_v18 = vor.u32 %v10562_v28, %v9622_v6  ;;  %v17386_v55 = vld [vmem:[#allocation39_spill] sm:$0xff]  ;;  %v17391_v6 = vld [vmem:[#allocation77_spill] sm:$0xff] }
 0x8bb   : > { %4425 = vmatmul.bf16.gmra.mxu1 %v17316_v20  ;;  %v4233_v59 = vadd.f32 %v4232_v42, %v4183_v51  ;;  %v10009_v46 = vor.u32 %v10658_v13, %v10006_v37  ;;  %v4281_v7 = vpop.f32.mrf.mxu2  ;;  %v6459_v35 = vmul.f32 %v15293_v48, %v15278_v52  ;;  %v7049_v32 = vmul.f32 %v15155_v14, %v15155_v14  ;;  %v17388_v42 = vld [vmem:[#allocation36_spill] sm:$0xff]  ;;  %v17393_v14 = vld [vmem:[#allocation86_spill] sm:$0xff] }
 0x8bc   : > { %11294 = vst [vmem:[%s14594_s10 + $0x50] sm:$0xff] %v10942_v36   ;;  %v10478_v36 = vld [vmem:[#allocation5 + $0x504] sm:$0xf]  ;;  %4698 = vmatpush.bf16.msrb.mxu3 %v10057_v27  ;;  %v6308_v10 = vmul.f32 %v14877_v53, %v12430_v19  ;;  %vm6465_vm5 = vweird.f32 %v15293_v48 }
 0x8bd   : > { %v9289_v9 = vor.u32 %v10478_v36, %v9286_v34  ;;  %17383 = vst [vmem:[#allocation110_spill] sm:$0xff] %v15298_v17  ;;  %v4282_v26 = vadd.f32 %v4281_v7, %v4233_v59  ;;  %v6460_v37 = vmul.f32 %v15293_v48, %v6459_v35  ;;  %4479 = vmatmul.bf16.gmra.mxu2 %v17320_v33  ;;  %v17390_v36 = vld [vmem:[#allocation37_spill] sm:$0xff]  ;;  %vm15344_vm7 = vmor %vm6464_vm6, %vm6465_vm5 }
 0x8be   : > { %4650 = vmatpush.bf16.msrb.mxu2 %v9625_v18  ;;  %v15322_v34 = vadd.f32 1.1920929e-07, %v6308_v10  ;;  %v6311_v59 = vmul.f32 %v17391_v6, %v12430_v19  ;;  %v17395_v6 = vld [vmem:[#allocation87_spill] sm:$0xff] }
 0x8bf   : > { %4600 = vmatpush.bf16.msrb.mxu1 %v9289_v9  ;;  %v15305_v51 = vadd.f32 %v4330_v57, %v4282_v26  ;;  %v4186_v28 = vpop.f32.mrf.mxu0  ;;  %4528 = vmatmul.bf16.gmra.mxu3 %v17386_v55  ;;  %v6461_v53 = vmul.f32 0.5, %v6460_v37  ;;  %v4333_v9 = vpop.f32.mrf.mxu3  ;;  %v10370_v57 = vld [vmem:[#allocation5 + $0x1a4] sm:$0xf]  ;;  %v17392_v37 = vld [vmem:[#allocation31_spill] sm:$0xff]  ;;  %v6591_v47 = vmul.f32 %v17395_v6, %v17394_v5 }
 0x8c0   : > { %4699 = vmatpush.bf16.msrb.mxu3 %v10009_v46  ;;  %11656 = vrsqrt.f32 %v15322_v34  ;;  %v15327_v26 = vadd.f32 1.1920929e-07, %v6311_v59  ;;  %v6590_v3 = vmul.f32 %v17393_v14, %v17392_v37  ;;  %v8857_v39 = vor.u32 %v10370_v57, %v8854_v45  ;;  %v10358_v6 = vld [vmem:[#allocation5 + $0x144] sm:$0xf] }
 0x8c1   : > { %17385 = vst [vmem:[#allocation66_spill] sm:$0xff] %v15305_v51  ;;  %v6462_v18 = vsub.f32 1.5, %v6461_v53  ;;  %v10466_v53 = vld [vmem:[#allocation5 + $0x4a4] sm:$0xf]  ;;  %v9574_v51 = vld [vmem:[#allocation5 + $0x770] sm:$0xf0]  ;;  %v9961_v57 = vor.u32 %v10646_v15, %v9958_v62  ;;  %vm6454_vm9 = vweird.f32 %v15322_v34 }
 0x8c2   : > { %v4235_v25 = vpop.f32.mrf.mxu1  ;;  %v15316_v12 = vpop.xlane.xlu0 %7067  ;;  %4552 = vmatpush.bf16.msrb.mxu0 %v8857_v39  ;;  %11658 = vrsqrt.f32 %v15327_v26  ;;  %v17408_v39 = vld [vmem:[#allocation83_spill] sm:$0xff]  ;;  %vm6484_vm12 = vweird.f32 %v15327_v26 }
 0x8c3   : > { %17387 = vst [vmem:[#allocation39_spill] sm:$0xff] %v15316_v12  ;;  %v4284_v21 = vpop.f32.mrf.mxu2  ;;  %v4236_v46 = vadd.f32 %v4235_v25, %v4186_v28  ;;  %v9238_v28 = vld [vmem:[#allocation5 + $0x4d0] sm:$0xf0]  ;;  %v10550_v25 = vld [vmem:[#allocation5 + $0x744] sm:$0xf]  ;;  %v6463_v59 = vmul.f32 %v15293_v48, %v6462_v18 }
 0x8c4   : > { %v9577_v5 = vor.u32 %v10550_v25, %v9574_v51  ;;  %4700 = vmatpush.bf16.msrb.mxu3 %v9961_v57  ;;  %v17401_v51 = vld [vmem:[#allocation28_spill] sm:$0xff]  ;;  %v9526_v25 = vld [vmem:[#allocation5 + $0x710] sm:$0xf0] }
 0x8c5   : > { %4381 = vmatmul.bf16.gmra.mxu0 %v17388_v42 }
 0x8c6   : > { %v15339_v18 = vpop.eup %11656  ;;  %4651 = vmatpush.bf16.msrb.mxu2 %v9577_v5  ;;  %v9910_v5 = vld [vmem:[#allocation5 + $0xa10] sm:$0xf0] }
 0x8c7   : > { %v4188_v13 = vpop.f32.mrf.mxu0  ;;  %v4335_v37 = vpop.f32.mrf.mxu3  ;;  %vm6455_vm8 = vweird.f32 %v15339_v18 }
 0x8c8   : > { %vm6456_vm10 = vmor %vm6454_vm9, %vm6455_vm8 }
 0x8c9   : > { %6622 = vrot.lane.b32.xlu1 %v15303_v56, %s12008_s2 }
 0x8ca   : > { %v4237_v7 = vpop.f32.mrf.mxu1 }
 0x8cb   : > { %7079 = vadd.xlane.f32.xlu0 %v7049_v32  ;;  %4430 = vmatmul.bf16.gmra.mxu1 %v17390_v36  ;;  %v4238_v35 = vadd.f32 %v4237_v7, %v4188_v13  ;;  %v4285_v32 = vadd.f32 %v4284_v21, %v4236_v46  ;;  %v17396_v13 = vld [vmem:[#allocation85_spill] sm:$0xff]  ;;  %v9241_v46 = vor.u32 %v10466_v53, %v9238_v28  ;;  %v4286_v12 = vpop.f32.mrf.mxu2  ;;  %v10454_v36 = vld [vmem:[#allocation5 + $0x444] sm:$0xf]  ;;  %v9190_v28 = vld [vmem:[#allocation5 + $0x470] sm:$0xf0] }
 0x8cc   : > { %v8809_v53 = vor.u32 %v10358_v6, %v8806_v4  ;;  %v9193_v15 = vor.u32 %v10454_v36, %v9190_v28  ;;  %v6467_v4 = vsel %vm15344_vm7, %v15293_v48, %v6463_v59  ;;  %v17404_v36 = vld [vmem:[#allocation43_spill] sm:$0xff]  ;;  %v10538_v6 = vld [vmem:[#allocation5 + $0x6e4] sm:$0xf]  ;;  %v17407_v59 = vld [vmem:[#allocation41_spill] sm:$0xff] }
 0x8cd   : > { %v15319_v27 = vpop.xlane.xlu2 %7065  ;;  %v15337_v14 = vadd.f32 %v4333_v9, %v4285_v32  ;;  %v4287_v45 = vadd.f32 %v4286_v12, %v4238_v35  ;;  %4601 = vmatpush.bf16.msrb.mxu1 %v9241_v46  ;;  %v17403_v12 = vld [vmem:[#allocation42_spill] sm:$0xff]  ;;  %v6449_v35 = vmul.f32 %v15339_v18, %v15322_v34  ;;  %v17406_v48 = vld [vmem:[#allocation40_spill] sm:$0xff]  ;;  %v9529_v46 = vor.u32 %v10538_v6, %v9526_v25 }
 0x8ce   : > { %17389 = vst [vmem:[#allocation36_spill] sm:$0xff] %v15319_v27  ;;  %v17397_v27 = vld [vmem:[#allocation88_spill] sm:$0xff]  ;;  %4484 = vmatmul.bf16.gmra.mxu2 %v17403_v12  ;;  %4553 = vmatpush.bf16.msrb.mxu0 %v8809_v53  ;;  %v17415_v34 = vld [vmem:[#allocation94_spill] sm:$0xff] }
 0x8cf   : > { %17398 = vst [vmem:[#allocation77_spill] sm:$0xff] %v15337_v14  ;;  %v4191_v62 = vpop.f32.mrf.mxu0  ;;  %v15354_v52 = vadd.f32 %v4335_v37, %v4287_v45  ;;  %4533 = vmatmul.bf16.gmra.mxu3 %v17404_v36  ;;  %v10634_v37 = vld [vmem:[#allocation5 + $0x9e4] sm:$0xf]  ;;  %v4338_v45 = vpop.f32.mrf.mxu3  ;;  %v6450_v53 = vmul.f32 %v15339_v18, %v6449_v35  ;;  %4652 = vmatpush.bf16.msrb.mxu2 %v9529_v46 }
 0x8d1   : > { %17402 = vst [vmem:[#allocation31_spill] sm:$0xff] %v15354_v52  ;;  %4602 = vmatpush.bf16.msrb.mxu1 %v9193_v15  ;;  %v6310_v15 = vmul.f32 %v17408_v39, %v12430_v19  ;;  %v17412_v39 = vld [vmem:[#allocation47_spill] sm:$0xff] }
 0x8d3   : > { %v4289_v57 = vpop.f32.mrf.mxu2  ;;  %v15377_v25 = vadd.f32 1.1920929e-07, %v6310_v15  ;;  %v17413_v15 = vld [vmem:[#allocation44_spill] sm:$0xff] }
 0x8d5   : > { %v6613_v10 = vpop.permute.xlu2 %6612  ;;  %v6615_v23 = vpop.permute.xlu0 %6614  ;;  %4386 = vmatmul.bf16.gmra.mxu0 %v17406_v48  ;;  %11660 = vrsqrt.f32 %v15377_v25  ;;  %vm6474_vm15 = vweird.f32 %v15377_v25 }
 0x8d6   : > { %v6638_v7 = vmul.f32 %v17396_v13, %v6613_v10  ;;  %v6639_v21 = vmul.f32 %v17397_v27, %v6615_v23 }
 0x8d8   : > { %v6654_v23 = vadd.f32 %v6638_v7, %v6590_v3  ;;  %v6655_v10 = vadd.f32 %v6639_v21, %v6591_v47  ;;  %v7048_v3 = vmul.f32 %v17401_v51, %v17401_v51  ;;  %v4240_v9 = vpop.f32.mrf.mxu1  ;;  %v17405_v7 = vld [vmem:[#allocation61_spill] sm:$0xff] }
 0x8d9   : > { %v4241_v32 = vadd.f32 %v4240_v9, %v4191_v62  ;;  %v15362_v21 = vmul.f32 %v6467_v4, %v17405_v7  ;;  %v6451_v4 = vmul.f32 0.5, %v6450_v53  ;;  %v4340_v7 = vpop.f32.mrf.mxu3 }
 0x8da   : > { %v10947_v47 = vpack.c.bf16 %v6655_v10, %v6654_v23  ;;  %v9913_v23 = vor.u32 %v10634_v37, %v9910_v5  ;;  %v15366_v10 = vpop.eup %11658 }
 0x8db   : > { %4435 = vmatmul.bf16.gmra.mxu1 %v17407_v59  ;;  %v4290_v28 = vadd.f32 %v4289_v57, %v4241_v32  ;;  %v6479_v9 = vmul.f32 %v15366_v10, %v15327_v26  ;;  %v4291_v35 = vpop.f32.mrf.mxu2  ;;  %v6452_v37 = vsub.f32 1.5, %v6451_v4  ;;  %vm6485_vm11 = vweird.f32 %v15366_v10  ;;  %v17417_v26 = vld [vmem:[#allocation82_spill] sm:$0xff] }
 0x8dc   : > { %11295 = vst [vmem:[%s14594_s10 + $0x58] sm:$0xff] %v10947_v47   ;;  %7077 = vadd.xlane.f32.xlu2 %v7048_v3  ;;  %4701 = vmatpush.bf16.msrb.mxu3 %v9913_v23  ;;  %v4193_v3 = vpop.f32.mrf.mxu0  ;;  %vm6486_vm13 = vmor %vm6484_vm12, %vm6485_vm11 }
 0x8dd   : > { %v15373_v62 = vadd.f32 %v4338_v45, %v4290_v28  ;;  %v6480_v32 = vmul.f32 %v15366_v10, %v6479_v9  ;;  %v17411_v45 = vld [vmem:[#allocation46_spill] sm:$0xff]  ;;  %v6453_v53 = vmul.f32 %v15339_v18, %v6452_v37  ;;  %v15390_v9 = vpop.eup %11660 }
 0x8de   : > { %4489 = vmatmul.bf16.gmra.mxu2 %v17411_v45  ;;  %vm6475_vm14 = vweird.f32 %v15390_v9 }
 0x8df   : > { %6626 = vrot.lane.b32.xlu0 %v15362_v21, %s12008_s2  ;;  %17409 = vst [vmem:[#allocation67_spill] sm:$0xff] %v15373_v62  ;;  %v6481_v28 = vmul.f32 0.5, %v6480_v32  ;;  %4538 = vmatmul.bf16.gmra.mxu3 %v17412_v39  ;;  %v6469_v32 = vmul.f32 %v15390_v9, %v15377_v25  ;;  %vm15428_vm0 = vmor %vm6474_vm15, %vm6475_vm14 }
 0x8e0   : > { %v4242_v47 = vpop.f32.mrf.mxu1 }
 0x8e1   : > { %v4243_v6 = vadd.f32 %v4242_v47, %v4193_v3  ;;  %v17414_v3 = vld [vmem:[#allocation45_spill] sm:$0xff] }
 0x8e2   : > { %v4343_v4 = vpop.f32.mrf.mxu3 }
 0x8e3   : > { %v4292_v46 = vadd.f32 %v4291_v35, %v4243_v6  ;;  %v4294_v47 = vpop.f32.mrf.mxu2  ;;  %v6482_v6 = vsub.f32 1.5, %v6481_v28  ;;  %v6457_v35 = vsel %vm6456_vm10, %v15339_v18, %v6453_v53  ;;  %v10346_v18 = vld [vmem:[#allocation5 + $0xe4] sm:$0xf]  ;;  %v8758_v53 = vld [vmem:[#allocation5 + $0x110] sm:$0xf0] }
 0x8e4   : > { %v4196_v57 = vpop.f32.mrf.mxu0  ;;  %v8761_v62 = vor.u32 %v10346_v18, %v8758_v53  ;;  %v17419_v53 = vld [vmem:[#allocation24_spill] sm:$0xff] }
 0x8e5   : > { %v15381_v5 = vadd.f32 %v4340_v7, %v4292_v46  ;;  %4391 = vmatmul.bf16.gmra.mxu0 %v17413_v15  ;;  %v7050_v7 = vmul.f32 %v15161_v1, %v15161_v1  ;;  %v15398_v46 = vmul.f32 %v6457_v35, %v17415_v34  ;;  %v6483_v13 = vmul.f32 %v15366_v10, %v6482_v6  ;;  %v10442_v1 = vld [vmem:[#allocation5 + $0x3e4] sm:$0xf]  ;;  %v9142_v35 = vld [vmem:[#allocation5 + $0x410] sm:$0xf0] }
 0x8e6   : > { %v10526_v34 = vld [vmem:[#allocation5 + $0x684] sm:$0xf]  ;;  %v9145_v6 = vor.u32 %v10442_v1, %v9142_v35  ;;  %4554 = vmatpush.bf16.msrb.mxu0 %v8761_v62  ;;  %v17422_v35 = vld [vmem:[#allocation51_spill] sm:$0xff]  ;;  %v17424_v62 = vld [vmem:[#allocation49_spill] sm:$0xff] }
 0x8e7   : > { %17410 = vst [vmem:[#allocation42_spill] sm:$0xff] %v15381_v5  ;;  %v6487_v52 = vsel %vm6486_vm13, %v15366_v10, %v6483_v13  ;;  %v17423_v10 = vld [vmem:[#allocation48_spill] sm:$0xff] }
 0x8e8   : > { %v4245_v23 = vpop.f32.mrf.mxu1  ;;  %4603 = vmatpush.bf16.msrb.mxu1 %v9145_v6  ;;  %v15414_v1 = vmul.f32 %v6487_v52, %v17419_v53  ;;  %v10622_v52 = vld [vmem:[#allocation5 + $0x984] sm:$0xf] }
 0x8e9   : > { %v4246_v51 = vadd.f32 %v4245_v23, %v4196_v57  ;;  %v9478_v57 = vld [vmem:[#allocation5 + $0x6b0] sm:$0xf0]  ;;  %v6470_v23 = vmul.f32 %v15390_v9, %v6469_v32  ;;  %v10322_v15 = vld [vmem:[#allocation5 + $0x24] sm:$0xf] }
 0x8ea   : > { %17420 = vst [vmem:[#allocation83_spill] sm:$0xff] %v15414_v1 }
 0x8eb   : > { %4440 = vmatmul.bf16.gmra.mxu1 %v17414_v3  ;;  %v4295_v5 = vadd.f32 %v4294_v47, %v4246_v51  ;;  %v7085_v51 = vmul.f32 %v17417_v26, %v12430_v19  ;;  %v6471_v32 = vmul.f32 0.5, %v6470_v23  ;;  %v10430_v26 = vld [vmem:[#allocation5 + $0x384] sm:$0xf] }
 0x8ec   : > { %v4198_v37 = vpop.f32.mrf.mxu0 }
 0x8ed   : > { %v15406_v14 = vadd.f32 %v4343_v4, %v4295_v5  ;;  %v17421_v5 = vld [vmem:[#allocation50_spill] sm:$0xff]  ;;  %v15420_v13 = vadd.f32 1.1920929e-07, %v7085_v51 }
 0x8ee   : > { %4494 = vmatmul.bf16.gmra.mxu2 %v17421_v5 }
 0x8ef   : > { %17416 = vst [vmem:[#allocation43_spill] sm:$0xff] %v15406_v14  ;;  %4543 = vmatmul.bf16.gmra.mxu3 %v17422_v35  ;;  %11662 = vrsqrt.f32 %v15420_v13  ;;  %v9094_v14 = vld [vmem:[#allocation5 + $0x3b0] sm:$0xf0]  ;;  %vm7141_vm1 = vweird.f32 %v15420_v13 }
 0x8f0   : > { %v4247_v27 = vpop.f32.mrf.mxu1  ;;  %v9814_v35 = vld [vmem:[#allocation5 + $0x950] sm:$0xf0] }
 0x8f1   : > { %v4248_v28 = vadd.f32 %v4247_v27, %v4198_v37  ;;  %v9481_v27 = vor.u32 %v10526_v34, %v9478_v57  ;;  %v4345_v37 = vpop.f32.mrf.mxu3  ;;  %v9862_v57 = vld [vmem:[#allocation5 + $0x9b0] sm:$0xf0] }
 0x8f2   : > { %v9865_v23 = vor.u32 %v10622_v52, %v9862_v57  ;;  %v9097_v52 = vor.u32 %v10430_v26, %v9094_v14  ;;  %v9046_v14 = vld [vmem:[#allocation5 + $0x350] sm:$0xf0] }
 0x8f3   : > { %7081 = vadd.xlane.f32.xlu1 %v7050_v7  ;;  %v4296_v7 = vpop.f32.mrf.mxu2  ;;  %4653 = vmatpush.bf16.msrb.mxu2 %v9481_v27 }
 0x8f4   : > { %6624 = vrot.lane.b32.xlu2 %v15398_v46, %s12008_s2  ;;  %v4297_v3 = vadd.f32 %v4296_v7, %v4248_v28  ;;  %v4201_v18 = vpop.f32.mrf.mxu0  ;;  %v10334_v7 = vld [vmem:[#allocation5 + $0x84] sm:$0xf]  ;;  %4702 = vmatpush.bf16.msrb.mxu3 %v9865_v23 }
 0x8f5   : > { %4396 = vmatmul.bf16.gmra.mxu0 %v17423_v10  ;;  %4604 = vmatpush.bf16.msrb.mxu1 %v9097_v52 }
 0x8f6   : > { %v15411_v47 = vadd.f32 %v4345_v37, %v4297_v3  ;;  %v6472_v3 = vsub.f32 1.5, %v6471_v32  ;;  %v8710_v37 = vld [vmem:[#allocation5 + $0xb0] sm:$0xf0] }
 0x8f8   : > { %17418 = vst [vmem:[#allocation61_spill] sm:$0xff] %v15411_v47  ;;  %v4250_v4 = vpop.f32.mrf.mxu1  ;;  %v6473_v27 = vmul.f32 %v15390_v9, %v6472_v3  ;;  %v8713_v47 = vor.u32 %v10334_v7, %v8710_v37  ;;  %v10610_v3 = vld [vmem:[#allocation5 + $0x924] sm:$0xf]  ;;  %v15437_v37 = vpop.eup %11662 }
 0x8f9   : > { %v4348_v34 = vpop.f32.mrf.mxu3  ;;  %v4251_v51 = vadd.f32 %v4250_v4, %v4201_v18  ;;  %v9817_v5 = vor.u32 %v10610_v3, %v9814_v35  ;;  %v8662_v18 = vld [vmem:[#allocation5 + $0x50] sm:$0xf0]  ;;  %v10418_v4 = vld [vmem:[#allocation5 + $0x324] sm:$0xf]  ;;  %vm7142_vm2 = vweird.f32 %v15437_v37 }
 0x8fa   : > { %4555 = vmatpush.bf16.msrb.mxu0 %v8713_v47  ;;  %v6477_v39 = vsel %vm15428_vm0, %v15390_v9, %v6473_v27  ;;  %v7822_v47 = vmul.f32 %v15196_v2, %v15196_v2  ;;  %v9049_v35 = vor.u32 %v10418_v4, %v9046_v14  ;;  %v17430_v27 = vld [vmem:[#allocation27_spill] sm:$0xff]  ;;  %v17433_v14 = vld [vmem:[#allocation96_spill] sm:$0xff]  ;;  %vm7143_vm3 = vmor %vm7141_vm1, %vm7142_vm2 }
 0x8fb   : > { %4445 = vmatmul.bf16.gmra.mxu1 %v17424_v62  ;;  %v4299_v28 = vpop.f32.mrf.mxu2  ;;  %v10514_v62 = vld [vmem:[#allocation5 + $0x624] sm:$0xf]  ;;  %4703 = vmatpush.bf16.msrb.mxu3 %v9817_v5  ;;  %v15448_v26 = vmul.f32 %v6477_v39, %v17430_v27  ;;  %v7825_v39 = vmul.f32 %v15237_v58, %v15237_v58  ;;  %v17435_v27 = vld [vmem:[#allocation95_spill] sm:$0xff] }
 0x8fc   : > { %6630 = vrot.lane.b32.xlu2 %v15414_v1, %s12008_s2  ;;  %v4203_v6 = vpop.f32.mrf.mxu0  ;;  %v4300_v57 = vadd.f32 %v4299_v28, %v4251_v51  ;;  %v9430_v1 = vld [vmem:[#allocation5 + $0x650] sm:$0xf0]  ;;  %4605 = vmatpush.bf16.msrb.mxu1 %v9049_v35 }
 0x8fd   : > { %v9433_v25 = vor.u32 %v10514_v62, %v9430_v1  ;;  %v15441_v62 = vpop.xlane.xlu1 %7069 }
 0x8fe   : > { %v15435_v23 = vadd.f32 %v4348_v34, %v4300_v57  ;;  %17428 = vst [vmem:[#allocation94_spill] sm:$0xff] %v15441_v62 }
 0x8ff   : > { %4654 = vmatpush.bf16.msrb.mxu2 %v9433_v25  ;;  %4704 = vmatmul.bf16.vlgmr.msrb.gmra.mxu3 %v17152_v60  ;;  %v17432_v25 = vld [vmem:[#allocation29_spill] sm:$0xff] }
 0x900   : > { %v4252_v53 = vpop.f32.mrf.mxu1  ;;  %17427 = vst [vmem:[#allocation46_spill] sm:$0xff] %v15435_v23 }
 0x901   : > { %v4253_v10 = vadd.f32 %v4252_v53, %v4203_v6  ;;  %v8665_v6 = vor.u32 %v10322_v15, %v8662_v18  ;;  %v4350_v28 = vpop.f32.mrf.mxu3  ;;  %v7136_v15 = vmul.f32 %v15437_v37, %v15420_v13  ;;  %v7083_v18 = vmul.f32 %v17432_v25, %v12430_v19  ;;  %v10593_v13 = vld [vmem:[#allocation5 + $0x894] sm:$0xf0] }
 0x902   : > { %4655 = vmatmul.bf16.vlgmr.msrb.gmra.mxu2 %v17151_v54 }
 0x903   : > { %v4301_v7 = vpop.f32.mrf.mxu2  ;;  %4556 = vmatpush.bf16.msrb.mxu0 %v8665_v6  ;;  %v7137_v5 = vmul.f32 %v15437_v37, %v7136_v15  ;;  %v15464_v35 = vadd.f32 1.1920929e-07, %v7083_v18  ;;  %v17434_v15 = vld [vmem:[#allocation102_spill] sm:$0xff]  ;;  %v10701_v18 = vld [vmem:[#allocation5 + $0xbf4] sm:$0xf0] }
 0x904   : > { %v4302_v1 = vadd.f32 %v4301_v7, %v4253_v10  ;;  %v4362_v34 = vpop.f32.mrf.mxu0  ;;  %v6592_v23 = vmul.f32 %v17435_v27, %v17434_v15 }
 0x905   : > { %v6617_v52 = vpop.permute.xlu1 %6616  ;;  %v7138_v3 = vmul.f32 0.5, %v7137_v5  ;;  %11664 = vrsqrt.f32 %v15464_v35  ;;  %vm7121_vm5 = vweird.f32 %v15464_v35 }
 0x906   : > { %v15443_v9 = vadd.f32 %v4350_v28, %v4302_v1  ;;  %4557 = vmatmul.bf16.vlgmr.msrb.gmra.mxu0 %v17153_v40  ;;  %v6640_v28 = vmul.f32 %v17433_v14, %v6617_v52  ;;  %v10413_v14 = vld [vmem:[#allocation5 + $0x2f4] sm:$0xf0] }
 0x907   : > { %v7139_v1 = vsub.f32 1.5, %v7138_v3  ;;  %v10509_v40 = vld [vmem:[#allocation5 + $0x5f4] sm:$0xf0] }
 0x908   : > { %17429 = vst [vmem:[#allocation82_spill] sm:$0xff] %v15443_v9  ;;  %v4411_v51 = vpop.f32.mrf.mxu1  ;;  %v17437_v9 = vld [vmem:[#allocation91_spill] sm:$0xff] }
 0x909   : > { %7838 = vadd.xlane.f32.xlu0 %v7822_v47  ;;  %v4509_v32 = vpop.f32.mrf.mxu3  ;;  %v4412_v4 = vadd.f32 %v4411_v51, %v4362_v34  ;;  %v9772_v34 = vld [vmem:[#allocation5 + $0x8c8] sm:$0xf]  ;;  %v10605_v51 = vld [vmem:[#allocation5 + $0x8f4] sm:$0xf0] }
 0x90a   : > { %v9773_v3 = vor.u32 %v10605_v51, %v9772_v34 }
 0x90b   : > { %4606 = vmatmul.bf16.vlgmr.msrb.gmra.mxu1 %v17154_v61  ;;  %v4460_v53 = vpop.f32.mrf.mxu2  ;;  %v9388_v61 = vld [vmem:[#allocation5 + $0x5c8] sm:$0xf] }
 0x90c   : > { %6628 = vrot.lane.b32.xlu1 %v15448_v26, %s12008_s2  ;;  %v4364_v57 = vpop.f32.mrf.mxu0  ;;  %v4461_v47 = vadd.f32 %v4460_v53, %v4412_v4  ;;  %v6656_v53 = vadd.f32 %v6640_v28, %v6592_v23  ;;  %v9004_v4 = vld [vmem:[#allocation5 + $0x2c8] sm:$0xf]  ;;  %4843 = vmatpush.bf16.msra.mxu2 %v9773_v3  ;;  %v7140_v23 = vmul.f32 %v15437_v37, %v7139_v1 }
 0x90d   : > { %v9005_v27 = vor.u32 %v10413_v14, %v9004_v4  ;;  %v15489_v14 = vpop.eup %11664 }
 0x90e   : > { %v15457_v10 = vpop.xlane.xlu2 %7071  ;;  %v4510_v25 = vadd.f32 %v4509_v32, %v4461_v47  ;;  %v17438_v47 = vld [vmem:[#allocation25_spill] sm:$0xff]  ;;  %vm7122_vm4 = vweird.f32 %v15489_v14 }
 0x90f   : > { %17431 = vst [vmem:[#allocation24_spill] sm:$0xff] %v15457_v10  ;;  %4745 = vmatpush.bf16.msra.mxu0 %v9005_v27  ;;  %4709 = vmatmul.bf16.gmra.mxu3 %v17231_v24  ;;  %v9724_v27 = vld [vmem:[#allocation5 + $0x868] sm:$0xf]  ;;  %vm7123_vm6 = vmor %vm7121_vm5, %vm7122_vm4 }
 0x910   : > { %v4413_v7 = vpop.f32.mrf.mxu1  ;;  %v9725_v51 = vor.u32 %v10593_v13, %v9724_v27  ;;  %v8956_v27 = vld [vmem:[#allocation5 + $0x268] sm:$0xf] }
 0x911   : > { %7844 = vadd.xlane.f32.xlu0 %v7825_v39  ;;  %v4414_v6 = vadd.f32 %v4413_v7, %v4364_v57  ;;  %v17436_v39 = vld [vmem:[#allocation93_spill] sm:$0xff]  ;;  %v4511_v52 = vpop.f32.mrf.mxu3 }
 0x912   : > { %v6593_v5 = vmul.f32 %v17436_v39, %v15261_v11  ;;  %v10156_v57 = vld [vmem:[#allocation5 + $0xbc8] sm:$0xf]  ;;  %4660 = vmatmul.bf16.gmra.mxu2 %v17230_v41 }
 0x913   : > { %v4462_v2 = vpop.f32.mrf.mxu2  ;;  %v10157_v15 = vor.u32 %v10701_v18, %v10156_v57  ;;  %4844 = vmatpush.bf16.msra.mxu2 %v9725_v51 }
 0x914   : > { %v4463_v7 = vadd.f32 %v4462_v2, %v4414_v6  ;;  %v4367_v39 = vpop.f32.mrf.mxu0  ;;  %v9389_v2 = vor.u32 %v10509_v40, %v9388_v61  ;;  %v7144_v61 = vsel %vm7143_vm3, %v15437_v37, %v7140_v23  ;;  %v7116_v37 = vmul.f32 %v15489_v14, %v15464_v35 }
 0x915   : > { %4892 = vmatpush.bf16.msra.mxu3 %v10157_v15  ;;  %v15492_v1 = vmul.f32 %v7144_v61, %v17438_v47  ;;  %v10689_v47 = vld [vmem:[#allocation5 + $0xb94] sm:$0xf0] }
 0x916   : > { %v6619_v58 = vpop.permute.xlu2 %6618  ;;  %v4512_v11 = vadd.f32 %v4511_v52, %v4463_v7  ;;  %4794 = vmatpush.bf16.msra.mxu1 %v9389_v2  ;;  %4562 = vmatmul.bf16.gmra.mxu0 %v17232_v44  ;;  %v7117_v4 = vmul.f32 %v15489_v14, %v7116_v37  ;;  %v9340_v37 = vld [vmem:[#allocation5 + $0x568] sm:$0xf] }
 0x917   : > { %v6641_v10 = vmul.f32 %v17437_v9, %v6619_v58 }
 0x918   : > { %v4416_v58 = vpop.f32.mrf.mxu1  ;;  %v10852_v32 = vpack.c.bf16 %v4512_v11, %v4510_v25  ;;  %v7823_v25 = vmul.f32 %v15204_v30, %v15204_v30  ;;  %v10437_v30 = vld [vmem:[#allocation5 + $0x3b4] sm:$0xf0] }
 0x919   : > { %v6657_v62 = vadd.f32 %v6641_v10, %v6593_v5  ;;  %v4514_v6 = vpop.f32.mrf.mxu3 }
 0x91a   : > { %10853 = vst [vmem:[%s15484_s12] sm:$0xff] %v10852_v32  }
 0x91b   : > { %v10952_v10 = vpack.c.bf16 %v6657_v62, %v6656_v53  ;;  %v4465_v40 = vpop.f32.mrf.mxu2  ;;  %4611 = vmatmul.bf16.gmra.mxu1 %v17233_v43  ;;  %v4417_v62 = vadd.f32 %v4416_v58, %v4367_v39  ;;  %v17439_v39 = vld [vmem:[#allocation78_spill] sm:$0xff] }
 0x91c   : > { %v4369_v28 = vpop.f32.mrf.mxu0  ;;  %v7084_v7 = vmul.f32 %v17439_v39, %v12430_v19 }
 0x91d   : > { %11296 = vst [vmem:[%s14594_s10 + $0x60] sm:$0xff] %v10952_v10   ;;  %v4466_v34 = vadd.f32 %v4465_v40, %v4417_v62  ;;  %v7118_v10 = vmul.f32 0.5, %v7117_v4  ;;  %v15511_v40 = vpop.xlane.xlu0 %7073  ;;  %v9676_v4 = vld [vmem:[#allocation5 + $0x808] sm:$0xf] }
 0x91e   : > { %v15503_v15 = vadd.f32 1.1920929e-07, %v7084_v7 }
 0x91f   : > { %v4515_v53 = vadd.f32 %v4514_v6, %v4466_v34  ;;  %4714 = vmatmul.bf16.gmra.mxu3 %v17308_v22  ;;  %v7119_v62 = vsub.f32 1.5, %v7118_v10 }
 0x920   : > { %v4418_v5 = vpop.f32.mrf.mxu1  ;;  %11666 = vrsqrt.f32 %v15503_v15  ;;  %vm7131_vm8 = vweird.f32 %v15503_v15 }
 0x921   : > { %v4419_v57 = vadd.f32 %v4418_v5, %v4369_v28  ;;  %v4516_v18 = vpop.f32.mrf.mxu3  ;;  %v10108_v28 = vld [vmem:[#allocation5 + $0xb68] sm:$0xf]  ;;  %v7120_v7 = vmul.f32 %v15489_v14, %v7119_v62 }
 0x922   : > { %4665 = vmatmul.bf16.gmra.mxu2 %v17307_v50  ;;  %v10109_v51 = vor.u32 %v10689_v47, %v10108_v28 }
 0x923   : > { %v4467_v52 = vpop.f32.mrf.mxu2  ;;  %v15516_v34 = vpop.xlane.xlu1 %7075  ;;  %v7124_v47 = vsel %vm7123_vm6, %v15489_v14, %v7120_v7  ;;  %v17444_v14 = vld [vmem:[#allocation99_spill] sm:$0xff] }
 0x924   : > { %v4468_v3 = vadd.f32 %v4467_v52, %v4419_v57  ;;  %v4372_v2 = vpop.f32.mrf.mxu0  ;;  %17440 = vst [vmem:[#allocation27_spill] sm:$0xff] %v15516_v34  ;;  %v10401_v57 = vld [vmem:[#allocation5 + $0x294] sm:$0xf0]  ;;  %v7824_v52 = vmul.f32 %v15227_v49, %v15227_v49  ;;  %4893 = vmatpush.bf16.msra.mxu3 %v10109_v51  ;;  %v17441_v51 = vld [vmem:[#allocation57_spill] sm:$0xff]  ;;  %v6595_v7 = vmul.f32 %v17444_v14, %v15303_v56 }
 0x925   : > { %7840 = vadd.xlane.f32.xlu2 %v7823_v25  ;;  %7391 = vrot.lane.b32.xlu0 %v15492_v1, %s12008_s2  ;;  %v6621_v62 = vpop.permute.xlu0 %6620 }
 0x926   : > { %v4517_v11 = vadd.f32 %v4516_v18, %v4468_v3  ;;  %4567 = vmatmul.bf16.gmra.mxu0 %v17309_v38  ;;  %v15513_v25 = vpop.eup %11666  ;;  %v10497_v3 = vld [vmem:[#allocation5 + $0x594] sm:$0xf0] }
 0x927   : > { %vm7132_vm7 = vweird.f32 %v15513_v25 }
 0x928   : > { %v4421_v58 = vpop.f32.mrf.mxu1  ;;  %v10857_v23 = vpack.c.bf16 %v4517_v11, %v4515_v53  ;;  %v8957_v53 = vor.u32 %v10401_v57, %v8956_v27  ;;  %v10581_v11 = vld [vmem:[#allocation5 + $0x834] sm:$0xf0]  ;;  %v7088_v27 = vmul.f32 %v15239_v31, %v12430_v19  ;;  %v6642_v57 = vmul.f32 %v17441_v51, %v6621_v62  ;;  %v9628_v51 = vld [vmem:[#allocation5 + $0x7a8] sm:$0xf]  ;;  %vm7133_vm9 = vmor %vm7131_vm8, %vm7132_vm7 }
 0x929   : > { %v4519_v61 = vpop.f32.mrf.mxu3  ;;  %v4422_v13 = vadd.f32 %v4421_v58, %v4372_v2  ;;  %v9341_v2 = vor.u32 %v10497_v3, %v9340_v37  ;;  %v9677_v58 = vor.u32 %v10581_v11, %v9676_v4  ;;  %v17445_v4 = vld [vmem:[#allocation101_spill] sm:$0xff] }
 0x92a   : > { %11277 = vst [vmem:[%s15484_s12 + $0x8] sm:$0xff] %v10857_v23   ;;  %v7126_v23 = vmul.f32 %v15513_v25, %v15503_v15  ;;  %4746 = vmatpush.bf16.msra.mxu0 %v8957_v53  ;;  %v17442_v53 = vld [vmem:[#allocation84_spill] sm:$0xff]  ;;  %v15540_v11 = vadd.f32 1.1920929e-07, %v7088_v27  ;;  %v10677_v27 = vld [vmem:[#allocation5 + $0xb34] sm:$0xf0] }
 0x92b   : > { %v4470_v32 = vpop.f32.mrf.mxu2  ;;  %4616 = vmatmul.bf16.gmra.mxu1 %v17310_v8  ;;  %4845 = vmatpush.bf16.msra.mxu2 %v9677_v58  ;;  %v15532_v3 = vmul.f32 %v7124_v47, %v17442_v53  ;;  %v10060_v47 = vld [vmem:[#allocation5 + $0xb08] sm:$0xf] }
 0x92c   : > { %v4374_v6 = vpop.f32.mrf.mxu0  ;;  %v4471_v18 = vadd.f32 %v4470_v32, %v4422_v13  ;;  %4795 = vmatpush.bf16.msra.mxu1 %v9341_v2  ;;  %11668 = vrsqrt.f32 %v15540_v11  ;;  %v9292_v53 = vld [vmem:[#allocation5 + $0x508] sm:$0xf]  ;;  %vm7171_vm10 = vweird.f32 %v15540_v11 }
 0x92f   : > { %4719 = vmatmul.bf16.gmra.mxu3 %v17314_v63 }
 0x930   : > { %v4423_v5 = vpop.f32.mrf.mxu1 }
 0x931   : > { %v4424_v39 = vadd.f32 %v4423_v5, %v4374_v6  ;;  %v4520_v6 = vadd.f32 %v4519_v61, %v4471_v18  ;;  %v4521_v28 = vpop.f32.mrf.mxu3  ;;  %v7127_v5 = vmul.f32 %v15513_v25, %v7126_v23 }
 0x932   : > { %4670 = vmatmul.bf16.gmra.mxu2 %v17313_v29 }
 0x933   : > { %v4472_v10 = vpop.f32.mrf.mxu2  ;;  %v7128_v2 = vmul.f32 0.5, %v7127_v5 }
 0x934   : > { %v4473_v32 = vadd.f32 %v4472_v10, %v4424_v39  ;;  %v4377_v35 = vpop.f32.mrf.mxu0  ;;  %v17443_v39 = vld [vmem:[#allocation98_spill] sm:$0xff] }
 0x935   : > { %v6594_v18 = vmul.f32 %v17443_v39, %v15225_v0 }
 0x936   : > { %7842 = vadd.xlane.f32.xlu1 %v7824_v52  ;;  %v4522_v13 = vadd.f32 %v4521_v28, %v4473_v32  ;;  %4572 = vmatmul.bf16.gmra.mxu0 %v17315_v16 }
 0x937   : > { %v6658_v58 = vadd.f32 %v6642_v57, %v6594_v18  ;;  %v10061_v57 = vor.u32 %v10677_v27, %v10060_v47  ;;  %v15552_v47 = vpop.eup %11668 }
 0x938   : > { %v4426_v37 = vpop.f32.mrf.mxu1  ;;  %v10862_v61 = vpack.c.bf16 %v4522_v13, %v4520_v6  ;;  %v7129_v6 = vsub.f32 1.5, %v7128_v2  ;;  %v8908_v13 = vld [vmem:[#allocation5 + $0x208] sm:$0xf]  ;;  %v10665_v2 = vld [vmem:[#allocation5 + $0xad4] sm:$0xf0]  ;;  %vm7172_vm11 = vweird.f32 %v15552_v47 }
 0x939   : > { %v4524_v56 = vpop.f32.mrf.mxu3  ;;  %v4427_v32 = vadd.f32 %v4426_v37, %v4377_v35  ;;  %4894 = vmatpush.bf16.msra.mxu3 %v10061_v57  ;;  %v7166_v57 = vmul.f32 %v15552_v47, %v15540_v11  ;;  %vm15596_vm12 = vmor %vm7171_vm10, %vm7172_vm11 }
 0x93a   : > { %11278 = vst [vmem:[%s15484_s12 + $0x10] sm:$0xff] %v10862_v61   ;;  %v10485_v61 = vld [vmem:[#allocation5 + $0x534] sm:$0xf0]  ;;  %v7130_v39 = vmul.f32 %v15513_v25, %v7129_v6 }
 0x93b   : > { %v6623_v52 = vpop.permute.xlu1 %6622  ;;  %v4475_v0 = vpop.f32.mrf.mxu2  ;;  %4621 = vmatmul.bf16.gmra.mxu1 %v17316_v20 }
 0x93c   : > { %v6643_v31 = vmul.f32 %v17445_v4, %v6623_v52  ;;  %v4379_v62 = vpop.f32.mrf.mxu0  ;;  %v10389_v52 = vld [vmem:[#allocation5 + $0x234] sm:$0xf0]  ;;  %v4476_v18 = vadd.f32 %v4475_v0, %v4427_v32  ;;  %v17451_v4 = vld [vmem:[#allocation105_spill] sm:$0xff] }
 0x93d   : > { %7387 = vrot.lane.b32.xlu2 %v15532_v3, %s12008_s2 }
 0x93e   : > { %v6659_v23 = vadd.f32 %v6643_v31, %v6595_v7  ;;  %v8909_v7 = vor.u32 %v10389_v52, %v8908_v13  ;;  %v9293_v31 = vor.u32 %v10485_v61, %v9292_v53  ;;  %v4525_v35 = vadd.f32 %v4524_v56, %v4476_v18  ;;  %v9244_v13 = vld [vmem:[#allocation5 + $0x4a8] sm:$0xf]  ;;  %v10473_v52 = vld [vmem:[#allocation5 + $0x4d4] sm:$0xf0]  ;;  %v15560_v18 = vpop.xlane.xlu0 %7079 }
 0x93f   : > { %v9245_v56 = vor.u32 %v10473_v52, %v9244_v13  ;;  %v7134_v61 = vsel %vm7133_vm9, %v15513_v25, %v7130_v39  ;;  %4724 = vmatmul.bf16.gmra.mxu3 %v17386_v55  ;;  %v7167_v25 = vmul.f32 %v15552_v47, %v7166_v57 }
 0x940   : > { %v10957_v10 = vpack.c.bf16 %v6659_v23, %v6658_v58  ;;  %v4428_v28 = vpop.f32.mrf.mxu1  ;;  %v10569_v58 = vld [vmem:[#allocation5 + $0x7d4] sm:$0xf0]  ;;  %v10012_v23 = vld [vmem:[#allocation5 + $0xaa8] sm:$0xf]  ;;  %4747 = vmatpush.bf16.msra.mxu0 %v8909_v7  ;;  %4796 = vmatpush.bf16.msra.mxu1 %v9293_v31  ;;  %v7828_v7 = vmul.f32 %v15298_v17, %v15298_v17  ;;  %v17446_v31 = vld [vmem:[#allocation64_spill] sm:$0xff] }
 0x941   : > { %v4429_v5 = vadd.f32 %v4428_v28, %v4379_v62  ;;  %v9629_v37 = vor.u32 %v10569_v58, %v9628_v51  ;;  %v8860_v62 = vld [vmem:[#allocation5 + $0x1a8] sm:$0xf]  ;;  %v10377_v28 = vld [vmem:[#allocation5 + $0x1d4] sm:$0xf0]  ;;  %v10013_v0 = vor.u32 %v10665_v2, %v10012_v23  ;;  %v4526_v53 = vpop.f32.mrf.mxu3  ;;  %v15566_v58 = vmul.f32 %v7134_v61, %v17446_v31  ;;  %v17449_v2 = vld [vmem:[#allocation92_spill] sm:$0xff] }
 0x942   : > { %11297 = vst [vmem:[%s14594_s10 + $0x68] sm:$0xff] %v10957_v10   ;;  %v8861_v27 = vor.u32 %v10377_v28, %v8860_v62  ;;  %4675 = vmatmul.bf16.gmra.mxu2 %v17320_v33  ;;  %v17447_v23 = vld [vmem:[#allocation37_spill] sm:$0xff]  ;;  %v7168_v28 = vmul.f32 0.5, %v7167_v25  ;;  %v17452_v25 = vld [vmem:[#allocation104_spill] sm:$0xff] }
 0x943   : > { %v4477_v10 = vpop.f32.mrf.mxu2  ;;  %4846 = vmatpush.bf16.msra.mxu2 %v9629_v37  ;;  %4895 = vmatpush.bf16.msra.mxu3 %v10013_v0 }
 0x944   : > { %v4478_v32 = vadd.f32 %v4477_v10, %v4429_v5  ;;  %v4382_v6 = vpop.f32.mrf.mxu0  ;;  %4748 = vmatpush.bf16.msra.mxu0 %v8861_v27  ;;  %4797 = vmatpush.bf16.msra.mxu1 %v9245_v56  ;;  %v7086_v10 = vmul.f32 %v17449_v2, %v12430_v19  ;;  %v7169_v56 = vsub.f32 1.5, %v7168_v28  ;;  %v6597_v2 = vmul.f32 %v17451_v4, %v15362_v21  ;;  %v9580_v28 = vld [vmem:[#allocation5 + $0x748] sm:$0xf]  ;;  %v10461_v4 = vld [vmem:[#allocation5 + $0x474] sm:$0xf0] }
 0x946   : > { %v4527_v51 = vadd.f32 %v4526_v53, %v4478_v32  ;;  %4577 = vmatmul.bf16.gmra.mxu0 %v17388_v42  ;;  %v15579_v53 = vadd.f32 1.1920929e-07, %v7086_v10  ;;  %v7170_v10 = vmul.f32 %v15552_v47, %v7169_v56  ;;  %v9196_v56 = vld [vmem:[#allocation5 + $0x448] sm:$0xf] }
 0x948   : > { %v4431_v5 = vpop.f32.mrf.mxu1  ;;  %v10867_v15 = vpack.c.bf16 %v4527_v51, %v4525_v35  ;;  %v17450_v51 = vld [vmem:[#allocation106_spill] sm:$0xff]  ;;  %11670 = vrsqrt.f32 %v15579_v53  ;;  %vm7151_vm14 = vweird.f32 %v15579_v53 }
 0x949   : > { %v4529_v35 = vpop.f32.mrf.mxu3  ;;  %v4432_v0 = vadd.f32 %v4431_v5, %v4382_v6  ;;  %v6596_v6 = vmul.f32 %v17452_v25, %v15398_v46  ;;  %v17453_v5 = vld [vmem:[#allocation103_spill] sm:$0xff] }
 0x94a   : > { %11279 = vst [vmem:[%s15484_s12 + $0x18] sm:$0xff] %v10867_v15  }
 0x94b   : > { %v4480_v39 = vpop.f32.mrf.mxu2  ;;  %4626 = vmatmul.bf16.gmra.mxu1 %v17447_v23 }
 0x94c   : > { %v4384_v62 = vpop.f32.mrf.mxu0  ;;  %v4481_v52 = vadd.f32 %v4480_v39, %v4432_v0  ;;  %v10557_v0 = vld [vmem:[#allocation5 + $0x774] sm:$0xf0] }
 0x94d   : > { %v9581_v46 = vor.u32 %v10557_v0, %v9580_v28  ;;  %v17458_v0 = vld [vmem:[#allocation63_spill] sm:$0xff] }
 0x94e   : > { %v4530_v31 = vadd.f32 %v4529_v35, %v4481_v52  ;;  %v8812_v52 = vld [vmem:[#allocation5 + $0x148] sm:$0xf] }
 0x94f   : > { %v15573_v37 = vpop.xlane.xlu2 %7077  ;;  %7389 = vrot.lane.b32.xlu1 %v15566_v58, %s12008_s2  ;;  %7850 = vadd.xlane.f32.xlu0 %v7828_v7 }
 0x950   : > { %17448 = vst [vmem:[#allocation29_spill] sm:$0xff] %v15573_v37  ;;  %v4433_v32 = vpop.f32.mrf.mxu1  ;;  %4847 = vmatpush.bf16.msra.mxu2 %v9581_v46  ;;  %4729 = vmatmul.bf16.gmra.mxu3 %v17404_v36 }
 0x951   : > { %v6627_v27 = vpop.permute.xlu0 %6626  ;;  %v4434_v13 = vadd.f32 %v4433_v32, %v4384_v62  ;;  %v4531_v14 = vpop.f32.mrf.mxu3  ;;  %v9964_v32 = vld [vmem:[#allocation5 + $0xa48] sm:$0xf] }
 0x952   : > { %v6645_v57 = vmul.f32 %v17450_v51, %v6627_v27  ;;  %4680 = vmatmul.bf16.gmra.mxu2 %v17403_v12 }
 0x953   : > { %v4482_v61 = vpop.f32.mrf.mxu2 }
 0x954   : > { %v4483_v7 = vadd.f32 %v4482_v61, %v4434_v13  ;;  %v6661_v35 = vadd.f32 %v6645_v57, %v6597_v2  ;;  %v4387_v21 = vpop.f32.mrf.mxu0  ;;  %v10653_v13 = vld [vmem:[#allocation5 + $0xa74] sm:$0xf0]  ;;  %v9197_v57 = vor.u32 %v10461_v4, %v9196_v56  ;;  %v17456_v4 = vld [vmem:[#allocation65_spill] sm:$0xff] }
 0x955   : > { %v10365_v61 = vld [vmem:[#allocation5 + $0x174] sm:$0xf0] }
 0x956   : > { %v4532_v39 = vadd.f32 %v4531_v14, %v4483_v7  ;;  %v9965_v14 = vor.u32 %v10653_v13, %v9964_v32  ;;  %v8813_v7 = vor.u32 %v10365_v61, %v8812_v52  ;;  %4798 = vmatpush.bf16.msra.mxu1 %v9197_v57  ;;  %4582 = vmatmul.bf16.gmra.mxu0 %v17406_v48  ;;  %v17459_v61 = vld [vmem:[#allocation38_spill] sm:$0xff] }
 0x957   : > { %v6625_v15 = vpop.permute.xlu2 %6624  ;;  %v7826_v32 = vmul.f32 %v17458_v0, %v17458_v0 }
 0x958   : > { %v6644_v9 = vmul.f32 %v17453_v5, %v6625_v15  ;;  %v4436_v27 = vpop.f32.mrf.mxu1  ;;  %v10872_v15 = vpack.c.bf16 %v4532_v39, %v4530_v31  ;;  %v7174_v31 = vsel %vm15596_vm12, %v15552_v47, %v7170_v10  ;;  %4896 = vmatpush.bf16.msra.mxu3 %v9965_v14  ;;  %4749 = vmatpush.bf16.msra.mxu0 %v8813_v7 }
 0x959   : > { %v4437_v11 = vadd.f32 %v4436_v27, %v4387_v21  ;;  %v4534_v39 = vpop.f32.mrf.mxu3 }
 0x95a   : > { %v6660_v62 = vadd.f32 %v6644_v9, %v6596_v6  ;;  %11280 = vst [vmem:[%s15484_s12 + $0x20] sm:$0xff] %v10872_v15   ;;  %v15606_v6 = vpop.eup %11670  ;;  %v7087_v15 = vmul.f32 %v17459_v61, %v12430_v19  ;;  %v9148_v61 = vld [vmem:[#allocation5 + $0x3e8] sm:$0xf] }
 0x95b   : > { %v4485_v2 = vpop.f32.mrf.mxu2  ;;  %4631 = vmatmul.bf16.gmra.mxu1 %v17407_v59  ;;  %v7146_v47 = vmul.f32 %v15606_v6, %v15579_v53  ;;  %vm7152_vm13 = vweird.f32 %v15606_v6 }
 0x95c   : > { %v10962_v51 = vpack.c.bf16 %v6661_v35, %v6660_v62  ;;  %v15611_v35 = vmul.f32 %v7174_v31, %v17456_v4  ;;  %v4486_v10 = vadd.f32 %v4485_v2, %v4437_v11  ;;  %v15622_v31 = vadd.f32 1.1920929e-07, %v7087_v15  ;;  %v17460_v2 = vld [vmem:[#allocation47_spill] sm:$0xff]  ;;  %vm15641_vm15 = vmor %vm7151_vm14, %vm7152_vm13 }
 0x95d   : > { %v7147_v27 = vmul.f32 %v15606_v6, %v7146_v47  ;;  %v10545_v47 = vld [vmem:[#allocation5 + $0x714] sm:$0xf0] }
 0x95e   : > { %11298 = vst [vmem:[%s14594_s10 + $0x70] sm:$0xff] %v10962_v51   ;;  %v4389_v51 = vpop.f32.mrf.mxu0  ;;  %v4535_v46 = vadd.f32 %v4534_v39, %v4486_v10  ;;  %v17461_v39 = vld [vmem:[#allocation44_spill] sm:$0xff]  ;;  %11672 = vrsqrt.f32 %v15622_v31  ;;  %v9916_v10 = vld [vmem:[#allocation5 + $0x9e8] sm:$0xf]  ;;  %v10449_v15 = vld [vmem:[#allocation5 + $0x414] sm:$0xf0]  ;;  %vm7161_vm1 = vweird.f32 %v15622_v31 }
 0x95f   : > { %17457 = vst [vmem:[#allocation102_spill] sm:$0xff] %v15611_v35  ;;  %v7148_v9 = vmul.f32 0.5, %v7147_v27  ;;  %v8764_v27 = vld [vmem:[#allocation5 + $0xe8] sm:$0xf] }
 0x960   : > { %v4438_v62 = vpop.f32.mrf.mxu1  ;;  %4734 = vmatmul.bf16.gmra.mxu3 %v17460_v2 }
 0x961   : > { %v4439_v28 = vadd.f32 %v4438_v62, %v4389_v51  ;;  %v4536_v52 = vpop.f32.mrf.mxu3  ;;  %v7149_v4 = vsub.f32 1.5, %v7148_v9  ;;  %v9532_v62 = vld [vmem:[#allocation5 + $0x6e8] sm:$0xf] }
 0x962   : > { %4685 = vmatmul.bf16.gmra.mxu2 %v17411_v45 }
 0x963   : > { %7397 = vrot.lane.b32.xlu0 %v15611_v35, %s12008_s2  ;;  %v4487_v21 = vpop.f32.mrf.mxu2  ;;  %v7150_v0 = vmul.f32 %v15606_v6, %v7149_v4 }
 0x964   : > { %v4488_v13 = vadd.f32 %v4487_v21, %v4439_v28  ;;  %v17462_v28 = vld [vmem:[#allocation45_spill] sm:$0xff]  ;;  %v10641_v21 = vld [vmem:[#allocation5 + $0xa14] sm:$0xf0] }
 0x966   : > { %7846 = vadd.xlane.f32.xlu2 %v7826_v32  ;;  %v4537_v14 = vadd.f32 %v4536_v52, %v4488_v13  ;;  %v4392_v7 = vpop.f32.mrf.mxu0  ;;  %4587 = vmatmul.bf16.gmra.mxu0 %v17461_v39  ;;  %v9533_v32 = vor.u32 %v10545_v47, %v9532_v62  ;;  %v9917_v13 = vor.u32 %v10641_v21, %v9916_v10  ;;  %v15632_v47 = vpop.eup %11672 }
 0x967   : > { %v15635_v10 = vpop.xlane.xlu1 %7081  ;;  %v7156_v53 = vmul.f32 %v15632_v47, %v15622_v31  ;;  %vm7162_vm0 = vweird.f32 %v15632_v47 }
 0x968   : > { %v4441_v56 = vpop.f32.mrf.mxu1  ;;  %v10877_v57 = vpack.c.bf16 %v4537_v14, %v4535_v46  ;;  %v10353_v46 = vld [vmem:[#allocation5 + $0x114] sm:$0xf0]  ;;  %4848 = vmatpush.bf16.msra.mxu2 %v9533_v32  ;;  %4897 = vmatpush.bf16.msra.mxu3 %v9917_v13  ;;  %17463 = vst [vmem:[#allocation25_spill] sm:$0xff] %v15635_v10  ;;  %vm7163_vm2 = vmor %vm7161_vm1, %vm7162_vm0 }
 0x969   : > { %v4539_v51 = vpop.f32.mrf.mxu3  ;;  %v8765_v52 = vor.u32 %v10353_v46, %v8764_v27  ;;  %v4442_v25 = vadd.f32 %v4441_v56, %v4392_v7  ;;  %v17464_v32 = vld [vmem:[#allocation39_spill] sm:$0xff]  ;;  %v17465_v7 = vld [vmem:[#allocation109_spill] sm:$0xff] }
 0x96a   : > { %11281 = vst [vmem:[%s15484_s12 + $0x28] sm:$0xff] %v10877_v57   ;;  %v9149_v57 = vor.u32 %v10449_v15, %v9148_v61  ;;  %v7091_v27 = vmul.f32 %v17464_v32, %v12430_v19  ;;  %v7827_v56 = vmul.f32 %v17465_v7, %v17465_v7  ;;  %v6631_v61 = vpop.permute.xlu2 %6630  ;;  %v7154_v15 = vsel %vm15641_vm15, %v15606_v6, %v7150_v0  ;;  %v9100_v32 = vld [vmem:[#allocation5 + $0x388] sm:$0xf]  ;;  %v17469_v0 = vld [vmem:[#allocation50_spill] sm:$0xff] }
 0x96b   : > { %v4490_v11 = vpop.f32.mrf.mxu2  ;;  %4636 = vmatmul.bf16.gmra.mxu1 %v17462_v28  ;;  %4750 = vmatpush.bf16.msra.mxu0 %v8765_v52  ;;  %v9101_v37 = vor.u32 %v10437_v30, %v9100_v32  ;;  %v17468_v52 = vld [vmem:[#allocation56_spill] sm:$0xff] }
 0x96c   : > { %4799 = vmatpush.bf16.msra.mxu1 %v9149_v57  ;;  %v4491_v62 = vadd.f32 %v4490_v11, %v4442_v25  ;;  %v9484_v25 = vld [vmem:[#allocation5 + $0x688] sm:$0xf]  ;;  %v10533_v11 = vld [vmem:[#allocation5 + $0x6b4] sm:$0xf0]  ;;  %v15650_v17 = vadd.f32 1.1920929e-07, %v7091_v27  ;;  %v15653_v6 = vmul.f32 %v7154_v15, %v17468_v52 }
 0x96d   : > { %v17473_v15 = vld [vmem:[#allocation79_spill] sm:$0xff] }
 0x96e   : > { %v4394_v14 = vpop.f32.mrf.mxu0  ;;  %v4540_v46 = vadd.f32 %v4539_v51, %v4491_v62  ;;  %v10629_v51 = vld [vmem:[#allocation5 + $0x9b4] sm:$0xf0]  ;;  %11674 = vrsqrt.f32 %v15650_v17  ;;  %vm7201_vm3 = vweird.f32 %v15650_v17 }
 0x96f   : > { %v10521_v52 = vld [vmem:[#allocation5 + $0x654] sm:$0xf0] }
 0x970   : > { %v4443_v9 = vpop.f32.mrf.mxu1  ;;  %4800 = vmatpush.bf16.msra.mxu1 %v9101_v37 }
 0x971   : > { %v4444_v5 = vadd.f32 %v4443_v9, %v4394_v14  ;;  %v4541_v4 = vpop.f32.mrf.mxu3  ;;  %v9485_v14 = vor.u32 %v10533_v11, %v9484_v25  ;;  %v9868_v9 = vld [vmem:[#allocation5 + $0x988] sm:$0xf]  ;;  %v17471_v11 = vld [vmem:[#allocation51_spill] sm:$0xff] }
 0x972   : > { %v9869_v62 = vor.u32 %v10629_v51, %v9868_v9  ;;  %4690 = vmatmul.bf16.gmra.mxu2 %v17469_v0  ;;  %4739 = vmatmul.bf16.gmra.mxu3 %v17471_v11  ;;  %v17474_v9 = vld [vmem:[#allocation89_spill] sm:$0xff]  ;;  %v17475_v51 = vld [vmem:[#allocation90_spill] sm:$0xff] }
 0x973   : > { %v4492_v21 = vpop.f32.mrf.mxu2  ;;  %4849 = vmatpush.bf16.msra.mxu2 %v9485_v14 }
 0x974   : > { %v4493_v13 = vadd.f32 %v4492_v21, %v4444_v5  ;;  %v8716_v5 = vld [vmem:[#allocation5 + $0x88] sm:$0xf]  ;;  %v10341_v21 = vld [vmem:[#allocation5 + $0xb4] sm:$0xf0]  ;;  %4898 = vmatpush.bf16.msra.mxu3 %v9869_v62 }
 0x976   : > { %v4542_v57 = vadd.f32 %v4541_v4, %v4493_v13  ;;  %v4397_v7 = vpop.f32.mrf.mxu0  ;;  %v7157_v13 = vmul.f32 %v15632_v47, %v7156_v53  ;;  %v17470_v4 = vld [vmem:[#allocation60_spill] sm:$0xff]  ;;  %v6598_v53 = vmul.f32 %v17474_v9, %v15448_v26  ;;  %v9820_v9 = vld [vmem:[#allocation5 + $0x928] sm:$0xf] }
 0x977   : > { %v6647_v25 = vmul.f32 %v17470_v4, %v6631_v61 }
 0x978   : > { %v4446_v49 = vpop.f32.mrf.mxu1  ;;  %v10882_v10 = vpack.c.bf16 %v4542_v57, %v4540_v46  ;;  %v17472_v46 = vld [vmem:[#allocation83_spill] sm:$0xff]  ;;  %v17477_v57 = vld [vmem:[#allocation49_spill] sm:$0xff]  ;;  %v7158_v62 = vmul.f32 0.5, %v7157_v13 }
 0x979   : > { %7848 = vadd.xlane.f32.xlu1 %v7827_v56  ;;  %v8717_v56 = vor.u32 %v10341_v21, %v8716_v5  ;;  %v6599_v14 = vmul.f32 %v17473_v15, %v17472_v46  ;;  %v17476_v5 = vld [vmem:[#allocation48_spill] sm:$0xff]  ;;  %v4544_v37 = vpop.f32.mrf.mxu3  ;;  %v8668_v13 = vld [vmem:[#allocation5 + $0x28] sm:$0xf] }
 0x97a   : > { %11282 = vst [vmem:[%s15484_s12 + $0x30] sm:$0xff] %v10882_v10   ;;  %4592 = vmatmul.bf16.gmra.mxu0 %v17476_v5  ;;  %v4447_v10 = vadd.f32 %v4446_v49, %v4397_v7  ;;  %v7159_v5 = vsub.f32 1.5, %v7158_v62 }
 0x97b   : > { %4751 = vmatpush.bf16.msra.mxu0 %v8717_v56  ;;  %v4495_v30 = vpop.f32.mrf.mxu2  ;;  %4641 = vmatmul.bf16.gmra.mxu1 %v17477_v57  ;;  %v6663_v21 = vadd.f32 %v6647_v25, %v6599_v14  ;;  %v9436_v56 = vld [vmem:[#allocation5 + $0x628] sm:$0xf]  ;;  %v10329_v25 = vld [vmem:[#allocation5 + $0x54] sm:$0xf0] }
 0x97c   : > { %v9437_v15 = vor.u32 %v10521_v52, %v9436_v56  ;;  %v4496_v26 = vadd.f32 %v4495_v30, %v4447_v10  ;;  %v9052_v14 = vld [vmem:[#allocation5 + $0x328] sm:$0xf]  ;;  %v8669_v57 = vor.u32 %v10329_v25, %v8668_v13  ;;  %v7160_v30 = vmul.f32 %v15632_v47, %v7159_v5 }
 0x97e   : > { %7393 = vrot.lane.b32.xlu2 %v15653_v6, %s12008_s2  ;;  %v6629_v27 = vpop.permute.xlu1 %6628  ;;  %v4399_v4 = vpop.f32.mrf.mxu0  ;;  %4850 = vmatpush.bf16.msra.mxu2 %v9437_v15  ;;  %v7164_v5 = vsel %vm7163_vm2, %v15632_v47, %v7160_v30 }
 0x97f   : > { %v6646_v61 = vmul.f32 %v17475_v51, %v6629_v27  ;;  %v10617_v27 = vld [vmem:[#allocation5 + $0x954] sm:$0xf0]  ;;  %v15670_v51 = vpop.eup %11674  ;;  %4752 = vmatpush.bf16.msra.mxu0 %v8669_v57 }
 0x980   : > { %v4448_v34 = vpop.f32.mrf.mxu1  ;;  %v9821_v49 = vor.u32 %v10617_v27, %v9820_v9  ;;  %v17480_v27 = vld [vmem:[#allocation81_spill] sm:$0xff]  ;;  %vm7202_vm4 = vweird.f32 %v15670_v51 }
 0x981   : > { %v6662_v32 = vadd.f32 %v6646_v61, %v6598_v53  ;;  %v4449_v35 = vadd.f32 %v4448_v34, %v4399_v4  ;;  %v4545_v53 = vadd.f32 %v4544_v37, %v4496_v26  ;;  %v7196_v34 = vmul.f32 %v15670_v51, %v15650_v17  ;;  %vm15699_vm5 = vmor %vm7201_vm3, %vm7202_vm4 }
 0x982   : > { %4899 = vmatpush.bf16.msra.mxu3 %v9821_v49  ;;  %4851 = vmatmul.bf16.vlgmr.msra.gmra.mxu2 %v17151_v54  ;;  %v15687_v49 = vmul.f32 %v7164_v5, %v17480_v27  ;;  %v10158_v27 = vld [vmem:[#allocation5 + $0xbf8] sm:$0xf0] }
 0x983   : > { %v10967_v46 = vpack.c.bf16 %v6663_v21, %v6662_v32  ;;  %v4497_v7 = vpop.f32.mrf.mxu2  ;;  %v10425_v21 = vld [vmem:[#allocation5 + $0x354] sm:$0xf0]  ;;  %v4546_v32 = vpop.f32.mrf.mxu3  ;;  %v7197_v56 = vmul.f32 %v15670_v51, %v7196_v34 }
 0x984   : > { %v4498_v61 = vadd.f32 %v4497_v7, %v4449_v35  ;;  %v9053_v4 = vor.u32 %v10425_v21, %v9052_v14  ;;  %v17478_v35 = vld [vmem:[#allocation31_spill] sm:$0xff]  ;;  %v17481_v7 = vld [vmem:[#allocation21_spill] sm:$0xff] }
 0x985   : > { %11299 = vst [vmem:[%s14594_s10 + $0x78] sm:$0xff] %v10967_v46   ;;  %v7831_v37 = vmul.f32 %v17478_v35, %v17478_v35  ;;  %4900 = vmatmul.bf16.vlgmr.msra.gmra.mxu3 %v17152_v60  ;;  %v17479_v46 = vld [vmem:[#allocation20_spill] sm:$0xff]  ;;  %v7198_v26 = vmul.f32 0.5, %v7197_v56  ;;  %v17491_v35 = vld [vmem:[#allocation77_spill] sm:$0xff] }
 0x986   : > { %v4547_v15 = vadd.f32 %v4546_v32, %v4498_v61  ;;  %4801 = vmatpush.bf16.msra.mxu1 %v9053_v4  ;;  %v4558_v9 = vpop.f32.mrf.mxu0  ;;  %v17482_v61 = vld [vmem:[#allocation108_spill] sm:$0xff] }
 0x987   : > { %v7089_v21 = vmul.f32 %v17482_v61, %v12430_v19 }
 0x988   : > { %v4607_v10 = vpop.f32.mrf.mxu1  ;;  %v10887_v62 = vpack.c.bf16 %v4547_v15, %v4545_v53  ;;  %v7199_v53 = vsub.f32 1.5, %v7198_v26 }
 0x989   : > { %v4608_v52 = vadd.f32 %v4607_v10, %v4558_v9  ;;  %v15697_v9 = vadd.f32 1.1920929e-07, %v7089_v21  ;;  %v9390_v21 = vld [vmem:[#allocation5 + $0x5f8] sm:$0xf0] }
 0x98a   : > { %11283 = vst [vmem:[%s15484_s12 + $0x38] sm:$0xff] %v10887_v62   ;;  %4753 = vmatmul.bf16.vlgmr.msra.gmra.mxu0 %v17479_v46  ;;  %v7200_v15 = vmul.f32 %v15670_v51, %v7199_v53  ;;  %v9726_v10 = vld [vmem:[#allocation5 + $0x898] sm:$0xf0] }
 0x98b   : > { %v4656_v57 = vpop.f32.mrf.mxu2  ;;  %v4705_v31 = vpop.f32.mrf.mxu3  ;;  %4802 = vmatmul.bf16.vlgmr.msra.gmra.mxu1 %v17481_v7  ;;  %11676 = vrsqrt.f32 %v15697_v9  ;;  %vm7181_vm7 = vweird.f32 %v15697_v9 }
 0x98c   : > { %v4657_v47 = vadd.f32 %v4656_v57, %v4608_v52  ;;  %v7204_v17 = vsel %vm15699_vm5, %v15670_v51, %v7200_v15  ;;  %v10599_v57 = vld [vmem:[#allocation5 + $0x8cc] sm:$0xf]  ;;  %v9774_v52 = vld [vmem:[#allocation5 + $0x8f8] sm:$0xf0] }
 0x98d   : > { %7856 = vadd.xlane.f32.xlu0 %v7831_v37  ;;  %v9777_v26 = vor.u32 %v10599_v57, %v9774_v52  ;;  %v10503_v51 = vld [vmem:[#allocation5 + $0x5cc] sm:$0xf]  ;;  %v10110_v57 = vld [vmem:[#allocation5 + $0xb98] sm:$0xf0] }
 0x98e   : > { %v4560_v13 = vpop.f32.mrf.mxu0  ;;  %v4706_v34 = vadd.f32 %v4705_v31, %v4657_v47  ;;  %v10695_v31 = vld [vmem:[#allocation5 + $0xbcc] sm:$0xf]  ;;  %v17485_v47 = vld [vmem:[#allocation23_spill] sm:$0xff] }
 0x98f   : > { %v10161_v53 = vor.u32 %v10695_v31, %v10158_v27  ;;  %5039 = vmatpush.bf16.msrb.mxu2 %v9777_v26  ;;  %v10587_v15 = vld [vmem:[#allocation5 + $0x86c] sm:$0xf]  ;;  %v17487_v27 = vld [vmem:[#allocation66_spill] sm:$0xff] }
 0x990   : > { %v4609_v25 = vpop.f32.mrf.mxu1 }
 0x991   : > { %v4610_v14 = vadd.f32 %v4609_v25, %v4560_v13  ;;  %v10407_v13 = vld [vmem:[#allocation5 + $0x2cc] sm:$0xf]  ;;  %v9006_v25 = vld [vmem:[#allocation5 + $0x2f8] sm:$0xf0]  ;;  %5088 = vmatpush.bf16.msrb.mxu3 %v10161_v53  ;;  %v15717_v31 = vpop.eup %11676 }
 0x992   : > { %7395 = vrot.lane.b32.xlu1 %v15687_v49, %s12008_s2  ;;  %4856 = vmatmul.bf16.gmra.mxu2 %v17230_v41  ;;  %v9009_v61 = vor.u32 %v10407_v13, %v9006_v25  ;;  %v7829_v13 = vmul.f32 %v17487_v27, %v17487_v27  ;;  %v7176_v25 = vmul.f32 %v15717_v31, %v15697_v9  ;;  %vm7182_vm6 = vweird.f32 %v15717_v31 }
 0x993   : > { %v4658_v32 = vpop.f32.mrf.mxu2  ;;  %v4707_v30 = vpop.f32.mrf.mxu3  ;;  %vm15747_vm8 = vmor %vm7181_vm7, %vm7182_vm6  ;;  %v7830_v9 = vmul.f32 %v17491_v35, %v17491_v35 }
 0x994   : > { %v4659_v4 = vadd.f32 %v4658_v32, %v4610_v14  ;;  %v15710_v14 = vmul.f32 %v7204_v17, %v17485_v47  ;;  %v9729_v17 = vor.u32 %v10587_v15, %v9726_v10  ;;  %4941 = vmatpush.bf16.msrb.mxu0 %v9009_v61  ;;  %v10491_v10 = vld [vmem:[#allocation5 + $0x56c] sm:$0xf] }
 0x995   : > { %4905 = vmatmul.bf16.gmra.mxu3 %v17231_v24 }
 0x996   : > { %v4708_v37 = vadd.f32 %v4707_v30, %v4659_v4  ;;  %v4563_v62 = vpop.f32.mrf.mxu0  ;;  %17486 = vst [vmem:[#allocation78_spill] sm:$0xff] %v15710_v14  ;;  %5040 = vmatpush.bf16.msrb.mxu2 %v9729_v17 }
 0x998   : > { %v10972_v56 = vpack.c.bf16 %v4708_v37, %v4706_v34  ;;  %v4612_v5 = vpop.f32.mrf.mxu1  ;;  %v9393_v34 = vor.u32 %v10503_v51, %v9390_v21  ;;  %v10683_v37 = vld [vmem:[#allocation5 + $0xb6c] sm:$0xf]  ;;  %v8958_v21 = vld [vmem:[#allocation5 + $0x298] sm:$0xf0] }
 0x999   : > { %v4613_v4 = vadd.f32 %v4612_v5, %v4563_v62  ;;  %v10113_v52 = vor.u32 %v10683_v37, %v10110_v57  ;;  %v10395_v51 = vld [vmem:[#allocation5 + $0x26c] sm:$0xf]  ;;  %v17488_v37 = vld [vmem:[#allocation36_spill] sm:$0xff] }
 0x99a   : > { %11300 = vst [vmem:[%s15484_s12 + $0x40] sm:$0xff] %v10972_v56   ;;  %4758 = vmatmul.bf16.gmra.mxu0 %v17232_v44  ;;  %4990 = vmatpush.bf16.msrb.mxu1 %v9393_v34  ;;  %v8961_v15 = vor.u32 %v10395_v51, %v8958_v21  ;;  %v7090_v17 = vmul.f32 %v17488_v37, %v12430_v19  ;;  %v15736_v21 = vpop.xlane.xlu2 %7840  ;;  %v10575_v37 = vld [vmem:[#allocation5 + $0x80c] sm:$0xf] }
 0x99b   : > { %v4661_v32 = vpop.f32.mrf.mxu2  ;;  %4807 = vmatmul.bf16.gmra.mxu1 %v17233_v43  ;;  %v4710_v30 = vpop.f32.mrf.mxu3  ;;  %5089 = vmatpush.bf16.msrb.mxu3 %v10113_v52 }
 0x99c   : > { %v4662_v62 = vadd.f32 %v4661_v32, %v4613_v4  ;;  %v9342_v32 = vld [vmem:[#allocation5 + $0x598] sm:$0xf0]  ;;  %v7177_v4 = vmul.f32 %v15717_v31, %v7176_v25  ;;  %4942 = vmatpush.bf16.msrb.mxu0 %v8961_v15 }
 0x99d   : > { %v9345_v57 = vor.u32 %v10491_v10, %v9342_v32 }
 0x99e   : > { %v4565_v56 = vpop.f32.mrf.mxu0  ;;  %v4711_v53 = vadd.f32 %v4710_v30, %v4662_v62  ;;  %v7178_v62 = vmul.f32 0.5, %v7177_v4 }
 0x99f   : > { %4991 = vmatpush.bf16.msrb.mxu1 %v9345_v57 }
 0x9a0   : > { %v4614_v26 = vpop.f32.mrf.mxu1 }
 0x9a1   : > { %7403 = vrot.lane.b32.xlu0 %v15710_v14, %s12008_s2  ;;  %v4615_v5 = vadd.f32 %v4614_v26, %v4565_v56 }
 0x9a2   : > { %4861 = vmatmul.bf16.gmra.mxu2 %v17307_v50 }
 0x9a3   : > { %v4663_v47 = vpop.f32.mrf.mxu2  ;;  %v4712_v34 = vpop.f32.mrf.mxu3 }
 0x9a4   : > { %v4664_v61 = vadd.f32 %v4663_v47, %v4615_v5  ;;  %v15727_v5 = vadd.f32 1.1920929e-07, %v7090_v17  ;;  %v7179_v47 = vsub.f32 1.5, %v7178_v62  ;;  %v9678_v17 = vld [vmem:[#allocation5 + $0x838] sm:$0xf0] }
 0x9a5   : > { %4910 = vmatmul.bf16.gmra.mxu3 %v17308_v22  ;;  %v9681_v57 = vor.u32 %v10575_v37, %v9678_v17 }
 0x9a6   : > { %v4713_v56 = vadd.f32 %v4712_v34, %v4664_v61  ;;  %v4568_v52 = vpop.f32.mrf.mxu0  ;;  %11678 = vrsqrt.f32 %v15727_v5  ;;  %v7180_v32 = vmul.f32 %v15717_v31, %v7179_v47  ;;  %v10479_v47 = vld [vmem:[#allocation5 + $0x50c] sm:$0xf]  ;;  %vm7191_vm10 = vweird.f32 %v15727_v5 }
 0x9a7   : > { %7852 = vadd.xlane.f32.xlu2 %v7829_v13  ;;  %5041 = vmatpush.bf16.msrb.mxu2 %v9681_v57 }
 0x9a8   : > { %v4617_v26 = vpop.f32.mrf.mxu1  ;;  %v10977_v30 = vpack.c.bf16 %v4713_v56, %v4711_v53  ;;  %v7094_v53 = vmul.f32 %v15511_v40, %v12430_v19  ;;  %v10671_v56 = vld [vmem:[#allocation5 + $0xb0c] sm:$0xf] }
 0x9a9   : > { %v4618_v61 = vadd.f32 %v4617_v26, %v4568_v52  ;;  %v10383_v40 = vld [vmem:[#allocation5 + $0x20c] sm:$0xf]  ;;  %v15751_v37 = vpop.xlane.xlu1 %7842 }
 0x9aa   : > { %11301 = vst [vmem:[%s15484_s12 + $0x48] sm:$0xff] %v10977_v30   ;;  %4763 = vmatmul.bf16.gmra.mxu0 %v17309_v38  ;;  %v15740_v4 = vadd.f32 1.1920929e-07, %v7094_v53  ;;  %v10062_v30 = vld [vmem:[#allocation5 + $0xb38] sm:$0xf0] }
 0x9ab   : > { %v4666_v13 = vpop.f32.mrf.mxu2  ;;  %4812 = vmatmul.bf16.gmra.mxu1 %v17310_v8  ;;  %v4715_v25 = vpop.f32.mrf.mxu3 }
 0x9ac   : > { %v4667_v15 = vadd.f32 %v4666_v13, %v4618_v61  ;;  %v15742_v52 = vpop.eup %11678  ;;  %v10065_v13 = vor.u32 %v10671_v56, %v10062_v30  ;;  %11680 = vrsqrt.f32 %v15740_v4  ;;  %vm7231_vm13 = vweird.f32 %v15740_v4 }
 0x9ad   : > { %vm7192_vm9 = vweird.f32 %v15742_v52 }
 0x9ae   : > { %v4570_v51 = vpop.f32.mrf.mxu0  ;;  %v4716_v26 = vadd.f32 %v4715_v25, %v4667_v15  ;;  %v7184_v25 = vsel %vm15747_vm8, %v15717_v31, %v7180_v32  ;;  %5090 = vmatpush.bf16.msrb.mxu3 %v10065_v13  ;;  %v17494_v32 = vld [vmem:[#allocation68_spill] sm:$0xff]  ;;  %vm15793_vm11 = vmor %vm7191_vm10, %vm7192_vm9 }
 0x9b0   : > { %v4619_v34 = vpop.f32.mrf.mxu1 }
 0x9b1   : > { %v4620_v10 = vadd.f32 %v4619_v34, %v4570_v51  ;;  %v8910_v51 = vld [vmem:[#allocation5 + $0x238] sm:$0xf0] }
 0x9b2   : > { %v9294_v34 = vld [vmem:[#allocation5 + $0x538] sm:$0xf0]  ;;  %v8913_v17 = vor.u32 %v10383_v40, %v8910_v51  ;;  %4866 = vmatmul.bf16.gmra.mxu2 %v17313_v29  ;;  %v17492_v40 = vld [vmem:[#allocation22_spill] sm:$0xff] }
 0x9b3   : > { %v4668_v62 = vpop.f32.mrf.mxu2  ;;  %v4717_v27 = vpop.f32.mrf.mxu3  ;;  %v9297_v14 = vor.u32 %v10479_v47, %v9294_v34  ;;  %v15763_v51 = vmul.f32 %v7184_v25, %v17492_v40  ;;  %v17495_v34 = vld [vmem:[#allocation69_spill] sm:$0xff]  ;;  %v17497_v25 = vld [vmem:[#allocation71_spill] sm:$0xff] }
 0x9b4   : > { %v4669_v61 = vadd.f32 %v4668_v62, %v4620_v10  ;;  %v7186_v10 = vmul.f32 %v15742_v52, %v15727_v5  ;;  %4943 = vmatpush.bf16.msrb.mxu0 %v8913_v17  ;;  %v7388_v62 = vpop.permute.xlu2 %7387  ;;  %v7371_v53 = vmul.f32 %v17495_v34, %v15532_v3  ;;  %v17496_v17 = vld [vmem:[#allocation70_spill] sm:$0xff] }
 0x9b5   : > { %4992 = vmatpush.bf16.msrb.mxu1 %v9297_v14  ;;  %17493 = vst [vmem:[#allocation84_spill] sm:$0xff] %v15763_v51  ;;  %4915 = vmatmul.bf16.gmra.mxu3 %v17314_v63  ;;  %v15771_v14 = vpop.eup %11680 }
 0x9b6   : > { %v4718_v15 = vadd.f32 %v4717_v27, %v4669_v61  ;;  %v4573_v57 = vpop.f32.mrf.mxu0  ;;  %v7187_v31 = vmul.f32 %v15742_v52, %v7186_v10  ;;  %vm7232_vm12 = vweird.f32 %v15771_v14 }
 0x9b7   : > { %vm7233_vm14 = vmor %vm7231_vm13, %vm7232_vm12 }
 0x9b8   : > { %v4622_v56 = vpop.f32.mrf.mxu1  ;;  %v10982_v30 = vpack.c.bf16 %v4718_v15, %v4716_v26  ;;  %v7419_v26 = vmul.f32 %v17494_v32, %v7388_v62  ;;  %v7188_v10 = vmul.f32 0.5, %v7187_v31 }
 0x9b9   : > { %v4623_v13 = vadd.f32 %v4622_v56, %v4573_v57 }
 0x9ba   : > { %11302 = vst [vmem:[%s15484_s12 + $0x50] sm:$0xff] %v10982_v30   ;;  %4768 = vmatmul.bf16.gmra.mxu0 %v17315_v16  ;;  %v7226_v30 = vmul.f32 %v15771_v14, %v15740_v4  ;;  %v7435_v57 = vadd.f32 %v7419_v26, %v7371_v53  ;;  %v7189_v16 = vsub.f32 1.5, %v7188_v10 }
 0x9bb   : > { %v4671_v27 = vpop.f32.mrf.mxu2  ;;  %4817 = vmatmul.bf16.gmra.mxu1 %v17316_v20  ;;  %v4720_v61 = vpop.f32.mrf.mxu3 }
 0x9bc   : > { %7854 = vadd.xlane.f32.xlu1 %v7830_v9  ;;  %v7372_v9 = vmul.f32 %v17496_v17, %v15566_v58  ;;  %v4672_v32 = vadd.f32 %v4671_v27, %v4623_v13  ;;  %v7227_v3 = vmul.f32 %v15771_v14, %v7226_v30  ;;  %v7190_v27 = vmul.f32 %v15742_v52, %v7189_v16  ;;  %v9246_v30 = vld [vmem:[#allocation5 + $0x4d8] sm:$0xf0] }
 0x9be   : > { %v4575_v40 = vpop.f32.mrf.mxu0  ;;  %v4721_v34 = vadd.f32 %v4720_v61, %v4672_v32  ;;  %v7228_v13 = vmul.f32 0.5, %v7227_v3  ;;  %v10014_v61 = vld [vmem:[#allocation5 + $0xad8] sm:$0xf0]  ;;  %v7194_v5 = vsel %vm15793_vm11, %v15742_v52, %v7190_v27  ;;  %v17502_v52 = vld [vmem:[#allocation94_spill] sm:$0xff] }
 0x9bf   : > { %7399 = vrot.lane.b32.xlu2 %v15763_v51, %s12008_s2 }
 0x9c0   : > { %v4624_v62 = vpop.f32.mrf.mxu1  ;;  %v7229_v3 = vsub.f32 1.5, %v7228_v13 }
 0x9c1   : > { %v7390_v47 = vpop.permute.xlu1 %7389  ;;  %v4625_v35 = vadd.f32 %v4624_v62, %v4575_v40 }
 0x9c2   : > { %v7420_v15 = vmul.f32 %v17497_v25, %v7390_v47  ;;  %v17498_v47 = vld [vmem:[#allocation43_spill] sm:$0xff]  ;;  %v15786_v25 = vpop.xlane.xlu0 %7838  ;;  %4871 = vmatmul.bf16.gmra.mxu2 %v17320_v33 }
 0x9c3   : > { %v4673_v20 = vpop.f32.mrf.mxu2  ;;  %v4722_v17 = vpop.f32.mrf.mxu3  ;;  %v7834_v31 = vmul.f32 %v17498_v47, %v17498_v47 }
 0x9c4   : > { %v7436_v56 = vadd.f32 %v7420_v15, %v7372_v9  ;;  %v4674_v58 = vadd.f32 %v4673_v20, %v4625_v35  ;;  %v10563_v20 = vld [vmem:[#allocation5 + $0x7ac] sm:$0xf]  ;;  %v9630_v35 = vld [vmem:[#allocation5 + $0x7d8] sm:$0xf0] }
 0x9c5   : > { %v9633_v32 = vor.u32 %v10563_v20, %v9630_v35  ;;  %v8862_v15 = vld [vmem:[#allocation5 + $0x1d8] sm:$0xf0]  ;;  %4920 = vmatmul.bf16.gmra.mxu3 %v17386_v55 }
 0x9c6   : > { %v11052_v51 = vpack.c.bf16 %v7436_v56, %v7435_v57  ;;  %v4723_v63 = vadd.f32 %v4722_v17, %v4674_v58  ;;  %v4578_v26 = vpop.f32.mrf.mxu0  ;;  %v10371_v17 = vld [vmem:[#allocation5 + $0x1ac] sm:$0xf]  ;;  %v17501_v58 = vld [vmem:[#allocation54_spill] sm:$0xff] }
 0x9c7   : > { %5042 = vmatpush.bf16.msrb.mxu2 %v9633_v32 }
 0x9c8   : > { %11316 = vst [vmem:[%s14594_s10 + $0x80] sm:$0xff] %v11052_v51   ;;  %v4627_v53 = vpop.f32.mrf.mxu1  ;;  %v10987_v9 = vpack.c.bf16 %v4723_v63, %v4721_v34  ;;  %v10659_v51 = vld [vmem:[#allocation5 + $0xaac] sm:$0xf]  ;;  %v8865_v63 = vor.u32 %v10371_v17, %v8862_v15 }
 0x9c9   : > { %v10017_v10 = vor.u32 %v10659_v51, %v10014_v61  ;;  %v10467_v34 = vld [vmem:[#allocation5 + $0x4ac] sm:$0xf]  ;;  %v4628_v57 = vadd.f32 %v4627_v53, %v4578_v26  ;;  %v7092_v26 = vmul.f32 %v17502_v52, %v12430_v19  ;;  %v7230_v53 = vmul.f32 %v15771_v14, %v7229_v3 }
 0x9ca   : > { %11303 = vst [vmem:[%s15484_s12 + $0x58] sm:$0xff] %v10987_v9   ;;  %4773 = vmatmul.bf16.gmra.mxu0 %v17388_v42  ;;  %v9249_v62 = vor.u32 %v10467_v34, %v9246_v30  ;;  %v15806_v35 = vpop.xlane.xlu0 %7844  ;;  %v10551_v3 = vld [vmem:[#allocation5 + $0x74c] sm:$0xf] }
 0x9cb   : > { %7862 = vadd.xlane.f32.xlu0 %v7834_v31  ;;  %v4676_v40 = vpop.f32.mrf.mxu2  ;;  %4822 = vmatmul.bf16.gmra.mxu1 %v17447_v23  ;;  %v4725_v56 = vpop.f32.mrf.mxu3  ;;  %v15804_v31 = vmul.f32 %v7194_v5, %v17501_v58  ;;  %v15817_v16 = vadd.f32 1.1920929e-07, %v7092_v26  ;;  %v17503_v5 = vld [vmem:[#allocation76_spill] sm:$0xff]  ;;  %v9582_v58 = vld [vmem:[#allocation5 + $0x778] sm:$0xf0] }
 0x9cc   : > { %5091 = vmatpush.bf16.msrb.mxu3 %v10017_v10  ;;  %4944 = vmatpush.bf16.msrb.mxu0 %v8865_v63  ;;  %v4677_v51 = vadd.f32 %v4676_v40, %v4628_v57  ;;  %v7234_v10 = vsel %vm7233_vm14, %v15771_v14, %v7230_v53  ;;  %v17505_v57 = vld [vmem:[#allocation72_spill] sm:$0xff]  ;;  %v9585_v53 = vor.u32 %v10551_v3, %v9582_v58 }
 0x9cd   : > { %4993 = vmatpush.bf16.msrb.mxu1 %v9249_v62  ;;  %v15822_v62 = vmul.f32 %v7234_v10, %v17503_v5  ;;  %11682 = vrsqrt.f32 %v15817_v16  ;;  %vm7211_vm0 = vweird.f32 %v15817_v16 }
 0x9ce   : > { %v4580_v9 = vpop.f32.mrf.mxu0  ;;  %v4726_v13 = vadd.f32 %v4725_v56, %v4677_v51  ;;  %5043 = vmatpush.bf16.msrb.mxu2 %v9585_v53 }
 0x9cf   : > { %17504 = vst [vmem:[#allocation64_spill] sm:$0xff] %v15822_v62 }
 0x9d0   : > { %v4629_v20 = vpop.f32.mrf.mxu1 }
 0x9d1   : > { %v4630_v61 = vadd.f32 %v4629_v20, %v4580_v9  ;;  %v10647_v9 = vld [vmem:[#allocation5 + $0xa4c] sm:$0xf] }
 0x9d2   : > { %v7392_v34 = vpop.permute.xlu0 %7391  ;;  %4876 = vmatmul.bf16.gmra.mxu2 %v17403_v12 }
 0x9d3   : > { %v4678_v27 = vpop.f32.mrf.mxu2  ;;  %v4727_v17 = vpop.f32.mrf.mxu3  ;;  %v7421_v56 = vmul.f32 %v17505_v57, %v7392_v34  ;;  %v10455_v57 = vld [vmem:[#allocation5 + $0x44c] sm:$0xf] }
 0x9d4   : > { %v4679_v32 = vadd.f32 %v4678_v27, %v4630_v61  ;;  %v17506_v61 = vld [vmem:[#allocation73_spill] sm:$0xff]  ;;  %v9966_v27 = vld [vmem:[#allocation5 + $0xa78] sm:$0xf0]  ;;  %v15837_v3 = vpop.eup %11682 }
 0x9d5   : > { %7401 = vrot.lane.b32.xlu1 %v15804_v31, %s12008_s2  ;;  %4925 = vmatmul.bf16.gmra.mxu3 %v17404_v36  ;;  %v7373_v52 = vmul.f32 %v17506_v61, %v15492_v1  ;;  %v10635_v1 = vld [vmem:[#allocation5 + $0x9ec] sm:$0xf]  ;;  %v9918_v61 = vld [vmem:[#allocation5 + $0xa18] sm:$0xf0]  ;;  %v7206_v53 = vmul.f32 %v15837_v3, %v15817_v16  ;;  %vm7212_vm15 = vweird.f32 %v15837_v3 }
 0x9d6   : > { %v4728_v63 = vadd.f32 %v4727_v17, %v4679_v32  ;;  %v4583_v40 = vpop.f32.mrf.mxu0  ;;  %v8814_v32 = vld [vmem:[#allocation5 + $0x178] sm:$0xf0]  ;;  %v17507_v17 = vld [vmem:[#allocation74_spill] sm:$0xff]  ;;  %vm7213_vm1 = vmor %vm7211_vm0, %vm7212_vm15 }
 0x9d7   : > { %v7374_v10 = vmul.f32 %v17507_v17, %v15653_v6 }
 0x9d8   : > { %v10992_v30 = vpack.c.bf16 %v4728_v63, %v4726_v13  ;;  %v4632_v4 = vpop.f32.mrf.mxu1  ;;  %v10359_v13 = vld [vmem:[#allocation5 + $0x14c] sm:$0xf]  ;;  %v17508_v63 = vld [vmem:[#allocation75_spill] sm:$0xff] }
 0x9d9   : > { %v15815_v15 = vpop.xlane.xlu2 %7846  ;;  %v4633_v20 = vadd.f32 %v4632_v4, %v4583_v40  ;;  %v8817_v5 = vor.u32 %v10359_v13, %v8814_v32  ;;  %v9198_v40 = vld [vmem:[#allocation5 + $0x478] sm:$0xf0]  ;;  %v10539_v4 = vld [vmem:[#allocation5 + $0x6ec] sm:$0xf] }
 0x9da   : > { %11304 = vst [vmem:[%s15484_s12 + $0x60] sm:$0xff] %v10992_v30   ;;  %4778 = vmatmul.bf16.gmra.mxu0 %v17406_v48  ;;  %v9969_v30 = vor.u32 %v10647_v9, %v9966_v27  ;;  %v9534_v48 = vld [vmem:[#allocation5 + $0x718] sm:$0xf0]  ;;  %v9921_v27 = vor.u32 %v10635_v1, %v9918_v61 }
 0x9db   : > { %v4681_v14 = vpop.f32.mrf.mxu2  ;;  %4827 = vmatmul.bf16.gmra.mxu1 %v17407_v59  ;;  %v4730_v51 = vpop.f32.mrf.mxu3  ;;  %v9201_v59 = vor.u32 %v10455_v57, %v9198_v40  ;;  %4945 = vmatpush.bf16.msrb.mxu0 %v8817_v5  ;;  %v9537_v17 = vor.u32 %v10539_v4, %v9534_v48  ;;  %v17509_v13 = vld [vmem:[#allocation67_spill] sm:$0xff] }
 0x9dc   : > { %5092 = vmatpush.bf16.msrb.mxu3 %v9969_v30  ;;  %v4682_v6 = vadd.f32 %v4681_v14, %v4633_v20  ;;  %v7207_v20 = vmul.f32 %v15837_v3, %v7206_v53  ;;  %v17510_v30 = vld [vmem:[#allocation24_spill] sm:$0xff] }
 0x9dd   : > { %4994 = vmatpush.bf16.msrb.mxu1 %v9201_v59  ;;  %5044 = vmatpush.bf16.msrb.mxu2 %v9537_v17  ;;  %v7093_v5 = vmul.f32 %v17510_v30, %v12430_v19 }
 0x9de   : > { %v7208_v17 = vmul.f32 0.5, %v7207_v20 }
 0x9df   : > { %7409 = vrot.lane.b32.xlu0 %v15822_v62, %s12008_s2  ;;  %v7437_v62 = vadd.f32 %v7421_v56, %v7373_v52  ;;  %v7832_v56 = vmul.f32 %v17509_v13, %v17509_v13  ;;  %v15854_v1 = vadd.f32 1.1920929e-07, %v7093_v5 }
 0x9e0   : > { %v4634_v9 = vpop.f32.mrf.mxu1  ;;  %5093 = vmatpush.bf16.msrb.mxu3 %v9921_v27  ;;  %v8766_v27 = vld [vmem:[#allocation5 + $0x118] sm:$0xf0] }
 0x9e1   : > { %v7394_v26 = vpop.permute.xlu2 %7393  ;;  %11684 = vrsqrt.f32 %v15854_v1  ;;  %vm7221_vm3 = vweird.f32 %v15854_v1 }
 0x9e2   : > { %v7422_v34 = vmul.f32 %v17508_v63, %v7394_v26  ;;  %v4585_v26 = vpop.f32.mrf.mxu0  ;;  %4881 = vmatmul.bf16.gmra.mxu2 %v17411_v45 }
 0x9e3   : > { %v4635_v57 = vadd.f32 %v4634_v9, %v4585_v26  ;;  %v4683_v32 = vpop.f32.mrf.mxu2  ;;  %v4732_v14 = vpop.f32.mrf.mxu3  ;;  %v10347_v9 = vld [vmem:[#allocation5 + $0xec] sm:$0xf] }
 0x9e4   : > { %v7438_v58 = vadd.f32 %v7422_v34, %v7374_v10  ;;  %v4731_v10 = vadd.f32 %v4730_v51, %v4682_v6  ;;  %v7097_v51 = vmul.f32 %v15560_v18, %v12430_v19  ;;  %v7209_v6 = vsub.f32 1.5, %v7208_v17  ;;  %v10527_v18 = vld [vmem:[#allocation5 + $0x68c] sm:$0xf] }
 0x9e5   : > { %v4684_v48 = vadd.f32 %v4683_v32, %v4635_v57  ;;  %4930 = vmatmul.bf16.gmra.mxu3 %v17460_v2  ;;  %v8769_v53 = vor.u32 %v10347_v9, %v8766_v27  ;;  %v9150_v32 = vld [vmem:[#allocation5 + $0x418] sm:$0xf0]  ;;  %v15861_v9 = vpop.xlane.xlu0 %7850 }
 0x9e6   : > { %v11057_v52 = vpack.c.bf16 %v7438_v58, %v7437_v62  ;;  %v15856_v26 = vadd.f32 1.1920929e-07, %v7097_v51  ;;  %v7210_v30 = vmul.f32 %v15837_v3, %v7209_v6  ;;  %v8718_v51 = vld [vmem:[#allocation5 + $0xb8] sm:$0xf0] }
 0x9e7   : > { %v4733_v59 = vadd.f32 %v4732_v14, %v4684_v48  ;;  %4946 = vmatpush.bf16.msrb.mxu0 %v8769_v53 }
 0x9e8   : > { %11317 = vst [vmem:[%s14594_s10 + $0x88] sm:$0xff] %v11057_v52   ;;  %7858 = vadd.xlane.f32.xlu2 %v7832_v56  ;;  %v4637_v34 = vpop.f32.mrf.mxu1  ;;  %v10443_v56 = vld [vmem:[#allocation5 + $0x3ec] sm:$0xf]  ;;  %11686 = vrsqrt.f32 %v15856_v26  ;;  %vm7261_vm6 = vweird.f32 %v15856_v26 }
 0x9e9   : > { %v10997_v61 = vpack.c.bf16 %v4733_v59, %v4731_v10  ;;  %v9486_v10 = vld [vmem:[#allocation5 + $0x6b8] sm:$0xf0]  ;;  %v9153_v14 = vor.u32 %v10443_v56, %v9150_v32 }
 0x9ea   : > { %v4588_v62 = vpop.f32.mrf.mxu0  ;;  %4783 = vmatmul.bf16.gmra.mxu0 %v17461_v39  ;;  %v9489_v59 = vor.u32 %v10527_v18, %v9486_v10  ;;  %v7870_v18 = vmul.f32 %v15786_v25, %v12430_v19 }
 0x9eb   : > { %11305 = vst [vmem:[%s15484_s12 + $0x68] sm:$0xff] %v10997_v61   ;;  %v4686_v40 = vpop.f32.mrf.mxu2  ;;  %4832 = vmatmul.bf16.gmra.mxu1 %v17462_v28  ;;  %v4735_v4 = vpop.f32.mrf.mxu3  ;;  %v4638_v58 = vadd.f32 %v4637_v34, %v4588_v62  ;;  %v10623_v61 = vld [vmem:[#allocation5 + $0x98c] sm:$0xf]  ;;  %v9870_v62 = vld [vmem:[#allocation5 + $0x9b8] sm:$0xf0] }
 0x9ec   : > { %v10335_v34 = vld [vmem:[#allocation5 + $0x8c] sm:$0xf]  ;;  %v9873_v5 = vor.u32 %v10623_v61, %v9870_v62  ;;  %4995 = vmatpush.bf16.msrb.mxu1 %v9153_v14  ;;  %5045 = vmatpush.bf16.msrb.mxu2 %v9489_v59  ;;  %v15872_v10 = vpop.xlane.xlu1 %7848  ;;  %v17511_v14 = vld [vmem:[#allocation42_spill] sm:$0xff] }
 0x9ed   : > { %v4687_v52 = vadd.f32 %v4686_v40, %v4638_v58  ;;  %v10431_v40 = vld [vmem:[#allocation5 + $0x38c] sm:$0xf]  ;;  %v9102_v58 = vld [vmem:[#allocation5 + $0x3b8] sm:$0xf0]  ;;  %v7833_v59 = vmul.f32 %v17511_v14, %v17511_v14  ;;  %v17512_v61 = vld [vmem:[#allocation30_spill] sm:$0xff] }
 0x9ee   : > { %5094 = vmatpush.bf16.msrb.mxu3 %v9873_v5  ;;  %v9105_v6 = vor.u32 %v10431_v40, %v9102_v58  ;;  %v7398_v5 = vpop.permute.xlu0 %7397  ;;  %v7873_v58 = vmul.f32 %v15806_v35, %v12430_v19  ;;  %v10611_v35 = vld [vmem:[#allocation5 + $0x92c] sm:$0xf]  ;;  %v9822_v14 = vld [vmem:[#allocation5 + $0x958] sm:$0xf0] }
 0x9ef   : > { %v4736_v27 = vadd.f32 %v4735_v4, %v4687_v52  ;;  %v7214_v4 = vsel %vm7213_vm1, %v15837_v3, %v7210_v30  ;;  %v15870_v52 = vpop.eup %11684  ;;  %v15884_v3 = vadd.f32 1.1920929e-07, %v7870_v18  ;;  %v17513_v30 = vld [vmem:[#allocation48_spill] sm:$0xff] }
 0x9f0   : > { %v4639_v48 = vpop.f32.mrf.mxu1  ;;  %4996 = vmatpush.bf16.msrb.mxu1 %v9105_v6  ;;  %v15878_v62 = vmul.f32 %v7214_v4, %v17512_v61  ;;  %v7216_v25 = vmul.f32 %v15870_v52, %v15854_v1  ;;  %v15890_v40 = vpop.eup %11686  ;;  %v17515_v6 = vld [vmem:[#allocation80_spill] sm:$0xff]  ;;  %vm7222_vm2 = vweird.f32 %v15870_v52  ;;  %v17521_v1 = vld [vmem:[#allocation27_spill] sm:$0xff] }
 0x9f1   : > { %11688 = vrsqrt.f32 %v15884_v3  ;;  %v7256_v4 = vmul.f32 %v15890_v40, %v15856_v26  ;;  %vm7223_vm4 = vmor %vm7221_vm3, %vm7222_vm2  ;;  %vm7262_vm5 = vweird.f32 %v15890_v40  ;;  %vm7908_vm9 = vweird.f32 %v15884_v3 }
 0x9f2   : > { %v4590_v57 = vpop.f32.mrf.mxu0  ;;  %4886 = vmatmul.bf16.gmra.mxu2 %v17469_v0  ;;  %vm15943_vm7 = vmor %vm7261_vm6, %vm7262_vm5 }
 0x9f3   : > { %v4640_v20 = vadd.f32 %v4639_v48, %v4590_v57  ;;  %v4688_v17 = vpop.f32.mrf.mxu2  ;;  %v8721_v57 = vor.u32 %v10335_v34, %v8718_v51  ;;  %v4737_v32 = vpop.f32.mrf.mxu3  ;;  %v17514_v51 = vld [vmem:[#allocation49_spill] sm:$0xff] }
 0x9f5   : > { %v4689_v56 = vadd.f32 %v4688_v17, %v4640_v20  ;;  %4947 = vmatpush.bf16.msrb.mxu0 %v8721_v57  ;;  %4935 = vmatmul.bf16.gmra.mxu3 %v17471_v11  ;;  %v9438_v57 = vld [vmem:[#allocation5 + $0x658] sm:$0xf0]  ;;  %v17519_v11 = vld [vmem:[#allocation52_spill] sm:$0xff] }
 0x9f7   : > { %v4738_v53 = vadd.f32 %v4737_v32, %v4689_v56  ;;  %v10515_v56 = vld [vmem:[#allocation5 + $0x62c] sm:$0xf]  ;;  %v7217_v32 = vmul.f32 %v15870_v52, %v7216_v25 }
 0x9f8   : > { %v4642_v20 = vpop.f32.mrf.mxu1  ;;  %v9441_v18 = vor.u32 %v10515_v56, %v9438_v57  ;;  %v17518_v25 = vld [vmem:[#allocation53_spill] sm:$0xff]  ;;  %v9825_v56 = vor.u32 %v10611_v35, %v9822_v14  ;;  %v17520_v57 = vld [vmem:[#allocation82_spill] sm:$0xff]  ;;  %v15909_v35 = vpop.eup %11688 }
 0x9f9   : > { %v11002_v16 = vpack.c.bf16 %v4738_v53, %v4736_v27  ;;  %v7424_v53 = vmul.f32 %v17515_v6, %v7398_v5  ;;  %v7837_v6 = vmul.f32 %v17520_v57, %v17520_v57  ;;  %vm7909_vm8 = vweird.f32 %v15909_v35 }
 0x9fa   : > { %v4593_v48 = vpop.f32.mrf.mxu0  ;;  %4788 = vmatmul.bf16.gmra.mxu0 %v17513_v30  ;;  %v7375_v30 = vmul.f32 %v17518_v25, %v15687_v49  ;;  %5046 = vmatpush.bf16.msrb.mxu2 %v9441_v18  ;;  %v9054_v49 = vld [vmem:[#allocation5 + $0x358] sm:$0xf0]  ;;  %vm7910_vm10 = vmor %vm7908_vm9, %vm7909_vm8 }
 0x9fb   : > { %11306 = vst [vmem:[%s15484_s12 + $0x70] sm:$0xff] %v11002_v16   ;;  %v4691_v34 = vpop.f32.mrf.mxu2  ;;  %v4643_v17 = vadd.f32 %v4642_v20, %v4593_v48  ;;  %4837 = vmatmul.bf16.gmra.mxu1 %v17514_v51  ;;  %v4740_v27 = vpop.f32.mrf.mxu3  ;;  %v17516_v16 = vld [vmem:[#allocation102_spill] sm:$0xff]  ;;  %v15901_v51 = vadd.f32 1.1920929e-07, %v7873_v58  ;;  %5095 = vmatpush.bf16.msrb.mxu3 %v9825_v56 }
 0x9fc   : > { %v17517_v48 = vld [vmem:[#allocation58_spill] sm:$0xff] }
 0x9fd   : > { %v4692_v61 = vadd.f32 %v4691_v34, %v4643_v17  ;;  %v10419_v34 = vld [vmem:[#allocation5 + $0x32c] sm:$0xf]  ;;  %v7218_v17 = vmul.f32 0.5, %v7217_v32  ;;  %11690 = vrsqrt.f32 %v15901_v51  ;;  %v7876_v32 = vmul.f32 %v15861_v9, %v12430_v19 }
 0x9fe   : > { %v9057_v14 = vor.u32 %v10419_v34, %v9054_v49  ;;  %vm7938_vm12 = vweird.f32 %v15901_v51 }
 0x9ff   : > { %7860 = vadd.xlane.f32.xlu1 %v7833_v59  ;;  %v7376_v59 = vmul.f32 %v17517_v48, %v17516_v16  ;;  %v10323_v16 = vld [vmem:[#allocation5 + $0x2c] sm:$0xf]  ;;  %v8670_v48 = vld [vmem:[#allocation5 + $0x58] sm:$0xf0]  ;;  %v4741_v18 = vadd.f32 %v4740_v27, %v4692_v61 }
 0xa00   : > { %7405 = vrot.lane.b32.xlu2 %v15878_v62, %s12008_s2  ;;  %v4644_v5 = vpop.f32.mrf.mxu1  ;;  %v8673_v2 = vor.u32 %v10323_v16, %v8670_v48  ;;  %4997 = vmatpush.bf16.msrb.mxu1 %v9057_v14 }
 0xa01   : > { %v7440_v28 = vadd.f32 %v7424_v53, %v7376_v59 }
 0xa02   : > { %v4595_v63 = vpop.f32.mrf.mxu0  ;;  %4948 = vmatpush.bf16.msrb.mxu0 %v8673_v2  ;;  %5047 = vmatmul.bf16.vlgmr.msrb.gmra.mxu2 %v17151_v54  ;;  %v7857_v54 = vpop.xlane.xlu0 %7856 }
 0xa03   : > { %v4645_v13 = vadd.f32 %v4644_v5, %v4595_v63  ;;  %v4693_v58 = vpop.f32.mrf.mxu2  ;;  %v4742_v63 = vpop.f32.mrf.mxu3 }
 0xa04   : > { %v7396_v20 = vpop.permute.xlu1 %7395 }
 0xa05   : > { %v7423_v0 = vmul.f32 %v17519_v11, %v7396_v20  ;;  %v7257_v20 = vmul.f32 %v15890_v40, %v7256_v4  ;;  %v4694_v11 = vadd.f32 %v4693_v58, %v4645_v13  ;;  %v7903_v13 = vmul.f32 %v15909_v35, %v15884_v3  ;;  %5096 = vmatmul.bf16.vlgmr.msrb.gmra.mxu3 %v17152_v60  ;;  %v17522_v58 = vld [vmem:[#allocation55_spill] sm:$0xff] }
 0xa07   : > { %v7439_v39 = vadd.f32 %v7423_v0, %v7375_v30  ;;  %v4743_v0 = vadd.f32 %v4742_v63, %v4694_v11  ;;  %v7219_v30 = vsub.f32 1.5, %v7218_v17  ;;  %v7258_v53 = vmul.f32 0.5, %v7257_v20 }
 0xa08   : > { %v15922_v11 = vadd.f32 1.1920929e-07, %v7876_v32  ;;  %v7904_v48 = vmul.f32 %v15909_v35, %v7903_v13  ;;  %v7095_v17 = vmul.f32 %v17521_v1, %v12430_v19 }
 0xa09   : > { %v11062_v25 = vpack.c.bf16 %v7440_v28, %v7439_v39  ;;  %7868 = vadd.xlane.f32.xlu0 %v7837_v6  ;;  %v11007_v27 = vpack.c.bf16 %v4743_v0, %v4741_v18  ;;  %v4803_v28 = vpop.f32.mrf.mxu1  ;;  %v7220_v2 = vmul.f32 %v15870_v52, %v7219_v30  ;;  %v15925_v6 = vpop.eup %11690  ;;  %v7259_v4 = vsub.f32 1.5, %v7258_v53 }
 0xa0a   : > { %v4754_v39 = vpop.f32.mrf.mxu0  ;;  %4949 = vmatmul.bf16.vlgmr.msrb.gmra.mxu0 %v17479_v46  ;;  %v7933_v61 = vmul.f32 %v15925_v6, %v15901_v51  ;;  %11692 = vrsqrt.f32 %v15922_v11  ;;  %v7879_v46 = vmul.f32 %v7857_v54, %v12430_v19  ;;  %v7905_v56 = vmul.f32 0.5, %v7904_v48 }
 0xa0b   : > { %11318 = vst [vmem:[%s14594_s10 + $0x90] sm:$0xff] %v11062_v25   ;;  %v4852_v9 = vpop.f32.mrf.mxu2  ;;  %v4804_v59 = vadd.f32 %v4803_v28, %v4754_v39  ;;  %4998 = vmatmul.bf16.vlgmr.msrb.gmra.mxu1 %v17481_v7  ;;  %v4901_v60 = vpop.f32.mrf.mxu3  ;;  %v7224_v25 = vsel %vm7223_vm4, %v15870_v52, %v7220_v2  ;;  %v7260_v5 = vmul.f32 %v15890_v40, %v7259_v4  ;;  %v17525_v28 = vld [vmem:[#allocation25_spill] sm:$0xff]  ;;  %v17526_v4 = vld [vmem:[#allocation26_spill] sm:$0xff]  ;;  %vm7939_vm11 = vweird.f32 %v15925_v6 }
 0xa0c   : > { %11307 = vst [vmem:[%s15484_s12 + $0x78] sm:$0xff] %v11007_v27   ;;  %v15941_v49 = vmul.f32 %v7224_v25, %v17522_v58  ;;  %v7934_v52 = vmul.f32 %v15925_v6, %v7933_v61  ;;  %v15948_v14 = vadd.f32 1.1920929e-07, %v7879_v46  ;;  %v7906_v0 = vsub.f32 1.5, %v7905_v56  ;;  %vm15999_vm13 = vmor %vm7938_vm12, %vm7939_vm11 }
 0xa0d   : > { %v4853_v16 = vadd.f32 %v4852_v9, %v4804_v59  ;;  %v7264_v26 = vsel %vm15943_vm7, %v15890_v40, %v7260_v5  ;;  %v15957_v27 = vadd.f32 1.1920929e-07, %v7095_v17  ;;  %v7098_v2 = vmul.f32 %v17525_v28, %v12430_v19 }
 0xa0e   : > { %v7935_v9 = vmul.f32 0.5, %v7934_v52  ;;  %11694 = vrsqrt.f32 %v15948_v14  ;;  %v15963_v48 = vmul.f32 %v7264_v26, %v17526_v4  ;;  %v7907_v40 = vmul.f32 %v15909_v35, %v7906_v0  ;;  %v17530_v0 = vld [vmem:[#allocation61_spill] sm:$0xff]  ;;  %v17533_v52 = vld [vmem:[#allocation110_spill] sm:$0xff] }
 0xa0f   : > { %v4902_v30 = vadd.f32 %v4901_v60, %v4853_v16  ;;  %11696 = vrsqrt.f32 %v15957_v27  ;;  %v15977_v5 = vadd.f32 1.1920929e-07, %v7098_v2  ;;  %v7835_v26 = vmul.f32 %v17530_v0, %v17530_v0 }
 0xa10   : > { %v15955_v53 = vpop.eup %11692  ;;  %v7936_v46 = vsub.f32 1.5, %v7935_v9  ;;  %v7911_v56 = vsel %vm7910_vm10, %v15909_v35, %v7907_v40  ;;  %vm7968_vm15 = vweird.f32 %v15922_v11  ;;  %vm7998_vm2 = vweird.f32 %v15948_v14 }
 0xa11   : > { %v4805_v34 = vpop.f32.mrf.mxu1  ;;  %v7963_v54 = vmul.f32 %v15955_v53, %v15922_v11  ;;  %11698 = vrsqrt.f32 %v15977_v5  ;;  %vm7969_vm14 = vweird.f32 %v15955_v53  ;;  %vm7241_vm5 = vweird.f32 %v15957_v27 }
 0xa12   : > { %v4756_v7 = vpop.f32.mrf.mxu0  ;;  %5052 = vmatmul.bf16.gmra.mxu2 %v17230_v41  ;;  %vm7970_vm0 = vmor %vm7968_vm15, %vm7969_vm14  ;;  %vm7271_vm8 = vweird.f32 %v15977_v5 }
 0xa13   : > { %v4806_v20 = vadd.f32 %v4805_v34, %v4756_v7  ;;  %v4854_v63 = vpop.f32.mrf.mxu2  ;;  %v4903_v13 = vpop.f32.mrf.mxu3  ;;  %v7964_v41 = vmul.f32 %v15955_v53, %v7963_v54  ;;  %v7937_v34 = vmul.f32 %v15925_v6, %v7936_v46 }
 0xa14   : > { %v15982_v16 = vpop.eup %11694 }
 0xa15   : > { %v4855_v32 = vadd.f32 %v4854_v63, %v4806_v20  ;;  %5101 = vmatmul.bf16.gmra.mxu3 %v17231_v24  ;;  %v17527_v24 = vld [vmem:[#allocation100_spill] sm:$0xff]  ;;  %v7965_v17 = vmul.f32 0.5, %v7964_v41  ;;  %v7993_v35 = vmul.f32 %v15982_v16, %v15948_v14  ;;  %v7872_v20 = vmul.f32 %v15751_v37, %v12430_v19 }
 0xa16   : > { %v15987_v1 = vmul.f32 %v7911_v56, %v17527_v24  ;;  %v7941_v51 = vsel %vm15999_vm13, %v15925_v6, %v7937_v34  ;;  %vm7999_vm1 = vweird.f32 %v15982_v16 }
 0xa17   : > { %v4904_v39 = vadd.f32 %v4903_v13, %v4855_v32  ;;  %v7966_v32 = vsub.f32 1.5, %v7965_v17  ;;  %v7994_v13 = vmul.f32 %v15982_v16, %v7993_v35  ;;  %v16011_v2 = vadd.f32 1.1920929e-07, %v7872_v20  ;;  %vm8000_vm4 = vmor %vm7998_vm2, %vm7999_vm1 }
 0xa18   : > { %7407 = vrot.lane.b32.xlu1 %v15941_v49, %s12008_s2 }
 0xa19   : > { %v11092_v59 = vpack.c.bf16 %v4904_v39, %v4902_v30  ;;  %v4808_v61 = vpop.f32.mrf.mxu1  ;;  %v7967_v6 = vmul.f32 %v15955_v53, %v7966_v32  ;;  %11700 = vrsqrt.f32 %v16011_v2  ;;  %v16057_v32 = vpop.permute.xlu0 %7403  ;;  %vm7928_vm11 = vweird.f32 %v16011_v2 }
 0xa1a   : > { %v4759_v60 = vpop.f32.mrf.mxu0  ;;  %4954 = vmatmul.bf16.gmra.mxu0 %v17232_v44  ;;  %v15989_v44 = vpop.eup %11696 }
 0xa1b   : > { %11324 = vst [vmem:[%s15484_s12 + $0x80] sm:$0xff] %v11092_v59   ;;  %v4857_v25 = vpop.f32.mrf.mxu2  ;;  %5003 = vmatmul.bf16.gmra.mxu1 %v17233_v43  ;;  %v4906_v7 = vpop.f32.mrf.mxu3  ;;  %v4809_v3 = vadd.f32 %v4808_v61, %v4759_v60  ;;  %v7236_v30 = vmul.f32 %v15989_v44, %v15957_v27  ;;  %v17531_v59 = vld [vmem:[#allocation62_spill] sm:$0xff]  ;;  %v7995_v61 = vmul.f32 0.5, %v7994_v13  ;;  %v7971_v35 = vsel %vm7970_vm0, %v15955_v53, %v7967_v6 }
 0xa1c   : > { %v16013_v4 = vpop.eup %11698  ;;  %v16017_v60 = vmul.f32 %v7941_v51, %v17531_v59  ;;  %vm7242_vm3 = vweird.f32 %v15989_v44  ;;  %v16069_v6 = vpop.xlane.xlu2 %7852 }
 0xa1d   : > { %7415 = vrot.lane.b32.xlu0 %v15963_v48, %s12008_s2  ;;  %v4858_v43 = vadd.f32 %v4857_v25, %v4809_v3  ;;  %v7237_v54 = vmul.f32 %v15989_v44, %v7236_v30  ;;  %v7266_v41 = vmul.f32 %v16013_v4, %v15977_v5  ;;  %v7996_v17 = vsub.f32 1.5, %v7995_v61  ;;  %vm16071_vm6 = vmor %vm7241_vm5, %vm7242_vm3 }
 0xa1e   : > { %vm7272_vm7 = vweird.f32 %v16013_v4 }
 0xa1f   : > { %v4907_v39 = vadd.f32 %v4906_v7, %v4858_v43  ;;  %v7875_v7 = vmul.f32 %v15872_v10, %v12430_v19  ;;  %v7238_v3 = vmul.f32 0.5, %v7237_v54  ;;  %v7267_v10 = vmul.f32 %v16013_v4, %v7266_v41  ;;  %vm16116_vm9 = vmor %vm7271_vm8, %vm7272_vm7 }
 0xa21   : > { %v4810_v18 = vpop.f32.mrf.mxu1  ;;  %v16040_v43 = vadd.f32 1.1920929e-07, %v7875_v7  ;;  %v7239_v20 = vsub.f32 1.5, %v7238_v3  ;;  %v7268_v30 = vmul.f32 0.5, %v7267_v10 }
 0xa22   : > { %v4761_v58 = vpop.f32.mrf.mxu0  ;;  %5057 = vmatmul.bf16.gmra.mxu2 %v17307_v50  ;;  %v17532_v50 = vld [vmem:[#allocation29_spill] sm:$0xff] }
 0xa23   : > { %v4811_v63 = vadd.f32 %v4810_v18, %v4761_v58  ;;  %v4859_v37 = vpop.f32.mrf.mxu2  ;;  %v4908_v9 = vpop.f32.mrf.mxu3  ;;  %v7096_v34 = vmul.f32 %v17532_v50, %v12430_v19  ;;  %11702 = vrsqrt.f32 %v16040_v43  ;;  %vm7958_vm0 = vweird.f32 %v16040_v43 }
 0xa24   : > { %v16042_v58 = vpop.eup %11700 }
 0xa25   : > { %8174 = vrot.lane.b32.xlu0 %v15987_v1, %s12008_s2  ;;  %v4860_v28 = vadd.f32 %v4859_v37, %v4811_v63  ;;  %5106 = vmatmul.bf16.gmra.mxu3 %v17308_v22  ;;  %v16044_v18 = vadd.f32 1.1920929e-07, %v7096_v34  ;;  %v16047_v63 = vmul.f32 %v7971_v35, %v17533_v52  ;;  %v7923_v37 = vmul.f32 %v16042_v58, %v16011_v2  ;;  %v17538_v52 = vld [vmem:[#allocation35_spill] sm:$0xff] }
 0xa26   : > { %vm7929_vm10 = vweird.f32 %v16042_v58 }
 0xa27   : > { %v4909_v40 = vadd.f32 %v4908_v9, %v4860_v28  ;;  %11704 = vrsqrt.f32 %v16044_v18  ;;  %v7924_v41 = vmul.f32 %v16042_v58, %v7923_v37  ;;  %vm16159_vm12 = vmor %vm7928_vm11, %vm7929_vm10  ;;  %vm7251_vm3 = vweird.f32 %v16044_v18 }
 0xa29   : > { %7864 = vadd.xlane.f32.xlu2 %v7835_v26  ;;  %v11097_v46 = vpack.c.bf16 %v4909_v40, %v4907_v39  ;;  %v4813_v56 = vpop.f32.mrf.mxu1  ;;  %v7240_v39 = vmul.f32 %v15989_v44, %v7239_v20  ;;  %v7871_v40 = vmul.f32 %v15736_v21, %v12430_v19  ;;  %v17536_v21 = vld [vmem:[#allocation31_spill] sm:$0xff]  ;;  %v16084_v3 = vpop.eup %11702 }
 0xa2a   : > { %v4764_v25 = vpop.f32.mrf.mxu0  ;;  %4959 = vmatmul.bf16.gmra.mxu0 %v17309_v38  ;;  %v7997_v38 = vmul.f32 %v15982_v16, %v7996_v17  ;;  %vm7959_vm13 = vweird.f32 %v16084_v3 }
 0xa2b   : > { %11325 = vst [vmem:[%s15484_s12 + $0x88] sm:$0xff] %v11097_v46   ;;  %v4862_v24 = vpop.f32.mrf.mxu2  ;;  %5008 = vmatmul.bf16.gmra.mxu1 %v17310_v8  ;;  %v4911_v11 = vpop.f32.mrf.mxu3  ;;  %v4814_v22 = vadd.f32 %v4813_v56, %v4764_v25  ;;  %v7269_v25 = vsub.f32 1.5, %v7268_v30  ;;  %v7244_v27 = vsel %vm16071_vm6, %v15989_v44, %v7240_v39  ;;  %v16086_v50 = vadd.f32 1.1920929e-07, %v7871_v40  ;;  %v17540_v30 = vld [vmem:[#allocation46_spill] sm:$0xff]  ;;  %vm16194_vm1 = vmor %vm7958_vm0, %vm7959_vm13 }
 0xa2c   : > { %v8001_v14 = vsel %vm8000_vm4, %v15982_v16, %v7997_v38  ;;  %v7953_v38 = vmul.f32 %v16084_v3, %v16040_v43 }
 0xa2d   : > { %8180 = vrot.lane.b32.xlu0 %v16017_v60, %s12008_s2  ;;  %v4863_v8 = vadd.f32 %v4862_v24, %v4814_v22  ;;  %v16079_v16 = vmul.f32 %v8001_v14, %v17536_v21  ;;  %v16089_v17 = vpop.eup %11704  ;;  %v7270_v10 = vmul.f32 %v16013_v4, %v7269_v25  ;;  %v17537_v22 = vld [vmem:[#allocation107_spill] sm:$0xff]  ;;  %v17545_v21 = vld [vmem:[#allocation86_spill] sm:$0xff]  ;;  %vm7918_vm10 = vweird.f32 %v16086_v50 }
 0xa2e   : > { %v16096_v20 = vmul.f32 %v7244_v27, %v17537_v22  ;;  %vm7252_vm15 = vweird.f32 %v16089_v17 }
 0xa2f   : > { %v7855_v53 = vpop.xlane.xlu1 %7854  ;;  %v4912_v54 = vadd.f32 %v4911_v11, %v4863_v8  ;;  %v7925_v11 = vmul.f32 0.5, %v7924_v41  ;;  %vm16206_vm5 = vmor %vm7251_vm3, %vm7252_vm15 }
 0xa30   : > { %v7878_v28 = vmul.f32 %v7855_v53, %v12430_v19 }
 0xa31   : > { %v4815_v51 = vpop.f32.mrf.mxu1  ;;  %v7926_v40 = vsub.f32 1.5, %v7925_v11 }
 0xa32   : > { %v4766_v26 = vpop.f32.mrf.mxu0  ;;  %v16076_v7 = vadd.f32 1.1920929e-07, %v7878_v28  ;;  %5062 = vmatmul.bf16.gmra.mxu2 %v17313_v29  ;;  %v7874_v29 = vmul.f32 %v15815_v15, %v12430_v19  ;;  %v7246_v15 = vmul.f32 %v16089_v17, %v16044_v18 }
 0xa33   : > { %v4816_v13 = vadd.f32 %v4815_v51, %v4766_v26  ;;  %v4864_v9 = vpop.f32.mrf.mxu2  ;;  %v4913_v61 = vpop.f32.mrf.mxu3  ;;  %v17539_v26 = vld [vmem:[#allocation32_spill] sm:$0xff]  ;;  %v7836_v51 = vmul.f32 %v17540_v30, %v17540_v30 }
 0xa34   : > { %11706 = vrsqrt.f32 %v16076_v7  ;;  %v16127_v14 = vadd.f32 1.1920929e-07, %v7874_v29  ;;  %v7247_v41 = vmul.f32 %v16089_v17, %v7246_v15  ;;  %v7927_v29 = vmul.f32 %v16042_v58, %v7926_v40 }
 0xa35   : > { %8186 = vrot.lane.b32.xlu0 %v16047_v63, %s12008_s2  ;;  %v4865_v59 = vadd.f32 %v4864_v9, %v4816_v13  ;;  %5111 = vmatmul.bf16.gmra.mxu3 %v17538_v52  ;;  %11708 = vrsqrt.f32 %v16086_v50  ;;  %v17541_v13 = vld [vmem:[#allocation33_spill] sm:$0xff]  ;;  %v7274_v9 = vsel %vm16116_vm9, %v16013_v4, %v7270_v10  ;;  %v17547_v10 = vld [vmem:[#allocation87_spill] sm:$0xff]  ;;  %v7877_v40 = vmul.f32 %v16069_v6, %v12430_v19 }
 0xa36   : > { %v17546_v4 = vld [vmem:[#allocation85_spill] sm:$0xff]  ;;  %v7378_v11 = vmul.f32 %v17547_v10, %v15804_v31  ;;  %v7248_v39 = vmul.f32 0.5, %v7247_v41  ;;  %v7931_v6 = vsel %vm16159_vm12, %v16042_v58, %v7927_v29  ;;  %vm7988_vm8 = vweird.f32 %v16076_v7 }
 0xa37   : > { %v4914_v56 = vadd.f32 %v4913_v61, %v4865_v59  ;;  %v7400_v59 = vpop.permute.xlu2 %7399  ;;  %v17552_v29 = vld [vmem:[#allocation97_spill] sm:$0xff]  ;;  %vm7948_vm13 = vweird.f32 %v16127_v14 }
 0xa39   : > { %v11102_v34 = vpack.c.bf16 %v4914_v56, %v4912_v54  ;;  %v4818_v35 = vpop.f32.mrf.mxu1  ;;  %v7954_v54 = vmul.f32 %v16084_v3, %v7953_v38  ;;  %v17544_v56 = vld [vmem:[#allocation84_spill] sm:$0xff] }
 0xa3a   : > { %v4769_v24 = vpop.f32.mrf.mxu0  ;;  %4964 = vmatmul.bf16.gmra.mxu0 %v17539_v26  ;;  %v16131_v25 = vpop.eup %11706  ;;  %v7377_v27 = vmul.f32 %v17545_v21, %v17544_v56 }
 0xa3b   : > { %11326 = vst [vmem:[%s15484_s12 + $0x90] sm:$0xff] %v11102_v34   ;;  %v4867_v8 = vpop.f32.mrf.mxu2  ;;  %v4819_v37 = vadd.f32 %v4818_v35, %v4769_v24  ;;  %5013 = vmatmul.bf16.gmra.mxu1 %v17541_v13  ;;  %v4916_v5 = vpop.f32.mrf.mxu3  ;;  %v7425_v35 = vmul.f32 %v17546_v4, %v7400_v59  ;;  %v7955_v38 = vmul.f32 0.5, %v7954_v54  ;;  %v7983_v26 = vmul.f32 %v16131_v25, %v16076_v7 }
 0xa3c   : > { %v16136_v24 = vpop.eup %11708  ;;  %vm7989_vm6 = vweird.f32 %v16131_v25 }
 0xa3d   : > { %8192 = vrot.lane.b32.xlu0 %v16079_v16, %s12008_s2  ;;  %v4868_v61 = vadd.f32 %v4867_v8, %v4819_v37  ;;  %v7956_v2 = vsub.f32 1.5, %v7955_v38  ;;  %v7984_v56 = vmul.f32 %v16131_v25, %v7983_v26  ;;  %v16179_v26 = vmul.f32 %v7931_v6, %v17552_v29  ;;  %vm16236_vm9 = vmor %vm7988_vm8, %vm7989_vm6 }
 0xa3e   : > { %v7863_v44 = vpop.xlane.xlu0 %7862  ;;  %vm7919_vm7 = vweird.f32 %v16136_v24 }
 0xa3f   : > { %v7882_v53 = vmul.f32 %v7863_v44, %v12430_v19  ;;  %v17548_v44 = vld [vmem:[#allocation34_spill] sm:$0xff]  ;;  %v4917_v13 = vadd.f32 %v4916_v5, %v4868_v61  ;;  %v7441_v5 = vadd.f32 %v7425_v35, %v7377_v27  ;;  %v16171_v35 = vadd.f32 1.1920929e-07, %v7877_v40  ;;  %vm16250_vm11 = vmor %vm7918_vm10, %vm7919_vm7 }
 0xa40   : > { %v16142_v22 = vmul.f32 %v7274_v9, %v17548_v44  ;;  %v7913_v9 = vmul.f32 %v16136_v24, %v16086_v50  ;;  %v7957_v58 = vmul.f32 %v16084_v3, %v7956_v2 }
 0xa41   : > { %v16120_v28 = vadd.f32 1.1920929e-07, %v7882_v53  ;;  %7411 = vrot.lane.b32.xlu2 %v16096_v20, %s12008_s2  ;;  %v4820_v34 = vpop.f32.mrf.mxu1  ;;  %vm7978_vm0 = vweird.f32 %v16171_v35 }
 0xa42   : > { %7866 = vadd.xlane.f32.xlu1 %v7836_v51  ;;  %v4771_v46 = vpop.f32.mrf.mxu0  ;;  %v17549_v51 = vld [vmem:[#allocation88_spill] sm:$0xff]  ;;  %5067 = vmatmul.bf16.gmra.mxu2 %v17320_v33  ;;  %v7914_v38 = vmul.f32 %v16136_v24, %v7913_v9 }
 0xa43   : > { %11710 = vrsqrt.f32 %v16120_v28  ;;  %v4821_v52 = vadd.f32 %v4820_v34, %v4771_v46  ;;  %v4869_v8 = vpop.f32.mrf.mxu2  ;;  %v4918_v54 = vpop.f32.mrf.mxu3  ;;  %vm8028_vm2 = vweird.f32 %v16120_v28 }
 0xa44   : > { %11712 = vrsqrt.f32 %v16127_v14  ;;  %v7915_v40 = vmul.f32 0.5, %v7914_v38 }
 0xa45   : > { %v4870_v31 = vadd.f32 %v4869_v8, %v4821_v52  ;;  %v7249_v8 = vsub.f32 1.5, %v7248_v39  ;;  %5116 = vmatmul.bf16.gmra.mxu3 %v17386_v55  ;;  %11714 = vrsqrt.f32 %v16171_v35 }
 0xa46   : > { %v7916_v6 = vsub.f32 1.5, %v7915_v40 }
 0xa47   : > { %v7402_v53 = vpop.permute.xlu1 %7401  ;;  %v4919_v41 = vadd.f32 %v4918_v54, %v4870_v31 }
 0xa48   : > { %v7426_v37 = vmul.f32 %v17549_v51, %v7402_v53 }
 0xa49   : > { %v11711_v15 = vpop.eup %11710  ;;  %7417 = vrot.lane.b32.xlu2 %v16142_v22, %s12008_s2  ;;  %v11107_v52 = vpack.c.bf16 %v4919_v41, %v4917_v13  ;;  %v7985_v13 = vmul.f32 0.5, %v7984_v56 }
 0xa4a   : > { %v8023_v61 = vmul.f32 %v11711_v15, %v16120_v28  ;;  %v7442_v46 = vadd.f32 %v7426_v37, %v7378_v11  ;;  %v4774_v53 = vpop.f32.mrf.mxu0  ;;  %v16169_v27 = vpop.eup %11712  ;;  %4969 = vmatmul.bf16.gmra.mxu0 %v17388_v42  ;;  %vm8029_vm14 = vweird.f32 %v11711_v15  ;;  %v7250_v42 = vmul.f32 %v16089_v17, %v7249_v8 }
 0xa4b   : > { %v4823_v11 = vpop.f32.mrf.mxu1  ;;  %11327 = vst [vmem:[%s15484_s12 + $0x98] sm:$0xff] %v11107_v52   ;;  %v4872_v33 = vpop.f32.mrf.mxu2  ;;  %5018 = vmatmul.bf16.gmra.mxu1 %v17447_v23  ;;  %v7943_v55 = vmul.f32 %v16169_v27, %v16127_v14  ;;  %vm8030_vm4 = vmor %vm8028_vm2, %vm8029_vm14  ;;  %v7986_v43 = vsub.f32 1.5, %v7985_v13  ;;  %vm7949_vm12 = vweird.f32 %v16169_v27 }
 0xa4c   : > { %v8024_v34 = vmul.f32 %v11711_v15, %v8023_v61  ;;  %v11067_v44 = vpack.c.bf16 %v7442_v46, %v7441_v5  ;;  %v4824_v39 = vadd.f32 %v4823_v11, %v4774_v53  ;;  %v4921_v9 = vpop.f32.mrf.mxu3  ;;  %v7961_v5 = vsel %vm16194_vm1, %v16084_v3, %v7957_v58  ;;  %v16217_v56 = vpop.eup %11714  ;;  %vm16280_vm14 = vmor %vm7948_vm13, %vm7949_vm12 }
 0xa4d   : > { %v7944_v28 = vmul.f32 %v16169_v27, %v7943_v55  ;;  %v7987_v53 = vmul.f32 %v16131_v25, %v7986_v43  ;;  %v7917_v58 = vmul.f32 %v16136_v24, %v7916_v6  ;;  %v7973_v29 = vmul.f32 %v16217_v56, %v16171_v35 }
 0xa4e   : > { %v8025_v37 = vmul.f32 0.5, %v8024_v34  ;;  %11319 = vst [vmem:[%s14594_s10 + $0x98] sm:$0xff] %v11067_v44   ;;  %v4873_v61 = vadd.f32 %v4872_v33, %v4824_v39  ;;  %v17557_v34 = vld [vmem:[#allocation109_spill] sm:$0xff]  ;;  %vm7979_vm15 = vweird.f32 %v16217_v56 }
 0xa4f   : > { %v16222_v44 = vmul.f32 %v7961_v5, %v17557_v34  ;;  %v7945_v8 = vmul.f32 0.5, %v7944_v28  ;;  %v7991_v55 = vsel %vm16236_vm9, %v16131_v25, %v7987_v53  ;;  %v7974_v50 = vmul.f32 %v16217_v56, %v7973_v29  ;;  %v17564_v5 = vld [vmem:[#allocation40_spill] sm:$0xff]  ;;  %v17571_v53 = vld [vmem:[#allocation95_spill] sm:$0xff]  ;;  %vm7980_vm1 = vmor %vm7978_vm0, %vm7979_vm15 }
 0xa50   : > { %v8026_v31 = vsub.f32 1.5, %v8025_v37  ;;  %v7921_v25 = vsel %vm16250_vm11, %v16136_v24, %v7917_v58  ;;  %v17566_v24 = vld [vmem:[#allocation59_spill] sm:$0xff]  ;;  %v17567_v28 = vld [vmem:[#allocation96_spill] sm:$0xff] }
 0xa51   : > { %8178 = vrot.lane.b32.xlu2 %v16179_v26, %s12008_s2  ;;  %v7946_v40 = vsub.f32 1.5, %v7945_v8  ;;  %v16273_v41 = vmul.f32 %v7921_v25, %v17566_v24  ;;  %v7975_v6 = vmul.f32 0.5, %v7974_v50  ;;  %v17574_v50 = vld [vmem:[#allocation63_spill] sm:$0xff] }
 0xa52   : > { %v8027_v54 = vmul.f32 %v11711_v15, %v8026_v31  ;;  %v4776_v46 = vpop.f32.mrf.mxu0  ;;  %5072 = vmatmul.bf16.gmra.mxu2 %v17403_v12  ;;  %v17563_v12 = vld [vmem:[#allocation77_spill] sm:$0xff] }
 0xa53   : > { %v4825_v2 = vpop.f32.mrf.mxu1  ;;  %v4874_v52 = vpop.f32.mrf.mxu2  ;;  %v16263_v43 = vmul.f32 %v7991_v55, %v17563_v12 }
 0xa54   : > { %v8031_v59 = vsel %vm8030_vm4, %v11711_v15, %v8027_v54  ;;  %v7254_v15 = vsel %vm16206_vm5, %v16089_v17, %v7250_v42  ;;  %v4826_v3 = vadd.f32 %v4825_v2, %v4776_v46  ;;  %v17558_v17 = vld [vmem:[#allocation28_spill] sm:$0xff]  ;;  %v4923_v37 = vpop.f32.mrf.mxu3  ;;  %v7947_v46 = vmul.f32 %v16169_v27, %v7946_v40 }
 0xa55   : > { %v16212_v18 = vmul.f32 %v8031_v59, %v17498_v47  ;;  %v4922_v47 = vadd.f32 %v4921_v9, %v4873_v61  ;;  %v16230_v38 = vmul.f32 %v7254_v15, %v17558_v17  ;;  %5121 = vmatmul.bf16.gmra.mxu3 %v17404_v36  ;;  %v17565_v61 = vld [vmem:[#allocation41_spill] sm:$0xff]  ;;  %v7427_v2 = vmul.f32 %v17567_v28, %v16057_v32  ;;  %v17573_v17 = vld [vmem:[#allocation91_spill] sm:$0xff] }
 0xa56   : > { %v4875_v11 = vadd.f32 %v4874_v52, %v4826_v3  ;;  %v17570_v52 = vld [vmem:[#allocation78_spill] sm:$0xff]  ;;  %v7951_v14 = vsel %vm16280_vm14, %v16169_v27, %v7947_v46 }
 0xa57   : > { %8198 = vrot.lane.b32.xlu0 %v16212_v18, %s12008_s2  ;;  %v16294_v25 = vmul.f32 %v7951_v14, %v17574_v50 }
 0xa58   : > { %v4924_v33 = vadd.f32 %v4923_v37, %v4875_v11  ;;  %v17572_v11 = vld [vmem:[#allocation93_spill] sm:$0xff] }
 0xa59   : > { %8184 = vrot.lane.b32.xlu2 %v16222_v44, %s12008_s2  ;;  %v7380_v8 = vmul.f32 %v17572_v11, %v15878_v62 }
 0xa5a   : > { %v11112_v9 = vpack.c.bf16 %v4924_v33, %v4922_v47  ;;  %v4779_v7 = vpop.f32.mrf.mxu0  ;;  %4974 = vmatmul.bf16.gmra.mxu0 %v17564_v5  ;;  %v7379_v47 = vmul.f32 %v17571_v53, %v17570_v52  ;;  %v17577_v52 = vld [vmem:[#allocation45_spill] sm:$0xff] }
 0xa5b   : > { %7413 = vrot.lane.b32.xlu1 %v16230_v38, %s12008_s2  ;;  %v7859_v31 = vpop.xlane.xlu2 %7858  ;;  %v4828_v23 = vpop.f32.mrf.mxu1  ;;  %5023 = vmatmul.bf16.gmra.mxu1 %v17565_v61 }
 0xa5c   : > { %v7880_v39 = vmul.f32 %v7859_v31, %v12430_v19  ;;  %11328 = vst [vmem:[%s15484_s12 + $0xa0] sm:$0xff] %v11112_v9   ;;  %v4877_v59 = vpop.f32.mrf.mxu2  ;;  %v4926_v36 = vpop.f32.mrf.mxu3  ;;  %v4829_v15 = vadd.f32 %v4828_v23, %v4779_v7  ;;  %v7443_v13 = vadd.f32 %v7427_v2, %v7379_v47  ;;  %v7976_v31 = vsub.f32 1.5, %v7975_v6  ;;  %v17575_v6 = vld [vmem:[#allocation47_spill] sm:$0xff]  ;;  %v17578_v47 = vld [vmem:[#allocation66_spill] sm:$0xff] }
 0xa5e   : > { %v16255_v54 = vadd.f32 1.1920929e-07, %v7880_v39  ;;  %v4878_v37 = vadd.f32 %v4877_v59, %v4829_v15  ;;  %v7977_v27 = vmul.f32 %v16217_v56, %v7976_v31 }
 0xa60   : > { %11716 = vrsqrt.f32 %v16255_v54  ;;  %v4927_v62 = vadd.f32 %v4926_v36, %v4878_v37  ;;  %v7981_v2 = vsel %vm7980_vm1, %v16217_v56, %v7977_v27  ;;  %v7410_v56 = vpop.permute.xlu0 %7409  ;;  %vm8008_vm3 = vweird.f32 %v16255_v54 }
 0xa61   : > { %8190 = vrot.lane.b32.xlu2 %v16263_v43, %s12008_s2  ;;  %v16309_v35 = vmul.f32 %v7981_v2, %v17578_v47  ;;  %v17582_v2 = vld [vmem:[#allocation48_spill] sm:$0xff] }
 0xa62   : > { %v4781_v58 = vpop.f32.mrf.mxu0  ;;  %5077 = vmatmul.bf16.gmra.mxu2 %v17411_v45 }
 0xa63   : > { %8176 = vrot.lane.b32.xlu1 %v16273_v41, %s12008_s2  ;;  %v7406_v3 = vpop.permute.xlu2 %7405  ;;  %v4830_v29 = vpop.f32.mrf.mxu1 }
 0xa64   : > { %v7428_v32 = vmul.f32 %v17573_v17, %v7406_v3  ;;  %v4831_v55 = vadd.f32 %v4830_v29, %v4781_v58  ;;  %v4879_v7 = vpop.f32.mrf.mxu2  ;;  %v4928_v12 = vpop.f32.mrf.mxu3  ;;  %v17576_v3 = vld [vmem:[#allocation44_spill] sm:$0xff] }
 0xa65   : > { %5126 = vmatmul.bf16.gmra.mxu3 %v17575_v6 }
 0xa66   : > { %v11717_v33 = vpop.eup %11716  ;;  %v7444_v39 = vadd.f32 %v7428_v32, %v7380_v8  ;;  %v4880_v40 = vadd.f32 %v4879_v7, %v4831_v55 }
 0xa67   : > { %v8003_v9 = vmul.f32 %v11717_v33, %v16255_v54  ;;  %vm8009_vm2 = vweird.f32 %v11717_v33 }
 0xa68   : > { %v11072_v42 = vpack.c.bf16 %v7444_v39, %v7443_v13  ;;  %v4929_v59 = vadd.f32 %v4928_v12, %v4880_v40  ;;  %vm8010_vm4 = vmor %vm8008_vm3, %vm8009_vm2  ;;  %v17580_v12 = vld [vmem:[#allocation50_spill] sm:$0xff] }
 0xa69   : > { %v8004_v23 = vmul.f32 %v11717_v33, %v8003_v9 }
 0xa6a   : > { %11320 = vst [vmem:[%s14594_s10 + $0xa0] sm:$0xff] %v11072_v42   ;;  %v11117_v61 = vpack.c.bf16 %v4929_v59, %v4927_v62  ;;  %v4784_v46 = vpop.f32.mrf.mxu0  ;;  %4979 = vmatmul.bf16.gmra.mxu0 %v17576_v3  ;;  %v17579_v42 = vld [vmem:[#allocation67_spill] sm:$0xff]  ;;  %v17583_v3 = vld [vmem:[#allocation49_spill] sm:$0xff] }
 0xa6b   : > { %v8005_v5 = vmul.f32 0.5, %v8004_v23  ;;  %8182 = vrot.lane.b32.xlu1 %v16294_v25, %s12008_s2  ;;  %v4833_v24 = vpop.f32.mrf.mxu1  ;;  %5028 = vmatmul.bf16.gmra.mxu1 %v17577_v52 }
 0xa6c   : > { %11329 = vst [vmem:[%s15484_s12 + $0xa8] sm:$0xff] %v11117_v61   ;;  %v4882_v15 = vpop.f32.mrf.mxu2  ;;  %v4834_v34 = vadd.f32 %v4833_v24, %v4784_v46  ;;  %v4931_v8 = vpop.f32.mrf.mxu3  ;;  %v17581_v46 = vld [vmem:[#allocation51_spill] sm:$0xff] }
 0xa6d   : > { %v8006_v36 = vsub.f32 1.5, %v8005_v5 }
 0xa6e   : > { %v4883_v58 = vadd.f32 %v4882_v15, %v4834_v34 }
 0xa6f   : > { %v8007_v45 = vmul.f32 %v11717_v33, %v8006_v36 }
 0xa70   : > { %v4932_v9 = vadd.f32 %v4931_v8, %v4883_v58 }
 0xa71   : > { %v8011_v31 = vsel %vm8010_vm4, %v11717_v33, %v8007_v45 }
 0xa72   : > { %v7861_v32 = vpop.xlane.xlu1 %7860  ;;  %v4786_v14 = vpop.f32.mrf.mxu0  ;;  %v16316_v62 = vmul.f32 %v8011_v31, %v17579_v42  ;;  %5082 = vmatmul.bf16.gmra.mxu2 %v17580_v12 }
 0xa73   : > { %v7881_v37 = vmul.f32 %v7861_v32, %v12430_v19  ;;  %8188 = vrot.lane.b32.xlu1 %v16309_v35, %s12008_s2  ;;  %v4835_v13 = vpop.f32.mrf.mxu1 }
 0xa74   : > { %v4836_v39 = vadd.f32 %v4835_v13, %v4786_v14  ;;  %v4884_v55 = vpop.f32.mrf.mxu2  ;;  %v4933_v40 = vpop.f32.mrf.mxu3 }
 0xa75   : > { %v7897_v29 = vadd.f32 1.1920929e-07, %v7881_v37  ;;  %5131 = vmatmul.bf16.gmra.mxu3 %v17581_v46 }
 0xa76   : > { %v4885_v7 = vadd.f32 %v4884_v55, %v4836_v39 }
 0xa77   : > { %11718 = vrsqrt.f32 %v7897_v29  ;;  %vm8018_vm6 = vweird.f32 %v7897_v29 }
 0xa78   : > { %v4934_v23 = vadd.f32 %v4933_v40, %v4885_v7  ;;  %v17584_v7 = vld [vmem:[#allocation101_spill] sm:$0xff]  ;;  %v17585_v40 = vld [vmem:[#allocation42_spill] sm:$0xff] }
 0xa79   : > { %v7430_v42 = vmul.f32 %v17584_v7, %v7410_v56 }
 0xa7a   : > { %v11122_v50 = vpack.c.bf16 %v4934_v23, %v4932_v9  ;;  %v4789_v27 = vpop.f32.mrf.mxu0  ;;  %4984 = vmatmul.bf16.gmra.mxu0 %v17582_v2 }
 0xa7b   : > { %8194 = vrot.lane.b32.xlu1 %v16316_v62, %s12008_s2  ;;  %v4838_v5 = vpop.f32.mrf.mxu1  ;;  %5033 = vmatmul.bf16.gmra.mxu1 %v17583_v3 }
 0xa7c   : > { %v7869_v54 = vpop.xlane.xlu0 %7868  ;;  %11330 = vst [vmem:[%s15484_s12 + $0xb0] sm:$0xff] %v11122_v50   ;;  %v4887_v36 = vpop.f32.mrf.mxu2  ;;  %v4839_v15 = vadd.f32 %v4838_v5, %v4789_v27 }
 0xa7d   : > { %v11719_v33 = vpop.eup %11718  ;;  %v7885_v59 = vmul.f32 %v7869_v54, %v12430_v19  ;;  %v4936_v34 = vpop.f32.mrf.mxu3 }
 0xa7e   : > { %v8013_v61 = vmul.f32 %v11719_v33, %v7897_v29  ;;  %vm8019_vm5 = vweird.f32 %v11719_v33  ;;  %v4888_v8 = vadd.f32 %v4887_v36, %v4839_v15  ;;  %v17587_v29 = vld [vmem:[#allocation99_spill] sm:$0xff]  ;;  %v17589_v36 = vld [vmem:[#allocation57_spill] sm:$0xff] }
 0xa7f   : > { %v7901_v24 = vadd.f32 1.1920929e-07, %v7885_v59  ;;  %vm8020_vm7 = vmor %vm8018_vm6, %vm8019_vm5  ;;  %v17586_v59 = vld [vmem:[#allocation64_spill] sm:$0xff] }
 0xa80   : > { %v8014_v6 = vmul.f32 %v11719_v33, %v8013_v61  ;;  %v4937_v55 = vadd.f32 %v4936_v34, %v4888_v8  ;;  %v7382_v5 = vmul.f32 %v17587_v29, %v17586_v59  ;;  %v17588_v61 = vld [vmem:[#allocation98_spill] sm:$0xff] }
 0xa81   : > { %11720 = vrsqrt.f32 %v7901_v24  ;;  %v7381_v46 = vmul.f32 %v17588_v61, %v15941_v49  ;;  %vm8058_vm9 = vweird.f32 %v7901_v24 }
 0xa82   : > { %v8015_v52 = vmul.f32 0.5, %v8014_v6  ;;  %v4791_v45 = vpop.f32.mrf.mxu0  ;;  %v7446_v15 = vadd.f32 %v7430_v42, %v7382_v5 }
 0xa83   : > { %v4840_v32 = vpop.f32.mrf.mxu1 }
 0xa84   : > { %v8016_v47 = vsub.f32 1.5, %v8015_v52  ;;  %v4841_v58 = vadd.f32 %v4840_v32, %v4791_v45  ;;  %v4889_v13 = vpop.f32.mrf.mxu2 }
 0xa85   : > { %v4938_v54 = vpop.f32.mrf.mxu3 }
 0xa86   : > { %v8017_v37 = vmul.f32 %v11719_v33, %v8016_v47  ;;  %v4890_v9 = vadd.f32 %v4889_v13, %v4841_v58 }
 0xa87   : > { %v11721_v14 = vpop.eup %11720 }
 0xa88   : > { %v8053_v31 = vmul.f32 %v11721_v14, %v7901_v24  ;;  %v8021_v39 = vsel %vm8020_vm7, %v11719_v33, %v8017_v37  ;;  %v4939_v27 = vadd.f32 %v4938_v54, %v4890_v9  ;;  %vm8059_vm8 = vweird.f32 %v11721_v14 }
 0xa89   : > { %v16328_v23 = vmul.f32 %v8021_v39, %v17585_v40  ;;  %vm8060_vm10 = vmor %vm8058_vm9, %vm8059_vm8 }
 0xa8a   : > { %v8054_v50 = vmul.f32 %v11721_v14, %v8053_v31  ;;  %v7408_v12 = vpop.permute.xlu1 %7407  ;;  %v11127_v2 = vpack.c.bf16 %v4939_v27, %v4937_v55  ;;  %v4950_v6 = vpop.f32.mrf.mxu0 }
 0xa8b   : > { %v7429_v33 = vmul.f32 %v17589_v36, %v7408_v12  ;;  %8196 = vrot.lane.b32.xlu2 %v16328_v23, %s12008_s2  ;;  %v4999_v34 = vpop.f32.mrf.mxu1 }
 0xa8c   : > { %v8055_v56 = vmul.f32 0.5, %v8054_v50  ;;  %11331 = vst [vmem:[%s15484_s12 + $0xb8] sm:$0xff] %v11127_v2   ;;  %v5048_v8 = vpop.f32.mrf.mxu2  ;;  %v5000_v49 = vadd.f32 %v4999_v34, %v4950_v6 }
 0xa8d   : > { %v7445_v3 = vadd.f32 %v7429_v33, %v7381_v46  ;;  %v5097_v32 = vpop.f32.mrf.mxu3 }
 0xa8e   : > { %v8056_v52 = vsub.f32 1.5, %v8055_v56  ;;  %v5049_v13 = vadd.f32 %v5048_v8, %v5000_v49 }
 0xa8f   : > { %v11077_v47 = vpack.c.bf16 %v7446_v15, %v7445_v3  ;;  %v7416_v9 = vpop.permute.xlu0 %7415 }
 0xa90   : > { %v8057_v45 = vmul.f32 %v11721_v14, %v8056_v52  ;;  %v5098_v40 = vadd.f32 %v5097_v32, %v5049_v13 }
 0xa91   : > { %11321 = vst [vmem:[%s14594_s10 + $0xa8] sm:$0xff] %v11077_v47  }
 0xa92   : > { %v8061_v37 = vsel %vm8060_vm10, %v11721_v14, %v8057_v45  ;;  %v4952_v31 = vpop.f32.mrf.mxu0 }
 0xa93   : > { %v16340_v58 = vmul.f32 %v8061_v37, %v17520_v57  ;;  %v5001_v39 = vpop.f32.mrf.mxu1 }
 0xa94   : > { %v5002_v55 = vadd.f32 %v5001_v39, %v4952_v31  ;;  %v5050_v42 = vpop.f32.mrf.mxu2  ;;  %v17590_v39 = vld [vmem:[#allocation90_spill] sm:$0xff] }
 0xa95   : > { %8204 = vrot.lane.b32.xlu0 %v16340_v58, %s12008_s2  ;;  %v5099_v54 = vpop.f32.mrf.mxu3 }
 0xa96   : > { %v5051_v24 = vadd.f32 %v5050_v42, %v5002_v55  ;;  %v7433_v55 = vmul.f32 %v17590_v39, %v7416_v9 }
 0xa97   : > { %v16346_v33 = vpop.permute.xlu0 %8174 }
 0xa98   : > { %v5100_v50 = vadd.f32 %v5099_v54, %v5051_v24 }
 0xa9a   : > { %v11212_v27 = vpack.c.bf16 %v5100_v50, %v5098_v40  ;;  %v4955_v14 = vpop.f32.mrf.mxu0 }
 0xa9b   : > { %v5004_v59 = vpop.f32.mrf.mxu1 }
 0xa9c   : > { %v7865_v12 = vpop.xlane.xlu2 %7864  ;;  %11348 = vst [vmem:[%s15484_s12 + $0xc0] sm:$0xff] %v11212_v27   ;;  %v5053_v46 = vpop.f32.mrf.mxu2  ;;  %v5005_v2 = vadd.f32 %v5004_v59, %v4955_v14  ;;  %v17592_v14 = vld [vmem:[#allocation79_spill] sm:$0xff]  ;;  %v17593_v59 = vld [vmem:[#allocation60_spill] sm:$0xff] }
 0xa9d   : > { %v7883_v57 = vmul.f32 %v7865_v12, %v12430_v19  ;;  %v5102_v56 = vpop.f32.mrf.mxu3  ;;  %v17591_v12 = vld [vmem:[#allocation89_spill] sm:$0xff] }
 0xa9e   : > { %v5054_v15 = vadd.f32 %v5053_v46, %v5005_v2  ;;  %v7385_v27 = vmul.f32 %v17591_v12, %v15963_v48 }
 0xa9f   : > { %v7899_v5 = vadd.f32 1.1920929e-07, %v7883_v57  ;;  %v8181_v42 = vpop.permute.xlu0 %8180  ;;  %v7386_v57 = vmul.f32 %v17592_v14, %v16142_v22 }
 0xaa0   : > { %v5103_v49 = vadd.f32 %v5102_v56, %v5054_v15  ;;  %v7449_v9 = vadd.f32 %v7433_v55, %v7385_v27 }
 0xaa1   : > { %11722 = vrsqrt.f32 %v7899_v5  ;;  %vm8038_vm12 = vweird.f32 %v7899_v5 }
 0xaa2   : > { %v4957_v3 = vpop.f32.mrf.mxu0 }
 0xaa3   : > { %v5006_v34 = vpop.f32.mrf.mxu1 }
 0xaa4   : > { %v16348_v6 = vpop.permute.xlu2 %7411  ;;  %v5007_v52 = vadd.f32 %v5006_v34, %v4957_v3  ;;  %v5055_v8 = vpop.f32.mrf.mxu2 }
 0xaa5   : > { %v5104_v37 = vpop.f32.mrf.mxu3 }
 0xaa6   : > { %v5056_v32 = vadd.f32 %v5055_v8, %v5007_v52 }
 0xaa7   : > { %v11723_v47 = vpop.eup %11722 }
 0xaa8   : > { %v8033_v45 = vmul.f32 %v11723_v47, %v7899_v5  ;;  %v5105_v31 = vadd.f32 %v5104_v37, %v5056_v32  ;;  %vm8039_vm11 = vweird.f32 %v11723_v47  ;;  %v17595_v5 = vld [vmem:[#allocation74_spill] sm:$0xff] }
 0xaa9   : > { %vm8040_vm13 = vmor %vm8038_vm12, %vm8039_vm11  ;;  %v8161_v55 = vmul.f32 %v17595_v5, %v16017_v60 }
 0xaaa   : > { %v8034_v13 = vmul.f32 %v11723_v47, %v8033_v45  ;;  %v11217_v54 = vpack.c.bf16 %v5105_v31, %v5103_v49  ;;  %v4960_v50 = vpop.f32.mrf.mxu0  ;;  %v17594_v45 = vld [vmem:[#allocation75_spill] sm:$0xff] }
 0xaab   : > { %v5009_v56 = vpop.f32.mrf.mxu1  ;;  %v8209_v49 = vmul.f32 %v17594_v45, %v8181_v42 }
 0xaac   : > { %v8035_v40 = vmul.f32 0.5, %v8034_v13  ;;  %v7418_v24 = vpop.permute.xlu2 %7417  ;;  %11349 = vst [vmem:[%s15484_s12 + $0xc8] sm:$0xff] %v11217_v54   ;;  %v5058_v3 = vpop.f32.mrf.mxu2  ;;  %v5010_v52 = vadd.f32 %v5009_v56, %v4960_v50 }
 0xaad   : > { %v7434_v46 = vmul.f32 %v17593_v59, %v7418_v24  ;;  %v5107_v48 = vpop.f32.mrf.mxu3  ;;  %v16377_v50 = vpop.permute.xlu0 %8186  ;;  %v8225_v60 = vadd.f32 %v8209_v49, %v8161_v55 }
 0xaae   : > { %v8036_v2 = vsub.f32 1.5, %v8035_v40  ;;  %v5059_v13 = vadd.f32 %v5058_v3, %v5010_v52  ;;  %v17596_v40 = vld [vmem:[#allocation73_spill] sm:$0xff] }
 0xaaf   : > { %v7450_v15 = vadd.f32 %v7434_v46, %v7386_v57  ;;  %v8160_v24 = vmul.f32 %v17596_v40, %v16179_v26 }
 0xab0   : > { %v8037_v34 = vmul.f32 %v11723_v47, %v8036_v2  ;;  %v5108_v2 = vadd.f32 %v5107_v48, %v5059_v13 }
 0xab1   : > { %v11087_v8 = vpack.c.bf16 %v7450_v15, %v7449_v9 }
 0xab2   : > { %v8041_v22 = vsel %vm8040_vm13, %v11723_v47, %v8037_v34  ;;  %v4962_v31 = vpop.f32.mrf.mxu0  ;;  %v17597_v47 = vld [vmem:[#allocation72_spill] sm:$0xff] }
 0xab3   : > { %11323 = vst [vmem:[%s14594_s10 + $0xb8] sm:$0xff] %v11087_v8   ;;  %v16363_v32 = vmul.f32 %v8041_v22, %v17530_v0  ;;  %v5011_v42 = vpop.f32.mrf.mxu1 }
 0xab4   : > { %v8179_v37 = vpop.permute.xlu2 %8178  ;;  %v5012_v57 = vadd.f32 %v5011_v42, %v4962_v31  ;;  %v5060_v26 = vpop.f32.mrf.mxu2 }
 0xab5   : > { %v8208_v54 = vmul.f32 %v17597_v47, %v8179_v37  ;;  %8200 = vrot.lane.b32.xlu1 %v16363_v32, %s12008_s2  ;;  %v7867_v0 = vpop.xlane.xlu1 %7866 }
 0xab6   : > { %v7884_v27 = vmul.f32 %v7867_v0, %v12430_v19  ;;  %v5061_v9 = vadd.f32 %v5060_v26, %v5012_v57 }
 0xab7   : > { %v8224_v46 = vadd.f32 %v8208_v54, %v8160_v24 }
 0xab8   : > { %v7900_v56 = vadd.f32 1.1920929e-07, %v7884_v27 }
 0xab9   : > { %11873 = shalt.err (!%p11870_p0)
}
 0xaba   : > { %s12009_s9 = smov 4   ;;  %v11177_v19 = vpack.c.bf16 %v8225_v60, %v8224_v46  ;;  %v5109_v15 = vpop.f32.mrf.mxu3  ;;  %11724 = vrsqrt.f32 %v7900_v56  ;;  %v4965_v8 = vpop.f32.mrf.mxu0  ;;  %v8167_v54 = vmul.f32 %v17572_v11, %v16079_v16  ;;  %v8166_v42 = vmul.f32 %v17571_v53, %v16263_v43  ;;  %s8396_s7 = scalar_lea.hbm %s16552_s5, %s16358_s28 }
 0xabb   : > { %11370 = dma.vmem_to_hbm [thread:$0]  (%p12132_p3), %s8379_s24, 4096, %s8381_s8, %s8354_s11, %s12008_s2, %s12008_s2, %s12009_s9   ;;  %v5110_v3 = vadd.f32 %v5109_v15, %v5061_v9  ;;  %v5014_v48 = vpop.f32.mrf.mxu1  ;;  %v8193_v49 = vpop.permute.xlu0 %8192  ;;  %vm8048_vm15 = vweird.f32 %v7900_v56 }
 0xabc   : > { %11341 = vst [vmem:[%s14594_s10 + $0xc8] sm:$0xff] %v11177_v19   ;;  %v16395_v34 = vpop.permute.xlu2 %8184  ;;  %v5063_v22 = vpop.f32.mrf.mxu2  ;;  %v5015_v37 = vadd.f32 %v5014_v48, %v4965_v8  ;;  %v8215_v5 = vmul.f32 %v17573_v17, %v8193_v49  ;;  %s8415_s11 = scalar_lea.hbm %s16553_s6, %s16358_s28  ;;  %s8358_s14 = sand.u32 1, %s12076_s27  }
 0xabd   : > { %v11222_v52 = vpack.c.bf16 %v5110_v3, %v5108_v2  ;;  %s8397_s15 = sshll.u32 %s14594_s10, 4  ;;  %s16476_s13 = sshll.u32 %s8396_s7, 4  ;;  %s8398_s15 = int_to_ptr.vmem [resolvable:$true] %s8397_s15  ;;  %s8400_s13 = int_to_ptr.hbm [resolvable:$true] %s16476_s13 }
 0xabe   : > { %v5064_v24 = vadd.f32 %v5063_v22, %v5015_v37  ;;  %v8231_v46 = vadd.f32 %v8215_v5, %v8167_v54  ;;  %v17601_v5 = vld [vmem:[#allocation106_spill] sm:$0xff]  ;;  %v17602_v54 = vld [vmem:[#allocation68_spill] sm:$0xff]  ;;  %s16478_s28 = sshll.u32 %s8415_s11, 4  ;;  %s8416_s17 = sshll.u32 %s15484_s12, 4  ;;  %s8419_s28 = int_to_ptr.hbm [resolvable:$true] %s16478_s28  ;;  %s16484_s17 = int_to_ptr.vmem [resolvable:$true] %s8416_s17 }
 0xabf   : > { %11350 = vst [vmem:[%s15484_s12 + $0xd0] sm:$0xff] %v11222_v52   ;;  %s16487_s27 = scalar_lea.sflag [#allocation12], %s8358_s14  ;;  %s11888_s18 = sshra.s32 %s8400_s13, 4  ;;  %s11889_s18 = int_to_ptr.hbm [resolvable:$true] %s11888_s18 }
 0xac0   : > { %v11725_v45 = vpop.eup %11724  ;;  %s11890_s3 = scalar_lea.hbm %s11889_s18, 256  ;;  %s11894_s1 = scalar_lea.hbm %s16552_s5, 512 }
 0xac1   : > { %v8043_v13 = vmul.f32 %v11725_v45, %v7900_v56  ;;  %vm8049_vm14 = vweird.f32 %v11725_v45  ;;  %v17599_v56 = vld [vmem:[#allocation104_spill] sm:$0xff]  ;;  %p11891_p5 = scmp.ne.s32.totalorder %s11889_s18, %s11890_s3  ;;  %p11895_p2 = scmp.lt.s32.totalorder %s11889_s18, %s16552_s5 }
 0xac2   : > { %v5112_v31 = vpop.f32.mrf.mxu3  ;;  %v4967_v47 = vpop.f32.mrf.mxu0  ;;  %vm8050_vm0 = vmor %vm8048_vm15, %vm8049_vm14  ;;  %v7383_v37 = vmul.f32 %v17599_v56, %v16096_v20  ;;  %p11896_p1 = scmp.lt.s32.totalorder %s11894_s1, %s11890_s3 }
 0xac3   : > { %v8044_v55 = vmul.f32 %v11725_v45, %v8043_v13  ;;  %v5016_v57 = vpop.f32.mrf.mxu1  ;;  %v5113_v9 = vadd.f32 %v5112_v31, %v5064_v24  ;;  %v17600_v13 = vld [vmem:[#allocation105_spill] sm:$0xff]  ;;  %p11892_p7 = pnand %p11891_p5, %p12132_p3 }
 0xac4   : > { %v8191_v40 = vpop.permute.xlu2 %8190  ;;  %v5017_v60 = vadd.f32 %v5016_v57, %v4967_v47  ;;  %v5065_v2 = vpop.f32.mrf.mxu2  ;;  %v7384_v31 = vmul.f32 %v17600_v13, %v16230_v38  ;;  %v17603_v57 = vld [vmem:[#allocation69_spill] sm:$0xff]  ;;  %p11897_p4 = por %p11896_p1, %p11895_p2 }
 0xac5   : > { %v8045_v0 = vmul.f32 0.5, %v8044_v55  ;;  %v8214_v27 = vmul.f32 %v17567_v28, %v8191_v40  ;;  %v17598_v28 = vld [vmem:[#allocation103_spill] sm:$0xff]  ;;  %p11893_p9 = pneg %p11892_p7 }
 0xac6   : > { %v5066_v19 = vadd.f32 %v5065_v2, %v5017_v60  ;;  %v7431_v53 = vmul.f32 %v17598_v28, %v16348_v6  ;;  %v8158_v60 = vmul.f32 %v17603_v57, %v15987_v1 }
 0xac7   : > { %v8046_v26 = vsub.f32 1.5, %v8045_v0  ;;  %v8230_v17 = vadd.f32 %v8214_v27, %v8166_v42  ;;  %v8206_v0 = vmul.f32 %v17602_v54, %v16346_v33  ;;  %p11898_p8 = pnand %p11897_p4, %p11893_p9 }
 0xac9   : > { %v8047_v15 = vmul.f32 %v11725_v45, %v8046_v26  ;;  %v11192_v3 = vpack.c.bf16 %v8231_v46, %v8230_v17  ;;  %v17604_v46 = vld [vmem:[#allocation70_spill] sm:$0xff]  ;;  %v17605_v17 = vld [vmem:[#allocation71_spill] sm:$0xff] }
 0xaca   : > { %v5114_v16 = vpop.f32.mrf.mxu3  ;;  %v4970_v48 = vpop.f32.mrf.mxu0  ;;  %v8159_v26 = vmul.f32 %v17604_v46, %v16273_v41 }
 0xacb   : > { %v5115_v11 = vadd.f32 %v5114_v16, %v5066_v19  ;;  %11344 = vst [vmem:[%s14594_s10 + $0xe0] sm:$0xff] %v11192_v3   ;;  %v8051_v43 = vsel %vm8050_vm0, %v11725_v45, %v8047_v15  ;;  %v5019_v49 = vpop.f32.mrf.mxu1  ;;  %v8222_v15 = vadd.f32 %v8206_v0, %v8158_v60 }
 0xacc   : > { %v16408_v52 = vmul.f32 %v8051_v43, %v17540_v30  ;;  %v5068_v6 = vpop.f32.mrf.mxu2  ;;  %v7447_v30 = vadd.f32 %v7431_v53, %v7383_v37  ;;  %v5020_v40 = vadd.f32 %v5019_v49, %v4970_v48  ;;  %v17607_v37 = vld [vmem:[#allocation58_spill] sm:$0xff] }
 0xacd   : > { %v11227_v8 = vpack.c.bf16 %v5115_v11, %v5113_v9  ;;  %v7414_v22 = vpop.permute.xlu1 %7413 }
 0xace   : > { %v7432_v55 = vmul.f32 %v17601_v5, %v7414_v22  ;;  %8202 = vrot.lane.b32.xlu2 %v16408_v52, %s12008_s2  ;;  %v5069_v20 = vadd.f32 %v5068_v6, %v5020_v40 }
 0xacf   : > { %11351 = vst [vmem:[%s15484_s12 + $0xd8] sm:$0xff] %v11227_v8   ;;  %v17606_v8 = vld [vmem:[#allocation80_spill] sm:$0xff] }
 0xad0   : > { %v7448_v45 = vadd.f32 %v7432_v55, %v7384_v31  ;;  %v8211_v48 = vmul.f32 %v17606_v8, %v16395_v34  ;;  %v8163_v31 = vmul.f32 %v17607_v37, %v16222_v44  ;;  %v17608_v55 = vld [vmem:[#allocation53_spill] sm:$0xff]  ;;  %v8164_v44 = vmul.f32 %v17545_v21, %v16047_v63 }
 0xad1   : > { %v8162_v6 = vmul.f32 %v17608_v55, %v16294_v25  ;;  %v8165_v25 = vmul.f32 %v17547_v10, %v16309_v35  ;;  %v8168_v35 = vmul.f32 %v17588_v61, %v16316_v62 }
 0xad2   : > { %v5117_v24 = vpop.f32.mrf.mxu3  ;;  %v11082_v47 = vpack.c.bf16 %v7448_v45, %v7447_v30  ;;  %v4972_v42 = vpop.f32.mrf.mxu0  ;;  %v17609_v30 = vld [vmem:[#allocation52_spill] sm:$0xff] }
 0xad3   : > { %v5021_v27 = vpop.f32.mrf.mxu1  ;;  %v5118_v33 = vadd.f32 %v5117_v24, %v5069_v20  ;;  %v8227_v24 = vadd.f32 %v8211_v48, %v8163_v31  ;;  %v8212_v20 = vmul.f32 %v17546_v4, %v16377_v50 }
 0xad4   : > { %11322 = vst [vmem:[%s14594_s10 + $0xb0] sm:$0xff] %v11082_v47   ;;  %v5022_v9 = vadd.f32 %v5021_v27, %v4972_v42  ;;  %v5070_v19 = vpop.f32.mrf.mxu2 }
 0xad5   : > { %v8177_v38 = vpop.permute.xlu1 %8176 }
 0xad6   : > { %v8207_v2 = vmul.f32 %v17605_v17, %v8177_v38  ;;  %v5071_v16 = vadd.f32 %v5070_v19, %v5022_v9  ;;  %v8228_v17 = vadd.f32 %v8212_v20, %v8164_v44 }
 0xad8   : > { %v8223_v3 = vadd.f32 %v8207_v2, %v8159_v26 }
 0xada   : > { %v5119_v11 = vpop.f32.mrf.mxu3  ;;  %v11172_v43 = vpack.c.bf16 %v8223_v3, %v8222_v15  ;;  %v4975_v22 = vpop.f32.mrf.mxu0 }
 0xadb   : > { %v5120_v53 = vadd.f32 %v5119_v11, %v5071_v16  ;;  %v5024_v49 = vpop.f32.mrf.mxu1 }
 0xadc   : > { %11340 = vst [vmem:[%s14594_s10 + $0xc0] sm:$0xff] %v11172_v43   ;;  %v5073_v40 = vpop.f32.mrf.mxu2  ;;  %v5025_v54 = vadd.f32 %v5024_v49, %v4975_v22 }
 0xadd   : > { %v11232_v1 = vpack.c.bf16 %v5120_v53, %v5118_v33  ;;  %v8183_v41 = vpop.permute.xlu1 %8182 }
 0xade   : > { %v8210_v45 = vmul.f32 %v17609_v30, %v8183_v41  ;;  %v5074_v27 = vadd.f32 %v5073_v40, %v5025_v54 }
 0xadf   : > { %11352 = vst [vmem:[%s15484_s12 + $0xe0] sm:$0xff] %v11232_v1  }
 0xae0   : > { %v8226_v47 = vadd.f32 %v8210_v45, %v8162_v6 }
 0xae2   : > { %v5122_v34 = vpop.f32.mrf.mxu3  ;;  %v11182_v0 = vpack.c.bf16 %v8227_v24, %v8226_v47  ;;  %v4977_v42 = vpop.f32.mrf.mxu0 }
 0xae3   : > { %v5026_v60 = vpop.f32.mrf.mxu1  ;;  %v5123_v50 = vadd.f32 %v5122_v34, %v5074_v27 }
 0xae4   : > { %11342 = vst [vmem:[%s14594_s10 + $0xd0] sm:$0xff] %v11182_v0   ;;  %v5027_v46 = vadd.f32 %v5026_v60, %v4977_v42  ;;  %v5075_v26 = vpop.f32.mrf.mxu2 }
 0xae5   : > { %v8189_v38 = vpop.permute.xlu1 %8188  ;;  %v8197_v4 = vpop.permute.xlu2 %8196 }
 0xae6   : > { %v8213_v57 = vmul.f32 %v17549_v51, %v8189_v38  ;;  %v5076_v9 = vadd.f32 %v5075_v26, %v5027_v46  ;;  %v8217_v33 = vmul.f32 %v17584_v7, %v8197_v4  ;;  %v8169_v51 = vmul.f32 %v17587_v29, %v16328_v23 }
 0xae8   : > { %v8229_v2 = vadd.f32 %v8213_v57, %v8165_v25  ;;  %v8233_v53 = vadd.f32 %v8217_v33, %v8169_v51  ;;  %v8199_v25 = vpop.permute.xlu0 %8198 }
 0xae9   : > { %v8218_v60 = vmul.f32 %v17598_v28, %v8199_v25  ;;  %v8172_v28 = vmul.f32 %v17591_v12, %v16408_v52 }
 0xaea   : > { %v5124_v19 = vpop.f32.mrf.mxu3  ;;  %v11187_v15 = vpack.c.bf16 %v8229_v2, %v8228_v17  ;;  %v4980_v63 = vpop.f32.mrf.mxu0  ;;  %v8170_v17 = vmul.f32 %v17599_v56, %v16212_v18  ;;  %v8171_v2 = vmul.f32 %v17600_v13, %v16363_v32 }
 0xaeb   : > { %v5125_v3 = vadd.f32 %v5124_v19, %v5076_v9  ;;  %v5029_v11 = vpop.f32.mrf.mxu1 }
 0xaec   : > { %11343 = vst [vmem:[%s14594_s10 + $0xd8] sm:$0xff] %v11187_v15   ;;  %v5078_v43 = vpop.f32.mrf.mxu2  ;;  %v5030_v48 = vadd.f32 %v5029_v11, %v4980_v63  ;;  %v8234_v56 = vadd.f32 %v8218_v60, %v8170_v17 }
 0xaed   : > { %v8195_v21 = vpop.permute.xlu1 %8194  ;;  %v11237_v10 = vpack.c.bf16 %v5125_v3, %v5123_v50 }
 0xaee   : > { %v8216_v16 = vmul.f32 %v17589_v36, %v8195_v21  ;;  %v5079_v41 = vadd.f32 %v5078_v43, %v5030_v48 }
 0xaef   : > { %11353 = vst [vmem:[%s15484_s12 + $0xe8] sm:$0xff] %v11237_v10  }
 0xaf0   : > { %v8232_v8 = vadd.f32 %v8216_v16, %v8168_v35 }
 0xaf2   : > { %v5127_v7 = vpop.f32.mrf.mxu3  ;;  %v11197_v1 = vpack.c.bf16 %v8233_v53, %v8232_v8  ;;  %v4982_v22 = vpop.f32.mrf.mxu0 }
 0xaf3   : > { %v5031_v49 = vpop.f32.mrf.mxu1  ;;  %v5128_v29 = vadd.f32 %v5127_v7, %v5079_v41 }
 0xaf4   : > { %11345 = vst [vmem:[%s14594_s10 + $0xe8] sm:$0xff] %v11197_v1   ;;  %v5032_v37 = vadd.f32 %v5031_v49, %v4982_v22  ;;  %v5080_v23 = vpop.f32.mrf.mxu2 }
 0xaf6   : > { %v5081_v31 = vadd.f32 %v5080_v23, %v5032_v37 }
 0xafa   : > { %v5129_v62 = vpop.f32.mrf.mxu3  ;;  %v4985_v36 = vpop.f32.mrf.mxu0 }
 0xafb   : > { %v5130_v61 = vadd.f32 %v5129_v62, %v5081_v31  ;;  %v5034_v6 = vpop.f32.mrf.mxu1 }
 0xafc   : > { %v5083_v30 = vpop.f32.mrf.mxu2  ;;  %v5035_v45 = vadd.f32 %v5034_v6, %v4985_v36 }
 0xafd   : > { %v11242_v55 = vpack.c.bf16 %v5130_v61, %v5128_v29 }
 0xafe   : > { %v5084_v47 = vadd.f32 %v5083_v30, %v5035_v45 }
 0xaff   : > { %11354 = vst [vmem:[%s15484_s12 + $0xf0] sm:$0xff] %v11242_v55  }
 0xb02   : > { %v5132_v40 = vpop.f32.mrf.mxu3  ;;  %v4987_v24 = vpop.f32.mrf.mxu0 }
 0xb03   : > { %v5036_v54 = vpop.f32.mrf.mxu1  ;;  %v5133_v20 = vadd.f32 %v5132_v40, %v5084_v47 }
 0xb04   : > { %v5037_v34 = vadd.f32 %v5036_v54, %v4987_v24  ;;  %v5085_v0 = vpop.f32.mrf.mxu2 }
 0xb06   : > { %v5086_v42 = vadd.f32 %v5085_v0, %v5037_v34 }
 0xb07   : > { %v8205_v57 = vpop.permute.xlu0 %8204 }
 0xb08   : > { %v8221_v46 = vmul.f32 %v17593_v59, %v8205_v57  ;;  %v8173_v59 = vmul.f32 %v17592_v14, %v16340_v58 }
 0xb0a   : > { %v5134_v38 = vpop.f32.mrf.mxu3  ;;  %v8237_v13 = vadd.f32 %v8221_v46, %v8173_v59 }
 0xb0b   : > { %v5135_v27 = vadd.f32 %v5134_v38, %v5086_v42 }
 0xb0d   : > { %v11247_v44 = vpack.c.bf16 %v5135_v27, %v5133_v20 }
 0xb0f   : > { %11355 = vst [vmem:[%s15484_s12 + $0xf8] sm:$0xff] %v11247_v44  }
 0xb27   : > { %v8201_v26 = vpop.permute.xlu1 %8200 }
 0xb28   : > { %v8219_v4 = vmul.f32 %v17601_v5, %v8201_v26  ;;  %v8203_v50 = vpop.permute.xlu2 %8202 }
 0xb29   : > { %v8220_v18 = vmul.f32 %v17590_v39, %v8203_v50 }
 0xb2a   : > { %v8235_v32 = vadd.f32 %v8219_v4, %v8171_v2 }
 0xb2b   : > { %v8236_v5 = vadd.f32 %v8220_v18, %v8172_v28 }
 0xb2c   : > { %v11202_v58 = vpack.c.bf16 %v8235_v32, %v8234_v56 }
 0xb2d   : > { %v11207_v14 = vpack.c.bf16 %v8237_v13, %v8236_v5 }
 0xb2e   : > { %11346 = vst [vmem:[%s14594_s10 + $0xf0] sm:$0xff] %v11202_v58  }
 0xb2f   : > { %11347 = vst [vmem:[%s14594_s10 + $0xf8] sm:$0xff] %v11207_v14  }
 0xb30   : > { %11901 = shalt.err (!%p11898_p8)
}
 0xb31   : > { %11371 = dma.vmem_to_hbm [thread:$0]  (%p12132_p3), %s8398_s15, 4096, %s8400_s13, %s16487_s27, %s12008_s2, %s12008_s2, %s12009_s9  }
 0xb32   : > { %s11916_s10 = sshra.s32 %s8419_s28, 4  ;;  %s11922_s14 = scalar_lea.hbm %s16553_s6, 512  ;;  %s11917_s10 = int_to_ptr.hbm [resolvable:$true] %s11916_s10 }
 0xb33   : > { %s11918_s24 = scalar_lea.hbm %s11917_s10, 256  ;;  %p11923_p0 = scmp.lt.s32.totalorder %s11917_s10, %s16553_s6 }
 0xb34   : > { %p11919_p10 = scmp.ne.s32.totalorder %s11917_s10, %s11918_s24  ;;  %p11924_p5 = scmp.lt.s32.totalorder %s11922_s14, %s11918_s24 }
 0xb36   : > { %p11920_p12 = pnand %p11919_p10, %p12132_p3  ;;  %p11925_p7 = por %p11924_p5, %p11923_p0 }
 0xb38   : > { %p11921_p13 = pneg %p11920_p12 }
 0xb3a   : > { %p11926_p9 = pnand %p11925_p7, %p11921_p13 }
 0xb3c   : > { %11929 = shalt.err (!%p11926_p9)
}
 0xb3d   : > { %11372 = dma.vmem_to_hbm [thread:$0]  (%p12132_p3), %s16484_s17, 4096, %s8419_s28, %s16487_s27, %s12008_s2, %s12008_s2, %s12009_s9  }
 0xb3e PF: > { %s8433_s15 = sand.u32 1, %s11976_s21   ;;  %p11391_p2 = pnand %p8614_p11, %p12092_p6 }
 0xb3f   : > { %s8434_s13 = scalar_lea.sflag [#allocation4], %s8433_s15 }
 0xb40   : > { %p11392_p1 = pneg %p11391_p2 }
 0xb42   : > { %11967 = dma.done.wait (%p11392_p1), %s8434_s13, 4096  }
 0xb43   : > { %11969 = vsyncadd (%p11392_p1), %s8434_s13, 4294963200  ;;  %s17610_s16 = sadd.s32 4294967294, %s11996_s26  }
 0xb44   : > { %s8443_s29 = sand.u32 1, %s17610_s16  }
 0xb45   : > { %s8444_s12 = scalar_lea.sflag [#allocation12], %s8443_s29 }
 0xb46   : > { %11971 = dma.done.wait (%p11392_p1), %s8444_s12, 8192  }
 0xb47   : > { %11973 = vsyncadd (%p11392_p1), %s8444_s12, 4294959104  ;;  %s28_s26 = sadd.s32 1, %s11996_s26   ;;  %s17611_s30 = sld [smem:[#allocation19_spill]] }
 0xb48   : > { %p25_p3 = scmp.ge.s32.totalorder %s28_s26, 4   ;;  %s17612_s21 = smov %s11980_s22 }
 0xb49   : > { %s17613_s22 = smov %s11984_s23  ;;  %s17614_s23 = smov %s12148_s19 }
 0xb4a   : > { %s17615_s24 = smov %s11992_s25  ;;  %27 = sbr.rel (!%p25_p3) target bundleno = 14 (0xe), region = 136 }
 0xb4d   : > { %s17616_s25 = smov %s17611_s30 }
 0xb4f   :  { %8460 = vsyncpa [#allocation3], 1 }
 0xb50   :  { %8462 = vsyncpa [#allocation3 + $0x1], 1 }
 0xb51   :  { %8463 = vsyncpa [#allocation6], 1 }
 0xb52   :  { %8464 = vsyncpa [#allocation9], 1 }
 0xb53   :  { %8465 = vsyncpa [#allocation4], 1 }
 0xb54   :  { %8467 = vsyncpa [#allocation4 + $0x1], 1 }
 0xb55   :  { %8468 = vsyncpa [#allocation12], 1 }
 0xb56   :  { %8470 = vsyncpa [#allocation12 + $0x1], 1 }

</bundles_post_ra>
